<compile_context>
chip_gen: v6e
topology: v6e:2x2x1
jax: 0.10.0
libtpu: 0.0.40
codegen_flags: <defaults>
</compile_context>

<pallas_src>
import jax
import jax.numpy as jnp
from jax.experimental import pallas as pl
from jax.experimental.pallas import tpu as pltpu


def _make_conv_sigmoid_kernel(taps, m_pad):
    """taps: tuple of (phase_index, row_offset) per kernel tap (static Python ints)."""

    def kernel(ph_ref, w_ref, b_ref, o_ref):
        # ph_ref: (4, SP, CIN_PAD)        bf16  stride-2 phase images, channel-last, flat spatial
        # w_ref : (9, CIN_PAD, COUT_PAD)  bf16  per-tap weight slabs
        # b_ref : (1, COUT_PAD)           f32
        # o_ref : (m_pad, COUT_PAD)       f32   lane-dense output
        acc = None
        for t, (p, off) in enumerate(taps):
            tap = ph_ref[p, pl.ds(off, m_pad), :]                 # contiguous static slice
            contrib = jnp.dot(tap, w_ref[t],
                              preferred_element_type=jnp.float32)  # MXU, f32 accumulate
            acc = contrib if acc is None else acc + contrib
        acc = acc + b_ref[...]                                     # broadcast bias over rows
        o_ref[...] = jax.nn.sigmoid(acc)                           # EUP/VPU epilogue

    return kernel


def conv2d_sigmoid(x_nchw, w_oihw, bias, *, stride=2, pad=2):
    N, Cin, H, W = x_nchw.shape
    Cout, _, kh, kw = w_oihw.shape
    assert N == 1 and stride == 2 and kh == 3 and kw == 3, "specialized to the module's conv"
    Hout = (H + 2 * pad - kh) // stride + 1          # 17
    Wout = (W + 2 * pad - kw) // stride + 1          # 17
    Hp, Wp = H + 2 * pad, W + 2 * pad                # 36, 36
    assert Hp % 2 == 0 and Wp % 2 == 0
    Hh, Wh = Hp // 2, Wp // 2                        # phase spatial dims: 18, 18

    CIN_PAD = 8
    COUT_PAD = 128
    M_ROWS = Hout * Wh                               # 306 rows actually read back (ow=17 col is junk)
    M_PAD = ((M_ROWS + 15) // 16) * 16               # 320: bf16-sublane & (8,·) aligned
    max_off = ((kh - 1) // 2) * Wh + ((kw - 1) // 2) # 19
    SP = ((max_off + M_PAD + 15) // 16) * 16         # 352: padded flat spatial length per phase

    # --- wrapper glue (tiny, ~15 KB arrays): pad + space-to-depth ---------------------
    # ph[p, hh*Wh + ww, c] = x_pad[c, 2*hh + p//2, 2*ww + p%2]
    xp = jnp.pad(x_nchw, ((0, 0), (0, 0), (pad, pad), (pad, pad)))[0]        # (Cin, Hp, Wp)
    xr = xp.reshape(Cin, Hh, 2, Wh, 2)
    ph = jnp.transpose(xr, (2, 4, 1, 3, 0)).reshape(4, Hh * Wh, Cin)         # (4, 324, Cin)
    ph = jnp.pad(ph, ((0, 0), (0, SP - Hh * Wh), (0, CIN_PAD - Cin)))
    ph = ph.astype(jnp.bfloat16)

    # weights (Cout, Cin, kh, kw) -> per-tap (kh*kw, CIN_PAD, COUT_PAD), tap t = i*kw + j
    wt = jnp.transpose(w_oihw, (2, 3, 1, 0)).reshape(kh * kw, Cin, Cout)
    wt = jnp.pad(wt, ((0, 0), (0, CIN_PAD - Cin), (0, COUT_PAD - Cout))).astype(jnp.bfloat16)

    bm = jnp.pad(bias.reshape(1, Cout), ((0, 0), (0, COUT_PAD - Cout))).astype(jnp.float32)

    # static tap table: tap (i, j) -> phase (i%2, j%2), row offset (i//2)*Wh + (j//2)
    taps = []
    for i in range(kh):
        for j in range(kw):
            taps.append(((i % 2) * 2 + (j % 2), (i // 2) * Wh + (j // 2)))
    taps = tuple(taps)

    flops = 2 * M_PAD * CIN_PAD * COUT_PAD * len(taps)
    bytes_accessed = ph.size * 2 + wt.size * 2 + bm.size * 4 + M_PAD * COUT_PAD * 4

    out_flat = pl.pallas_call(
        _make_conv_sigmoid_kernel(taps, M_PAD),
        out_shape=jax.ShapeDtypeStruct((M_PAD, COUT_PAD), jnp.float32),
        grid=(1,),
        in_specs=[
            pl.BlockSpec((4, SP, CIN_PAD), lambda i: (0, 0, 0)),
            pl.BlockSpec((kh * kw, CIN_PAD, COUT_PAD), lambda i: (0, 0, 0)),
            pl.BlockSpec((1, COUT_PAD), lambda i: (0, 0)),
        ],
        out_specs=pl.BlockSpec((M_PAD, COUT_PAD), lambda i: (0, 0)),
        compiler_params=pltpu.CompilerParams(
            dimension_semantics=("arbitrary",)),
        cost_estimate=pl.CostEstimate(
            flops=flops,
            transcendentals=M_PAD * COUT_PAD,
            bytes_accessed=bytes_accessed),
    )(ph, wt, bm)

    # (M_PAD, 128) -> (1, Cout, Hout, Wout); rows are m = oh*Wh + ow, drop junk col/rows.
    out = out_flat[:M_ROWS].reshape(Hout, Wh, COUT_PAD)[:, :Wout, :Cout]
    return jnp.transpose(out, (2, 0, 1))[None]


if __name__ == "__main__":
    key = jax.random.PRNGKey(0)
    kx, kw_key, kb_key = jax.random.split(key, 3)

    # Shapes implied by the module: x1 = randn(1, 3, 32, 32), Conv2d(3, 64, 3, s=2, p=2)
    N, Cin, H, W = 1, 3, 32, 32
    Cout, kh, kwid = 64, 3, 3

    x1 = jax.random.normal(kx, (N, Cin, H, W), dtype=jnp.float32)
    fan_in = Cin * kh * kwid
    bound = 1.0 / (fan_in ** 0.5)
    w = jax.random.uniform(kw_key, (Cout, Cin, kh, kwid), jnp.float32, -bound, bound)
    b = jax.random.uniform(kb_key, (Cout,), jnp.float32, -bound, bound)

    fwd = jax.jit(conv2d_sigmoid)
    out = jax.block_until_ready(fwd(x1, w, b))
    assert out.shape == (1, 64, 17, 17), out.shape

    # Reference: XLA f32 conv (NCHW, OIHW) + bias + sigmoid. bf16 MXU inputs => relaxed atol.
    ref = jax.lax.conv_general_dilated(
        x1, w, window_strides=(2, 2), padding=((2, 2), (2, 2)),
        dimension_numbers=("NCHW", "OIHW", "NCHW"),
    ) + b[None, :, None, None]
    ref = jax.nn.sigmoid(ref)
    err = float(jnp.max(jnp.abs(out - ref)))
    assert err < 2e-2, err

    print("KERNEL_OK")
</pallas_src>

<mosaic_0001>
module attributes {stable_mosaic.version = 11 : i64} {
  func.func @kernel(%arg0: i32, %arg1: memref<4x352x8xbf16, #tpu.memory_space<vmem>>, %arg2: memref<9x8x128xbf16, #tpu.memory_space<vmem>>, %arg3: memref<1x128xf32, #tpu.memory_space<vmem>>, %arg4: memref<320x128xf32, #tpu.memory_space<vmem>>) attributes {dimension_semantics = [#tpu.dimension_semantics<arbitrary>], iteration_bounds = array<i64: 1>, scalar_prefetch = 0 : i64, scratch_operands = 0 : i64, tpu.core_type = #tpu.core_type<tc>, window_params = [{pipeline_mode = #tpu.pipeline_mode<synchronous>, transform_indices = @transform_0, window_bounds = array<i64: 4, 352, 8>}, {pipeline_mode = #tpu.pipeline_mode<synchronous>, transform_indices = @transform_1, window_bounds = array<i64: 9, 8, 128>}, {pipeline_mode = #tpu.pipeline_mode<synchronous>, transform_indices = @transform_2, window_bounds = array<i64: 1, 128>}, {pipeline_mode = #tpu.pipeline_mode<synchronous>, transform_indices = @transform_3, window_bounds = array<i64: 320, 128>}]} {
    %c0 = arith.constant 0 : index
    %c0_0 = arith.constant 0 : index
    %c0_1 = arith.constant 0 : index
    %0 = vector.load %arg1[%c0, %c0_0, %c0_1] : memref<4x352x8xbf16, #tpu.memory_space<vmem>>, vector<1x320x8xbf16>
    %1 = vector.shape_cast %0 : vector<1x320x8xbf16> to vector<320x8xbf16>
    %c0_2 = arith.constant 0 : index
    %c0_3 = arith.constant 0 : index
    %c0_4 = arith.constant 0 : index
    %2 = vector.load %arg2[%c0_2, %c0_3, %c0_4] : memref<9x8x128xbf16, #tpu.memory_space<vmem>>, vector<1x8x128xbf16>
    %3 = vector.shape_cast %2 : vector<1x8x128xbf16> to vector<8x128xbf16>
    %cst = arith.constant dense<0.000000e+00> : vector<320x128xf32>
    %4 = tpu.matmul %1, %3, %cst {dimension_numbers = #tpu.dot_dimension_numbers<[1], [0], [0], [1], [0, 0, 1, 1], [], []>} : vector<320x8xbf16>, vector<8x128xbf16>, vector<320x128xf32> -> vector<320x128xf32>
    %c1 = arith.constant 1 : index
    %c0_5 = arith.constant 0 : index
    %c0_6 = arith.constant 0 : index
    %5 = vector.load %arg1[%c1, %c0_5, %c0_6] : memref<4x352x8xbf16, #tpu.memory_space<vmem>>, vector<1x320x8xbf16>
    %6 = vector.shape_cast %5 : vector<1x320x8xbf16> to vector<320x8xbf16>
    %c1_7 = arith.constant 1 : index
    %c0_8 = arith.constant 0 : index
    %c0_9 = arith.constant 0 : index
    %7 = vector.load %arg2[%c1_7, %c0_8, %c0_9] : memref<9x8x128xbf16, #tpu.memory_space<vmem>>, vector<1x8x128xbf16>
    %8 = vector.shape_cast %7 : vector<1x8x128xbf16> to vector<8x128xbf16>
    %cst_10 = arith.constant dense<0.000000e+00> : vector<320x128xf32>
    %9 = tpu.matmul %6, %8, %cst_10 {dimension_numbers = #tpu.dot_dimension_numbers<[1], [0], [0], [1], [0, 0, 1, 1], [], []>} : vector<320x8xbf16>, vector<8x128xbf16>, vector<320x128xf32> -> vector<320x128xf32>
    %10 = arith.addf %4, %9 : vector<320x128xf32>
    %c0_11 = arith.constant 0 : index
    %c1_12 = arith.constant 1 : index
    %c0_13 = arith.constant 0 : index
    %11 = vector.load %arg1[%c0_11, %c1_12, %c0_13] : memref<4x352x8xbf16, #tpu.memory_space<vmem>>, vector<1x320x8xbf16>
    %12 = vector.shape_cast %11 : vector<1x320x8xbf16> to vector<320x8xbf16>
    %c2 = arith.constant 2 : index
    %c0_14 = arith.constant 0 : index
    %c0_15 = arith.constant 0 : index
    %13 = vector.load %arg2[%c2, %c0_14, %c0_15] : memref<9x8x128xbf16, #tpu.memory_space<vmem>>, vector<1x8x128xbf16>
    %14 = vector.shape_cast %13 : vector<1x8x128xbf16> to vector<8x128xbf16>
    %cst_16 = arith.constant dense<0.000000e+00> : vector<320x128xf32>
    %15 = tpu.matmul %12, %14, %cst_16 {dimension_numbers = #tpu.dot_dimension_numbers<[1], [0], [0], [1], [0, 0, 1, 1], [], []>} : vector<320x8xbf16>, vector<8x128xbf16>, vector<320x128xf32> -> vector<320x128xf32>
    %16 = arith.addf %10, %15 : vector<320x128xf32>
    %c2_17 = arith.constant 2 : index
    %c0_18 = arith.constant 0 : index
    %c0_19 = arith.constant 0 : index
    %17 = vector.load %arg1[%c2_17, %c0_18, %c0_19] : memref<4x352x8xbf16, #tpu.memory_space<vmem>>, vector<1x320x8xbf16>
    %18 = vector.shape_cast %17 : vector<1x320x8xbf16> to vector<320x8xbf16>
    %c3 = arith.constant 3 : index
    %c0_20 = arith.constant 0 : index
    %c0_21 = arith.constant 0 : index
    %19 = vector.load %arg2[%c3, %c0_20, %c0_21] : memref<9x8x128xbf16, #tpu.memory_space<vmem>>, vector<1x8x128xbf16>
    %20 = vector.shape_cast %19 : vector<1x8x128xbf16> to vector<8x128xbf16>
    %cst_22 = arith.constant dense<0.000000e+00> : vector<320x128xf32>
    %21 = tpu.matmul %18, %20, %cst_22 {dimension_numbers = #tpu.dot_dimension_numbers<[1], [0], [0], [1], [0, 0, 1, 1], [], []>} : vector<320x8xbf16>, vector<8x128xbf16>, vector<320x128xf32> -> vector<320x128xf32>
    %22 = arith.addf %16, %21 : vector<320x128xf32>
    %c3_23 = arith.constant 3 : index
    %c0_24 = arith.constant 0 : index
    %c0_25 = arith.constant 0 : index
    %23 = vector.load %arg1[%c3_23, %c0_24, %c0_25] : memref<4x352x8xbf16, #tpu.memory_space<vmem>>, vector<1x320x8xbf16>
    %24 = vector.shape_cast %23 : vector<1x320x8xbf16> to vector<320x8xbf16>
    %c4 = arith.constant 4 : index
    %c0_26 = arith.constant 0 : index
    %c0_27 = arith.constant 0 : index
    %25 = vector.load %arg2[%c4, %c0_26, %c0_27] : memref<9x8x128xbf16, #tpu.memory_space<vmem>>, vector<1x8x128xbf16>
    %26 = vector.shape_cast %25 : vector<1x8x128xbf16> to vector<8x128xbf16>
    %cst_28 = arith.constant dense<0.000000e+00> : vector<320x128xf32>
    %27 = tpu.matmul %24, %26, %cst_28 {dimension_numbers = #tpu.dot_dimension_numbers<[1], [0], [0], [1], [0, 0, 1, 1], [], []>} : vector<320x8xbf16>, vector<8x128xbf16>, vector<320x128xf32> -> vector<320x128xf32>
    %28 = arith.addf %22, %27 : vector<320x128xf32>
    %c2_29 = arith.constant 2 : index
    %c1_30 = arith.constant 1 : index
    %c0_31 = arith.constant 0 : index
    %29 = vector.load %arg1[%c2_29, %c1_30, %c0_31] : memref<4x352x8xbf16, #tpu.memory_space<vmem>>, vector<1x320x8xbf16>
    %30 = vector.shape_cast %29 : vector<1x320x8xbf16> to vector<320x8xbf16>
    %c5 = arith.constant 5 : index
    %c0_32 = arith.constant 0 : index
    %c0_33 = arith.constant 0 : index
    %31 = vector.load %arg2[%c5, %c0_32, %c0_33] : memref<9x8x128xbf16, #tpu.memory_space<vmem>>, vector<1x8x128xbf16>
    %32 = vector.shape_cast %31 : vector<1x8x128xbf16> to vector<8x128xbf16>
    %cst_34 = arith.constant dense<0.000000e+00> : vector<320x128xf32>
    %33 = tpu.matmul %30, %32, %cst_34 {dimension_numbers = #tpu.dot_dimension_numbers<[1], [0], [0], [1], [0, 0, 1, 1], [], []>} : vector<320x8xbf16>, vector<8x128xbf16>, vector<320x128xf32> -> vector<320x128xf32>
    %34 = arith.addf %28, %33 : vector<320x128xf32>
    %c0_35 = arith.constant 0 : index
    %c18 = arith.constant 18 : index
    %c0_36 = arith.constant 0 : index
    %35 = vector.load %arg1[%c0_35, %c18, %c0_36] : memref<4x352x8xbf16, #tpu.memory_space<vmem>>, vector<1x320x8xbf16>
    %36 = vector.shape_cast %35 : vector<1x320x8xbf16> to vector<320x8xbf16>
    %c6 = arith.constant 6 : index
    %c0_37 = arith.constant 0 : index
    %c0_38 = arith.constant 0 : index
    %37 = vector.load %arg2[%c6, %c0_37, %c0_38] : memref<9x8x128xbf16, #tpu.memory_space<vmem>>, vector<1x8x128xbf16>
    %38 = vector.shape_cast %37 : vector<1x8x128xbf16> to vector<8x128xbf16>
    %cst_39 = arith.constant dense<0.000000e+00> : vector<320x128xf32>
    %39 = tpu.matmul %36, %38, %cst_39 {dimension_numbers = #tpu.dot_dimension_numbers<[1], [0], [0], [1], [0, 0, 1, 1], [], []>} : vector<320x8xbf16>, vector<8x128xbf16>, vector<320x128xf32> -> vector<320x128xf32>
    %40 = arith.addf %34, %39 : vector<320x128xf32>
    %c1_40 = arith.constant 1 : index
    %c18_41 = arith.constant 18 : index
    %c0_42 = arith.constant 0 : index
    %41 = vector.load %arg1[%c1_40, %c18_41, %c0_42] : memref<4x352x8xbf16, #tpu.memory_space<vmem>>, vector<1x320x8xbf16>
    %42 = vector.shape_cast %41 : vector<1x320x8xbf16> to vector<320x8xbf16>
    %c7 = arith.constant 7 : index
    %c0_43 = arith.constant 0 : index
    %c0_44 = arith.constant 0 : index
    %43 = vector.load %arg2[%c7, %c0_43, %c0_44] : memref<9x8x128xbf16, #tpu.memory_space<vmem>>, vector<1x8x128xbf16>
    %44 = vector.shape_cast %43 : vector<1x8x128xbf16> to vector<8x128xbf16>
    %cst_45 = arith.constant dense<0.000000e+00> : vector<320x128xf32>
    %45 = tpu.matmul %42, %44, %cst_45 {dimension_numbers = #tpu.dot_dimension_numbers<[1], [0], [0], [1], [0, 0, 1, 1], [], []>} : vector<320x8xbf16>, vector<8x128xbf16>, vector<320x128xf32> -> vector<320x128xf32>
    %46 = arith.addf %40, %45 : vector<320x128xf32>
    %c0_46 = arith.constant 0 : index
    %c19 = arith.constant 19 : index
    %c0_47 = arith.constant 0 : index
    %47 = vector.load %arg1[%c0_46, %c19, %c0_47] : memref<4x352x8xbf16, #tpu.memory_space<vmem>>, vector<1x320x8xbf16>
    %48 = vector.shape_cast %47 : vector<1x320x8xbf16> to vector<320x8xbf16>
    %c8 = arith.constant 8 : index
    %c0_48 = arith.constant 0 : index
    %c0_49 = arith.constant 0 : index
    %49 = vector.load %arg2[%c8, %c0_48, %c0_49] : memref<9x8x128xbf16, #tpu.memory_space<vmem>>, vector<1x8x128xbf16>
    %50 = vector.shape_cast %49 : vector<1x8x128xbf16> to vector<8x128xbf16>
    %cst_50 = arith.constant dense<0.000000e+00> : vector<320x128xf32>
    %51 = tpu.matmul %48, %50, %cst_50 {dimension_numbers = #tpu.dot_dimension_numbers<[1], [0], [0], [1], [0, 0, 1, 1], [], []>} : vector<320x8xbf16>, vector<8x128xbf16>, vector<320x128xf32> -> vector<320x128xf32>
    %52 = arith.addf %46, %51 : vector<320x128xf32>
    %c0_51 = arith.constant 0 : index
    %c0_52 = arith.constant 0 : index
    %53 = vector.load %arg3[%c0_51, %c0_52] : memref<1x128xf32, #tpu.memory_space<vmem>>, vector<1x128xf32>
    %54 = vector.broadcast %53 : vector<1x128xf32> to vector<320x128xf32>
    %55 = arith.addf %52, %54 : vector<320x128xf32>
    %56 = arith.negf %55 : vector<320x128xf32>
    %57 = math.exp %56 : vector<320x128xf32>
    %cst_53 = arith.constant 1.000000e+00 : f32
    %58 = vector.broadcast %cst_53 : f32 to vector<320x128xf32>
    %59 = arith.addf %58, %57 : vector<320x128xf32>
    %60 = arith.divf %58, %59 : vector<320x128xf32>
    %c0_54 = arith.constant 0 : index
    %c0_55 = arith.constant 0 : index
    %61 = vector.load %arg4[%c0_54, %c0_55] : memref<320x128xf32, #tpu.memory_space<vmem>>, vector<320x128xf32>
    tpu.vector_store %arg4[%c0_54, %c0_55], %60 {strides = array<i32>} : memref<320x128xf32, #tpu.memory_space<vmem>>, vector<320x128xf32>,
    return
  }
  func.func @transform_0(%arg0: i32) -> (i32, i32, i32) {
    %c0_i32 = arith.constant 0 : i32
    %c0_i32_0 = arith.constant 0 : i32
    %c0_i32_1 = arith.constant 0 : i32
    %c0_i32_2 = arith.constant 0 : i32
    return %c0_i32, %c0_i32_0, %c0_i32_1 : i32, i32, i32
  }
  func.func @transform_1(%arg0: i32) -> (i32, i32, i32) {
    %c0_i32 = arith.constant 0 : i32
    %c0_i32_0 = arith.constant 0 : i32
    %c0_i32_1 = arith.constant 0 : i32
    %c0_i32_2 = arith.constant 0 : i32
    return %c0_i32, %c0_i32_0, %c0_i32_1 : i32, i32, i32
  }
  func.func @transform_2(%arg0: i32) -> (i32, i32) {
    %c0_i32 = arith.constant 0 : i32
    %c0_i32_0 = arith.constant 0 : i32
    %c0_i32_1 = arith.constant 0 : i32
    return %c0_i32, %c0_i32_0 : i32, i32
  }
  func.func @transform_3(%arg0: i32) -> (i32, i32) {
    %c0_i32 = arith.constant 0 : i32
    %c0_i32_0 = arith.constant 0 : i32
    %c0_i32_1 = arith.constant 0 : i32
    return %c0_i32, %c0_i32_0 : i32, i32
  }
}

</mosaic_0001>

<bundles_post_ra>
// kernel: squeeze.0
= control target key start
LH: loop header
LB: loop body
LE: loop exit
PB: predicated region body
PF: predicated region fallthrough
CT: control target
= control target key end

     0   :  { %s8230_s22 = smov 124   ;;  %s8231_s23 = smov 122   ;;  %vm243_vm0 = vcmask 15360   ;;  %s10180_s0 = inlined_call_operand.vmem [shape: bf16[1,3,36,36], index: 0, kind: input, shape index: {}]   ;;  %s10181_s1 = inlined_call_operand.vmem [shape: bf16[3,18,2,18,2], index: 1, kind: output, shape index: {}]  }
   0x1   :  { %v6637_v0 = vld [vmem:[%s10180_s0] sm:$0xff]   ;;  %v7453_v1 = vld [vmem:[%s10180_s0 + $0x18] sm:$0xff]   ;;  %v7454_v2 = vld [vmem:[%s10180_s0 + $0x10] sm:$0xff]   ;;  %s8232_s24 = smov 120   ;;  %s8233_s25 = smov 118  }
   0x2   :  { %v6638_v3 = vunpack.c.l.bf16 %v6637_v0  ;;  %v6639_v4 = vunpack.c.h.bf16 %v6637_v0  ;;  %v6626_v5 = vunpack.c.l.bf16 %v7453_v1  ;;  %v6627_v6 = vunpack.c.h.bf16 %v7453_v1  ;;  %v7455_v7 = vld [vmem:[%s10180_s0 + $0x8] sm:$0xff]   ;;  %v7452_v8 = vld [vmem:[%s10180_s0 + $0x20] sm:$0xff]   ;;  %v7450_v14 = vld [vmem:[%s10180_s0 + $0x30] sm:$0xff]   ;;  %s8234_s26 = smov 116   ;;  %s8235_s27 = smov 114  }
   0x3   :  { %v7451_v9 = vld [vmem:[%s10180_s0 + $0x28] sm:$0xff]   ;;  %v6630_v10 = vunpack.c.l.bf16 %v7454_v2  ;;  %v6631_v11 = vunpack.c.h.bf16 %v7454_v2  ;;  %v6634_v12 = vunpack.c.l.bf16 %v7455_v7  ;;  %v6635_v13 = vunpack.c.h.bf16 %v7455_v7  ;;  %v6275_v15 = vld [vmem:[%s10180_s0 + $0x38] sm:$0xf]  ;;  %s8229_s0 = smov 126   ;;  %s8236_s28 = smov 112  }
   0x4   :  { %228 = vst [vmem:[#allocation1 + $0x8] sm:$0xff] %v6639_v4  ;;  %241 = vst [vmem:[#allocation1] sm:$0xff] %v6638_v3  ;;  %v6622_v16 = vunpack.c.l.bf16 %v7452_v8  ;;  %v6618_v17 = vunpack.c.l.bf16 %v7451_v9  ;;  %v6623_v18 = vunpack.c.h.bf16 %v7452_v8  ;;  %v6614_v19 = vunpack.c.l.bf16 %v7450_v14  ;;  %s8237_s29 = smov 110   ;;  %s8238_s30 = smov 108  }
   0x5   :  { %149 = vst [vmem:[#allocation1 + $0x30] sm:$0xff] %v6626_v5  ;;  %133 = vst [vmem:[#allocation1 + $0x38] sm:$0xff] %v6627_v6  ;;  %v6619_v20 = vunpack.c.h.bf16 %v7451_v9  ;;  %v18_v21 = vunpack.c.l.bf16 %v6275_v15  ;;  %v6615_v22 = vunpack.c.h.bf16 %v7450_v14  ;;  %s8239_s2 = smov 106   ;;  %s8240_s3 = smov 104  }
   0x6   :  { %165 = vst [vmem:[#allocation1 + $0x28] sm:$0xff] %v6631_v11  ;;  %181 = vst [vmem:[#allocation1 + $0x20] sm:$0xff] %v6630_v10  ;;  %s8241_s4 = smov 102   ;;  %s8242_s5 = smov 100  }
   0x7   :  { %197 = vst [vmem:[#allocation1 + $0x18] sm:$0xff] %v6635_v13  ;;  %213 = vst [vmem:[#allocation1 + $0x10] sm:$0xff] %v6634_v12  ;;  %s8243_s6 = smov 98   ;;  %s8244_s7 = smov 96  }
   0x8   :  { %117 = vst [vmem:[#allocation1 + $0x40] sm:$0xff] %v6622_v16  ;;  %85 = vst [vmem:[#allocation1 + $0x50] sm:$0xff] %v6618_v17  ;;  %s8245_s8 = smov 94  }
   0x9   :  { %101 = vst [vmem:[#allocation1 + $0x48] sm:$0xff] %v6623_v18  ;;  %53 = vst [vmem:[#allocation1 + $0x60] sm:$0xff] %v6614_v19 }
   0xa   :  { %69 = vst [vmem:[#allocation1 + $0x58] sm:$0xff] %v6619_v20  ;;  %21 = vst [vmem:[#allocation1 + $0x70] sm:$0xff] %v18_v21 }
   0xb   :  { %37 = vst [vmem:[#allocation1 + $0x68] sm:$0xff] %v6615_v22  ;;  %v338_v23 = vld.sshfl [vmem:[#allocation1] sm:$0xff pattern:$0x56741230]   ;;  %v247_v46 = vld [vmem:[#allocation1 + $0x8] sm:$0xff]  }
   0xc   :  { %v351_v24 = vld.sshfl [vmem:[#allocation1 + $0x8] sm:$0xff pattern:$0x56741230]   ;;  %v416_v32 = vld.sshfl [vmem:[#allocation1 + $0x34] sm:$0xff pattern:$0x56741230]  }
   0xd   :  { %v8280_v25 = vpack.i.bf16 %v351_v24, %v338_v23  ;;  %v390_v26 = vld.sshfl [vmem:[#allocation1 + $0x20] sm:$0xff pattern:$0x9ab81230]   ;;  %v403_v27 = vld.sshfl [vmem:[#allocation1 + $0x2c] sm:$0xff pattern:$0x56741230]  }
   0xe   :  { %v8282_v28 = vpack.i.bf16 %v403_v27, %v390_v26  ;;  %v364_v29 = vld.sshfl [vmem:[#allocation1 + $0x10] sm:$0xff pattern:$0x56741230]   ;;  %v377_v30 = vld.sshfl [vmem:[#allocation1 + $0x18] sm:$0xff pattern:$0x56741230]  }
   0xf   :  { %7635 = vrot.lane.b32.xlu0 %v8280_v25, %s8229_s0  ;;  %v8285_v31 = vpack.i.bf16 %v377_v30, %v364_v29  ;;  %v429_v33 = vld.sshfl [vmem:[#allocation1 + $0x3c] sm:$0xff pattern:$0x56741230]   ;;  %v455_v36 = vld.sshfl [vmem:[#allocation1 + $0x50] sm:$0xff pattern:$0x56741230]  }
  0x10   :  { %7645 = vrot.lane.b32.xlu1 %v8282_v28, %s8229_s0  ;;  %v8288_v34 = vpack.i.bf16 %v429_v33, %v416_v32  ;;  %v442_v35 = vld.sshfl [vmem:[#allocation1 + $0x44] sm:$0xff pattern:$0x56741230]   ;;  %v254_v44 = vld [vmem:[#allocation1 + $0x10] sm:$0xff]   ;;  %v261_v45 = vld [vmem:[#allocation1 + $0x18] sm:$0xff]  }
  0x11   :  { %v468_v37 = vld.sshfl [vmem:[#allocation1 + $0x58] sm:$0xff pattern:$0x56741230]   ;;  %v481_v38 = vld.sshfl [vmem:[#allocation1 + $0x60] sm:$0xff pattern:$0x56741230]   ;;  %v8291_v39 = vpack.i.bf16 %v455_v36, %v442_v35 }
  0x12   :  { %v8294_v40 = vpack.i.bf16 %v481_v38, %v468_v37  ;;  %v494_v41 = vld.sshfl [vmem:[#allocation1 + $0x68] sm:$0xff pattern:$0x56741230]   ;;  %v507_v42 = vld.sshfl [vmem:[#allocation1 + $0x70] sm:$0xff pattern:$0x11111230]  }
  0x13   :  { %7640 = vrot.lane.b32.xlu0 %v8285_v31, %s8229_s0  ;;  %v8297_v43 = vpack.i.bf16 %v507_v42, %v494_v41  ;;  %259 = vst.msk [vmem:[#allocation0 + $0x180] ss:$24 sm:$0xf0] %vm243_vm0, %v254_v44   ;;  %266 = vst.msk [vmem:[#allocation0 + $0x240] ss:$24 sm:$0xf0] %vm243_vm0, %v261_v45  }
  0x14   :  { %7650 = vrot.lane.b32.xlu1 %v8288_v34, %s8229_s0  ;;  %257 = vst.msk [vmem:[#allocation0 + $0x180] ss:$24 sm:$0xf] %vm243_vm0, %v254_v44   ;;  %264 = vst.msk [vmem:[#allocation0 + $0x240] ss:$24 sm:$0xf] %vm243_vm0, %v261_v45  }
  0x15   :  { %250 = vst.msk [vmem:[#allocation0 + $0xc0] ss:$24 sm:$0xf] %vm243_vm0, %v247_v46   ;;  %252 = vst.msk [vmem:[#allocation0 + $0xc0] ss:$24 sm:$0xf0] %vm243_vm0, %v247_v46  }
  0x16   :  { %v287_v47 = vld [vmem:[#allocation1 + $0x38] sm:$0xff]   ;;  %v280_v48 = vld [vmem:[#allocation1 + $0x30] sm:$0xff]   ;;  %v242_v49 = vld [vmem:[#allocation1] sm:$0xff]  }
  0x17   :  { %7655 = vrot.lane.b32.xlu0 %v8291_v39, %s8229_s0  ;;  %290 = vst.msk [vmem:[#allocation0 + $0x4e0] ss:$24 sm:$0xf] %vm243_vm0, %v287_v47   ;;  %292 = vst.msk [vmem:[#allocation0 + $0x4e0] ss:$24 sm:$0xf0] %vm243_vm0, %v287_v47  }
  0x18   :  { %7660 = vrot.lane.b32.xlu1 %v8294_v40, %s8229_s0  ;;  %283 = vst.msk [vmem:[#allocation0 + $0x420] ss:$24 sm:$0xf] %vm243_vm0, %v280_v48   ;;  %285 = vst.msk [vmem:[#allocation0 + $0x420] ss:$24 sm:$0xf0] %vm243_vm0, %v280_v48  }
  0x19   :  { %244 = vst.msk [vmem:[#allocation0] ss:$24 sm:$0xf] %vm243_vm0, %v242_v49   ;;  %245 = vst.msk [vmem:[#allocation0] ss:$24 sm:$0xf0] %vm243_vm0, %v242_v49  }
  0x1a   :  { %v313_v50 = vld [vmem:[#allocation1 + $0x58] sm:$0xff]   ;;  %v320_v51 = vld [vmem:[#allocation1 + $0x60] sm:$0xff]   ;;  %v301_v52 = vld [vmem:[#allocation1 + $0x48] sm:$0xf]  }
  0x1b   :  { %7665 = vrot.lane.b32.xlu0 %v8297_v43, %s8229_s0  ;;  %318 = vst.msk [vmem:[#allocation0 + $0x780] ss:$24 sm:$0xf0] %vm243_vm0, %v313_v50   ;;  %325 = vst.msk [vmem:[#allocation0 + $0x840] ss:$24 sm:$0xf0] %vm243_vm0, %v320_v51  }
  0x1c   :  { %7670 = vrot.lane.b32.xlu1 %v8280_v25, %s8230_s22  ;;  %316 = vst.msk [vmem:[#allocation0 + $0x780] ss:$24 sm:$0xf] %vm243_vm0, %v313_v50   ;;  %323 = vst.msk [vmem:[#allocation0 + $0x840] ss:$24 sm:$0xf] %vm243_vm0, %v320_v51  }
  0x1d   :  { %304 = vst.msk [vmem:[#allocation0 + $0x660] ss:$24 sm:$0xf] %vm243_vm0, %v301_v52   ;;  %v306_v53 = vld [vmem:[#allocation1 + $0x50] sm:$0xff]   ;;  %v327_v54 = vld [vmem:[#allocation1 + $0x68] sm:$0xff]   ;;  %v294_v4 = vld [vmem:[#allocation1 + $0x40] sm:$0xff]  }
  0x1e   :  { %309 = vst.msk [vmem:[#allocation0 + $0x6c0] ss:$24 sm:$0xf] %vm243_vm0, %v306_v53   ;;  %311 = vst.msk [vmem:[#allocation0 + $0x6c0] ss:$24 sm:$0xf0] %vm243_vm0, %v306_v53  }
  0x1f   :  { %7675 = vrot.lane.b32.xlu0 %v8285_v31, %s8230_s22  ;;  %v334_v55 = vld [vmem:[#allocation1 + $0x70] sm:$0xf]   ;;  %332 = vst.msk [vmem:[#allocation0 + $0x900] ss:$24 sm:$0xf0] %vm243_vm0, %v327_v54   ;;  %v273_v63 = vld [vmem:[#allocation1 + $0x28] sm:$0xff]  }
  0x20   :  { %7680 = vrot.lane.b32.xlu1 %v8282_v28, %s8230_s22  ;;  %337 = vst.msk [vmem:[#allocation0 + $0x9c0] ss:$24 sm:$0xf] %vm243_vm0, %v334_v55   ;;  %330 = vst.msk [vmem:[#allocation0 + $0x900] ss:$24 sm:$0xf] %vm243_vm0, %v327_v54  }
  0x21   :  { %v1577_v56 = vld.sshfl [vmem:[#allocation1] sm:$0xff pattern:$0x67452301]   ;;  %v1590_v57 = vld.sshfl [vmem:[#allocation1 + $0x8] sm:$0xff pattern:$0x67452301]  }
  0x22   :  { %v8364_v58 = vpack.i.bf16 %v1590_v57, %v1577_v56  ;;  %v1603_v59 = vld.sshfl [vmem:[#allocation1 + $0x10] sm:$0xff pattern:$0x67452301]   ;;  %v1616_v60 = vld.sshfl [vmem:[#allocation1 + $0x18] sm:$0xff pattern:$0x67452301]  }
  0x23   :  { %7685 = vrot.lane.b32.xlu0 %v8288_v34, %s8230_s22  ;;  %v1629_v61 = vld.sshfl [vmem:[#allocation1 + $0x20] sm:$0xff pattern:$0xab892301]   ;;  %v1642_v62 = vld.sshfl [vmem:[#allocation1 + $0x2c] sm:$0xff pattern:$0x67452301]   ;;  %v8367_v0 = vpack.i.bf16 %v1616_v60, %v1603_v59 }
  0x24   :  { %7690 = vrot.lane.b32.xlu1 %v8291_v39, %s8230_s22  ;;  %v1655_v1 = vld.sshfl [vmem:[#allocation1 + $0x34] sm:$0xff pattern:$0x67452301]   ;;  %276 = vst.msk [vmem:[#allocation0 + $0x360] ss:$24 sm:$0xf] %vm243_vm0, %v273_v63   ;;  %v8372_v2 = vpack.i.bf16 %v1642_v62, %v1629_v61 }
  0x25   :  { %278 = vst.msk [vmem:[#allocation0 + $0x360] ss:$24 sm:$0xf0] %vm243_vm0, %v273_v63   ;;  %v1668_v3 = vld.sshfl [vmem:[#allocation1 + $0x3c] sm:$0xff pattern:$0x67452301]  }
  0x26   :  { %v1681_v5 = vld.sshfl [vmem:[#allocation1 + $0x44] sm:$0xff pattern:$0x67452301]   ;;  %v1694_v6 = vld.sshfl [vmem:[#allocation1 + $0x50] sm:$0xff pattern:$0x67452301]   ;;  %v8377_v7 = vpack.i.bf16 %v1668_v3, %v1655_v1 }
  0x27   :  { %7695 = vrot.lane.b32.xlu0 %v8294_v40, %s8230_s22  ;;  %297 = vst.msk [vmem:[#allocation0 + $0x5a0] ss:$24 sm:$0xf] %vm243_vm0, %v294_v4   ;;  %299 = vst.msk [vmem:[#allocation0 + $0x5a0] ss:$24 sm:$0xf0] %vm243_vm0, %v294_v4   ;;  %v8380_v8 = vpack.i.bf16 %v1694_v6, %v1681_v5 }
  0x28   :  { %7700 = vrot.lane.b32.xlu1 %v8297_v43, %s8230_s22  ;;  %v1707_v9 = vld.sshfl [vmem:[#allocation1 + $0x58] sm:$0xff pattern:$0x67452301]   ;;  %v1720_v10 = vld.sshfl [vmem:[#allocation1 + $0x60] sm:$0xff pattern:$0x67452301]  }
  0x29   :  { %v1733_v11 = vld.sshfl [vmem:[#allocation1 + $0x68] sm:$0xff pattern:$0x67452301]   ;;  %v1746_v12 = vld.sshfl [vmem:[#allocation1 + $0x70] sm:$0xff pattern:$0x22222301]   ;;  %v8383_v13 = vpack.i.bf16 %v1720_v10, %v1707_v9 }
  0x2a   :  { %v8386_v14 = vpack.i.bf16 %v1746_v12, %v1733_v11  ;;  %v268_v16 = vld [vmem:[#allocation1 + $0x20] sm:$0xf]  }
  0x2b   :  { %7705 = vrot.lane.b32.xlu0 %v8280_v25, %s8231_s23  ;;  %271 = vst.msk [vmem:[#allocation0 + $0x300] ss:$24 sm:$0xf] %vm243_vm0, %v268_v16  }
  0x2c   :  { %7710 = vrot.lane.b32.xlu1 %v8285_v31, %s8231_s23 }
  0x2f   :  { %7715 = vrot.lane.b32.xlu0 %v8282_v28, %s8231_s23 }
  0x30   :  { %7720 = vrot.lane.b32.xlu1 %v8288_v34, %s8231_s23 }
  0x33   :  { %7725 = vrot.lane.b32.xlu0 %v8291_v39, %s8231_s23 }
  0x34   :  { %7730 = vrot.lane.b32.xlu1 %v8294_v40, %s8231_s23 }
  0x37   :  { %7735 = vrot.lane.b32.xlu0 %v8297_v43, %s8231_s23 }
  0x38   :  { %7740 = vrot.lane.b32.xlu1 %v8280_v25, %s8232_s24 }
  0x3b   :  { %7745 = vrot.lane.b32.xlu0 %v8285_v31, %s8232_s24 }
  0x3c   :  { %7750 = vrot.lane.b32.xlu1 %v8282_v28, %s8232_s24 }
  0x3f   :  { %7755 = vrot.lane.b32.xlu0 %v8288_v34, %s8232_s24 }
  0x40   :  { %7760 = vrot.lane.b32.xlu1 %v8291_v39, %s8232_s24 }
  0x43   :  { %7765 = vrot.lane.b32.xlu0 %v8294_v40, %s8232_s24 }
  0x44   :  { %7770 = vrot.lane.b32.xlu1 %v8297_v43, %s8232_s24 }
  0x47   :  { %7775 = vrot.lane.b32.xlu0 %v8280_v25, %s8233_s25 }
  0x48   :  { %7780 = vrot.lane.b32.xlu1 %v8285_v31, %s8233_s25 }
  0x4b   :  { %7785 = vrot.lane.b32.xlu0 %v8282_v28, %s8233_s25 }
  0x4c   :  { %7790 = vrot.lane.b32.xlu1 %v8288_v34, %s8233_s25 }
  0x4f   :  { %7795 = vrot.lane.b32.xlu0 %v8291_v39, %s8233_s25 }
  0x50   :  { %7800 = vrot.lane.b32.xlu1 %v8294_v40, %s8233_s25 }
  0x53   :  { %7805 = vrot.lane.b32.xlu0 %v8297_v43, %s8233_s25 }
  0x54   :  { %7810 = vrot.lane.b32.xlu1 %v8280_v25, %s8234_s26 }
  0x57   :  { %7815 = vrot.lane.b32.xlu0 %v8285_v31, %s8234_s26 }
  0x58   :  { %7820 = vrot.lane.b32.xlu1 %v8282_v28, %s8234_s26 }
  0x5b   :  { %7825 = vrot.lane.b32.xlu0 %v8288_v34, %s8234_s26 }
  0x5c   :  { %7830 = vrot.lane.b32.xlu1 %v8291_v39, %s8234_s26 }
  0x5f   :  { %7835 = vrot.lane.b32.xlu0 %v8294_v40, %s8234_s26 }
  0x60   :  { %7840 = vrot.lane.b32.xlu1 %v8297_v43, %s8234_s26 }
  0x63   :  { %7845 = vrot.lane.b32.xlu0 %v8280_v25, %s8235_s27 }
  0x64   :  { %7850 = vrot.lane.b32.xlu1 %v8285_v31, %s8235_s27 }
  0x67   :  { %7855 = vrot.lane.b32.xlu0 %v8282_v28, %s8235_s27 }
  0x68   :  { %7860 = vrot.lane.b32.xlu1 %v8288_v34, %s8235_s27 }
  0x6b   :  { %7865 = vrot.lane.b32.xlu0 %v8291_v39, %s8235_s27 }
  0x6c   :  { %7870 = vrot.lane.b32.xlu1 %v8294_v40, %s8235_s27 }
  0x6f   :  { %7875 = vrot.lane.b32.xlu0 %v8297_v43, %s8235_s27 }
  0x70   :  { %7880 = vrot.lane.b32.xlu1 %v8364_v58, %s8236_s28 }
  0x73   :  { %7885 = vrot.lane.b32.xlu0 %v8367_v0, %s8236_s28 }
  0x74   :  { %7890 = vrot.lane.b32.xlu1 %v8372_v2, %s8236_s28 }
  0x77   :  { %7895 = vrot.lane.b32.xlu0 %v8377_v7, %s8236_s28 }
  0x78   :  { %7900 = vrot.lane.b32.xlu1 %v8380_v8, %s8236_s28 }
  0x7b   :  { %7905 = vrot.lane.b32.xlu0 %v8383_v13, %s8236_s28 }
  0x7c   :  { %7910 = vrot.lane.b32.xlu1 %v8386_v14, %s8236_s28 }
  0x7f   :  { %7915 = vrot.lane.b32.xlu0 %v8364_v58, %s8237_s29 }
  0x80   :  { %7920 = vrot.lane.b32.xlu1 %v8367_v0, %s8237_s29 }
  0x81   :  { %v7636_v15 = vpop.permute.xlu0 %7635 }
  0x82   :  { %v7638_v17 = vunpack.i.h.bf16 %v7636_v15  ;;  %v7637_v18 = vunpack.i.l.bf16 %v7636_v15  ;;  %v7646_v19 = vpop.permute.xlu1 %7645 }
  0x83   :  { %v7648_v20 = vunpack.i.h.bf16 %v7646_v19  ;;  %v7647_v21 = vunpack.i.l.bf16 %v7646_v19  ;;  %7925 = vrot.lane.b32.xlu0 %v8372_v2, %s8237_s29 }
  0x84   :  { %356 = vst.msk [vmem:[#allocation0 + $0xc1] ss:$72 sm:$0x3] %vm243_vm0, %v7638_v17   ;;  %358 = vst.msk [vmem:[#allocation0 + $0x121] ss:$-24 sm:$0xc] %vm243_vm0, %v7638_v17   ;;  %7930 = vrot.lane.b32.xlu1 %v8377_v7, %s8237_s29 }
  0x85   :  { %360 = vst.msk [vmem:[#allocation0 + $0x1] ss:$72 sm:$0x30] %vm243_vm0, %v7638_v17   ;;  %362 = vst.msk [vmem:[#allocation0 + $0x1e1] ss:$-24 sm:$0xc0] %vm243_vm0, %v7638_v17   ;;  %v7641_v22 = vpop.permute.xlu0 %7640 }
  0x86   :  { %343 = vst.msk [vmem:[#allocation0 + $0x1] ss:$72 sm:$0x3] %vm243_vm0, %v7637_v18   ;;  %345 = vst.msk [vmem:[#allocation0 + $0x61] ss:$-24 sm:$0xc] %vm243_vm0, %v7637_v18   ;;  %v7643_v23 = vunpack.i.h.bf16 %v7641_v22  ;;  %v7642_v24 = vunpack.i.l.bf16 %v7641_v22  ;;  %v7651_v25 = vpop.permute.xlu1 %7650 }
  0x87   :  { %347 = vst.msk [vmem:[#allocation0 - $0xbf] ss:$72 sm:$0x30] %vm243_vm0, %v7637_v18   ;;  %349 = vst.msk [vmem:[#allocation0 + $0x121] ss:$-24 sm:$0xc0] %vm243_vm0, %v7637_v18   ;;  %v7653_v26 = vunpack.i.h.bf16 %v7651_v25  ;;  %v7652_v27 = vunpack.i.l.bf16 %v7651_v25  ;;  %7935 = vrot.lane.b32.xlu0 %v8380_v8, %s8237_s29 }
  0x88   :  { %408 = vst.msk [vmem:[#allocation0 + $0x3c1] ss:$72 sm:$0x3] %vm243_vm0, %v7648_v20   ;;  %410 = vst.msk [vmem:[#allocation0 + $0x421] ss:$-24 sm:$0xc] %vm243_vm0, %v7648_v20   ;;  %7940 = vrot.lane.b32.xlu1 %v8383_v13, %s8237_s29 }
  0x89   :  { %412 = vst.msk [vmem:[#allocation0 + $0x301] ss:$72 sm:$0x30] %vm243_vm0, %v7648_v20   ;;  %414 = vst.msk [vmem:[#allocation0 + $0x4e1] ss:$-24 sm:$0xc0] %vm243_vm0, %v7648_v20   ;;  %v7656_v28 = vpop.permute.xlu0 %7655 }
  0x8a   :  { %395 = vst.msk [vmem:[#allocation0 + $0x301] ss:$72 sm:$0x3] %vm243_vm0, %v7647_v21   ;;  %397 = vst.msk [vmem:[#allocation0 + $0x361] ss:$-24 sm:$0xc] %vm243_vm0, %v7647_v21   ;;  %v7658_v29 = vunpack.i.h.bf16 %v7656_v28  ;;  %v7657_v30 = vunpack.i.l.bf16 %v7656_v28  ;;  %v7661_v31 = vpop.permute.xlu1 %7660 }
  0x8b   :  { %399 = vst.msk [vmem:[#allocation0 + $0x241] ss:$72 sm:$0x30] %vm243_vm0, %v7647_v21   ;;  %401 = vst.msk [vmem:[#allocation0 + $0x421] ss:$-24 sm:$0xc0] %vm243_vm0, %v7647_v21   ;;  %v7663_v32 = vunpack.i.h.bf16 %v7661_v31  ;;  %v7662_v33 = vunpack.i.l.bf16 %v7661_v31  ;;  %7945 = vrot.lane.b32.xlu0 %v8386_v14, %s8237_s29 }
  0x8c   :  { %382 = vst.msk [vmem:[#allocation0 + $0x241] ss:$72 sm:$0x3] %vm243_vm0, %v7643_v23   ;;  %384 = vst.msk [vmem:[#allocation0 + $0x2a1] ss:$-24 sm:$0xc] %vm243_vm0, %v7643_v23   ;;  %7950 = vrot.lane.b32.xlu1 %v8364_v58, %s8238_s30 }
  0x8d   :  { %386 = vst.msk [vmem:[#allocation0 + $0x181] ss:$72 sm:$0x30] %vm243_vm0, %v7643_v23   ;;  %388 = vst.msk [vmem:[#allocation0 + $0x361] ss:$-24 sm:$0xc0] %vm243_vm0, %v7643_v23   ;;  %v7666_v34 = vpop.permute.xlu0 %7665 }
  0x8e   :  { %369 = vst.msk [vmem:[#allocation0 + $0x181] ss:$72 sm:$0x3] %vm243_vm0, %v7642_v24   ;;  %371 = vst.msk [vmem:[#allocation0 + $0x1e1] ss:$-24 sm:$0xc] %vm243_vm0, %v7642_v24   ;;  %v7671_v35 = vpop.permute.xlu1 %7670  ;;  %v7668_v36 = vunpack.i.h.bf16 %v7666_v34  ;;  %v7667_v37 = vunpack.i.l.bf16 %v7666_v34 }
  0x8f   :  { %373 = vst.msk [vmem:[#allocation0 + $0xc1] ss:$72 sm:$0x30] %vm243_vm0, %v7642_v24   ;;  %375 = vst.msk [vmem:[#allocation0 + $0x2a1] ss:$-24 sm:$0xc0] %vm243_vm0, %v7642_v24   ;;  %v7673_v38 = vunpack.i.h.bf16 %v7671_v35  ;;  %v7672_v39 = vunpack.i.l.bf16 %v7671_v35  ;;  %7955 = vrot.lane.b32.xlu0 %v8367_v0, %s8238_s30 }
  0x90   :  { %434 = vst.msk [vmem:[#allocation0 + $0x541] ss:$72 sm:$0x3] %vm243_vm0, %v7653_v26   ;;  %436 = vst.msk [vmem:[#allocation0 + $0x5a1] ss:$-24 sm:$0xc] %vm243_vm0, %v7653_v26   ;;  %7960 = vrot.lane.b32.xlu1 %v8372_v2, %s8238_s30 }
  0x91   :  { %438 = vst.msk [vmem:[#allocation0 + $0x481] ss:$72 sm:$0x30] %vm243_vm0, %v7653_v26   ;;  %440 = vst.msk [vmem:[#allocation0 + $0x661] ss:$-24 sm:$0xc0] %vm243_vm0, %v7653_v26   ;;  %v7676_v40 = vpop.permute.xlu0 %7675 }
  0x92   :  { %421 = vst.msk [vmem:[#allocation0 + $0x481] ss:$72 sm:$0x3] %vm243_vm0, %v7652_v27   ;;  %423 = vst.msk [vmem:[#allocation0 + $0x4e1] ss:$-24 sm:$0xc] %vm243_vm0, %v7652_v27   ;;  %v7681_v41 = vpop.permute.xlu1 %7680  ;;  %v7678_v42 = vunpack.i.h.bf16 %v7676_v40  ;;  %v7677_v43 = vunpack.i.l.bf16 %v7676_v40 }
  0x93   :  { %425 = vst.msk [vmem:[#allocation0 + $0x3c1] ss:$72 sm:$0x30] %vm243_vm0, %v7652_v27   ;;  %427 = vst.msk [vmem:[#allocation0 + $0x5a1] ss:$-24 sm:$0xc0] %vm243_vm0, %v7652_v27   ;;  %v7683_v44 = vunpack.i.h.bf16 %v7681_v41  ;;  %v7682_v45 = vunpack.i.l.bf16 %v7681_v41  ;;  %7965 = vrot.lane.b32.xlu0 %v8377_v7, %s8238_s30 }
  0x94   :  { %460 = vst.msk [vmem:[#allocation0 + $0x6c1] ss:$72 sm:$0x3] %vm243_vm0, %v7658_v29   ;;  %462 = vst.msk [vmem:[#allocation0 + $0x721] ss:$-24 sm:$0xc] %vm243_vm0, %v7658_v29   ;;  %7970 = vrot.lane.b32.xlu1 %v8380_v8, %s8238_s30 }
  0x95   :  { %464 = vst.msk [vmem:[#allocation0 + $0x601] ss:$72 sm:$0x30] %vm243_vm0, %v7658_v29   ;;  %466 = vst.msk [vmem:[#allocation0 + $0x7e1] ss:$-24 sm:$0xc0] %vm243_vm0, %v7658_v29   ;;  %v7686_v46 = vpop.permute.xlu0 %7685 }
  0x96   :  { %447 = vst.msk [vmem:[#allocation0 + $0x601] ss:$72 sm:$0x3] %vm243_vm0, %v7657_v30   ;;  %449 = vst.msk [vmem:[#allocation0 + $0x661] ss:$-24 sm:$0xc] %vm243_vm0, %v7657_v30   ;;  %v7691_v47 = vpop.permute.xlu1 %7690  ;;  %v7688_v48 = vunpack.i.h.bf16 %v7686_v46  ;;  %v7687_v49 = vunpack.i.l.bf16 %v7686_v46 }
  0x97   :  { %451 = vst.msk [vmem:[#allocation0 + $0x541] ss:$72 sm:$0x30] %vm243_vm0, %v7657_v30   ;;  %453 = vst.msk [vmem:[#allocation0 + $0x721] ss:$-24 sm:$0xc0] %vm243_vm0, %v7657_v30   ;;  %v7693_v50 = vunpack.i.h.bf16 %v7691_v47  ;;  %v7692_v51 = vunpack.i.l.bf16 %v7691_v47  ;;  %7975 = vrot.lane.b32.xlu0 %v8383_v13, %s8238_s30 }
  0x98   :  { %486 = vst.msk [vmem:[#allocation0 + $0x841] ss:$72 sm:$0x3] %vm243_vm0, %v7663_v32   ;;  %488 = vst.msk [vmem:[#allocation0 + $0x8a1] ss:$-24 sm:$0xc] %vm243_vm0, %v7663_v32   ;;  %7980 = vrot.lane.b32.xlu1 %v8386_v14, %s8238_s30 }
  0x99   :  { %490 = vst.msk [vmem:[#allocation0 + $0x781] ss:$72 sm:$0x30] %vm243_vm0, %v7663_v32   ;;  %492 = vst.msk [vmem:[#allocation0 + $0x961] ss:$-24 sm:$0xc0] %vm243_vm0, %v7663_v32   ;;  %v7696_v52 = vpop.permute.xlu0 %7695 }
  0x9a   :  { %473 = vst.msk [vmem:[#allocation0 + $0x781] ss:$72 sm:$0x3] %vm243_vm0, %v7662_v33   ;;  %475 = vst.msk [vmem:[#allocation0 + $0x7e1] ss:$-24 sm:$0xc] %vm243_vm0, %v7662_v33   ;;  %v7701_v53 = vpop.permute.xlu1 %7700  ;;  %v7698_v54 = vunpack.i.h.bf16 %v7696_v52  ;;  %v7697_v55 = vunpack.i.l.bf16 %v7696_v52 }
  0x9b   :  { %477 = vst.msk [vmem:[#allocation0 + $0x6c1] ss:$72 sm:$0x30] %vm243_vm0, %v7662_v33   ;;  %479 = vst.msk [vmem:[#allocation0 + $0x8a1] ss:$-24 sm:$0xc0] %vm243_vm0, %v7662_v33   ;;  %v7703_v56 = vunpack.i.h.bf16 %v7701_v53  ;;  %v7702_v57 = vunpack.i.l.bf16 %v7701_v53  ;;  %7985 = vrot.lane.b32.xlu0 %v8364_v58, %s8239_s2 }
  0x9c   :  { %512 = vst.msk [vmem:[#allocation0 + $0x9c1] ss:$72 sm:$0x3] %vm243_vm0, %v7668_v36   ;;  %514 = vst.msk [vmem:[#allocation0 + $0xa21] ss:$-24 sm:$0xc] %vm243_vm0, %v7668_v36   ;;  %7990 = vrot.lane.b32.xlu1 %v8367_v0, %s8239_s2 }
  0x9d   :  { %499 = vst.msk [vmem:[#allocation0 + $0x901] ss:$72 sm:$0x3] %vm243_vm0, %v7667_v37   ;;  %501 = vst.msk [vmem:[#allocation0 + $0x961] ss:$-24 sm:$0xc] %vm243_vm0, %v7667_v37   ;;  %v7706_v59 = vpop.permute.xlu0 %7705 }
  0x9e   :  { %503 = vst.msk [vmem:[#allocation0 + $0x841] ss:$72 sm:$0x30] %vm243_vm0, %v7667_v37   ;;  %505 = vst.msk [vmem:[#allocation0 + $0xa21] ss:$-24 sm:$0xc0] %vm243_vm0, %v7667_v37   ;;  %v7711_v60 = vpop.permute.xlu1 %7710  ;;  %v7708_v61 = vunpack.i.h.bf16 %v7706_v59  ;;  %v7707_v62 = vunpack.i.l.bf16 %v7706_v59 }
  0x9f   :  { %533 = vst.msk [vmem:[#allocation0 + $0xc2] ss:$72 sm:$0x3] %vm243_vm0, %v7673_v38   ;;  %535 = vst.msk [vmem:[#allocation0 + $0x122] ss:$-24 sm:$0xc] %vm243_vm0, %v7673_v38   ;;  %v7713_v63 = vunpack.i.h.bf16 %v7711_v60  ;;  %v7712_v1 = vunpack.i.l.bf16 %v7711_v60  ;;  %7995 = vrot.lane.b32.xlu0 %v8372_v2, %s8239_s2 }
  0xa0   :  { %537 = vst.msk [vmem:[#allocation0 + $0x2] ss:$72 sm:$0x30] %vm243_vm0, %v7673_v38   ;;  %539 = vst.msk [vmem:[#allocation0 + $0x1e2] ss:$-24 sm:$0xc0] %vm243_vm0, %v7673_v38   ;;  %8000 = vrot.lane.b32.xlu1 %v8377_v7, %s8239_s2 }
  0xa1   :  { %520 = vst.msk [vmem:[#allocation0 + $0x2] ss:$72 sm:$0x3] %vm243_vm0, %v7672_v39   ;;  %522 = vst.msk [vmem:[#allocation0 + $0x62] ss:$-24 sm:$0xc] %vm243_vm0, %v7672_v39   ;;  %v7716_v3 = vpop.permute.xlu0 %7715 }
  0xa2   :  { %524 = vst.msk [vmem:[#allocation0 - $0xbe] ss:$72 sm:$0x30] %vm243_vm0, %v7672_v39   ;;  %526 = vst.msk [vmem:[#allocation0 + $0x122] ss:$-24 sm:$0xc0] %vm243_vm0, %v7672_v39   ;;  %v7721_v4 = vpop.permute.xlu1 %7720  ;;  %v7718_v5 = vunpack.i.h.bf16 %v7716_v3  ;;  %v7717_v6 = vunpack.i.l.bf16 %v7716_v3 }
  0xa3   :  { %559 = vst.msk [vmem:[#allocation0 + $0x242] ss:$72 sm:$0x3] %vm243_vm0, %v7678_v42   ;;  %561 = vst.msk [vmem:[#allocation0 + $0x2a2] ss:$-24 sm:$0xc] %vm243_vm0, %v7678_v42   ;;  %v7723_v9 = vunpack.i.h.bf16 %v7721_v4  ;;  %v7722_v10 = vunpack.i.l.bf16 %v7721_v4  ;;  %8005 = vrot.lane.b32.xlu0 %v8380_v8, %s8239_s2 }
  0xa4   :  { %563 = vst.msk [vmem:[#allocation0 + $0x182] ss:$72 sm:$0x30] %vm243_vm0, %v7678_v42   ;;  %565 = vst.msk [vmem:[#allocation0 + $0x362] ss:$-24 sm:$0xc0] %vm243_vm0, %v7678_v42   ;;  %8010 = vrot.lane.b32.xlu1 %v8383_v13, %s8239_s2 }
  0xa5   :  { %546 = vst.msk [vmem:[#allocation0 + $0x182] ss:$72 sm:$0x3] %vm243_vm0, %v7677_v43   ;;  %548 = vst.msk [vmem:[#allocation0 + $0x1e2] ss:$-24 sm:$0xc] %vm243_vm0, %v7677_v43   ;;  %v7726_v11 = vpop.permute.xlu0 %7725 }
  0xa6   :  { %550 = vst.msk [vmem:[#allocation0 + $0xc2] ss:$72 sm:$0x30] %vm243_vm0, %v7677_v43   ;;  %552 = vst.msk [vmem:[#allocation0 + $0x2a2] ss:$-24 sm:$0xc0] %vm243_vm0, %v7677_v43   ;;  %v7731_v12 = vpop.permute.xlu1 %7730  ;;  %v7728_v15 = vunpack.i.h.bf16 %v7726_v11  ;;  %v7727_v16 = vunpack.i.l.bf16 %v7726_v11 }
  0xa7   :  { %585 = vst.msk [vmem:[#allocation0 + $0x3c2] ss:$72 sm:$0x3] %vm243_vm0, %v7683_v44   ;;  %587 = vst.msk [vmem:[#allocation0 + $0x422] ss:$-24 sm:$0xc] %vm243_vm0, %v7683_v44   ;;  %v7733_v17 = vunpack.i.h.bf16 %v7731_v12  ;;  %v7732_v18 = vunpack.i.l.bf16 %v7731_v12  ;;  %8015 = vrot.lane.b32.xlu0 %v8386_v14, %s8239_s2 }
  0xa8   :  { %589 = vst.msk [vmem:[#allocation0 + $0x302] ss:$72 sm:$0x30] %vm243_vm0, %v7683_v44   ;;  %591 = vst.msk [vmem:[#allocation0 + $0x4e2] ss:$-24 sm:$0xc0] %vm243_vm0, %v7683_v44   ;;  %8020 = vrot.lane.b32.xlu1 %v8364_v58, %s8240_s3 }
  0xa9   :  { %572 = vst.msk [vmem:[#allocation0 + $0x302] ss:$72 sm:$0x3] %vm243_vm0, %v7682_v45   ;;  %574 = vst.msk [vmem:[#allocation0 + $0x362] ss:$-24 sm:$0xc] %vm243_vm0, %v7682_v45   ;;  %v7736_v19 = vpop.permute.xlu0 %7735 }
  0xaa   :  { %576 = vst.msk [vmem:[#allocation0 + $0x242] ss:$72 sm:$0x30] %vm243_vm0, %v7682_v45   ;;  %578 = vst.msk [vmem:[#allocation0 + $0x422] ss:$-24 sm:$0xc0] %vm243_vm0, %v7682_v45   ;;  %v7741_v20 = vpop.permute.xlu1 %7740  ;;  %v7738_v21 = vunpack.i.h.bf16 %v7736_v19  ;;  %v7737_v22 = vunpack.i.l.bf16 %v7736_v19 }
  0xab   :  { %611 = vst.msk [vmem:[#allocation0 + $0x542] ss:$72 sm:$0x3] %vm243_vm0, %v7688_v48   ;;  %613 = vst.msk [vmem:[#allocation0 + $0x5a2] ss:$-24 sm:$0xc] %vm243_vm0, %v7688_v48   ;;  %v7743_v23 = vunpack.i.h.bf16 %v7741_v20  ;;  %v7742_v24 = vunpack.i.l.bf16 %v7741_v20  ;;  %8025 = vrot.lane.b32.xlu0 %v8367_v0, %s8240_s3 }
  0xac   :  { %615 = vst.msk [vmem:[#allocation0 + $0x482] ss:$72 sm:$0x30] %vm243_vm0, %v7688_v48   ;;  %617 = vst.msk [vmem:[#allocation0 + $0x662] ss:$-24 sm:$0xc0] %vm243_vm0, %v7688_v48   ;;  %8030 = vrot.lane.b32.xlu1 %v8372_v2, %s8240_s3 }
  0xad   :  { %598 = vst.msk [vmem:[#allocation0 + $0x482] ss:$72 sm:$0x3] %vm243_vm0, %v7687_v49   ;;  %600 = vst.msk [vmem:[#allocation0 + $0x4e2] ss:$-24 sm:$0xc] %vm243_vm0, %v7687_v49   ;;  %v7746_v25 = vpop.permute.xlu0 %7745 }
  0xae   :  { %602 = vst.msk [vmem:[#allocation0 + $0x3c2] ss:$72 sm:$0x30] %vm243_vm0, %v7687_v49   ;;  %604 = vst.msk [vmem:[#allocation0 + $0x5a2] ss:$-24 sm:$0xc0] %vm243_vm0, %v7687_v49   ;;  %v7751_v26 = vpop.permute.xlu1 %7750  ;;  %v7748_v27 = vunpack.i.h.bf16 %v7746_v25  ;;  %v7747_v28 = vunpack.i.l.bf16 %v7746_v25 }
  0xaf   :  { %637 = vst.msk [vmem:[#allocation0 + $0x6c2] ss:$72 sm:$0x3] %vm243_vm0, %v7693_v50   ;;  %639 = vst.msk [vmem:[#allocation0 + $0x722] ss:$-24 sm:$0xc] %vm243_vm0, %v7693_v50   ;;  %v7753_v29 = vunpack.i.h.bf16 %v7751_v26  ;;  %v7752_v30 = vunpack.i.l.bf16 %v7751_v26  ;;  %8035 = vrot.lane.b32.xlu0 %v8377_v7, %s8240_s3 }
  0xb0   :  { %641 = vst.msk [vmem:[#allocation0 + $0x602] ss:$72 sm:$0x30] %vm243_vm0, %v7693_v50   ;;  %643 = vst.msk [vmem:[#allocation0 + $0x7e2] ss:$-24 sm:$0xc0] %vm243_vm0, %v7693_v50   ;;  %8040 = vrot.lane.b32.xlu1 %v8380_v8, %s8240_s3 }
  0xb1   :  { %624 = vst.msk [vmem:[#allocation0 + $0x602] ss:$72 sm:$0x3] %vm243_vm0, %v7692_v51   ;;  %626 = vst.msk [vmem:[#allocation0 + $0x662] ss:$-24 sm:$0xc] %vm243_vm0, %v7692_v51   ;;  %v7756_v31 = vpop.permute.xlu0 %7755 }
  0xb2   :  { %628 = vst.msk [vmem:[#allocation0 + $0x542] ss:$72 sm:$0x30] %vm243_vm0, %v7692_v51   ;;  %630 = vst.msk [vmem:[#allocation0 + $0x722] ss:$-24 sm:$0xc0] %vm243_vm0, %v7692_v51   ;;  %v7761_v32 = vpop.permute.xlu1 %7760  ;;  %v7758_v33 = vunpack.i.h.bf16 %v7756_v31  ;;  %v7757_v34 = vunpack.i.l.bf16 %v7756_v31 }
  0xb3   :  { %663 = vst.msk [vmem:[#allocation0 + $0x842] ss:$72 sm:$0x3] %vm243_vm0, %v7698_v54   ;;  %665 = vst.msk [vmem:[#allocation0 + $0x8a2] ss:$-24 sm:$0xc] %vm243_vm0, %v7698_v54   ;;  %v7763_v35 = vunpack.i.h.bf16 %v7761_v32  ;;  %v7762_v36 = vunpack.i.l.bf16 %v7761_v32  ;;  %8045 = vrot.lane.b32.xlu0 %v8383_v13, %s8240_s3 }
  0xb4   :  { %667 = vst.msk [vmem:[#allocation0 + $0x782] ss:$72 sm:$0x30] %vm243_vm0, %v7698_v54   ;;  %669 = vst.msk [vmem:[#allocation0 + $0x962] ss:$-24 sm:$0xc0] %vm243_vm0, %v7698_v54   ;;  %8050 = vrot.lane.b32.xlu1 %v8386_v14, %s8240_s3 }
  0xb5   :  { %650 = vst.msk [vmem:[#allocation0 + $0x782] ss:$72 sm:$0x3] %vm243_vm0, %v7697_v55   ;;  %652 = vst.msk [vmem:[#allocation0 + $0x7e2] ss:$-24 sm:$0xc] %vm243_vm0, %v7697_v55   ;;  %v7766_v14 = vpop.permute.xlu0 %7765 }
  0xb6   :  { %654 = vst.msk [vmem:[#allocation0 + $0x6c2] ss:$72 sm:$0x30] %vm243_vm0, %v7697_v55   ;;  %656 = vst.msk [vmem:[#allocation0 + $0x8a2] ss:$-24 sm:$0xc0] %vm243_vm0, %v7697_v55   ;;  %v7771_v37 = vpop.permute.xlu1 %7770  ;;  %v7768_v38 = vunpack.i.h.bf16 %v7766_v14  ;;  %v7767_v39 = vunpack.i.l.bf16 %v7766_v14 }
  0xb7   :  { %689 = vst.msk [vmem:[#allocation0 + $0x9c2] ss:$72 sm:$0x3] %vm243_vm0, %v7703_v56   ;;  %691 = vst.msk [vmem:[#allocation0 + $0xa22] ss:$-24 sm:$0xc] %vm243_vm0, %v7703_v56   ;;  %v7773_v40 = vunpack.i.h.bf16 %v7771_v37  ;;  %v7772_v41 = vunpack.i.l.bf16 %v7771_v37  ;;  %8055 = vrot.lane.b32.xlu0 %v8364_v58, %s8241_s4 }
  0xb8   :  { %676 = vst.msk [vmem:[#allocation0 + $0x902] ss:$72 sm:$0x3] %vm243_vm0, %v7702_v57   ;;  %678 = vst.msk [vmem:[#allocation0 + $0x962] ss:$-24 sm:$0xc] %vm243_vm0, %v7702_v57   ;;  %8060 = vrot.lane.b32.xlu1 %v8367_v0, %s8241_s4 }
  0xb9   :  { %680 = vst.msk [vmem:[#allocation0 + $0x842] ss:$72 sm:$0x30] %vm243_vm0, %v7702_v57   ;;  %682 = vst.msk [vmem:[#allocation0 + $0xa22] ss:$-24 sm:$0xc0] %vm243_vm0, %v7702_v57   ;;  %v7776_v58 = vpop.permute.xlu0 %7775 }
  0xba   :  { %710 = vst.msk [vmem:[#allocation0 + $0xc3] ss:$72 sm:$0x3] %vm243_vm0, %v7708_v61   ;;  %712 = vst.msk [vmem:[#allocation0 + $0x123] ss:$-24 sm:$0xc] %vm243_vm0, %v7708_v61   ;;  %v7781_v0 = vpop.permute.xlu1 %7780  ;;  %v7778_v42 = vunpack.i.h.bf16 %v7776_v58  ;;  %v7777_v43 = vunpack.i.l.bf16 %v7776_v58 }
  0xbb   :  { %714 = vst.msk [vmem:[#allocation0 + $0x3] ss:$72 sm:$0x30] %vm243_vm0, %v7708_v61   ;;  %716 = vst.msk [vmem:[#allocation0 + $0x1e3] ss:$-24 sm:$0xc0] %vm243_vm0, %v7708_v61   ;;  %v7783_v44 = vunpack.i.h.bf16 %v7781_v0  ;;  %v7782_v45 = vunpack.i.l.bf16 %v7781_v0  ;;  %8065 = vrot.lane.b32.xlu0 %v8372_v2, %s8241_s4 }
  0xbc   :  { %697 = vst.msk [vmem:[#allocation0 + $0x3] ss:$72 sm:$0x3] %vm243_vm0, %v7707_v62   ;;  %699 = vst.msk [vmem:[#allocation0 + $0x63] ss:$-24 sm:$0xc] %vm243_vm0, %v7707_v62   ;;  %8070 = vrot.lane.b32.xlu1 %v8377_v7, %s8241_s4 }
  0xbd   :  { %701 = vst.msk [vmem:[#allocation0 - $0xbd] ss:$72 sm:$0x30] %vm243_vm0, %v7707_v62   ;;  %703 = vst.msk [vmem:[#allocation0 + $0x123] ss:$-24 sm:$0xc0] %vm243_vm0, %v7707_v62   ;;  %v7786_v46 = vpop.permute.xlu0 %7785 }
  0xbe   :  { %736 = vst.msk [vmem:[#allocation0 + $0x243] ss:$72 sm:$0x3] %vm243_vm0, %v7713_v63   ;;  %738 = vst.msk [vmem:[#allocation0 + $0x2a3] ss:$-24 sm:$0xc] %vm243_vm0, %v7713_v63   ;;  %v7791_v49 = vpop.permute.xlu1 %7790  ;;  %v7788_v50 = vunpack.i.h.bf16 %v7786_v46  ;;  %v7787_v51 = vunpack.i.l.bf16 %v7786_v46 }
  0xbf   :  { %740 = vst.msk [vmem:[#allocation0 + $0x183] ss:$72 sm:$0x30] %vm243_vm0, %v7713_v63   ;;  %742 = vst.msk [vmem:[#allocation0 + $0x363] ss:$-24 sm:$0xc0] %vm243_vm0, %v7713_v63   ;;  %v7793_v52 = vunpack.i.h.bf16 %v7791_v49  ;;  %v7792_v53 = vunpack.i.l.bf16 %v7791_v49  ;;  %8075 = vrot.lane.b32.xlu0 %v8380_v8, %s8241_s4 }
  0xc0   :  { %723 = vst.msk [vmem:[#allocation0 + $0x183] ss:$72 sm:$0x3] %vm243_vm0, %v7712_v1   ;;  %725 = vst.msk [vmem:[#allocation0 + $0x1e3] ss:$-24 sm:$0xc] %vm243_vm0, %v7712_v1   ;;  %8080 = vrot.lane.b32.xlu1 %v8383_v13, %s8241_s4 }
  0xc1   :  { %727 = vst.msk [vmem:[#allocation0 + $0xc3] ss:$72 sm:$0x30] %vm243_vm0, %v7712_v1   ;;  %729 = vst.msk [vmem:[#allocation0 + $0x2a3] ss:$-24 sm:$0xc0] %vm243_vm0, %v7712_v1   ;;  %v7796_v56 = vpop.permute.xlu0 %7795 }
  0xc2   :  { %762 = vst.msk [vmem:[#allocation0 + $0x3c3] ss:$72 sm:$0x3] %vm243_vm0, %v7718_v5   ;;  %764 = vst.msk [vmem:[#allocation0 + $0x423] ss:$-24 sm:$0xc] %vm243_vm0, %v7718_v5   ;;  %v7801_v60 = vpop.permute.xlu1 %7800  ;;  %v7798_v61 = vunpack.i.h.bf16 %v7796_v56  ;;  %v7797_v62 = vunpack.i.l.bf16 %v7796_v56 }
  0xc3   :  { %766 = vst.msk [vmem:[#allocation0 + $0x303] ss:$72 sm:$0x30] %vm243_vm0, %v7718_v5   ;;  %768 = vst.msk [vmem:[#allocation0 + $0x4e3] ss:$-24 sm:$0xc0] %vm243_vm0, %v7718_v5   ;;  %v7803_v63 = vunpack.i.h.bf16 %v7801_v60  ;;  %v7802_v1 = vunpack.i.l.bf16 %v7801_v60 }
  0xc4   :  { %749 = vst.msk [vmem:[#allocation0 + $0x303] ss:$72 sm:$0x3] %vm243_vm0, %v7717_v6   ;;  %751 = vst.msk [vmem:[#allocation0 + $0x363] ss:$-24 sm:$0xc] %vm243_vm0, %v7717_v6  }
  0xc5   :  { %753 = vst.msk [vmem:[#allocation0 + $0x243] ss:$72 sm:$0x30] %vm243_vm0, %v7717_v6   ;;  %755 = vst.msk [vmem:[#allocation0 + $0x423] ss:$-24 sm:$0xc0] %vm243_vm0, %v7717_v6  }
  0xc6   :  { %788 = vst.msk [vmem:[#allocation0 + $0x543] ss:$72 sm:$0x3] %vm243_vm0, %v7723_v9   ;;  %790 = vst.msk [vmem:[#allocation0 + $0x5a3] ss:$-24 sm:$0xc] %vm243_vm0, %v7723_v9   ;;  %v7811_v12 = vpop.permute.xlu1 %7810 }
  0xc7   :  { %792 = vst.msk [vmem:[#allocation0 + $0x483] ss:$72 sm:$0x30] %vm243_vm0, %v7723_v9   ;;  %794 = vst.msk [vmem:[#allocation0 + $0x663] ss:$-24 sm:$0xc0] %vm243_vm0, %v7723_v9   ;;  %v7806_v9 = vpop.permute.xlu0 %7805 }
  0xc8   :  { %775 = vst.msk [vmem:[#allocation0 + $0x483] ss:$72 sm:$0x3] %vm243_vm0, %v7722_v10   ;;  %777 = vst.msk [vmem:[#allocation0 + $0x4e3] ss:$-24 sm:$0xc] %vm243_vm0, %v7722_v10  }
  0xc9   :  { %779 = vst.msk [vmem:[#allocation0 + $0x3c3] ss:$72 sm:$0x30] %vm243_vm0, %v7722_v10   ;;  %781 = vst.msk [vmem:[#allocation0 + $0x5a3] ss:$-24 sm:$0xc0] %vm243_vm0, %v7722_v10  }
  0xca   :  { %814 = vst.msk [vmem:[#allocation0 + $0x6c3] ss:$72 sm:$0x3] %vm243_vm0, %v7728_v15   ;;  %816 = vst.msk [vmem:[#allocation0 + $0x723] ss:$-24 sm:$0xc] %vm243_vm0, %v7728_v15  }
  0xcb   :  { %818 = vst.msk [vmem:[#allocation0 + $0x603] ss:$72 sm:$0x30] %vm243_vm0, %v7728_v15   ;;  %820 = vst.msk [vmem:[#allocation0 + $0x7e3] ss:$-24 sm:$0xc0] %vm243_vm0, %v7728_v15   ;;  %v7808_v15 = vunpack.i.h.bf16 %v7806_v9 }
  0xcc   :  { %801 = vst.msk [vmem:[#allocation0 + $0x603] ss:$72 sm:$0x3] %vm243_vm0, %v7727_v16   ;;  %803 = vst.msk [vmem:[#allocation0 + $0x663] ss:$-24 sm:$0xc] %vm243_vm0, %v7727_v16  }
  0xcd   :  { %805 = vst.msk [vmem:[#allocation0 + $0x543] ss:$72 sm:$0x30] %vm243_vm0, %v7727_v16   ;;  %807 = vst.msk [vmem:[#allocation0 + $0x723] ss:$-24 sm:$0xc0] %vm243_vm0, %v7727_v16   ;;  %v7807_v16 = vunpack.i.l.bf16 %v7806_v9 }
  0xce   :  { %840 = vst.msk [vmem:[#allocation0 + $0x843] ss:$72 sm:$0x3] %vm243_vm0, %v7733_v17   ;;  %842 = vst.msk [vmem:[#allocation0 + $0x8a3] ss:$-24 sm:$0xc] %vm243_vm0, %v7733_v17  }
  0xcf   :  { %844 = vst.msk [vmem:[#allocation0 + $0x783] ss:$72 sm:$0x30] %vm243_vm0, %v7733_v17   ;;  %846 = vst.msk [vmem:[#allocation0 + $0x963] ss:$-24 sm:$0xc0] %vm243_vm0, %v7733_v17   ;;  %v7813_v17 = vunpack.i.h.bf16 %v7811_v12 }
  0xd0   :  { %827 = vst.msk [vmem:[#allocation0 + $0x783] ss:$72 sm:$0x3] %vm243_vm0, %v7732_v18   ;;  %829 = vst.msk [vmem:[#allocation0 + $0x7e3] ss:$-24 sm:$0xc] %vm243_vm0, %v7732_v18  }
  0xd1   :  { %831 = vst.msk [vmem:[#allocation0 + $0x6c3] ss:$72 sm:$0x30] %vm243_vm0, %v7732_v18   ;;  %833 = vst.msk [vmem:[#allocation0 + $0x8a3] ss:$-24 sm:$0xc0] %vm243_vm0, %v7732_v18   ;;  %v7812_v18 = vunpack.i.l.bf16 %v7811_v12 }
  0xd2   :  { %866 = vst.msk [vmem:[#allocation0 + $0x9c3] ss:$72 sm:$0x3] %vm243_vm0, %v7738_v21   ;;  %868 = vst.msk [vmem:[#allocation0 + $0xa23] ss:$-24 sm:$0xc] %vm243_vm0, %v7738_v21  }
  0xd3   :  { %853 = vst.msk [vmem:[#allocation0 + $0x903] ss:$72 sm:$0x3] %vm243_vm0, %v7737_v22   ;;  %855 = vst.msk [vmem:[#allocation0 + $0x963] ss:$-24 sm:$0xc] %vm243_vm0, %v7737_v22  }
  0xd4   :  { %857 = vst.msk [vmem:[#allocation0 + $0x843] ss:$72 sm:$0x30] %vm243_vm0, %v7737_v22   ;;  %859 = vst.msk [vmem:[#allocation0 + $0xa23] ss:$-24 sm:$0xc0] %vm243_vm0, %v7737_v22  }
  0xd5   :  { %887 = vst.msk [vmem:[#allocation0 + $0xc4] ss:$72 sm:$0x3] %vm243_vm0, %v7743_v23   ;;  %889 = vst.msk [vmem:[#allocation0 + $0x124] ss:$-24 sm:$0xc] %vm243_vm0, %v7743_v23  }
  0xd6   :  { %891 = vst.msk [vmem:[#allocation0 + $0x4] ss:$72 sm:$0x30] %vm243_vm0, %v7743_v23   ;;  %893 = vst.msk [vmem:[#allocation0 + $0x1e4] ss:$-24 sm:$0xc0] %vm243_vm0, %v7743_v23   ;;  %v7816_v23 = vpop.permute.xlu0 %7815 }
  0xd7   :  { %874 = vst.msk [vmem:[#allocation0 + $0x4] ss:$72 sm:$0x3] %vm243_vm0, %v7742_v24   ;;  %876 = vst.msk [vmem:[#allocation0 + $0x64] ss:$-24 sm:$0xc] %vm243_vm0, %v7742_v24   ;;  %v7818_v25 = vunpack.i.h.bf16 %v7816_v23  ;;  %v7817_v26 = vunpack.i.l.bf16 %v7816_v23 }
  0xd8   :  { %878 = vst.msk [vmem:[#allocation0 - $0xbc] ss:$72 sm:$0x30] %vm243_vm0, %v7742_v24   ;;  %880 = vst.msk [vmem:[#allocation0 + $0x124] ss:$-24 sm:$0xc0] %vm243_vm0, %v7742_v24   ;;  %v7821_v24 = vpop.permute.xlu1 %7820 }
  0xd9   :  { %913 = vst.msk [vmem:[#allocation0 + $0x244] ss:$72 sm:$0x3] %vm243_vm0, %v7748_v27   ;;  %915 = vst.msk [vmem:[#allocation0 + $0x2a4] ss:$-24 sm:$0xc] %vm243_vm0, %v7748_v27  }
  0xda   :  { %917 = vst.msk [vmem:[#allocation0 + $0x184] ss:$72 sm:$0x30] %vm243_vm0, %v7748_v27   ;;  %919 = vst.msk [vmem:[#allocation0 + $0x364] ss:$-24 sm:$0xc0] %vm243_vm0, %v7748_v27   ;;  %v7823_v27 = vunpack.i.h.bf16 %v7821_v24 }
  0xdb   :  { %900 = vst.msk [vmem:[#allocation0 + $0x184] ss:$72 sm:$0x3] %vm243_vm0, %v7747_v28   ;;  %902 = vst.msk [vmem:[#allocation0 + $0x1e4] ss:$-24 sm:$0xc] %vm243_vm0, %v7747_v28  }
  0xdc   :  { %904 = vst.msk [vmem:[#allocation0 + $0xc4] ss:$72 sm:$0x30] %vm243_vm0, %v7747_v28   ;;  %906 = vst.msk [vmem:[#allocation0 + $0x2a4] ss:$-24 sm:$0xc0] %vm243_vm0, %v7747_v28   ;;  %v7822_v28 = vunpack.i.l.bf16 %v7821_v24  ;;  %v7831_v31 = vpop.permute.xlu1 %7830 }
  0xdd   :  { %939 = vst.msk [vmem:[#allocation0 + $0x3c4] ss:$72 sm:$0x3] %vm243_vm0, %v7753_v29   ;;  %941 = vst.msk [vmem:[#allocation0 + $0x424] ss:$-24 sm:$0xc] %vm243_vm0, %v7753_v29  }
  0xde   :  { %943 = vst.msk [vmem:[#allocation0 + $0x304] ss:$72 sm:$0x30] %vm243_vm0, %v7753_v29   ;;  %945 = vst.msk [vmem:[#allocation0 + $0x4e4] ss:$-24 sm:$0xc0] %vm243_vm0, %v7753_v29  }
  0xdf   :  { %926 = vst.msk [vmem:[#allocation0 + $0x304] ss:$72 sm:$0x3] %vm243_vm0, %v7752_v30   ;;  %928 = vst.msk [vmem:[#allocation0 + $0x364] ss:$-24 sm:$0xc] %vm243_vm0, %v7752_v30  }
  0xe0   :  { %930 = vst.msk [vmem:[#allocation0 + $0x244] ss:$72 sm:$0x30] %vm243_vm0, %v7752_v30   ;;  %932 = vst.msk [vmem:[#allocation0 + $0x424] ss:$-24 sm:$0xc0] %vm243_vm0, %v7752_v30   ;;  %v7826_v30 = vpop.permute.xlu0 %7825  ;;  %v7841_v14 = vpop.permute.xlu1 %7840 }
  0xe1   :  { %965 = vst.msk [vmem:[#allocation0 + $0x544] ss:$72 sm:$0x3] %vm243_vm0, %v7758_v33   ;;  %967 = vst.msk [vmem:[#allocation0 + $0x5a4] ss:$-24 sm:$0xc] %vm243_vm0, %v7758_v33   ;;  %v7828_v32 = vunpack.i.h.bf16 %v7826_v30 }
  0xe2   :  { %969 = vst.msk [vmem:[#allocation0 + $0x484] ss:$72 sm:$0x30] %vm243_vm0, %v7758_v33   ;;  %971 = vst.msk [vmem:[#allocation0 + $0x664] ss:$-24 sm:$0xc0] %vm243_vm0, %v7758_v33   ;;  %v7827_v33 = vunpack.i.l.bf16 %v7826_v30 }
  0xe3   :  { %952 = vst.msk [vmem:[#allocation0 + $0x484] ss:$72 sm:$0x3] %vm243_vm0, %v7757_v34   ;;  %954 = vst.msk [vmem:[#allocation0 + $0x4e4] ss:$-24 sm:$0xc] %vm243_vm0, %v7757_v34  }
  0xe4   :  { %956 = vst.msk [vmem:[#allocation0 + $0x3c4] ss:$72 sm:$0x30] %vm243_vm0, %v7757_v34   ;;  %958 = vst.msk [vmem:[#allocation0 + $0x5a4] ss:$-24 sm:$0xc0] %vm243_vm0, %v7757_v34   ;;  %v7833_v34 = vunpack.i.h.bf16 %v7831_v31  ;;  %v7851_v58 = vpop.permute.xlu1 %7850 }
  0xe5   :  { %991 = vst.msk [vmem:[#allocation0 + $0x6c4] ss:$72 sm:$0x3] %vm243_vm0, %v7763_v35   ;;  %993 = vst.msk [vmem:[#allocation0 + $0x724] ss:$-24 sm:$0xc] %vm243_vm0, %v7763_v35  }
  0xe6   :  { %995 = vst.msk [vmem:[#allocation0 + $0x604] ss:$72 sm:$0x30] %vm243_vm0, %v7763_v35   ;;  %997 = vst.msk [vmem:[#allocation0 + $0x7e4] ss:$-24 sm:$0xc0] %vm243_vm0, %v7763_v35   ;;  %v7832_v35 = vunpack.i.l.bf16 %v7831_v31 }
  0xe7   :  { %978 = vst.msk [vmem:[#allocation0 + $0x604] ss:$72 sm:$0x3] %vm243_vm0, %v7762_v36   ;;  %980 = vst.msk [vmem:[#allocation0 + $0x664] ss:$-24 sm:$0xc] %vm243_vm0, %v7762_v36  }
  0xe8   :  { %982 = vst.msk [vmem:[#allocation0 + $0x544] ss:$72 sm:$0x30] %vm243_vm0, %v7762_v36   ;;  %984 = vst.msk [vmem:[#allocation0 + $0x724] ss:$-24 sm:$0xc0] %vm243_vm0, %v7762_v36   ;;  %v7836_v36 = vpop.permute.xlu0 %7835  ;;  %v7861_v46 = vpop.permute.xlu1 %7860 }
  0xe9   :  { %1017 = vst.msk [vmem:[#allocation0 + $0x844] ss:$72 sm:$0x3] %vm243_vm0, %v7768_v38   ;;  %1019 = vst.msk [vmem:[#allocation0 + $0x8a4] ss:$-24 sm:$0xc] %vm243_vm0, %v7768_v38   ;;  %v7838_v37 = vunpack.i.h.bf16 %v7836_v36  ;;  %v7863_v49 = vunpack.i.h.bf16 %v7861_v46 }
  0xea   :  { %1021 = vst.msk [vmem:[#allocation0 + $0x784] ss:$72 sm:$0x30] %vm243_vm0, %v7768_v38   ;;  %1023 = vst.msk [vmem:[#allocation0 + $0x964] ss:$-24 sm:$0xc0] %vm243_vm0, %v7768_v38   ;;  %v7837_v38 = vunpack.i.l.bf16 %v7836_v36 }
  0xeb   :  { %1004 = vst.msk [vmem:[#allocation0 + $0x784] ss:$72 sm:$0x3] %vm243_vm0, %v7767_v39   ;;  %1006 = vst.msk [vmem:[#allocation0 + $0x7e4] ss:$-24 sm:$0xc] %vm243_vm0, %v7767_v39  }
  0xec   :  { %1008 = vst.msk [vmem:[#allocation0 + $0x6c4] ss:$72 sm:$0x30] %vm243_vm0, %v7767_v39   ;;  %1010 = vst.msk [vmem:[#allocation0 + $0x8a4] ss:$-24 sm:$0xc0] %vm243_vm0, %v7767_v39   ;;  %v7843_v39 = vunpack.i.h.bf16 %v7841_v14  ;;  %v7871_v56 = vpop.permute.xlu1 %7870 }
  0xed   :  { %1043 = vst.msk [vmem:[#allocation0 + $0x9c4] ss:$72 sm:$0x3] %vm243_vm0, %v7773_v40   ;;  %1045 = vst.msk [vmem:[#allocation0 + $0xa24] ss:$-24 sm:$0xc] %vm243_vm0, %v7773_v40   ;;  %v7842_v40 = vunpack.i.l.bf16 %v7841_v14  ;;  %v7873_v60 = vunpack.i.h.bf16 %v7871_v56 }
  0xee   :  { %1030 = vst.msk [vmem:[#allocation0 + $0x904] ss:$72 sm:$0x3] %vm243_vm0, %v7772_v41   ;;  %1032 = vst.msk [vmem:[#allocation0 + $0x964] ss:$-24 sm:$0xc] %vm243_vm0, %v7772_v41  }
  0xef   :  { %1034 = vst.msk [vmem:[#allocation0 + $0x844] ss:$72 sm:$0x30] %vm243_vm0, %v7772_v41   ;;  %1036 = vst.msk [vmem:[#allocation0 + $0xa24] ss:$-24 sm:$0xc0] %vm243_vm0, %v7772_v41   ;;  %v7846_v41 = vpop.permute.xlu0 %7845 }
  0xf0   :  { %1064 = vst.msk [vmem:[#allocation0 + $0xc5] ss:$72 sm:$0x3] %vm243_vm0, %v7778_v42   ;;  %1066 = vst.msk [vmem:[#allocation0 + $0x125] ss:$-24 sm:$0xc] %vm243_vm0, %v7778_v42   ;;  %v7848_v0 = vunpack.i.h.bf16 %v7846_v41 }
  0xf1   :  { %1068 = vst.msk [vmem:[#allocation0 + $0x5] ss:$72 sm:$0x30] %vm243_vm0, %v7778_v42   ;;  %1070 = vst.msk [vmem:[#allocation0 + $0x1e5] ss:$-24 sm:$0xc0] %vm243_vm0, %v7778_v42   ;;  %v7847_v42 = vunpack.i.l.bf16 %v7846_v41 }
  0xf2   :  { %1051 = vst.msk [vmem:[#allocation0 + $0x5] ss:$72 sm:$0x3] %vm243_vm0, %v7777_v43   ;;  %1053 = vst.msk [vmem:[#allocation0 + $0x65] ss:$-24 sm:$0xc] %vm243_vm0, %v7777_v43  }
  0xf3   :  { %1055 = vst.msk [vmem:[#allocation0 - $0xbb] ss:$72 sm:$0x30] %vm243_vm0, %v7777_v43   ;;  %1057 = vst.msk [vmem:[#allocation0 + $0x125] ss:$-24 sm:$0xc0] %vm243_vm0, %v7777_v43   ;;  %v7853_v43 = vunpack.i.h.bf16 %v7851_v58 }
  0xf4   :  { %v2618_v2 = vld.sshfl [vmem:[#allocation1 + $0x68] sm:$0xff pattern:$0x67452301]   ;;  %v2631_v7 = vld.sshfl [vmem:[#allocation1 + $0x70] sm:$0xff pattern:$0x22222301]  }
  0xf5   :  { %1090 = vst.msk [vmem:[#allocation0 + $0x245] ss:$72 sm:$0x3] %vm243_vm0, %v7783_v44   ;;  %1092 = vst.msk [vmem:[#allocation0 + $0x2a5] ss:$-24 sm:$0xc] %vm243_vm0, %v7783_v44   ;;  %v8689_v8 = vpack.i.bf16 %v2631_v7, %v2618_v2 }
  0xf6   :  { %1094 = vst.msk [vmem:[#allocation0 + $0x185] ss:$72 sm:$0x30] %vm243_vm0, %v7783_v44   ;;  %1096 = vst.msk [vmem:[#allocation0 + $0x365] ss:$-24 sm:$0xc0] %vm243_vm0, %v7783_v44   ;;  %v7852_v44 = vunpack.i.l.bf16 %v7851_v58 }
  0xf7   :  { %1077 = vst.msk [vmem:[#allocation0 + $0x185] ss:$72 sm:$0x3] %vm243_vm0, %v7782_v45   ;;  %1079 = vst.msk [vmem:[#allocation0 + $0x1e5] ss:$-24 sm:$0xc] %vm243_vm0, %v7782_v45   ;;  %8085 = vrot.lane.b32.xlu0 %v8689_v8, %s8241_s4 }
  0xf8   :  { %1081 = vst.msk [vmem:[#allocation0 + $0xc5] ss:$72 sm:$0x30] %vm243_vm0, %v7782_v45   ;;  %1083 = vst.msk [vmem:[#allocation0 + $0x2a5] ss:$-24 sm:$0xc0] %vm243_vm0, %v7782_v45   ;;  %v7856_v45 = vpop.permute.xlu0 %7855 }
  0xf9   :  { %v2639_v47 = vld.sshfl [vmem:[#allocation1] sm:$0xff pattern:$0x67452301]   ;;  %v2652_v48 = vld.sshfl [vmem:[#allocation1 + $0x8] sm:$0xff pattern:$0x67452301]  }
  0xfa   :  { %1116 = vst.msk [vmem:[#allocation0 + $0x3c5] ss:$72 sm:$0x3] %vm243_vm0, %v7788_v50   ;;  %1118 = vst.msk [vmem:[#allocation0 + $0x425] ss:$-24 sm:$0xc] %vm243_vm0, %v7788_v50   ;;  %v8701_v13 = vpack.i.bf16 %v2652_v48, %v2639_v47  ;;  %v7858_v47 = vunpack.i.h.bf16 %v7856_v45  ;;  %v7857_v48 = vunpack.i.l.bf16 %v7856_v45 }
  0xfb   :  { %1120 = vst.msk [vmem:[#allocation0 + $0x305] ss:$72 sm:$0x30] %vm243_vm0, %v7788_v50   ;;  %1122 = vst.msk [vmem:[#allocation0 + $0x4e5] ss:$-24 sm:$0xc0] %vm243_vm0, %v7788_v50   ;;  %v7862_v50 = vunpack.i.l.bf16 %v7861_v46 }
  0xfc   :  { %1103 = vst.msk [vmem:[#allocation0 + $0x305] ss:$72 sm:$0x3] %vm243_vm0, %v7787_v51   ;;  %1105 = vst.msk [vmem:[#allocation0 + $0x365] ss:$-24 sm:$0xc] %vm243_vm0, %v7787_v51   ;;  %8090 = vrot.lane.b32.xlu1 %v8701_v13, %s8242_s5 }
  0xfd   :  { %1107 = vst.msk [vmem:[#allocation0 + $0x245] ss:$72 sm:$0x30] %vm243_vm0, %v7787_v51   ;;  %1109 = vst.msk [vmem:[#allocation0 + $0x425] ss:$-24 sm:$0xc0] %vm243_vm0, %v7787_v51  }
  0xfe   :  { %v2665_v54 = vld.sshfl [vmem:[#allocation1 + $0x10] sm:$0xff pattern:$0x67452301]   ;;  %v2678_v55 = vld.sshfl [vmem:[#allocation1 + $0x18] sm:$0xff pattern:$0x67452301]  }
  0xff   :  { %1142 = vst.msk [vmem:[#allocation0 + $0x545] ss:$72 sm:$0x3] %vm243_vm0, %v7793_v52   ;;  %1144 = vst.msk [vmem:[#allocation0 + $0x5a5] ss:$-24 sm:$0xc] %vm243_vm0, %v7793_v52   ;;  %v8713_v3 = vpack.i.bf16 %v2678_v55, %v2665_v54 }
 0x100   :  { %1146 = vst.msk [vmem:[#allocation0 + $0x485] ss:$72 sm:$0x30] %vm243_vm0, %v7793_v52   ;;  %1148 = vst.msk [vmem:[#allocation0 + $0x665] ss:$-24 sm:$0xc0] %vm243_vm0, %v7793_v52  }
 0x101   :  { %1129 = vst.msk [vmem:[#allocation0 + $0x485] ss:$72 sm:$0x3] %vm243_vm0, %v7792_v53   ;;  %1131 = vst.msk [vmem:[#allocation0 + $0x4e5] ss:$-24 sm:$0xc] %vm243_vm0, %v7792_v53   ;;  %8095 = vrot.lane.b32.xlu0 %v8713_v3, %s8242_s5 }
 0x102   :  { %1133 = vst.msk [vmem:[#allocation0 + $0x3c5] ss:$72 sm:$0x30] %vm243_vm0, %v7792_v53   ;;  %1135 = vst.msk [vmem:[#allocation0 + $0x5a5] ss:$-24 sm:$0xc0] %vm243_vm0, %v7792_v53  }
 0x103   :  { %v2691_v57 = vld.sshfl [vmem:[#allocation1 + $0x20] sm:$0xff pattern:$0xab892301]   ;;  %v2704_v59 = vld.sshfl [vmem:[#allocation1 + $0x2c] sm:$0xff pattern:$0x67452301]  }
 0x104   :  { %1168 = vst.msk [vmem:[#allocation0 + $0x6c5] ss:$72 sm:$0x3] %vm243_vm0, %v7798_v61   ;;  %1170 = vst.msk [vmem:[#allocation0 + $0x725] ss:$-24 sm:$0xc] %vm243_vm0, %v7798_v61   ;;  %v8725_v4 = vpack.i.bf16 %v2704_v59, %v2691_v57 }
 0x105   :  { %1172 = vst.msk [vmem:[#allocation0 + $0x605] ss:$72 sm:$0x30] %vm243_vm0, %v7798_v61   ;;  %1174 = vst.msk [vmem:[#allocation0 + $0x7e5] ss:$-24 sm:$0xc0] %vm243_vm0, %v7798_v61   ;;  %v7872_v61 = vunpack.i.l.bf16 %v7871_v56 }
 0x106   :  { %1155 = vst.msk [vmem:[#allocation0 + $0x605] ss:$72 sm:$0x3] %vm243_vm0, %v7797_v62   ;;  %1157 = vst.msk [vmem:[#allocation0 + $0x665] ss:$-24 sm:$0xc] %vm243_vm0, %v7797_v62   ;;  %8100 = vrot.lane.b32.xlu1 %v8725_v4, %s8242_s5 }
 0x107   :  { %1159 = vst.msk [vmem:[#allocation0 + $0x545] ss:$72 sm:$0x30] %vm243_vm0, %v7797_v62   ;;  %1161 = vst.msk [vmem:[#allocation0 + $0x725] ss:$-24 sm:$0xc0] %vm243_vm0, %v7797_v62  }
 0x108   :  { %v2717_v5 = vld.sshfl [vmem:[#allocation1 + $0x34] sm:$0xff pattern:$0x67452301]   ;;  %v2730_v6 = vld.sshfl [vmem:[#allocation1 + $0x3c] sm:$0xff pattern:$0x67452301]  }
 0x109   :  { %1194 = vst.msk [vmem:[#allocation0 + $0x845] ss:$72 sm:$0x3] %vm243_vm0, %v7803_v63   ;;  %1196 = vst.msk [vmem:[#allocation0 + $0x8a5] ss:$-24 sm:$0xc] %vm243_vm0, %v7803_v63   ;;  %v8737_v19 = vpack.i.bf16 %v2730_v6, %v2717_v5  ;;  %v7881_v6 = vpop.permute.xlu1 %7880 }
 0x10a   :  { %1198 = vst.msk [vmem:[#allocation0 + $0x785] ss:$72 sm:$0x30] %vm243_vm0, %v7803_v63   ;;  %1200 = vst.msk [vmem:[#allocation0 + $0x965] ss:$-24 sm:$0xc0] %vm243_vm0, %v7803_v63   ;;  %v7882_v12 = vunpack.i.l.bf16 %v7881_v6 }
 0x10b   :  { %1181 = vst.msk [vmem:[#allocation0 + $0x785] ss:$72 sm:$0x3] %vm243_vm0, %v7802_v1   ;;  %1183 = vst.msk [vmem:[#allocation0 + $0x7e5] ss:$-24 sm:$0xc] %vm243_vm0, %v7802_v1   ;;  %8105 = vrot.lane.b32.xlu0 %v8737_v19, %s8242_s5 }
 0x10c   :  { %1185 = vst.msk [vmem:[#allocation0 + $0x6c5] ss:$72 sm:$0x30] %vm243_vm0, %v7802_v1   ;;  %1187 = vst.msk [vmem:[#allocation0 + $0x8a5] ss:$-24 sm:$0xc0] %vm243_vm0, %v7802_v1  }
 0x10d   :  { %v2743_v10 = vld.sshfl [vmem:[#allocation1 + $0x44] sm:$0xff pattern:$0x67452301]   ;;  %v2756_v11 = vld.sshfl [vmem:[#allocation1 + $0x50] sm:$0xff pattern:$0x67452301]  }
 0x10e   :  { %1220 = vst.msk [vmem:[#allocation0 + $0x9c5] ss:$72 sm:$0x3] %vm243_vm0, %v7808_v15   ;;  %1222 = vst.msk [vmem:[#allocation0 + $0xa25] ss:$-24 sm:$0xc] %vm243_vm0, %v7808_v15   ;;  %v8747_v20 = vpack.i.bf16 %v2756_v11, %v2743_v10  ;;  %v7883_v11 = vunpack.i.h.bf16 %v7881_v6 }
 0x10f   :  { %1207 = vst.msk [vmem:[#allocation0 + $0x905] ss:$72 sm:$0x3] %vm243_vm0, %v7807_v16   ;;  %1209 = vst.msk [vmem:[#allocation0 + $0x965] ss:$-24 sm:$0xc] %vm243_vm0, %v7807_v16  }
 0x110   :  { %1211 = vst.msk [vmem:[#allocation0 + $0x845] ss:$72 sm:$0x30] %vm243_vm0, %v7807_v16   ;;  %1213 = vst.msk [vmem:[#allocation0 + $0xa25] ss:$-24 sm:$0xc0] %vm243_vm0, %v7807_v16   ;;  %8110 = vrot.lane.b32.xlu1 %v8747_v20, %s8242_s5 }
 0x111   :  { %v2769_v21 = vld.sshfl [vmem:[#allocation1 + $0x58] sm:$0xff pattern:$0x67452301]   ;;  %v2782_v22 = vld.sshfl [vmem:[#allocation1 + $0x60] sm:$0xff pattern:$0x67452301]  }
 0x112   :  { %1241 = vst.msk [vmem:[#allocation0 + $0xc6] ss:$72 sm:$0x3] %vm243_vm0, %v7813_v17   ;;  %1243 = vst.msk [vmem:[#allocation0 + $0x126] ss:$-24 sm:$0xc] %vm243_vm0, %v7813_v17   ;;  %v8759_v29 = vpack.i.bf16 %v2782_v22, %v2769_v21  ;;  %v7891_v22 = vpop.permute.xlu1 %7890 }
 0x113   :  { %1245 = vst.msk [vmem:[#allocation0 + $0x6] ss:$72 sm:$0x30] %vm243_vm0, %v7813_v17   ;;  %1247 = vst.msk [vmem:[#allocation0 + $0x1e6] ss:$-24 sm:$0xc0] %vm243_vm0, %v7813_v17  }
 0x114   :  { %1228 = vst.msk [vmem:[#allocation0 + $0x6] ss:$72 sm:$0x3] %vm243_vm0, %v7812_v18   ;;  %1230 = vst.msk [vmem:[#allocation0 + $0x66] ss:$-24 sm:$0xc] %vm243_vm0, %v7812_v18   ;;  %8115 = vrot.lane.b32.xlu0 %v8759_v29, %s8242_s5  ;;  %8120 = vrot.lane.b32.xlu1 %v8689_v8, %s8242_s5 }
 0x115   :  { %1232 = vst.msk [vmem:[#allocation0 - $0xba] ss:$72 sm:$0x30] %vm243_vm0, %v7812_v18   ;;  %1234 = vst.msk [vmem:[#allocation0 + $0x126] ss:$-24 sm:$0xc0] %vm243_vm0, %v7812_v18  }
 0x116   :  { %1267 = vst.msk [vmem:[#allocation0 + $0x246] ss:$72 sm:$0x3] %vm243_vm0, %v7818_v25   ;;  %1269 = vst.msk [vmem:[#allocation0 + $0x2a6] ss:$-24 sm:$0xc] %vm243_vm0, %v7818_v25   ;;  %v7901_v30 = vpop.permute.xlu1 %7900 }
 0x117   :  { %1271 = vst.msk [vmem:[#allocation0 + $0x186] ss:$72 sm:$0x30] %vm243_vm0, %v7818_v25   ;;  %1273 = vst.msk [vmem:[#allocation0 + $0x366] ss:$-24 sm:$0xc0] %vm243_vm0, %v7818_v25   ;;  %v7893_v25 = vunpack.i.h.bf16 %v7891_v22 }
 0x118   :  { %1254 = vst.msk [vmem:[#allocation0 + $0x186] ss:$72 sm:$0x3] %vm243_vm0, %v7817_v26   ;;  %1256 = vst.msk [vmem:[#allocation0 + $0x1e6] ss:$-24 sm:$0xc] %vm243_vm0, %v7817_v26   ;;  %8125 = vrot.lane.b32.xlu0 %v8701_v13, %s8243_s6  ;;  %8130 = vrot.lane.b32.xlu1 %v8713_v3, %s8243_s6  ;;  %v7866_v13 = vpop.permute.xlu0 %7865 }
 0x119   :  { %1258 = vst.msk [vmem:[#allocation0 + $0xc6] ss:$72 sm:$0x30] %vm243_vm0, %v7817_v26   ;;  %1260 = vst.msk [vmem:[#allocation0 + $0x2a6] ss:$-24 sm:$0xc0] %vm243_vm0, %v7817_v26   ;;  %v7868_v57 = vunpack.i.h.bf16 %v7866_v13  ;;  %v7867_v59 = vunpack.i.l.bf16 %v7866_v13  ;;  %v7892_v26 = vunpack.i.l.bf16 %v7891_v22 }
 0x11a   :  { %1293 = vst.msk [vmem:[#allocation0 + $0x3c6] ss:$72 sm:$0x3] %vm243_vm0, %v7823_v27   ;;  %1295 = vst.msk [vmem:[#allocation0 + $0x426] ss:$-24 sm:$0xc] %vm243_vm0, %v7823_v27   ;;  %v7911_v36 = vpop.permute.xlu1 %7910 }
 0x11b   :  { %1297 = vst.msk [vmem:[#allocation0 + $0x306] ss:$72 sm:$0x30] %vm243_vm0, %v7823_v27   ;;  %1299 = vst.msk [vmem:[#allocation0 + $0x4e6] ss:$-24 sm:$0xc0] %vm243_vm0, %v7823_v27  }
 0x11c   :  { %1280 = vst.msk [vmem:[#allocation0 + $0x306] ss:$72 sm:$0x3] %vm243_vm0, %v7822_v28   ;;  %1282 = vst.msk [vmem:[#allocation0 + $0x366] ss:$-24 sm:$0xc] %vm243_vm0, %v7822_v28   ;;  %8135 = vrot.lane.b32.xlu0 %v8725_v4, %s8243_s6  ;;  %8140 = vrot.lane.b32.xlu1 %v8737_v19, %s8243_s6  ;;  %v7876_v3 = vpop.permute.xlu0 %7875 }
 0x11d   :  { %1284 = vst.msk [vmem:[#allocation0 + $0x246] ss:$72 sm:$0x30] %vm243_vm0, %v7822_v28   ;;  %1286 = vst.msk [vmem:[#allocation0 + $0x426] ss:$-24 sm:$0xc0] %vm243_vm0, %v7822_v28   ;;  %v7878_v9 = vunpack.i.h.bf16 %v7876_v3  ;;  %v7877_v10 = vunpack.i.l.bf16 %v7876_v3 }
 0x11e   :  { %1319 = vst.msk [vmem:[#allocation0 + $0x546] ss:$72 sm:$0x3] %vm243_vm0, %v7828_v32   ;;  %1321 = vst.msk [vmem:[#allocation0 + $0x5a6] ss:$-24 sm:$0xc] %vm243_vm0, %v7828_v32   ;;  %v7921_v41 = vpop.permute.xlu1 %7920 }
 0x11f   :  { %1323 = vst.msk [vmem:[#allocation0 + $0x486] ss:$72 sm:$0x30] %vm243_vm0, %v7828_v32   ;;  %1325 = vst.msk [vmem:[#allocation0 + $0x666] ss:$-24 sm:$0xc0] %vm243_vm0, %v7828_v32  }
 0x120   :  { %1306 = vst.msk [vmem:[#allocation0 + $0x486] ss:$72 sm:$0x3] %vm243_vm0, %v7827_v33   ;;  %1308 = vst.msk [vmem:[#allocation0 + $0x4e6] ss:$-24 sm:$0xc] %vm243_vm0, %v7827_v33   ;;  %8145 = vrot.lane.b32.xlu0 %v8747_v20, %s8243_s6  ;;  %8150 = vrot.lane.b32.xlu1 %v8759_v29, %s8243_s6  ;;  %v7886_v19 = vpop.permute.xlu0 %7885 }
 0x121   :  { %1310 = vst.msk [vmem:[#allocation0 + $0x3c6] ss:$72 sm:$0x30] %vm243_vm0, %v7827_v33   ;;  %1312 = vst.msk [vmem:[#allocation0 + $0x5a6] ss:$-24 sm:$0xc0] %vm243_vm0, %v7827_v33   ;;  %v7888_v23 = vunpack.i.h.bf16 %v7886_v19  ;;  %v7887_v24 = vunpack.i.l.bf16 %v7886_v19  ;;  %v7903_v33 = vunpack.i.h.bf16 %v7901_v30 }
 0x122   :  { %1345 = vst.msk [vmem:[#allocation0 + $0x6c6] ss:$72 sm:$0x3] %vm243_vm0, %v7833_v34   ;;  %1347 = vst.msk [vmem:[#allocation0 + $0x726] ss:$-24 sm:$0xc] %vm243_vm0, %v7833_v34   ;;  %v7931_v45 = vpop.permute.xlu1 %7930 }
 0x123   :  { %1349 = vst.msk [vmem:[#allocation0 + $0x606] ss:$72 sm:$0x30] %vm243_vm0, %v7833_v34   ;;  %1351 = vst.msk [vmem:[#allocation0 + $0x7e6] ss:$-24 sm:$0xc0] %vm243_vm0, %v7833_v34   ;;  %v7902_v34 = vunpack.i.l.bf16 %v7901_v30  ;;  %v7933_v46 = vunpack.i.h.bf16 %v7931_v45 }
 0x124   :  { %1332 = vst.msk [vmem:[#allocation0 + $0x606] ss:$72 sm:$0x3] %vm243_vm0, %v7832_v35   ;;  %1334 = vst.msk [vmem:[#allocation0 + $0x666] ss:$-24 sm:$0xc] %vm243_vm0, %v7832_v35   ;;  %8155 = vrot.lane.b32.xlu0 %v8689_v8, %s8243_s6  ;;  %v7896_v29 = vpop.permute.xlu0 %7895 }
 0x125   :  { %1336 = vst.msk [vmem:[#allocation0 + $0x546] ss:$72 sm:$0x30] %vm243_vm0, %v7832_v35   ;;  %1338 = vst.msk [vmem:[#allocation0 + $0x726] ss:$-24 sm:$0xc0] %vm243_vm0, %v7832_v35   ;;  %v7898_v31 = vunpack.i.h.bf16 %v7896_v29  ;;  %v7897_v32 = vunpack.i.l.bf16 %v7896_v29 }
 0x126   :  { %1371 = vst.msk [vmem:[#allocation0 + $0x846] ss:$72 sm:$0x3] %vm243_vm0, %v7838_v37   ;;  %1373 = vst.msk [vmem:[#allocation0 + $0x8a6] ss:$-24 sm:$0xc] %vm243_vm0, %v7838_v37  }
 0x127   :  { %1375 = vst.msk [vmem:[#allocation0 + $0x786] ss:$72 sm:$0x30] %vm243_vm0, %v7838_v37   ;;  %1377 = vst.msk [vmem:[#allocation0 + $0x966] ss:$-24 sm:$0xc0] %vm243_vm0, %v7838_v37  }
 0x128   :  { %1358 = vst.msk [vmem:[#allocation0 + $0x786] ss:$72 sm:$0x3] %vm243_vm0, %v7837_v38   ;;  %1360 = vst.msk [vmem:[#allocation0 + $0x7e6] ss:$-24 sm:$0xc] %vm243_vm0, %v7837_v38   ;;  %v7906_v35 = vpop.permute.xlu0 %7905 }
 0x129   :  { %1362 = vst.msk [vmem:[#allocation0 + $0x6c6] ss:$72 sm:$0x30] %vm243_vm0, %v7837_v38   ;;  %1364 = vst.msk [vmem:[#allocation0 + $0x8a6] ss:$-24 sm:$0xc0] %vm243_vm0, %v7837_v38   ;;  %v7908_v14 = vunpack.i.h.bf16 %v7906_v35  ;;  %v7907_v37 = vunpack.i.l.bf16 %v7906_v35  ;;  %v7913_v38 = vunpack.i.h.bf16 %v7911_v36 }
 0x12a   :  { %1397 = vst.msk [vmem:[#allocation0 + $0x9c6] ss:$72 sm:$0x3] %vm243_vm0, %v7843_v39   ;;  %1399 = vst.msk [vmem:[#allocation0 + $0xa26] ss:$-24 sm:$0xc] %vm243_vm0, %v7843_v39   ;;  %v7912_v39 = vunpack.i.l.bf16 %v7911_v36 }
 0x12b   :  { %1384 = vst.msk [vmem:[#allocation0 + $0x906] ss:$72 sm:$0x3] %vm243_vm0, %v7842_v40   ;;  %1386 = vst.msk [vmem:[#allocation0 + $0x966] ss:$-24 sm:$0xc] %vm243_vm0, %v7842_v40  }
 0x12c   :  { %1388 = vst.msk [vmem:[#allocation0 + $0x846] ss:$72 sm:$0x30] %vm243_vm0, %v7842_v40   ;;  %1390 = vst.msk [vmem:[#allocation0 + $0xa26] ss:$-24 sm:$0xc0] %vm243_vm0, %v7842_v40   ;;  %v7916_v40 = vpop.permute.xlu0 %7915 }
 0x12d   :  { %1418 = vst.msk [vmem:[#allocation0 + $0xc7] ss:$72 sm:$0x3] %vm243_vm0, %v7848_v0   ;;  %1420 = vst.msk [vmem:[#allocation0 + $0x127] ss:$-24 sm:$0xc] %vm243_vm0, %v7848_v0   ;;  %v7918_v58 = vunpack.i.h.bf16 %v7916_v40 }
 0x12e   :  { %1422 = vst.msk [vmem:[#allocation0 + $0x7] ss:$72 sm:$0x30] %vm243_vm0, %v7848_v0   ;;  %1424 = vst.msk [vmem:[#allocation0 + $0x1e7] ss:$-24 sm:$0xc0] %vm243_vm0, %v7848_v0   ;;  %v7917_v0 = vunpack.i.l.bf16 %v7916_v40 }
 0x12f   :  { %1405 = vst.msk [vmem:[#allocation0 + $0x7] ss:$72 sm:$0x3] %vm243_vm0, %v7847_v42   ;;  %1407 = vst.msk [vmem:[#allocation0 + $0x67] ss:$-24 sm:$0xc] %vm243_vm0, %v7847_v42  }
 0x130   :  { %1409 = vst.msk [vmem:[#allocation0 - $0xb9] ss:$72 sm:$0x30] %vm243_vm0, %v7847_v42   ;;  %1411 = vst.msk [vmem:[#allocation0 + $0x127] ss:$-24 sm:$0xc0] %vm243_vm0, %v7847_v42   ;;  %v7923_v42 = vunpack.i.h.bf16 %v7921_v41 }
 0x131   :  { %1444 = vst.msk [vmem:[#allocation0 + $0x247] ss:$72 sm:$0x3] %vm243_vm0, %v7853_v43   ;;  %1446 = vst.msk [vmem:[#allocation0 + $0x2a7] ss:$-24 sm:$0xc] %vm243_vm0, %v7853_v43  }
 0x132   :  { %1448 = vst.msk [vmem:[#allocation0 + $0x187] ss:$72 sm:$0x30] %vm243_vm0, %v7853_v43   ;;  %1450 = vst.msk [vmem:[#allocation0 + $0x367] ss:$-24 sm:$0xc0] %vm243_vm0, %v7853_v43   ;;  %v7922_v43 = vunpack.i.l.bf16 %v7921_v41 }
 0x133   :  { %1431 = vst.msk [vmem:[#allocation0 + $0x187] ss:$72 sm:$0x3] %vm243_vm0, %v7852_v44   ;;  %1433 = vst.msk [vmem:[#allocation0 + $0x1e7] ss:$-24 sm:$0xc] %vm243_vm0, %v7852_v44  }
 0x134   :  { %1435 = vst.msk [vmem:[#allocation0 + $0xc7] ss:$72 sm:$0x30] %vm243_vm0, %v7852_v44   ;;  %1437 = vst.msk [vmem:[#allocation0 + $0x2a7] ss:$-24 sm:$0xc0] %vm243_vm0, %v7852_v44   ;;  %v7926_v44 = vpop.permute.xlu0 %7925 }
 0x135   :  { %v2993_v2 = vld.sshfl [vmem:[#allocation1] sm:$0xff pattern:$0x74563012]   ;;  %v3006_v7 = vld.sshfl [vmem:[#allocation1 + $0x8] sm:$0xff pattern:$0x74563012]  }
 0x136   :  { %1470 = vst.msk [vmem:[#allocation0 + $0x3c7] ss:$72 sm:$0x3] %vm243_vm0, %v7858_v47   ;;  %1472 = vst.msk [vmem:[#allocation0 + $0x427] ss:$-24 sm:$0xc] %vm243_vm0, %v7858_v47   ;;  %v8849_v51 = vpack.i.bf16 %v3006_v7, %v2993_v2  ;;  %v7928_v2 = vunpack.i.h.bf16 %v7926_v44  ;;  %v7927_v7 = vunpack.i.l.bf16 %v7926_v44 }
 0x137   :  { %1474 = vst.msk [vmem:[#allocation0 + $0x307] ss:$72 sm:$0x30] %vm243_vm0, %v7858_v47   ;;  %1476 = vst.msk [vmem:[#allocation0 + $0x4e7] ss:$-24 sm:$0xc0] %vm243_vm0, %v7858_v47   ;;  %v7932_v47 = vunpack.i.l.bf16 %v7931_v45 }
 0x138   :  { %1457 = vst.msk [vmem:[#allocation0 + $0x307] ss:$72 sm:$0x3] %vm243_vm0, %v7857_v48   ;;  %1459 = vst.msk [vmem:[#allocation0 + $0x367] ss:$-24 sm:$0xc] %vm243_vm0, %v7857_v48   ;;  %8160 = vrot.lane.b32.xlu1 %v8849_v51, %s8244_s7 }
 0x139   :  { %1461 = vst.msk [vmem:[#allocation0 + $0x247] ss:$72 sm:$0x30] %vm243_vm0, %v7857_v48   ;;  %1463 = vst.msk [vmem:[#allocation0 + $0x427] ss:$-24 sm:$0xc0] %vm243_vm0, %v7857_v48   ;;  %v7936_v48 = vpop.permute.xlu0 %7935 }
 0x13a   :  { %v3019_v52 = vld.sshfl [vmem:[#allocation1 + $0x10] sm:$0xff pattern:$0x74563012]   ;;  %v3032_v53 = vld.sshfl [vmem:[#allocation1 + $0x18] sm:$0xff pattern:$0x74563012]  }
 0x13b   :  { %1496 = vst.msk [vmem:[#allocation0 + $0x547] ss:$72 sm:$0x3] %vm243_vm0, %v7863_v49   ;;  %1498 = vst.msk [vmem:[#allocation0 + $0x5a7] ss:$-24 sm:$0xc] %vm243_vm0, %v7863_v49   ;;  %v8861_v8 = vpack.i.bf16 %v3032_v53, %v3019_v52 }
 0x13c   :  { %1500 = vst.msk [vmem:[#allocation0 + $0x487] ss:$72 sm:$0x30] %vm243_vm0, %v7863_v49   ;;  %1502 = vst.msk [vmem:[#allocation0 + $0x667] ss:$-24 sm:$0xc0] %vm243_vm0, %v7863_v49   ;;  %v7941_v49 = vpop.permute.xlu1 %7940 }
 0x13d   :  { %1483 = vst.msk [vmem:[#allocation0 + $0x487] ss:$72 sm:$0x3] %vm243_vm0, %v7862_v50   ;;  %1485 = vst.msk [vmem:[#allocation0 + $0x4e7] ss:$-24 sm:$0xc] %vm243_vm0, %v7862_v50   ;;  %8165 = vrot.lane.b32.xlu0 %v8861_v8, %s8244_s7  ;;  %v7943_v52 = vunpack.i.h.bf16 %v7941_v49  ;;  %v7942_v53 = vunpack.i.l.bf16 %v7941_v49  ;;  %v7946_v13 = vpop.permute.xlu0 %7945 }
 0x13e   :  { %1487 = vst.msk [vmem:[#allocation0 + $0x3c7] ss:$72 sm:$0x30] %vm243_vm0, %v7862_v50   ;;  %1489 = vst.msk [vmem:[#allocation0 + $0x5a7] ss:$-24 sm:$0xc0] %vm243_vm0, %v7862_v50   ;;  %v7938_v50 = vunpack.i.h.bf16 %v7936_v48  ;;  %v7947_v56 = vunpack.i.l.bf16 %v7946_v13 }
 0x13f   :  { %v3045_v54 = vld.sshfl [vmem:[#allocation1 + $0x20] sm:$0xff pattern:$0xb89a3012]   ;;  %v3058_v55 = vld.sshfl [vmem:[#allocation1 + $0x2c] sm:$0xff pattern:$0x74563012]  }
 0x140   :  { %1522 = vst.msk [vmem:[#allocation0 + $0x6c7] ss:$72 sm:$0x3] %vm243_vm0, %v7868_v57   ;;  %1524 = vst.msk [vmem:[#allocation0 + $0x727] ss:$-24 sm:$0xc] %vm243_vm0, %v7868_v57   ;;  %v8873_v62 = vpack.i.bf16 %v3058_v55, %v3045_v54  ;;  %v7951_v54 = vpop.permute.xlu1 %7950  ;;  %v7948_v55 = vunpack.i.h.bf16 %v7946_v13 }
 0x141   :  { %1526 = vst.msk [vmem:[#allocation0 + $0x607] ss:$72 sm:$0x30] %vm243_vm0, %v7868_v57   ;;  %1528 = vst.msk [vmem:[#allocation0 + $0x7e7] ss:$-24 sm:$0xc0] %vm243_vm0, %v7868_v57   ;;  %v7953_v57 = vunpack.i.h.bf16 %v7951_v54 }
 0x142   :  { %1509 = vst.msk [vmem:[#allocation0 + $0x607] ss:$72 sm:$0x3] %vm243_vm0, %v7867_v59   ;;  %1511 = vst.msk [vmem:[#allocation0 + $0x667] ss:$-24 sm:$0xc] %vm243_vm0, %v7867_v59   ;;  %8170 = vrot.lane.b32.xlu1 %v8873_v62, %s8244_s7 }
 0x143   :  { %1513 = vst.msk [vmem:[#allocation0 + $0x547] ss:$72 sm:$0x30] %vm243_vm0, %v7867_v59   ;;  %1515 = vst.msk [vmem:[#allocation0 + $0x727] ss:$-24 sm:$0xc0] %vm243_vm0, %v7867_v59   ;;  %v7952_v59 = vunpack.i.l.bf16 %v7951_v54 }
 0x144   :  { %v3071_v63 = vld.sshfl [vmem:[#allocation1 + $0x34] sm:$0xff pattern:$0x74563012]   ;;  %v3084_v1 = vld.sshfl [vmem:[#allocation1 + $0x3c] sm:$0xff pattern:$0x74563012]  }
 0x145   :  { %1548 = vst.msk [vmem:[#allocation0 + $0x847] ss:$72 sm:$0x3] %vm243_vm0, %v7873_v60   ;;  %1550 = vst.msk [vmem:[#allocation0 + $0x8a7] ss:$-24 sm:$0xc] %vm243_vm0, %v7873_v60   ;;  %v8885_v15 = vpack.i.bf16 %v3084_v1, %v3071_v63 }
 0x146   :  { %1552 = vst.msk [vmem:[#allocation0 + $0x787] ss:$72 sm:$0x30] %vm243_vm0, %v7873_v60   ;;  %1554 = vst.msk [vmem:[#allocation0 + $0x967] ss:$-24 sm:$0xc0] %vm243_vm0, %v7873_v60   ;;  %v7956_v60 = vpop.permute.xlu0 %7955 }
 0x147   :  { %1535 = vst.msk [vmem:[#allocation0 + $0x787] ss:$72 sm:$0x3] %vm243_vm0, %v7872_v61   ;;  %1537 = vst.msk [vmem:[#allocation0 + $0x7e7] ss:$-24 sm:$0xc] %vm243_vm0, %v7872_v61   ;;  %8175 = vrot.lane.b32.xlu0 %v8885_v15, %s8244_s7 }
 0x148   :  { %1539 = vst.msk [vmem:[#allocation0 + $0x6c7] ss:$72 sm:$0x30] %vm243_vm0, %v7872_v61   ;;  %1541 = vst.msk [vmem:[#allocation0 + $0x8a7] ss:$-24 sm:$0xc0] %vm243_vm0, %v7872_v61   ;;  %v7961_v61 = vpop.permute.xlu1 %7960 }
 0x149   :  { %v3097_v4 = vld.sshfl [vmem:[#allocation1 + $0x44] sm:$0xff pattern:$0x74563012]   ;;  %v3110_v5 = vld.sshfl [vmem:[#allocation1 + $0x50] sm:$0xff pattern:$0x74563012]   ;;  %v7963_v63 = vunpack.i.h.bf16 %v7961_v61  ;;  %v7962_v1 = vunpack.i.l.bf16 %v7961_v61 }
 0x14a   :  { %1574 = vst.msk [vmem:[#allocation0 + $0x9c7] ss:$72 sm:$0x3] %vm243_vm0, %v7878_v9   ;;  %1576 = vst.msk [vmem:[#allocation0 + $0xa27] ss:$-24 sm:$0xc] %vm243_vm0, %v7878_v9   ;;  %v8895_v16 = vpack.i.bf16 %v3110_v5, %v3097_v4  ;;  %v7966_v3 = vpop.permute.xlu0 %7965 }
 0x14b   :  { %1561 = vst.msk [vmem:[#allocation0 + $0x907] ss:$72 sm:$0x3] %vm243_vm0, %v7877_v10   ;;  %1563 = vst.msk [vmem:[#allocation0 + $0x967] ss:$-24 sm:$0xc] %vm243_vm0, %v7877_v10   ;;  %v7968_v5 = vunpack.i.h.bf16 %v7966_v3  ;;  %v7967_v6 = vunpack.i.l.bf16 %v7966_v3 }
 0x14c   :  { %1565 = vst.msk [vmem:[#allocation0 + $0x847] ss:$72 sm:$0x30] %vm243_vm0, %v7877_v10   ;;  %1567 = vst.msk [vmem:[#allocation0 + $0xa27] ss:$-24 sm:$0xc0] %vm243_vm0, %v7877_v10   ;;  %8180 = vrot.lane.b32.xlu1 %v8895_v16, %s8244_s7  ;;  %v7971_v4 = vpop.permute.xlu1 %7970 }
 0x14d   :  { %v3123_v17 = vld.sshfl [vmem:[#allocation1 + $0x58] sm:$0xff pattern:$0x74563012]   ;;  %v3136_v18 = vld.sshfl [vmem:[#allocation1 + $0x60] sm:$0xff pattern:$0x74563012]   ;;  %v7973_v9 = vunpack.i.h.bf16 %v7971_v4  ;;  %v7972_v10 = vunpack.i.l.bf16 %v7971_v4 }
 0x14e   :  { %1595 = vst.msk [vmem:[#allocation0 + $0xe0] ss:$-24 sm:$0x3] %vm243_vm0, %v7883_v11   ;;  %1597 = vst.msk [vmem:[#allocation0 + $0x140] ss:$-24 sm:$0xc] %vm243_vm0, %v7883_v11   ;;  %v8907_v27 = vpack.i.bf16 %v3136_v18, %v3123_v17 }
 0x14f   :  { %1599 = vst.msk [vmem:[#allocation0 + $0x1a0] ss:$-24 sm:$0x30] %vm243_vm0, %v7883_v11   ;;  %1601 = vst.msk [vmem:[#allocation0 + $0x200] ss:$-24 sm:$0xc0] %vm243_vm0, %v7883_v11   ;;  %v7976_v11 = vpop.permute.xlu0 %7975 }
 0x150   :  { %1582 = vst.msk [vmem:[#allocation0 + $0x20] ss:$-24 sm:$0x3] %vm243_vm0, %v7882_v12   ;;  %1584 = vst.msk [vmem:[#allocation0 + $0x80] ss:$-24 sm:$0xc] %vm243_vm0, %v7882_v12   ;;  %8185 = vrot.lane.b32.xlu0 %v8907_v27, %s8244_s7 }
 0x151   :  { %1586 = vst.msk [vmem:[#allocation0 + $0xe0] ss:$-24 sm:$0x30] %vm243_vm0, %v7882_v12   ;;  %1588 = vst.msk [vmem:[#allocation0 + $0x140] ss:$-24 sm:$0xc0] %vm243_vm0, %v7882_v12   ;;  %v7981_v12 = vpop.permute.xlu1 %7980 }
 0x152   :  { %v3149_v20 = vld.sshfl [vmem:[#allocation1 + $0x68] sm:$0xff pattern:$0x74563012]   ;;  %v3162_v21 = vld.sshfl [vmem:[#allocation1 + $0x70] sm:$0xff pattern:$0x33333012]   ;;  %v7983_v17 = vunpack.i.h.bf16 %v7981_v12  ;;  %v7982_v18 = vunpack.i.l.bf16 %v7981_v12 }
 0x153   :  { %1621 = vst.msk [vmem:[#allocation0 + $0x260] ss:$-24 sm:$0x3] %vm243_vm0, %v7888_v23   ;;  %1623 = vst.msk [vmem:[#allocation0 + $0x2c0] ss:$-24 sm:$0xc] %vm243_vm0, %v7888_v23   ;;  %v8919_v28 = vpack.i.bf16 %v3162_v21, %v3149_v20  ;;  %v7986_v19 = vpop.permute.xlu0 %7985 }
 0x154   :  { %1625 = vst.msk [vmem:[#allocation0 + $0x320] ss:$-24 sm:$0x30] %vm243_vm0, %v7888_v23   ;;  %1627 = vst.msk [vmem:[#allocation0 + $0x380] ss:$-24 sm:$0xc0] %vm243_vm0, %v7888_v23   ;;  %8195 = vrot.lane.b32.xlu0 %v8849_v51, %s8245_s8  ;;  %v7937_v51 = vunpack.i.l.bf16 %v7936_v48  ;;  %v7988_v21 = vunpack.i.h.bf16 %v7986_v19  ;;  %v7987_v22 = vunpack.i.l.bf16 %v7986_v19 }
 0x155   :  { %1608 = vst.msk [vmem:[#allocation0 + $0x1a0] ss:$-24 sm:$0x3] %vm243_vm0, %v7887_v24   ;;  %1610 = vst.msk [vmem:[#allocation0 + $0x200] ss:$-24 sm:$0xc] %vm243_vm0, %v7887_v24   ;;  %8190 = vrot.lane.b32.xlu1 %v8919_v28, %s8244_s7  ;;  %v7991_v20 = vpop.permute.xlu1 %7990 }
 0x156   :  { %1612 = vst.msk [vmem:[#allocation0 + $0x260] ss:$-24 sm:$0x30] %vm243_vm0, %v7887_v24   ;;  %1614 = vst.msk [vmem:[#allocation0 + $0x2c0] ss:$-24 sm:$0xc0] %vm243_vm0, %v7887_v24   ;;  %v7993_v23 = vunpack.i.h.bf16 %v7991_v20  ;;  %v7992_v24 = vunpack.i.l.bf16 %v7991_v20 }
 0x157   :  { %1647 = vst.msk [vmem:[#allocation0 + $0x3e0] ss:$-24 sm:$0x3] %vm243_vm0, %v7893_v25   ;;  %1649 = vst.msk [vmem:[#allocation0 + $0x440] ss:$-24 sm:$0xc] %vm243_vm0, %v7893_v25  }
 0x158   :  { %1651 = vst.msk [vmem:[#allocation0 + $0x4a0] ss:$-24 sm:$0x30] %vm243_vm0, %v7893_v25   ;;  %1653 = vst.msk [vmem:[#allocation0 + $0x500] ss:$-24 sm:$0xc0] %vm243_vm0, %v7893_v25   ;;  %8205 = vrot.lane.b32.xlu0 %v8873_v62, %s8245_s8  ;;  %v7957_v62 = vunpack.i.l.bf16 %v7956_v60  ;;  %v7996_v25 = vpop.permute.xlu0 %7995 }
 0x159   :  { %1634 = vst.msk [vmem:[#allocation0 + $0x320] ss:$-24 sm:$0x3] %vm243_vm0, %v7892_v26   ;;  %1636 = vst.msk [vmem:[#allocation0 + $0x380] ss:$-24 sm:$0xc] %vm243_vm0, %v7892_v26   ;;  %8200 = vrot.lane.b32.xlu1 %v8861_v8, %s8245_s8  ;;  %v7958_v8 = vunpack.i.h.bf16 %v7956_v60 }
 0x15a   :  { %1638 = vst.msk [vmem:[#allocation0 + $0x3e0] ss:$-24 sm:$0x30] %vm243_vm0, %v7892_v26   ;;  %1640 = vst.msk [vmem:[#allocation0 + $0x440] ss:$-24 sm:$0xc0] %vm243_vm0, %v7892_v26   ;;  %v8001_v26 = vpop.permute.xlu1 %8000 }
 0x15b   :  { %1673 = vst.msk [vmem:[#allocation0 + $0x560] ss:$-24 sm:$0x3] %vm243_vm0, %v7898_v31   ;;  %1675 = vst.msk [vmem:[#allocation0 + $0x5c0] ss:$-24 sm:$0xc] %vm243_vm0, %v7898_v31   ;;  %v8003_v29 = vunpack.i.h.bf16 %v8001_v26  ;;  %v8002_v30 = vunpack.i.l.bf16 %v8001_v26 }
 0x15c   :  { %1677 = vst.msk [vmem:[#allocation0 + $0x620] ss:$-24 sm:$0x30] %vm243_vm0, %v7898_v31   ;;  %1679 = vst.msk [vmem:[#allocation0 + $0x680] ss:$-24 sm:$0xc0] %vm243_vm0, %v7898_v31   ;;  %8215 = vrot.lane.b32.xlu0 %v8895_v16, %s8245_s8  ;;  %v7977_v16 = vunpack.i.l.bf16 %v7976_v11  ;;  %v8006_v31 = vpop.permute.xlu0 %8005 }
 0x15d   :  { %1660 = vst.msk [vmem:[#allocation0 + $0x4a0] ss:$-24 sm:$0x3] %vm243_vm0, %v7897_v32   ;;  %1662 = vst.msk [vmem:[#allocation0 + $0x500] ss:$-24 sm:$0xc] %vm243_vm0, %v7897_v32   ;;  %8210 = vrot.lane.b32.xlu1 %v8885_v15, %s8245_s8  ;;  %v7978_v15 = vunpack.i.h.bf16 %v7976_v11 }
 0x15e   :  { %1664 = vst.msk [vmem:[#allocation0 + $0x560] ss:$-24 sm:$0x30] %vm243_vm0, %v7897_v32   ;;  %1666 = vst.msk [vmem:[#allocation0 + $0x5c0] ss:$-24 sm:$0xc0] %vm243_vm0, %v7897_v32   ;;  %v8011_v32 = vpop.permute.xlu1 %8010 }
 0x15f   :  { %1699 = vst.msk [vmem:[#allocation0 + $0x6e0] ss:$-24 sm:$0x3] %vm243_vm0, %v7903_v33   ;;  %1701 = vst.msk [vmem:[#allocation0 + $0x740] ss:$-24 sm:$0xc] %vm243_vm0, %v7903_v33   ;;  %v8013_v35 = vunpack.i.h.bf16 %v8011_v32  ;;  %v8012_v36 = vunpack.i.l.bf16 %v8011_v32 }
 0x160   :  { %1703 = vst.msk [vmem:[#allocation0 + $0x7a0] ss:$-24 sm:$0x30] %vm243_vm0, %v7903_v33   ;;  %1705 = vst.msk [vmem:[#allocation0 + $0x800] ss:$-24 sm:$0xc0] %vm243_vm0, %v7903_v33   ;;  %8225 = vrot.lane.b32.xlu0 %v8919_v28, %s8245_s8  ;;  %v7997_v28 = vunpack.i.l.bf16 %v7996_v25  ;;  %v8008_v33 = vunpack.i.h.bf16 %v8006_v31 }
 0x161   :  { %1686 = vst.msk [vmem:[#allocation0 + $0x620] ss:$-24 sm:$0x3] %vm243_vm0, %v7902_v34   ;;  %1688 = vst.msk [vmem:[#allocation0 + $0x680] ss:$-24 sm:$0xc] %vm243_vm0, %v7902_v34   ;;  %8220 = vrot.lane.b32.xlu1 %v8907_v27, %s8245_s8  ;;  %v7998_v27 = vunpack.i.h.bf16 %v7996_v25 }
 0x162   :  { %1690 = vst.msk [vmem:[#allocation0 + $0x6e0] ss:$-24 sm:$0x30] %vm243_vm0, %v7902_v34   ;;  %1692 = vst.msk [vmem:[#allocation0 + $0x740] ss:$-24 sm:$0xc0] %vm243_vm0, %v7902_v34   ;;  %v8007_v34 = vunpack.i.l.bf16 %v8006_v31 }
 0x163   :  { %1725 = vst.msk [vmem:[#allocation0 + $0x860] ss:$-24 sm:$0x3] %vm243_vm0, %v7908_v14   ;;  %1727 = vst.msk [vmem:[#allocation0 + $0x8c0] ss:$-24 sm:$0xc] %vm243_vm0, %v7908_v14  }
 0x164   :  { %1729 = vst.msk [vmem:[#allocation0 + $0x920] ss:$-24 sm:$0x30] %vm243_vm0, %v7908_v14   ;;  %1731 = vst.msk [vmem:[#allocation0 + $0x980] ss:$-24 sm:$0xc0] %vm243_vm0, %v7908_v14   ;;  %v8016_v14 = vpop.permute.xlu0 %8015 }
 0x165   :  { %1712 = vst.msk [vmem:[#allocation0 + $0x7a0] ss:$-24 sm:$0x3] %vm243_vm0, %v7907_v37   ;;  %1714 = vst.msk [vmem:[#allocation0 + $0x800] ss:$-24 sm:$0xc] %vm243_vm0, %v7907_v37  }
 0x166   :  { %1716 = vst.msk [vmem:[#allocation0 + $0x860] ss:$-24 sm:$0x30] %vm243_vm0, %v7907_v37   ;;  %1718 = vst.msk [vmem:[#allocation0 + $0x8c0] ss:$-24 sm:$0xc0] %vm243_vm0, %v7907_v37   ;;  %v8021_v37 = vpop.permute.xlu1 %8020 }
 0x167   :  { %1751 = vst.msk [vmem:[#allocation0 + $0x9e0] ss:$-24 sm:$0x3] %vm243_vm0, %v7913_v38   ;;  %1753 = vst.msk [vmem:[#allocation0 + $0xa40] ss:$-24 sm:$0xc] %vm243_vm0, %v7913_v38   ;;  %v8018_v38 = vunpack.i.h.bf16 %v8016_v14  ;;  %v8023_v40 = vunpack.i.h.bf16 %v8021_v37  ;;  %v8022_v41 = vunpack.i.l.bf16 %v8021_v37 }
 0x168   :  { %1738 = vst.msk [vmem:[#allocation0 + $0x920] ss:$-24 sm:$0x3] %vm243_vm0, %v7912_v39   ;;  %1740 = vst.msk [vmem:[#allocation0 + $0x980] ss:$-24 sm:$0xc] %vm243_vm0, %v7912_v39  }
 0x169   :  { %1742 = vst.msk [vmem:[#allocation0 + $0x9e0] ss:$-24 sm:$0x30] %vm243_vm0, %v7912_v39   ;;  %1744 = vst.msk [vmem:[#allocation0 + $0xa40] ss:$-24 sm:$0xc0] %vm243_vm0, %v7912_v39   ;;  %v8017_v39 = vunpack.i.l.bf16 %v8016_v14 }
 0x16a   :  { %1772 = vst.msk [vmem:[#allocation0 + $0xe1] ss:$-24 sm:$0x3] %vm243_vm0, %v7918_v58   ;;  %1774 = vst.msk [vmem:[#allocation0 + $0x141] ss:$-24 sm:$0xc] %vm243_vm0, %v7918_v58  }
 0x16b   :  { %1776 = vst.msk [vmem:[#allocation0 + $0x1a1] ss:$-24 sm:$0x30] %vm243_vm0, %v7918_v58   ;;  %1778 = vst.msk [vmem:[#allocation0 + $0x201] ss:$-24 sm:$0xc0] %vm243_vm0, %v7918_v58   ;;  %v8026_v58 = vpop.permute.xlu0 %8025 }
 0x16c   :  { %1759 = vst.msk [vmem:[#allocation0 + $0x21] ss:$-24 sm:$0x3] %vm243_vm0, %v7917_v0   ;;  %1761 = vst.msk [vmem:[#allocation0 + $0x81] ss:$-24 sm:$0xc] %vm243_vm0, %v7917_v0  }
 0x16d   :  { %1763 = vst.msk [vmem:[#allocation0 + $0xe1] ss:$-24 sm:$0x30] %vm243_vm0, %v7917_v0   ;;  %1765 = vst.msk [vmem:[#allocation0 + $0x141] ss:$-24 sm:$0xc0] %vm243_vm0, %v7917_v0   ;;  %v8031_v0 = vpop.permute.xlu1 %8030 }
 0x16e   :  { %1798 = vst.msk [vmem:[#allocation0 + $0x261] ss:$-24 sm:$0x3] %vm243_vm0, %v7923_v42   ;;  %1800 = vst.msk [vmem:[#allocation0 + $0x2c1] ss:$-24 sm:$0xc] %vm243_vm0, %v7923_v42   ;;  %v8033_v44 = vunpack.i.h.bf16 %v8031_v0  ;;  %v8032_v45 = vunpack.i.l.bf16 %v8031_v0 }
 0x16f   :  { %1802 = vst.msk [vmem:[#allocation0 + $0x321] ss:$-24 sm:$0x30] %vm243_vm0, %v7923_v42   ;;  %1804 = vst.msk [vmem:[#allocation0 + $0x381] ss:$-24 sm:$0xc0] %vm243_vm0, %v7923_v42   ;;  %v8028_v42 = vunpack.i.h.bf16 %v8026_v58 }
 0x170   :  { %1785 = vst.msk [vmem:[#allocation0 + $0x1a1] ss:$-24 sm:$0x3] %vm243_vm0, %v7922_v43   ;;  %1787 = vst.msk [vmem:[#allocation0 + $0x201] ss:$-24 sm:$0xc] %vm243_vm0, %v7922_v43  }
 0x171   :  { %1789 = vst.msk [vmem:[#allocation0 + $0x261] ss:$-24 sm:$0x30] %vm243_vm0, %v7922_v43   ;;  %1791 = vst.msk [vmem:[#allocation0 + $0x2c1] ss:$-24 sm:$0xc0] %vm243_vm0, %v7922_v43   ;;  %v8027_v43 = vunpack.i.l.bf16 %v8026_v58 }
 0x172   :  { %1824 = vst.msk [vmem:[#allocation0 + $0x3e1] ss:$-24 sm:$0x3] %vm243_vm0, %v7928_v2   ;;  %1826 = vst.msk [vmem:[#allocation0 + $0x441] ss:$-24 sm:$0xc] %vm243_vm0, %v7928_v2  }
 0x173   :  { %1828 = vst.msk [vmem:[#allocation0 + $0x4a1] ss:$-24 sm:$0x30] %vm243_vm0, %v7928_v2   ;;  %1830 = vst.msk [vmem:[#allocation0 + $0x501] ss:$-24 sm:$0xc0] %vm243_vm0, %v7928_v2   ;;  %v8036_v2 = vpop.permute.xlu0 %8035 }
 0x174   :  { %1811 = vst.msk [vmem:[#allocation0 + $0x321] ss:$-24 sm:$0x3] %vm243_vm0, %v7927_v7   ;;  %1813 = vst.msk [vmem:[#allocation0 + $0x381] ss:$-24 sm:$0xc] %vm243_vm0, %v7927_v7  }
 0x175   :  { %1815 = vst.msk [vmem:[#allocation0 + $0x3e1] ss:$-24 sm:$0x30] %vm243_vm0, %v7927_v7   ;;  %1817 = vst.msk [vmem:[#allocation0 + $0x441] ss:$-24 sm:$0xc0] %vm243_vm0, %v7927_v7   ;;  %v8041_v7 = vpop.permute.xlu1 %8040 }
 0x176   :  { %1850 = vst.msk [vmem:[#allocation0 + $0x561] ss:$-24 sm:$0x3] %vm243_vm0, %v7933_v46   ;;  %1852 = vst.msk [vmem:[#allocation0 + $0x5c1] ss:$-24 sm:$0xc] %vm243_vm0, %v7933_v46   ;;  %v8043_v48 = vunpack.i.h.bf16 %v8041_v7  ;;  %v8042_v49 = vunpack.i.l.bf16 %v8041_v7 }
 0x177   :  { %1854 = vst.msk [vmem:[#allocation0 + $0x621] ss:$-24 sm:$0x30] %vm243_vm0, %v7933_v46   ;;  %1856 = vst.msk [vmem:[#allocation0 + $0x681] ss:$-24 sm:$0xc0] %vm243_vm0, %v7933_v46   ;;  %v8038_v46 = vunpack.i.h.bf16 %v8036_v2 }
 0x178   :  { %1837 = vst.msk [vmem:[#allocation0 + $0x4a1] ss:$-24 sm:$0x3] %vm243_vm0, %v7932_v47   ;;  %1839 = vst.msk [vmem:[#allocation0 + $0x501] ss:$-24 sm:$0xc] %vm243_vm0, %v7932_v47  }
 0x179   :  { %1841 = vst.msk [vmem:[#allocation0 + $0x561] ss:$-24 sm:$0x30] %vm243_vm0, %v7932_v47   ;;  %1843 = vst.msk [vmem:[#allocation0 + $0x5c1] ss:$-24 sm:$0xc0] %vm243_vm0, %v7932_v47   ;;  %v8037_v47 = vunpack.i.l.bf16 %v8036_v2 }
 0x17a   :  { %1876 = vst.msk [vmem:[#allocation0 + $0x6e1] ss:$-24 sm:$0x3] %vm243_vm0, %v7938_v50   ;;  %1878 = vst.msk [vmem:[#allocation0 + $0x741] ss:$-24 sm:$0xc] %vm243_vm0, %v7938_v50  }
 0x17b   :  { %1880 = vst.msk [vmem:[#allocation0 + $0x7a1] ss:$-24 sm:$0x30] %vm243_vm0, %v7938_v50   ;;  %1882 = vst.msk [vmem:[#allocation0 + $0x801] ss:$-24 sm:$0xc0] %vm243_vm0, %v7938_v50   ;;  %v8046_v50 = vpop.permute.xlu0 %8045 }
 0x17c   :  { %1863 = vst.msk [vmem:[#allocation0 + $0x621] ss:$-24 sm:$0x3] %vm243_vm0, %v7937_v51   ;;  %1865 = vst.msk [vmem:[#allocation0 + $0x681] ss:$-24 sm:$0xc] %vm243_vm0, %v7937_v51  }
 0x17d   :  { %1867 = vst.msk [vmem:[#allocation0 + $0x6e1] ss:$-24 sm:$0x30] %vm243_vm0, %v7937_v51   ;;  %1869 = vst.msk [vmem:[#allocation0 + $0x741] ss:$-24 sm:$0xc0] %vm243_vm0, %v7937_v51   ;;  %v8051_v51 = vpop.permute.xlu1 %8050 }
 0x17e   :  { %1902 = vst.msk [vmem:[#allocation0 + $0x861] ss:$-24 sm:$0x3] %vm243_vm0, %v7943_v52   ;;  %1904 = vst.msk [vmem:[#allocation0 + $0x8c1] ss:$-24 sm:$0xc] %vm243_vm0, %v7943_v52   ;;  %v8053_v13 = vunpack.i.h.bf16 %v8051_v51  ;;  %v8052_v54 = vunpack.i.l.bf16 %v8051_v51 }
 0x17f   :  { %1906 = vst.msk [vmem:[#allocation0 + $0x921] ss:$-24 sm:$0x30] %vm243_vm0, %v7943_v52   ;;  %1908 = vst.msk [vmem:[#allocation0 + $0x981] ss:$-24 sm:$0xc0] %vm243_vm0, %v7943_v52   ;;  %v8048_v52 = vunpack.i.h.bf16 %v8046_v50 }
 0x180   :  { %1889 = vst.msk [vmem:[#allocation0 + $0x7a1] ss:$-24 sm:$0x3] %vm243_vm0, %v7942_v53   ;;  %1891 = vst.msk [vmem:[#allocation0 + $0x801] ss:$-24 sm:$0xc] %vm243_vm0, %v7942_v53  }
 0x181   :  { %1893 = vst.msk [vmem:[#allocation0 + $0x861] ss:$-24 sm:$0x30] %vm243_vm0, %v7942_v53   ;;  %1895 = vst.msk [vmem:[#allocation0 + $0x8c1] ss:$-24 sm:$0xc0] %vm243_vm0, %v7942_v53   ;;  %v8047_v53 = vunpack.i.l.bf16 %v8046_v50 }
 0x182   :  { %1928 = vst.msk [vmem:[#allocation0 + $0x9e1] ss:$-24 sm:$0x3] %vm243_vm0, %v7948_v55   ;;  %1930 = vst.msk [vmem:[#allocation0 + $0xa41] ss:$-24 sm:$0xc] %vm243_vm0, %v7948_v55   ;;  %v8056_v55 = vpop.permute.xlu0 %8055 }
 0x183   :  { %1915 = vst.msk [vmem:[#allocation0 + $0x921] ss:$-24 sm:$0x3] %vm243_vm0, %v7947_v56   ;;  %1917 = vst.msk [vmem:[#allocation0 + $0x981] ss:$-24 sm:$0xc] %vm243_vm0, %v7947_v56  }
 0x184   :  { %1919 = vst.msk [vmem:[#allocation0 + $0x9e1] ss:$-24 sm:$0x30] %vm243_vm0, %v7947_v56   ;;  %1921 = vst.msk [vmem:[#allocation0 + $0xa41] ss:$-24 sm:$0xc0] %vm243_vm0, %v7947_v56   ;;  %v8061_v56 = vpop.permute.xlu1 %8060 }
 0x185   :  { %1949 = vst.msk [vmem:[#allocation0 + $0xe2] ss:$-24 sm:$0x3] %vm243_vm0, %v7953_v57   ;;  %1951 = vst.msk [vmem:[#allocation0 + $0x142] ss:$-24 sm:$0xc] %vm243_vm0, %v7953_v57   ;;  %v8063_v60 = vunpack.i.h.bf16 %v8061_v56  ;;  %v8062_v61 = vunpack.i.l.bf16 %v8061_v56 }
 0x186   :  { %1953 = vst.msk [vmem:[#allocation0 + $0x1a2] ss:$-24 sm:$0x30] %vm243_vm0, %v7953_v57   ;;  %1955 = vst.msk [vmem:[#allocation0 + $0x202] ss:$-24 sm:$0xc0] %vm243_vm0, %v7953_v57   ;;  %v8058_v57 = vunpack.i.h.bf16 %v8056_v55 }
 0x187   :  { %1936 = vst.msk [vmem:[#allocation0 + $0x22] ss:$-24 sm:$0x3] %vm243_vm0, %v7952_v59   ;;  %1938 = vst.msk [vmem:[#allocation0 + $0x82] ss:$-24 sm:$0xc] %vm243_vm0, %v7952_v59  }
 0x188   :  { %1940 = vst.msk [vmem:[#allocation0 + $0xe2] ss:$-24 sm:$0x30] %vm243_vm0, %v7952_v59   ;;  %1942 = vst.msk [vmem:[#allocation0 + $0x142] ss:$-24 sm:$0xc0] %vm243_vm0, %v7952_v59   ;;  %v8057_v59 = vunpack.i.l.bf16 %v8056_v55 }
 0x189   :  { %1975 = vst.msk [vmem:[#allocation0 + $0x262] ss:$-24 sm:$0x3] %vm243_vm0, %v7958_v8   ;;  %1977 = vst.msk [vmem:[#allocation0 + $0x2c2] ss:$-24 sm:$0xc] %vm243_vm0, %v7958_v8  }
 0x18a   :  { %1979 = vst.msk [vmem:[#allocation0 + $0x322] ss:$-24 sm:$0x30] %vm243_vm0, %v7958_v8   ;;  %1981 = vst.msk [vmem:[#allocation0 + $0x382] ss:$-24 sm:$0xc0] %vm243_vm0, %v7958_v8   ;;  %v8066_v8 = vpop.permute.xlu0 %8065 }
 0x18b   :  { %1962 = vst.msk [vmem:[#allocation0 + $0x1a2] ss:$-24 sm:$0x3] %vm243_vm0, %v7957_v62   ;;  %1964 = vst.msk [vmem:[#allocation0 + $0x202] ss:$-24 sm:$0xc] %vm243_vm0, %v7957_v62  }
 0x18c   :  { %1966 = vst.msk [vmem:[#allocation0 + $0x262] ss:$-24 sm:$0x30] %vm243_vm0, %v7957_v62   ;;  %1968 = vst.msk [vmem:[#allocation0 + $0x2c2] ss:$-24 sm:$0xc0] %vm243_vm0, %v7957_v62   ;;  %v8071_v62 = vpop.permute.xlu1 %8070 }
 0x18d   :  { %2001 = vst.msk [vmem:[#allocation0 + $0x3e2] ss:$-24 sm:$0x3] %vm243_vm0, %v7963_v63   ;;  %2003 = vst.msk [vmem:[#allocation0 + $0x442] ss:$-24 sm:$0xc] %vm243_vm0, %v7963_v63   ;;  %v8073_v3 = vunpack.i.h.bf16 %v8071_v62  ;;  %v8072_v4 = vunpack.i.l.bf16 %v8071_v62 }
 0x18e   :  { %2005 = vst.msk [vmem:[#allocation0 + $0x4a2] ss:$-24 sm:$0x30] %vm243_vm0, %v7963_v63   ;;  %2007 = vst.msk [vmem:[#allocation0 + $0x502] ss:$-24 sm:$0xc0] %vm243_vm0, %v7963_v63   ;;  %v8068_v63 = vunpack.i.h.bf16 %v8066_v8 }
 0x18f   :  { %1988 = vst.msk [vmem:[#allocation0 + $0x322] ss:$-24 sm:$0x3] %vm243_vm0, %v7962_v1   ;;  %1990 = vst.msk [vmem:[#allocation0 + $0x382] ss:$-24 sm:$0xc] %vm243_vm0, %v7962_v1  }
 0x190   :  { %1992 = vst.msk [vmem:[#allocation0 + $0x3e2] ss:$-24 sm:$0x30] %vm243_vm0, %v7962_v1   ;;  %1994 = vst.msk [vmem:[#allocation0 + $0x442] ss:$-24 sm:$0xc0] %vm243_vm0, %v7962_v1   ;;  %v8067_v1 = vunpack.i.l.bf16 %v8066_v8 }
 0x191   :  { %2027 = vst.msk [vmem:[#allocation0 + $0x562] ss:$-24 sm:$0x3] %vm243_vm0, %v7968_v5   ;;  %2029 = vst.msk [vmem:[#allocation0 + $0x5c2] ss:$-24 sm:$0xc] %vm243_vm0, %v7968_v5  }
 0x192   :  { %2031 = vst.msk [vmem:[#allocation0 + $0x622] ss:$-24 sm:$0x30] %vm243_vm0, %v7968_v5   ;;  %2033 = vst.msk [vmem:[#allocation0 + $0x682] ss:$-24 sm:$0xc0] %vm243_vm0, %v7968_v5   ;;  %v8076_v5 = vpop.permute.xlu0 %8075 }
 0x193   :  { %2014 = vst.msk [vmem:[#allocation0 + $0x4a2] ss:$-24 sm:$0x3] %vm243_vm0, %v7967_v6   ;;  %2016 = vst.msk [vmem:[#allocation0 + $0x502] ss:$-24 sm:$0xc] %vm243_vm0, %v7967_v6  }
 0x194   :  { %2018 = vst.msk [vmem:[#allocation0 + $0x562] ss:$-24 sm:$0x30] %vm243_vm0, %v7967_v6   ;;  %2020 = vst.msk [vmem:[#allocation0 + $0x5c2] ss:$-24 sm:$0xc0] %vm243_vm0, %v7967_v6   ;;  %v8081_v6 = vpop.permute.xlu1 %8080 }
 0x195   :  { %2053 = vst.msk [vmem:[#allocation0 + $0x6e2] ss:$-24 sm:$0x3] %vm243_vm0, %v7973_v9   ;;  %2055 = vst.msk [vmem:[#allocation0 + $0x742] ss:$-24 sm:$0xc] %vm243_vm0, %v7973_v9   ;;  %v8083_v11 = vunpack.i.h.bf16 %v8081_v6  ;;  %v8082_v12 = vunpack.i.l.bf16 %v8081_v6 }
 0x196   :  { %2057 = vst.msk [vmem:[#allocation0 + $0x7a2] ss:$-24 sm:$0x30] %vm243_vm0, %v7973_v9   ;;  %2059 = vst.msk [vmem:[#allocation0 + $0x802] ss:$-24 sm:$0xc0] %vm243_vm0, %v7973_v9   ;;  %v8078_v9 = vunpack.i.h.bf16 %v8076_v5 }
 0x197   :  { %2040 = vst.msk [vmem:[#allocation0 + $0x622] ss:$-24 sm:$0x3] %vm243_vm0, %v7972_v10   ;;  %2042 = vst.msk [vmem:[#allocation0 + $0x682] ss:$-24 sm:$0xc] %vm243_vm0, %v7972_v10  }
 0x198   :  { %2044 = vst.msk [vmem:[#allocation0 + $0x6e2] ss:$-24 sm:$0x30] %vm243_vm0, %v7972_v10   ;;  %2046 = vst.msk [vmem:[#allocation0 + $0x742] ss:$-24 sm:$0xc0] %vm243_vm0, %v7972_v10   ;;  %v8077_v10 = vunpack.i.l.bf16 %v8076_v5 }
 0x199   :  { %2079 = vst.msk [vmem:[#allocation0 + $0x862] ss:$-24 sm:$0x3] %vm243_vm0, %v7978_v15   ;;  %2081 = vst.msk [vmem:[#allocation0 + $0x8c2] ss:$-24 sm:$0xc] %vm243_vm0, %v7978_v15  }
 0x19a   :  { %2083 = vst.msk [vmem:[#allocation0 + $0x922] ss:$-24 sm:$0x30] %vm243_vm0, %v7978_v15   ;;  %2085 = vst.msk [vmem:[#allocation0 + $0x982] ss:$-24 sm:$0xc0] %vm243_vm0, %v7978_v15   ;;  %v8086_v15 = vpop.permute.xlu0 %8085 }
 0x19b   :  { %2066 = vst.msk [vmem:[#allocation0 + $0x7a2] ss:$-24 sm:$0x3] %vm243_vm0, %v7977_v16   ;;  %2068 = vst.msk [vmem:[#allocation0 + $0x802] ss:$-24 sm:$0xc] %vm243_vm0, %v7977_v16  }
 0x19c   :  { %2070 = vst.msk [vmem:[#allocation0 + $0x862] ss:$-24 sm:$0x30] %vm243_vm0, %v7977_v16   ;;  %2072 = vst.msk [vmem:[#allocation0 + $0x8c2] ss:$-24 sm:$0xc0] %vm243_vm0, %v7977_v16   ;;  %v8091_v16 = vpop.permute.xlu1 %8090 }
 0x19d   :  { %2105 = vst.msk [vmem:[#allocation0 + $0x9e2] ss:$-24 sm:$0x3] %vm243_vm0, %v7983_v17   ;;  %2107 = vst.msk [vmem:[#allocation0 + $0xa42] ss:$-24 sm:$0xc] %vm243_vm0, %v7983_v17   ;;  %v8088_v17 = vunpack.i.h.bf16 %v8086_v15  ;;  %v8093_v19 = vunpack.i.h.bf16 %v8091_v16  ;;  %v8092_v20 = vunpack.i.l.bf16 %v8091_v16 }
 0x19e   :  { %2092 = vst.msk [vmem:[#allocation0 + $0x922] ss:$-24 sm:$0x3] %vm243_vm0, %v7982_v18   ;;  %2094 = vst.msk [vmem:[#allocation0 + $0x982] ss:$-24 sm:$0xc] %vm243_vm0, %v7982_v18  }
 0x19f   :  { %2096 = vst.msk [vmem:[#allocation0 + $0x9e2] ss:$-24 sm:$0x30] %vm243_vm0, %v7982_v18   ;;  %2098 = vst.msk [vmem:[#allocation0 + $0xa42] ss:$-24 sm:$0xc0] %vm243_vm0, %v7982_v18   ;;  %v8087_v18 = vunpack.i.l.bf16 %v8086_v15 }
 0x1a0   :  { %2126 = vst.msk [vmem:[#allocation0 + $0xe3] ss:$-24 sm:$0x3] %vm243_vm0, %v7988_v21   ;;  %2128 = vst.msk [vmem:[#allocation0 + $0x143] ss:$-24 sm:$0xc] %vm243_vm0, %v7988_v21  }
 0x1a1   :  { %2130 = vst.msk [vmem:[#allocation0 + $0x1a3] ss:$-24 sm:$0x30] %vm243_vm0, %v7988_v21   ;;  %2132 = vst.msk [vmem:[#allocation0 + $0x203] ss:$-24 sm:$0xc0] %vm243_vm0, %v7988_v21   ;;  %v8096_v21 = vpop.permute.xlu0 %8095 }
 0x1a2   :  { %2113 = vst.msk [vmem:[#allocation0 + $0x23] ss:$-24 sm:$0x3] %vm243_vm0, %v7987_v22   ;;  %2115 = vst.msk [vmem:[#allocation0 + $0x83] ss:$-24 sm:$0xc] %vm243_vm0, %v7987_v22  }
 0x1a3   :  { %2117 = vst.msk [vmem:[#allocation0 + $0xe3] ss:$-24 sm:$0x30] %vm243_vm0, %v7987_v22   ;;  %2119 = vst.msk [vmem:[#allocation0 + $0x143] ss:$-24 sm:$0xc0] %vm243_vm0, %v7987_v22   ;;  %v8101_v22 = vpop.permute.xlu1 %8100 }
 0x1a4   :  { %2152 = vst.msk [vmem:[#allocation0 + $0x263] ss:$-24 sm:$0x3] %vm243_vm0, %v7993_v23   ;;  %2154 = vst.msk [vmem:[#allocation0 + $0x2c3] ss:$-24 sm:$0xc] %vm243_vm0, %v7993_v23   ;;  %v8103_v25 = vunpack.i.h.bf16 %v8101_v22  ;;  %v8102_v26 = vunpack.i.l.bf16 %v8101_v22 }
 0x1a5   :  { %2156 = vst.msk [vmem:[#allocation0 + $0x323] ss:$-24 sm:$0x30] %vm243_vm0, %v7993_v23   ;;  %2158 = vst.msk [vmem:[#allocation0 + $0x383] ss:$-24 sm:$0xc0] %vm243_vm0, %v7993_v23   ;;  %v8098_v23 = vunpack.i.h.bf16 %v8096_v21 }
 0x1a6   :  { %2139 = vst.msk [vmem:[#allocation0 + $0x1a3] ss:$-24 sm:$0x3] %vm243_vm0, %v7992_v24   ;;  %2141 = vst.msk [vmem:[#allocation0 + $0x203] ss:$-24 sm:$0xc] %vm243_vm0, %v7992_v24  }
 0x1a7   :  { %2143 = vst.msk [vmem:[#allocation0 + $0x263] ss:$-24 sm:$0x30] %vm243_vm0, %v7992_v24   ;;  %2145 = vst.msk [vmem:[#allocation0 + $0x2c3] ss:$-24 sm:$0xc0] %vm243_vm0, %v7992_v24   ;;  %v8097_v24 = vunpack.i.l.bf16 %v8096_v21 }
 0x1a8   :  { %2178 = vst.msk [vmem:[#allocation0 + $0x3e3] ss:$-24 sm:$0x3] %vm243_vm0, %v7998_v27   ;;  %2180 = vst.msk [vmem:[#allocation0 + $0x443] ss:$-24 sm:$0xc] %vm243_vm0, %v7998_v27  }
 0x1a9   :  { %2182 = vst.msk [vmem:[#allocation0 + $0x4a3] ss:$-24 sm:$0x30] %vm243_vm0, %v7998_v27   ;;  %2184 = vst.msk [vmem:[#allocation0 + $0x503] ss:$-24 sm:$0xc0] %vm243_vm0, %v7998_v27   ;;  %v8106_v27 = vpop.permute.xlu0 %8105 }
 0x1aa   :  { %2165 = vst.msk [vmem:[#allocation0 + $0x323] ss:$-24 sm:$0x3] %vm243_vm0, %v7997_v28   ;;  %2167 = vst.msk [vmem:[#allocation0 + $0x383] ss:$-24 sm:$0xc] %vm243_vm0, %v7997_v28  }
 0x1ab   :  { %2169 = vst.msk [vmem:[#allocation0 + $0x3e3] ss:$-24 sm:$0x30] %vm243_vm0, %v7997_v28   ;;  %2171 = vst.msk [vmem:[#allocation0 + $0x443] ss:$-24 sm:$0xc0] %vm243_vm0, %v7997_v28   ;;  %v8111_v28 = vpop.permute.xlu1 %8110 }
 0x1ac   :  { %2204 = vst.msk [vmem:[#allocation0 + $0x563] ss:$-24 sm:$0x3] %vm243_vm0, %v8003_v29   ;;  %2206 = vst.msk [vmem:[#allocation0 + $0x5c3] ss:$-24 sm:$0xc] %vm243_vm0, %v8003_v29   ;;  %v8113_v31 = vunpack.i.h.bf16 %v8111_v28  ;;  %v8112_v32 = vunpack.i.l.bf16 %v8111_v28 }
 0x1ad   :  { %2208 = vst.msk [vmem:[#allocation0 + $0x623] ss:$-24 sm:$0x30] %vm243_vm0, %v8003_v29   ;;  %2210 = vst.msk [vmem:[#allocation0 + $0x683] ss:$-24 sm:$0xc0] %vm243_vm0, %v8003_v29   ;;  %v8108_v29 = vunpack.i.h.bf16 %v8106_v27 }
 0x1ae   :  { %2191 = vst.msk [vmem:[#allocation0 + $0x4a3] ss:$-24 sm:$0x3] %vm243_vm0, %v8002_v30   ;;  %2193 = vst.msk [vmem:[#allocation0 + $0x503] ss:$-24 sm:$0xc] %vm243_vm0, %v8002_v30  }
 0x1af   :  { %2195 = vst.msk [vmem:[#allocation0 + $0x563] ss:$-24 sm:$0x30] %vm243_vm0, %v8002_v30   ;;  %2197 = vst.msk [vmem:[#allocation0 + $0x5c3] ss:$-24 sm:$0xc0] %vm243_vm0, %v8002_v30   ;;  %v8107_v30 = vunpack.i.l.bf16 %v8106_v27 }
 0x1b0   :  { %2230 = vst.msk [vmem:[#allocation0 + $0x6e3] ss:$-24 sm:$0x3] %vm243_vm0, %v8008_v33   ;;  %2232 = vst.msk [vmem:[#allocation0 + $0x743] ss:$-24 sm:$0xc] %vm243_vm0, %v8008_v33  }
 0x1b1   :  { %2234 = vst.msk [vmem:[#allocation0 + $0x7a3] ss:$-24 sm:$0x30] %vm243_vm0, %v8008_v33   ;;  %2236 = vst.msk [vmem:[#allocation0 + $0x803] ss:$-24 sm:$0xc0] %vm243_vm0, %v8008_v33   ;;  %v8116_v33 = vpop.permute.xlu0 %8115 }
 0x1b2   :  { %2217 = vst.msk [vmem:[#allocation0 + $0x623] ss:$-24 sm:$0x3] %vm243_vm0, %v8007_v34   ;;  %2219 = vst.msk [vmem:[#allocation0 + $0x683] ss:$-24 sm:$0xc] %vm243_vm0, %v8007_v34  }
 0x1b3   :  { %2221 = vst.msk [vmem:[#allocation0 + $0x6e3] ss:$-24 sm:$0x30] %vm243_vm0, %v8007_v34   ;;  %2223 = vst.msk [vmem:[#allocation0 + $0x743] ss:$-24 sm:$0xc0] %vm243_vm0, %v8007_v34   ;;  %v8121_v34 = vpop.permute.xlu1 %8120 }
 0x1b4   :  { %2256 = vst.msk [vmem:[#allocation0 + $0x863] ss:$-24 sm:$0x3] %vm243_vm0, %v8013_v35   ;;  %2258 = vst.msk [vmem:[#allocation0 + $0x8c3] ss:$-24 sm:$0xc] %vm243_vm0, %v8013_v35   ;;  %v8123_v14 = vunpack.i.h.bf16 %v8121_v34  ;;  %v8122_v37 = vunpack.i.l.bf16 %v8121_v34 }
 0x1b5   :  { %2260 = vst.msk [vmem:[#allocation0 + $0x923] ss:$-24 sm:$0x30] %vm243_vm0, %v8013_v35   ;;  %2262 = vst.msk [vmem:[#allocation0 + $0x983] ss:$-24 sm:$0xc0] %vm243_vm0, %v8013_v35   ;;  %v8118_v35 = vunpack.i.h.bf16 %v8116_v33 }
 0x1b6   :  { %2243 = vst.msk [vmem:[#allocation0 + $0x7a3] ss:$-24 sm:$0x3] %vm243_vm0, %v8012_v36   ;;  %2245 = vst.msk [vmem:[#allocation0 + $0x803] ss:$-24 sm:$0xc] %vm243_vm0, %v8012_v36  }
 0x1b7   :  { %2247 = vst.msk [vmem:[#allocation0 + $0x863] ss:$-24 sm:$0x30] %vm243_vm0, %v8012_v36   ;;  %2249 = vst.msk [vmem:[#allocation0 + $0x8c3] ss:$-24 sm:$0xc0] %vm243_vm0, %v8012_v36   ;;  %v8117_v36 = vunpack.i.l.bf16 %v8116_v33 }
 0x1b8   :  { %2282 = vst.msk [vmem:[#allocation0 + $0x9e3] ss:$-24 sm:$0x3] %vm243_vm0, %v8018_v38   ;;  %2284 = vst.msk [vmem:[#allocation0 + $0xa43] ss:$-24 sm:$0xc] %vm243_vm0, %v8018_v38   ;;  %v8126_v38 = vpop.permute.xlu0 %8125 }
 0x1b9   :  { %2269 = vst.msk [vmem:[#allocation0 + $0x923] ss:$-24 sm:$0x3] %vm243_vm0, %v8017_v39   ;;  %2271 = vst.msk [vmem:[#allocation0 + $0x983] ss:$-24 sm:$0xc] %vm243_vm0, %v8017_v39  }
 0x1ba   :  { %2273 = vst.msk [vmem:[#allocation0 + $0x9e3] ss:$-24 sm:$0x30] %vm243_vm0, %v8017_v39   ;;  %2275 = vst.msk [vmem:[#allocation0 + $0xa43] ss:$-24 sm:$0xc0] %vm243_vm0, %v8017_v39   ;;  %v8131_v39 = vpop.permute.xlu1 %8130 }
 0x1bb   :  { %2303 = vst.msk [vmem:[#allocation0 + $0xe4] ss:$-24 sm:$0x3] %vm243_vm0, %v8023_v40   ;;  %2305 = vst.msk [vmem:[#allocation0 + $0x144] ss:$-24 sm:$0xc] %vm243_vm0, %v8023_v40   ;;  %v8133_v58 = vunpack.i.h.bf16 %v8131_v39  ;;  %v8132_v0 = vunpack.i.l.bf16 %v8131_v39 }
 0x1bc   :  { %2307 = vst.msk [vmem:[#allocation0 + $0x1a4] ss:$-24 sm:$0x30] %vm243_vm0, %v8023_v40   ;;  %2309 = vst.msk [vmem:[#allocation0 + $0x204] ss:$-24 sm:$0xc0] %vm243_vm0, %v8023_v40   ;;  %v8128_v40 = vunpack.i.h.bf16 %v8126_v38 }
 0x1bd   :  { %2290 = vst.msk [vmem:[#allocation0 + $0x24] ss:$-24 sm:$0x3] %vm243_vm0, %v8022_v41   ;;  %2292 = vst.msk [vmem:[#allocation0 + $0x84] ss:$-24 sm:$0xc] %vm243_vm0, %v8022_v41  }
 0x1be   :  { %2294 = vst.msk [vmem:[#allocation0 + $0xe4] ss:$-24 sm:$0x30] %vm243_vm0, %v8022_v41   ;;  %2296 = vst.msk [vmem:[#allocation0 + $0x144] ss:$-24 sm:$0xc0] %vm243_vm0, %v8022_v41   ;;  %v8127_v41 = vunpack.i.l.bf16 %v8126_v38 }
 0x1bf   :  { %2329 = vst.msk [vmem:[#allocation0 + $0x264] ss:$-24 sm:$0x3] %vm243_vm0, %v8028_v42   ;;  %2331 = vst.msk [vmem:[#allocation0 + $0x2c4] ss:$-24 sm:$0xc] %vm243_vm0, %v8028_v42  }
 0x1c0   :  { %2333 = vst.msk [vmem:[#allocation0 + $0x324] ss:$-24 sm:$0x30] %vm243_vm0, %v8028_v42   ;;  %2335 = vst.msk [vmem:[#allocation0 + $0x384] ss:$-24 sm:$0xc0] %vm243_vm0, %v8028_v42   ;;  %v8136_v42 = vpop.permute.xlu0 %8135 }
 0x1c1   :  { %2316 = vst.msk [vmem:[#allocation0 + $0x1a4] ss:$-24 sm:$0x3] %vm243_vm0, %v8027_v43   ;;  %2318 = vst.msk [vmem:[#allocation0 + $0x204] ss:$-24 sm:$0xc] %vm243_vm0, %v8027_v43  }
 0x1c2   :  { %2320 = vst.msk [vmem:[#allocation0 + $0x264] ss:$-24 sm:$0x30] %vm243_vm0, %v8027_v43   ;;  %2322 = vst.msk [vmem:[#allocation0 + $0x2c4] ss:$-24 sm:$0xc0] %vm243_vm0, %v8027_v43   ;;  %v8141_v43 = vpop.permute.xlu1 %8140 }
 0x1c3   :  { %2355 = vst.msk [vmem:[#allocation0 + $0x3e4] ss:$-24 sm:$0x3] %vm243_vm0, %v8033_v44   ;;  %2357 = vst.msk [vmem:[#allocation0 + $0x444] ss:$-24 sm:$0xc] %vm243_vm0, %v8033_v44   ;;  %v8143_v2 = vunpack.i.h.bf16 %v8141_v43  ;;  %v8142_v7 = vunpack.i.l.bf16 %v8141_v43 }
 0x1c4   :  { %2359 = vst.msk [vmem:[#allocation0 + $0x4a4] ss:$-24 sm:$0x30] %vm243_vm0, %v8033_v44   ;;  %2361 = vst.msk [vmem:[#allocation0 + $0x504] ss:$-24 sm:$0xc0] %vm243_vm0, %v8033_v44   ;;  %v8138_v44 = vunpack.i.h.bf16 %v8136_v42 }
 0x1c5   :  { %2342 = vst.msk [vmem:[#allocation0 + $0x324] ss:$-24 sm:$0x3] %vm243_vm0, %v8032_v45   ;;  %2344 = vst.msk [vmem:[#allocation0 + $0x384] ss:$-24 sm:$0xc] %vm243_vm0, %v8032_v45  }
 0x1c6   :  { %2346 = vst.msk [vmem:[#allocation0 + $0x3e4] ss:$-24 sm:$0x30] %vm243_vm0, %v8032_v45   ;;  %2348 = vst.msk [vmem:[#allocation0 + $0x444] ss:$-24 sm:$0xc0] %vm243_vm0, %v8032_v45   ;;  %v8137_v45 = vunpack.i.l.bf16 %v8136_v42  ;;  %v8151_v50 = vpop.permute.xlu1 %8150 }
 0x1c7   :  { %2381 = vst.msk [vmem:[#allocation0 + $0x564] ss:$-24 sm:$0x3] %vm243_vm0, %v8038_v46   ;;  %2383 = vst.msk [vmem:[#allocation0 + $0x5c4] ss:$-24 sm:$0xc] %vm243_vm0, %v8038_v46   ;;  %v8153_v8 = vunpack.i.h.bf16 %v8151_v50  ;;  %v8152_v62 = vunpack.i.l.bf16 %v8151_v50 }
 0x1c8   :  { %2385 = vst.msk [vmem:[#allocation0 + $0x624] ss:$-24 sm:$0x30] %vm243_vm0, %v8038_v46   ;;  %2387 = vst.msk [vmem:[#allocation0 + $0x684] ss:$-24 sm:$0xc0] %vm243_vm0, %v8038_v46   ;;  %v8146_v46 = vpop.permute.xlu0 %8145 }
 0x1c9   :  { %2368 = vst.msk [vmem:[#allocation0 + $0x4a4] ss:$-24 sm:$0x3] %vm243_vm0, %v8037_v47   ;;  %2370 = vst.msk [vmem:[#allocation0 + $0x504] ss:$-24 sm:$0xc] %vm243_vm0, %v8037_v47   ;;  %v8148_v51 = vunpack.i.h.bf16 %v8146_v46 }
 0x1ca   :  { %2372 = vst.msk [vmem:[#allocation0 + $0x564] ss:$-24 sm:$0x30] %vm243_vm0, %v8037_v47   ;;  %2374 = vst.msk [vmem:[#allocation0 + $0x5c4] ss:$-24 sm:$0xc0] %vm243_vm0, %v8037_v47  }
 0x1cb   :  { %2407 = vst.msk [vmem:[#allocation0 + $0x6e4] ss:$-24 sm:$0x3] %vm243_vm0, %v8043_v48   ;;  %2409 = vst.msk [vmem:[#allocation0 + $0x744] ss:$-24 sm:$0xc] %vm243_vm0, %v8043_v48  }
 0x1cc   :  { %2411 = vst.msk [vmem:[#allocation0 + $0x7a4] ss:$-24 sm:$0x30] %vm243_vm0, %v8043_v48   ;;  %2413 = vst.msk [vmem:[#allocation0 + $0x804] ss:$-24 sm:$0xc0] %vm243_vm0, %v8043_v48   ;;  %v8156_v22 = vpop.permute.xlu0 %8155 }
 0x1cd   :  { %2394 = vst.msk [vmem:[#allocation0 + $0x624] ss:$-24 sm:$0x3] %vm243_vm0, %v8042_v49   ;;  %2396 = vst.msk [vmem:[#allocation0 + $0x684] ss:$-24 sm:$0xc] %vm243_vm0, %v8042_v49   ;;  %v8158_v34 = vunpack.i.h.bf16 %v8156_v22 }
 0x1ce   :  { %2398 = vst.msk [vmem:[#allocation0 + $0x6e4] ss:$-24 sm:$0x30] %vm243_vm0, %v8042_v49   ;;  %2400 = vst.msk [vmem:[#allocation0 + $0x744] ss:$-24 sm:$0xc0] %vm243_vm0, %v8042_v49  }
 0x1cf   :  { %2433 = vst.msk [vmem:[#allocation0 + $0x864] ss:$-24 sm:$0x3] %vm243_vm0, %v8048_v52   ;;  %2435 = vst.msk [vmem:[#allocation0 + $0x8c4] ss:$-24 sm:$0xc] %vm243_vm0, %v8048_v52  }
 0x1d0   :  { %2437 = vst.msk [vmem:[#allocation0 + $0x924] ss:$-24 sm:$0x30] %vm243_vm0, %v8048_v52   ;;  %2439 = vst.msk [vmem:[#allocation0 + $0x984] ss:$-24 sm:$0xc0] %vm243_vm0, %v8048_v52   ;;  %v8147_v52 = vunpack.i.l.bf16 %v8146_v46 }
 0x1d1   :  { %2420 = vst.msk [vmem:[#allocation0 + $0x7a4] ss:$-24 sm:$0x3] %vm243_vm0, %v8047_v53   ;;  %2422 = vst.msk [vmem:[#allocation0 + $0x804] ss:$-24 sm:$0xc] %vm243_vm0, %v8047_v53  }
 0x1d2   :  { %2424 = vst.msk [vmem:[#allocation0 + $0x864] ss:$-24 sm:$0x30] %vm243_vm0, %v8047_v53   ;;  %2426 = vst.msk [vmem:[#allocation0 + $0x8c4] ss:$-24 sm:$0xc0] %vm243_vm0, %v8047_v53  }
 0x1d3   :  { %2459 = vst.msk [vmem:[#allocation0 + $0x9e4] ss:$-24 sm:$0x3] %vm243_vm0, %v8053_v13   ;;  %2461 = vst.msk [vmem:[#allocation0 + $0xa44] ss:$-24 sm:$0xc] %vm243_vm0, %v8053_v13  }
 0x1d4   :  { %2446 = vst.msk [vmem:[#allocation0 + $0x924] ss:$-24 sm:$0x3] %vm243_vm0, %v8052_v54   ;;  %2448 = vst.msk [vmem:[#allocation0 + $0x984] ss:$-24 sm:$0xc] %vm243_vm0, %v8052_v54  }
 0x1d5   :  { %2450 = vst.msk [vmem:[#allocation0 + $0x9e4] ss:$-24 sm:$0x30] %vm243_vm0, %v8052_v54   ;;  %2452 = vst.msk [vmem:[#allocation0 + $0xa44] ss:$-24 sm:$0xc0] %vm243_vm0, %v8052_v54  }
 0x1d6   :  { %2480 = vst.msk [vmem:[#allocation0 + $0xe5] ss:$-24 sm:$0x3] %vm243_vm0, %v8058_v57   ;;  %2482 = vst.msk [vmem:[#allocation0 + $0x145] ss:$-24 sm:$0xc] %vm243_vm0, %v8058_v57  }
 0x1d7   :  { %2484 = vst.msk [vmem:[#allocation0 + $0x1a5] ss:$-24 sm:$0x30] %vm243_vm0, %v8058_v57   ;;  %2486 = vst.msk [vmem:[#allocation0 + $0x205] ss:$-24 sm:$0xc0] %vm243_vm0, %v8058_v57  }
 0x1d8   :  { %2467 = vst.msk [vmem:[#allocation0 + $0x25] ss:$-24 sm:$0x3] %vm243_vm0, %v8057_v59   ;;  %2469 = vst.msk [vmem:[#allocation0 + $0x85] ss:$-24 sm:$0xc] %vm243_vm0, %v8057_v59  }
 0x1d9   :  { %2471 = vst.msk [vmem:[#allocation0 + $0xe5] ss:$-24 sm:$0x30] %vm243_vm0, %v8057_v59   ;;  %2473 = vst.msk [vmem:[#allocation0 + $0x145] ss:$-24 sm:$0xc0] %vm243_vm0, %v8057_v59  }
 0x1da   :  { %2506 = vst.msk [vmem:[#allocation0 + $0x265] ss:$-24 sm:$0x3] %vm243_vm0, %v8063_v60   ;;  %2508 = vst.msk [vmem:[#allocation0 + $0x2c5] ss:$-24 sm:$0xc] %vm243_vm0, %v8063_v60  }
 0x1db   :  { %2510 = vst.msk [vmem:[#allocation0 + $0x325] ss:$-24 sm:$0x30] %vm243_vm0, %v8063_v60   ;;  %2512 = vst.msk [vmem:[#allocation0 + $0x385] ss:$-24 sm:$0xc0] %vm243_vm0, %v8063_v60  }
 0x1dc   :  { %2493 = vst.msk [vmem:[#allocation0 + $0x1a5] ss:$-24 sm:$0x3] %vm243_vm0, %v8062_v61   ;;  %2495 = vst.msk [vmem:[#allocation0 + $0x205] ss:$-24 sm:$0xc] %vm243_vm0, %v8062_v61  }
 0x1dd   :  { %2497 = vst.msk [vmem:[#allocation0 + $0x265] ss:$-24 sm:$0x30] %vm243_vm0, %v8062_v61   ;;  %2499 = vst.msk [vmem:[#allocation0 + $0x2c5] ss:$-24 sm:$0xc0] %vm243_vm0, %v8062_v61  }
 0x1de   :  { %2532 = vst.msk [vmem:[#allocation0 + $0x3e5] ss:$-24 sm:$0x3] %vm243_vm0, %v8068_v63   ;;  %2534 = vst.msk [vmem:[#allocation0 + $0x445] ss:$-24 sm:$0xc] %vm243_vm0, %v8068_v63  }
 0x1df   :  { %2536 = vst.msk [vmem:[#allocation0 + $0x4a5] ss:$-24 sm:$0x30] %vm243_vm0, %v8068_v63   ;;  %2538 = vst.msk [vmem:[#allocation0 + $0x505] ss:$-24 sm:$0xc0] %vm243_vm0, %v8068_v63  }
 0x1e0   :  { %2519 = vst.msk [vmem:[#allocation0 + $0x325] ss:$-24 sm:$0x3] %vm243_vm0, %v8067_v1   ;;  %2521 = vst.msk [vmem:[#allocation0 + $0x385] ss:$-24 sm:$0xc] %vm243_vm0, %v8067_v1  }
 0x1e1   :  { %2523 = vst.msk [vmem:[#allocation0 + $0x3e5] ss:$-24 sm:$0x30] %vm243_vm0, %v8067_v1   ;;  %2525 = vst.msk [vmem:[#allocation0 + $0x445] ss:$-24 sm:$0xc0] %vm243_vm0, %v8067_v1  }
 0x1e2   :  { %2558 = vst.msk [vmem:[#allocation0 + $0x565] ss:$-24 sm:$0x3] %vm243_vm0, %v8073_v3   ;;  %2560 = vst.msk [vmem:[#allocation0 + $0x5c5] ss:$-24 sm:$0xc] %vm243_vm0, %v8073_v3  }
 0x1e3   :  { %2562 = vst.msk [vmem:[#allocation0 + $0x625] ss:$-24 sm:$0x30] %vm243_vm0, %v8073_v3   ;;  %2564 = vst.msk [vmem:[#allocation0 + $0x685] ss:$-24 sm:$0xc0] %vm243_vm0, %v8073_v3  }
 0x1e4   :  { %2545 = vst.msk [vmem:[#allocation0 + $0x4a5] ss:$-24 sm:$0x3] %vm243_vm0, %v8072_v4   ;;  %2547 = vst.msk [vmem:[#allocation0 + $0x505] ss:$-24 sm:$0xc] %vm243_vm0, %v8072_v4  }
 0x1e5   :  { %2549 = vst.msk [vmem:[#allocation0 + $0x565] ss:$-24 sm:$0x30] %vm243_vm0, %v8072_v4   ;;  %2551 = vst.msk [vmem:[#allocation0 + $0x5c5] ss:$-24 sm:$0xc0] %vm243_vm0, %v8072_v4  }
 0x1e6   :  { %2584 = vst.msk [vmem:[#allocation0 + $0x6e5] ss:$-24 sm:$0x3] %vm243_vm0, %v8078_v9   ;;  %2586 = vst.msk [vmem:[#allocation0 + $0x745] ss:$-24 sm:$0xc] %vm243_vm0, %v8078_v9  }
 0x1e7   :  { %2588 = vst.msk [vmem:[#allocation0 + $0x7a5] ss:$-24 sm:$0x30] %vm243_vm0, %v8078_v9   ;;  %2590 = vst.msk [vmem:[#allocation0 + $0x805] ss:$-24 sm:$0xc0] %vm243_vm0, %v8078_v9  }
 0x1e8   :  { %2571 = vst.msk [vmem:[#allocation0 + $0x625] ss:$-24 sm:$0x3] %vm243_vm0, %v8077_v10   ;;  %2573 = vst.msk [vmem:[#allocation0 + $0x685] ss:$-24 sm:$0xc] %vm243_vm0, %v8077_v10  }
 0x1e9   :  { %2575 = vst.msk [vmem:[#allocation0 + $0x6e5] ss:$-24 sm:$0x30] %vm243_vm0, %v8077_v10   ;;  %2577 = vst.msk [vmem:[#allocation0 + $0x745] ss:$-24 sm:$0xc0] %vm243_vm0, %v8077_v10  }
 0x1ea   :  { %2610 = vst.msk [vmem:[#allocation0 + $0x865] ss:$-24 sm:$0x3] %vm243_vm0, %v8083_v11   ;;  %2612 = vst.msk [vmem:[#allocation0 + $0x8c5] ss:$-24 sm:$0xc] %vm243_vm0, %v8083_v11  }
 0x1eb   :  { %2614 = vst.msk [vmem:[#allocation0 + $0x925] ss:$-24 sm:$0x30] %vm243_vm0, %v8083_v11   ;;  %2616 = vst.msk [vmem:[#allocation0 + $0x985] ss:$-24 sm:$0xc0] %vm243_vm0, %v8083_v11  }
 0x1ec   :  { %2597 = vst.msk [vmem:[#allocation0 + $0x7a5] ss:$-24 sm:$0x3] %vm243_vm0, %v8082_v12   ;;  %2599 = vst.msk [vmem:[#allocation0 + $0x805] ss:$-24 sm:$0xc] %vm243_vm0, %v8082_v12  }
 0x1ed   :  { %2601 = vst.msk [vmem:[#allocation0 + $0x865] ss:$-24 sm:$0x30] %vm243_vm0, %v8082_v12   ;;  %2603 = vst.msk [vmem:[#allocation0 + $0x8c5] ss:$-24 sm:$0xc0] %vm243_vm0, %v8082_v12  }
 0x1ee   :  { %2636 = vst.msk [vmem:[#allocation0 + $0x9e5] ss:$-24 sm:$0x3] %vm243_vm0, %v8088_v17   ;;  %2638 = vst.msk [vmem:[#allocation0 + $0xa45] ss:$-24 sm:$0xc] %vm243_vm0, %v8088_v17  }
 0x1ef   :  { %2623 = vst.msk [vmem:[#allocation0 + $0x925] ss:$-24 sm:$0x3] %vm243_vm0, %v8087_v18   ;;  %2625 = vst.msk [vmem:[#allocation0 + $0x985] ss:$-24 sm:$0xc] %vm243_vm0, %v8087_v18  }
 0x1f0   :  { %2627 = vst.msk [vmem:[#allocation0 + $0x9e5] ss:$-24 sm:$0x30] %vm243_vm0, %v8087_v18   ;;  %2629 = vst.msk [vmem:[#allocation0 + $0xa45] ss:$-24 sm:$0xc0] %vm243_vm0, %v8087_v18  }
 0x1f1   :  { %2657 = vst.msk [vmem:[#allocation0 + $0xe6] ss:$-24 sm:$0x3] %vm243_vm0, %v8093_v19   ;;  %2659 = vst.msk [vmem:[#allocation0 + $0x146] ss:$-24 sm:$0xc] %vm243_vm0, %v8093_v19  }
 0x1f2   :  { %2661 = vst.msk [vmem:[#allocation0 + $0x1a6] ss:$-24 sm:$0x30] %vm243_vm0, %v8093_v19   ;;  %2663 = vst.msk [vmem:[#allocation0 + $0x206] ss:$-24 sm:$0xc0] %vm243_vm0, %v8093_v19  }
 0x1f3   :  { %2644 = vst.msk [vmem:[#allocation0 + $0x26] ss:$-24 sm:$0x3] %vm243_vm0, %v8092_v20   ;;  %2646 = vst.msk [vmem:[#allocation0 + $0x86] ss:$-24 sm:$0xc] %vm243_vm0, %v8092_v20  }
 0x1f4   :  { %2648 = vst.msk [vmem:[#allocation0 + $0xe6] ss:$-24 sm:$0x30] %vm243_vm0, %v8092_v20   ;;  %2650 = vst.msk [vmem:[#allocation0 + $0x146] ss:$-24 sm:$0xc0] %vm243_vm0, %v8092_v20  }
 0x1f5   :  { %2683 = vst.msk [vmem:[#allocation0 + $0x266] ss:$-24 sm:$0x3] %vm243_vm0, %v8098_v23   ;;  %2685 = vst.msk [vmem:[#allocation0 + $0x2c6] ss:$-24 sm:$0xc] %vm243_vm0, %v8098_v23  }
 0x1f6   :  { %2687 = vst.msk [vmem:[#allocation0 + $0x326] ss:$-24 sm:$0x30] %vm243_vm0, %v8098_v23   ;;  %2689 = vst.msk [vmem:[#allocation0 + $0x386] ss:$-24 sm:$0xc0] %vm243_vm0, %v8098_v23  }
 0x1f7   :  { %2670 = vst.msk [vmem:[#allocation0 + $0x1a6] ss:$-24 sm:$0x3] %vm243_vm0, %v8097_v24   ;;  %2672 = vst.msk [vmem:[#allocation0 + $0x206] ss:$-24 sm:$0xc] %vm243_vm0, %v8097_v24  }
 0x1f8   :  { %2674 = vst.msk [vmem:[#allocation0 + $0x266] ss:$-24 sm:$0x30] %vm243_vm0, %v8097_v24   ;;  %2676 = vst.msk [vmem:[#allocation0 + $0x2c6] ss:$-24 sm:$0xc0] %vm243_vm0, %v8097_v24  }
 0x1f9   :  { %2709 = vst.msk [vmem:[#allocation0 + $0x3e6] ss:$-24 sm:$0x3] %vm243_vm0, %v8103_v25   ;;  %2711 = vst.msk [vmem:[#allocation0 + $0x446] ss:$-24 sm:$0xc] %vm243_vm0, %v8103_v25  }
 0x1fa   :  { %2713 = vst.msk [vmem:[#allocation0 + $0x4a6] ss:$-24 sm:$0x30] %vm243_vm0, %v8103_v25   ;;  %2715 = vst.msk [vmem:[#allocation0 + $0x506] ss:$-24 sm:$0xc0] %vm243_vm0, %v8103_v25  }
 0x1fb   :  { %2696 = vst.msk [vmem:[#allocation0 + $0x326] ss:$-24 sm:$0x3] %vm243_vm0, %v8102_v26   ;;  %2698 = vst.msk [vmem:[#allocation0 + $0x386] ss:$-24 sm:$0xc] %vm243_vm0, %v8102_v26  }
 0x1fc   :  { %2700 = vst.msk [vmem:[#allocation0 + $0x3e6] ss:$-24 sm:$0x30] %vm243_vm0, %v8102_v26   ;;  %2702 = vst.msk [vmem:[#allocation0 + $0x446] ss:$-24 sm:$0xc0] %vm243_vm0, %v8102_v26  }
 0x1fd   :  { %2735 = vst.msk [vmem:[#allocation0 + $0x566] ss:$-24 sm:$0x3] %vm243_vm0, %v8108_v29   ;;  %2737 = vst.msk [vmem:[#allocation0 + $0x5c6] ss:$-24 sm:$0xc] %vm243_vm0, %v8108_v29  }
 0x1fe   :  { %2739 = vst.msk [vmem:[#allocation0 + $0x626] ss:$-24 sm:$0x30] %vm243_vm0, %v8108_v29   ;;  %2741 = vst.msk [vmem:[#allocation0 + $0x686] ss:$-24 sm:$0xc0] %vm243_vm0, %v8108_v29  }
 0x1ff   :  { %2722 = vst.msk [vmem:[#allocation0 + $0x4a6] ss:$-24 sm:$0x3] %vm243_vm0, %v8107_v30   ;;  %2724 = vst.msk [vmem:[#allocation0 + $0x506] ss:$-24 sm:$0xc] %vm243_vm0, %v8107_v30  }
 0x200   :  { %2726 = vst.msk [vmem:[#allocation0 + $0x566] ss:$-24 sm:$0x30] %vm243_vm0, %v8107_v30   ;;  %2728 = vst.msk [vmem:[#allocation0 + $0x5c6] ss:$-24 sm:$0xc0] %vm243_vm0, %v8107_v30  }
 0x201   :  { %2761 = vst.msk [vmem:[#allocation0 + $0x6e6] ss:$-24 sm:$0x3] %vm243_vm0, %v8113_v31   ;;  %2763 = vst.msk [vmem:[#allocation0 + $0x746] ss:$-24 sm:$0xc] %vm243_vm0, %v8113_v31  }
 0x202   :  { %2765 = vst.msk [vmem:[#allocation0 + $0x7a6] ss:$-24 sm:$0x30] %vm243_vm0, %v8113_v31   ;;  %2767 = vst.msk [vmem:[#allocation0 + $0x806] ss:$-24 sm:$0xc0] %vm243_vm0, %v8113_v31  }
 0x203   :  { %2748 = vst.msk [vmem:[#allocation0 + $0x626] ss:$-24 sm:$0x3] %vm243_vm0, %v8112_v32   ;;  %2750 = vst.msk [vmem:[#allocation0 + $0x686] ss:$-24 sm:$0xc] %vm243_vm0, %v8112_v32  }
 0x204   :  { %2752 = vst.msk [vmem:[#allocation0 + $0x6e6] ss:$-24 sm:$0x30] %vm243_vm0, %v8112_v32   ;;  %2754 = vst.msk [vmem:[#allocation0 + $0x746] ss:$-24 sm:$0xc0] %vm243_vm0, %v8112_v32   ;;  %v8161_v32 = vpop.permute.xlu1 %8160 }
 0x205   :  { %2787 = vst.msk [vmem:[#allocation0 + $0x866] ss:$-24 sm:$0x3] %vm243_vm0, %v8118_v35   ;;  %2789 = vst.msk [vmem:[#allocation0 + $0x8c6] ss:$-24 sm:$0xc] %vm243_vm0, %v8118_v35  }
 0x206   :  { %2791 = vst.msk [vmem:[#allocation0 + $0x926] ss:$-24 sm:$0x30] %vm243_vm0, %v8118_v35   ;;  %2793 = vst.msk [vmem:[#allocation0 + $0x986] ss:$-24 sm:$0xc0] %vm243_vm0, %v8118_v35  }
 0x207   :  { %2774 = vst.msk [vmem:[#allocation0 + $0x7a6] ss:$-24 sm:$0x3] %vm243_vm0, %v8117_v36   ;;  %2776 = vst.msk [vmem:[#allocation0 + $0x806] ss:$-24 sm:$0xc] %vm243_vm0, %v8117_v36  }
 0x208   :  { %2778 = vst.msk [vmem:[#allocation0 + $0x866] ss:$-24 sm:$0x30] %vm243_vm0, %v8117_v36   ;;  %2780 = vst.msk [vmem:[#allocation0 + $0x8c6] ss:$-24 sm:$0xc0] %vm243_vm0, %v8117_v36  }
 0x209   :  { %2813 = vst.msk [vmem:[#allocation0 + $0x9e6] ss:$-24 sm:$0x3] %vm243_vm0, %v8123_v14   ;;  %2815 = vst.msk [vmem:[#allocation0 + $0xa46] ss:$-24 sm:$0xc] %vm243_vm0, %v8123_v14  }
 0x20a   :  { %2800 = vst.msk [vmem:[#allocation0 + $0x926] ss:$-24 sm:$0x3] %vm243_vm0, %v8122_v37   ;;  %2802 = vst.msk [vmem:[#allocation0 + $0x986] ss:$-24 sm:$0xc] %vm243_vm0, %v8122_v37  }
 0x20b   :  { %2804 = vst.msk [vmem:[#allocation0 + $0x9e6] ss:$-24 sm:$0x30] %vm243_vm0, %v8122_v37   ;;  %2806 = vst.msk [vmem:[#allocation0 + $0xa46] ss:$-24 sm:$0xc0] %vm243_vm0, %v8122_v37  }
 0x20c   :  { %2834 = vst.msk [vmem:[#allocation0 + $0xe7] ss:$-24 sm:$0x3] %vm243_vm0, %v8128_v40   ;;  %2836 = vst.msk [vmem:[#allocation0 + $0x147] ss:$-24 sm:$0xc] %vm243_vm0, %v8128_v40  }
 0x20d   :  { %2838 = vst.msk [vmem:[#allocation0 + $0x1a7] ss:$-24 sm:$0x30] %vm243_vm0, %v8128_v40   ;;  %2840 = vst.msk [vmem:[#allocation0 + $0x207] ss:$-24 sm:$0xc0] %vm243_vm0, %v8128_v40  }
 0x20e   :  { %2821 = vst.msk [vmem:[#allocation0 + $0x27] ss:$-24 sm:$0x3] %vm243_vm0, %v8127_v41   ;;  %2823 = vst.msk [vmem:[#allocation0 + $0x87] ss:$-24 sm:$0xc] %vm243_vm0, %v8127_v41  }
 0x20f   :  { %2825 = vst.msk [vmem:[#allocation0 + $0xe7] ss:$-24 sm:$0x30] %vm243_vm0, %v8127_v41   ;;  %2827 = vst.msk [vmem:[#allocation0 + $0x147] ss:$-24 sm:$0xc0] %vm243_vm0, %v8127_v41  }
 0x210   :  { %2860 = vst.msk [vmem:[#allocation0 + $0x267] ss:$-24 sm:$0x3] %vm243_vm0, %v8133_v58   ;;  %2862 = vst.msk [vmem:[#allocation0 + $0x2c7] ss:$-24 sm:$0xc] %vm243_vm0, %v8133_v58  }
 0x211   :  { %2864 = vst.msk [vmem:[#allocation0 + $0x327] ss:$-24 sm:$0x30] %vm243_vm0, %v8133_v58   ;;  %2866 = vst.msk [vmem:[#allocation0 + $0x387] ss:$-24 sm:$0xc0] %vm243_vm0, %v8133_v58   ;;  %v8163_v58 = vunpack.i.h.bf16 %v8161_v32 }
 0x212   :  { %2847 = vst.msk [vmem:[#allocation0 + $0x1a7] ss:$-24 sm:$0x3] %vm243_vm0, %v8132_v0   ;;  %2849 = vst.msk [vmem:[#allocation0 + $0x207] ss:$-24 sm:$0xc] %vm243_vm0, %v8132_v0  }
 0x213   :  { %2851 = vst.msk [vmem:[#allocation0 + $0x267] ss:$-24 sm:$0x30] %vm243_vm0, %v8132_v0   ;;  %2853 = vst.msk [vmem:[#allocation0 + $0x2c7] ss:$-24 sm:$0xc0] %vm243_vm0, %v8132_v0   ;;  %v8162_v0 = vunpack.i.l.bf16 %v8161_v32 }
 0x214   :  { %2886 = vst.msk [vmem:[#allocation0 + $0x3e7] ss:$-24 sm:$0x3] %vm243_vm0, %v8138_v44   ;;  %2888 = vst.msk [vmem:[#allocation0 + $0x447] ss:$-24 sm:$0xc] %vm243_vm0, %v8138_v44  }
 0x215   :  { %2890 = vst.msk [vmem:[#allocation0 + $0x4a7] ss:$-24 sm:$0x30] %vm243_vm0, %v8138_v44   ;;  %2892 = vst.msk [vmem:[#allocation0 + $0x507] ss:$-24 sm:$0xc0] %vm243_vm0, %v8138_v44  }
 0x216   :  { %2873 = vst.msk [vmem:[#allocation0 + $0x327] ss:$-24 sm:$0x3] %vm243_vm0, %v8137_v45   ;;  %2875 = vst.msk [vmem:[#allocation0 + $0x387] ss:$-24 sm:$0xc] %vm243_vm0, %v8137_v45  }
 0x217   :  { %2877 = vst.msk [vmem:[#allocation0 + $0x3e7] ss:$-24 sm:$0x30] %vm243_vm0, %v8137_v45   ;;  %2879 = vst.msk [vmem:[#allocation0 + $0x447] ss:$-24 sm:$0xc0] %vm243_vm0, %v8137_v45  }
 0x218   :  { %2912 = vst.msk [vmem:[#allocation0 + $0x567] ss:$-24 sm:$0x3] %vm243_vm0, %v8143_v2   ;;  %2914 = vst.msk [vmem:[#allocation0 + $0x5c7] ss:$-24 sm:$0xc] %vm243_vm0, %v8143_v2  }
 0x219   :  { %2916 = vst.msk [vmem:[#allocation0 + $0x627] ss:$-24 sm:$0x30] %vm243_vm0, %v8143_v2   ;;  %2918 = vst.msk [vmem:[#allocation0 + $0x687] ss:$-24 sm:$0xc0] %vm243_vm0, %v8143_v2  }
 0x21a   :  { %2899 = vst.msk [vmem:[#allocation0 + $0x4a7] ss:$-24 sm:$0x3] %vm243_vm0, %v8142_v7   ;;  %2901 = vst.msk [vmem:[#allocation0 + $0x507] ss:$-24 sm:$0xc] %vm243_vm0, %v8142_v7  }
 0x21b   :  { %2903 = vst.msk [vmem:[#allocation0 + $0x567] ss:$-24 sm:$0x30] %vm243_vm0, %v8142_v7   ;;  %2905 = vst.msk [vmem:[#allocation0 + $0x5c7] ss:$-24 sm:$0xc0] %vm243_vm0, %v8142_v7  }
 0x21c   :  { %v9333_v47 = vld [vmem:[#allocation0 + $0x1e0] sm:$0xff]  ;;  %v9337_v49 = vld [vmem:[#allocation0 + $0x1b0] sm:$0xff]  ;;  %v3358_v59 = vld [vmem:[#allocation0 + $0x8] sm:$0xff]  ;;  %2938 = vst.msk [vmem:[#allocation0 + $0x6e7] ss:$-24 sm:$0x3] %vm243_vm0, %v8148_v51  }
 0x21d   :  { %v9335_v48 = vld [vmem:[#allocation0 + $0x180] sm:$0xff]  ;;  %v3397_v13 = vld [vmem:[#allocation0 + $0x30] sm:$0xff]  ;;  %v3405_v60 = vld [vmem:[#allocation0 + $0x38] sm:$0xff]  ;;  %2940 = vst.msk [vmem:[#allocation0 + $0x747] ss:$-24 sm:$0xc] %vm243_vm0, %v8148_v51  }
 0x21e   :  { %v3352_v53 = vld [vmem:[#allocation0] sm:$0xff]  ;;  %v9339_v55 = vld [vmem:[#allocation0 + $0x210] sm:$0xff]  ;;  %v3453_v61 = vld [vmem:[#allocation0 + $0x68] sm:$0xff]  ;;  %2942 = vst.msk [vmem:[#allocation0 + $0x7a7] ss:$-24 sm:$0x30] %vm243_vm0, %v8148_v51   ;;  %v6658_v9 = vpack.c.bf16 %v3405_v60, %v3397_v13 }
 0x21f   :  { %v3445_v54 = vld [vmem:[#allocation0 + $0x60] sm:$0xff]  ;;  %v9343_v57 = vld [vmem:[#allocation0 + $0x270] sm:$0xff]  ;;  %v3741_v3 = vld [vmem:[#allocation0 + $0x188] sm:$0xff]  ;;  %2944 = vst.msk [vmem:[#allocation0 + $0x807] ss:$-24 sm:$0xc0] %vm243_vm0, %v8148_v51   ;;  %v6643_v6 = vpack.c.bf16 %v3358_v59, %v3352_v53 }
 0x220   :  { %v9341_v56 = vld [vmem:[#allocation0 + $0x240] sm:$0xff]  ;;  %v9345_v63 = vld [vmem:[#allocation0 + $0x2d0] sm:$0xff]  ;;  %v3789_v4 = vld [vmem:[#allocation0 + $0x1b8] sm:$0xff]  ;;  %2925 = vst.msk [vmem:[#allocation0 + $0x627] ss:$-24 sm:$0x3] %vm243_vm0, %v8147_v52   ;;  %v6673_v10 = vpack.c.bf16 %v3453_v61, %v3445_v54  ;;  %v6763_v19 = vpack.c.bf16 %v3741_v3, %v9335_v48  ;;  %v8171_v3 = vpop.permute.xlu1 %8170 }
 0x221   :  { %v9347_v1 = vld [vmem:[#allocation0 + $0x2a0] sm:$0xff]  ;;  %v3837_v5 = vld [vmem:[#allocation0 + $0x1e8] sm:$0xff]  ;;  %2927 = vst.msk [vmem:[#allocation0 + $0x687] ss:$-24 sm:$0xc] %vm243_vm0, %v8147_v52   ;;  %v9357_v11 = vld [vmem:[#allocation0 + $0xf0] sm:$0xff]  ;;  %v6778_v20 = vpack.c.bf16 %v3789_v4, %v9337_v49 }
 0x222   :  { %2929 = vst.msk [vmem:[#allocation0 + $0x6e7] ss:$-24 sm:$0x30] %vm243_vm0, %v8147_v52   ;;  %2931 = vst.msk [vmem:[#allocation0 + $0x747] ss:$-24 sm:$0xc0] %vm243_vm0, %v8147_v52   ;;  %v6793_v21 = vpack.c.bf16 %v3837_v5, %v9333_v47  ;;  %v8157_v47 = vunpack.i.l.bf16 %v8156_v22 }
 0x223   :  { %v9359_v12 = vld [vmem:[#allocation0 + $0xc0] sm:$0xff]  ;;  %v3885_v16 = vld [vmem:[#allocation0 + $0x218] sm:$0xff]  ;;  %v3933_v17 = vld [vmem:[#allocation0 + $0x248] sm:$0xff]  ;;  %2964 = vst.msk [vmem:[#allocation0 + $0x867] ss:$-24 sm:$0x3] %vm243_vm0, %v8153_v8  }
 0x224   :  { %v9361_v15 = vld [vmem:[#allocation0 + $0x120] sm:$0xff]  ;;  %v3981_v18 = vld [vmem:[#allocation0 + $0x278] sm:$0xff]  ;;  %2966 = vst.msk [vmem:[#allocation0 + $0x8c7] ss:$-24 sm:$0xc] %vm243_vm0, %v8153_v8   ;;  %v9374_v23 = vld [vmem:[#allocation0 + $0x150] sm:$0xff]  ;;  %v6808_v29 = vpack.c.bf16 %v3885_v16, %v9339_v55  ;;  %v6823_v30 = vpack.c.bf16 %v3933_v17, %v9341_v56  ;;  %v8166_v55 = vpop.permute.xlu0 %8165 }
 0x225   :  { %2968 = vst.msk [vmem:[#allocation0 + $0x927] ss:$-24 sm:$0x30] %vm243_vm0, %v8153_v8   ;;  %2970 = vst.msk [vmem:[#allocation0 + $0x987] ss:$-24 sm:$0xc0] %vm243_vm0, %v8153_v8   ;;  %v6838_v31 = vpack.c.bf16 %v3981_v18, %v9343_v57  ;;  %v8167_v22 = vunpack.i.l.bf16 %v8166_v55 }
 0x226   :  { %2951 = vst.msk [vmem:[#allocation0 + $0x7a7] ss:$-24 sm:$0x3] %vm243_vm0, %v8152_v62   ;;  %2953 = vst.msk [vmem:[#allocation0 + $0x807] ss:$-24 sm:$0xc] %vm243_vm0, %v8152_v62  }
 0x227   :  { %2955 = vst.msk [vmem:[#allocation0 + $0x867] ss:$-24 sm:$0x30] %vm243_vm0, %v8152_v62   ;;  %2957 = vst.msk [vmem:[#allocation0 + $0x8c7] ss:$-24 sm:$0xc0] %vm243_vm0, %v8152_v62  }
 0x228   :  { %v9376_v24 = vld [vmem:[#allocation0 + $0x480] sm:$0xff]  ;;  %v9378_v25 = vld [vmem:[#allocation0 + $0x4b0] sm:$0xff]  ;;  %v4029_v26 = vld [vmem:[#allocation0 + $0x2a8] sm:$0xff]  ;;  %6644 = vst [vmem:[%s10181_s1] sm:$0xff] %v6643_v6  }
 0x229   :  { %v4077_v27 = vld [vmem:[#allocation0 + $0x2d8] sm:$0xff]  ;;  %v9385_v33 = vld [vmem:[#allocation0 + $0x90] sm:$0xff]  ;;  %7458 = vst [vmem:[%s10181_s1 + $0x18] sm:$0xff] %v6658_v9   ;;  %7461 = vst [vmem:[%s10181_s1 + $0x30] sm:$0xff] %v6673_v10   ;;  %v6853_v40 = vpack.c.bf16 %v4029_v26, %v9347_v1  ;;  %v8168_v9 = vunpack.i.h.bf16 %v8166_v55 }
 0x22a   :  { %v9380_v28 = vld [vmem:[#allocation0 + $0x98] sm:$0xff]  ;;  %v9396_v35 = vld [vmem:[#allocation0 + $0x510] sm:$0xff]  ;;  %v9398_v36 = vld [vmem:[#allocation0 + $0x4e0] sm:$0xff]  ;;  %v6868_v41 = vpack.c.bf16 %v4077_v27, %v9345_v63  ;;  %7479 = vst [vmem:[%s10181_s1 + $0xc0] sm:$0xff] %v6763_v19  }
 0x22b   :  { %v9400_v14 = vld [vmem:[#allocation0 + $0x540] sm:$0xff]  ;;  %v3549_v37 = vld [vmem:[#allocation0 + $0xc8] sm:$0xff]  ;;  %v3597_v38 = vld [vmem:[#allocation0 + $0xf8] sm:$0xff]  ;;  %7482 = vst [vmem:[%s10181_s1 + $0xd8] sm:$0xff] %v6778_v20   ;;  %v6688_v13 = vpack.c.bf16 %v9380_v28, %v9385_v33  ;;  %v8173_v20 = vunpack.i.h.bf16 %v8171_v3 }
 0x22c   :  { %v3645_v39 = vld [vmem:[#allocation0 + $0x128] sm:$0xff]  ;;  %7485 = vst [vmem:[%s10181_s1 + $0xf0] sm:$0xff] %v6793_v21   ;;  %v9413_v42 = vld [vmem:[#allocation0 + $0x570] sm:$0xff]  ;;  %v3693_v43 = vld [vmem:[#allocation0 + $0x158] sm:$0xff]  ;;  %v6703_v44 = vpack.c.bf16 %v3549_v37, %v9359_v12  ;;  %v6718_v45 = vpack.c.bf16 %v3597_v38, %v9357_v11  ;;  %v8172_v21 = vunpack.i.l.bf16 %v8171_v3 }
 0x22d   :  { %v6733_v2 = vpack.c.bf16 %v3645_v39, %v9361_v15  ;;  %7488 = vst [vmem:[%s10181_s1 + $0x108] sm:$0xff] %v6808_v29   ;;  %7491 = vst [vmem:[%s10181_s1 + $0x120] sm:$0xff] %v6823_v30   ;;  %v4509_v7 = vld [vmem:[#allocation0 + $0x488] sm:$0xff]  ;;  %v4557_v46 = vld [vmem:[#allocation0 + $0x4b8] sm:$0xff]  ;;  %v6748_v48 = vpack.c.bf16 %v3693_v43, %v9374_v23 }
 0x22e   :  { %7494 = vst [vmem:[%s10181_s1 + $0x138] sm:$0xff] %v6838_v31   ;;  %2990 = vst.msk [vmem:[#allocation0 + $0x9e7] ss:$-24 sm:$0x3] %vm243_vm0, %v8158_v34   ;;  %v4605_v49 = vld [vmem:[#allocation0 + $0x4e8] sm:$0xff]  ;;  %v4653_v50 = vld [vmem:[#allocation0 + $0x518] sm:$0xff]  ;;  %v7003_v52 = vpack.c.bf16 %v4509_v7, %v9376_v24  ;;  %v7018_v53 = vpack.c.bf16 %v4557_v46, %v9378_v25  ;;  %v8181_v46 = vpop.permute.xlu1 %8180 }
 0x22f   :  { %2992 = vst.msk [vmem:[#allocation0 + $0xa47] ss:$-24 sm:$0xc] %vm243_vm0, %v8158_v34   ;;  %7497 = vst [vmem:[%s10181_s1 + $0x150] sm:$0xff] %v6853_v40   ;;  %v4701_v51 = vld [vmem:[#allocation0 + $0x548] sm:$0xff]  ;;  %v9448_v54 = vld [vmem:[#allocation0 + $0x360] sm:$0xff]  ;;  %v7033_v62 = vpack.c.bf16 %v4605_v49, %v9398_v36  ;;  %v7048_v63 = vpack.c.bf16 %v4653_v50, %v9396_v35 }
 0x230   :  { %7500 = vst [vmem:[%s10181_s1 + $0x168] sm:$0xff] %v6868_v41   ;;  %3011 = vst.msk [vmem:[#allocation0 + $0x100] ss:$-24 sm:$0x7] %vm243_vm0, %v8163_v58   ;;  %v9450_v56 = vld [vmem:[#allocation0 + $0x5a0] sm:$0xff]  ;;  %v9452_v57 = vld [vmem:[#allocation0 + $0x5d0] sm:$0xff]  ;;  %v7063_v1 = vpack.c.bf16 %v4701_v51, %v9400_v14  ;;  %v8176_v41 = vpop.permute.xlu0 %8175 }
 0x231   :  { %3013 = vst.msk [vmem:[#allocation0 + $0x40] ss:$72 sm:$0x18] %vm243_vm0, %v8163_v58   ;;  %3015 = vst.msk [vmem:[#allocation0 + $0x1c0] ss:$-24 sm:$0x60] %vm243_vm0, %v8163_v58  }
 0x232   :  { %3017 = vst.msk [vmem:[#allocation0 + $0x171] sm:$0x80] %vm243_vm0, %v8163_v58   ;;  %2998 = vst.msk [vmem:[#allocation0 + $0x40] ss:$-24 sm:$0x7] %vm243_vm0, %v8162_v0   ;;  %v9454_v59 = vld [vmem:[#allocation0 + $0x300] sm:$0xff] }
 0x233   :  { %3000 = vst.msk [vmem:[#allocation0 - $0x80] ss:$72 sm:$0x18] %vm243_vm0, %v8162_v0   ;;  %3002 = vst.msk [vmem:[#allocation0 + $0x100] ss:$-24 sm:$0x60] %vm243_vm0, %v8162_v0  }
 0x234   :  { %3004 = vst.msk [vmem:[#allocation0 + $0xb1] sm:$0x80] %vm243_vm0, %v8162_v0   ;;  %v4749_v60 = vld [vmem:[#allocation0 + $0x578] sm:$0xff]  ;;  %v9456_v61 = vld [vmem:[#allocation0 + $0x5a8] sm:$0xff]  ;;  %7467 = vst [vmem:[%s10181_s1 + $0x60] sm:$0xff] %v6703_v44  }
 0x235   :  { %v9458_v8 = vld [vmem:[#allocation0 + $0x5d8] sm:$0xff]  ;;  %7470 = vst [vmem:[%s10181_s1 + $0x78] sm:$0xff] %v6718_v45   ;;  %7473 = vst [vmem:[%s10181_s1 + $0x90] sm:$0xff] %v6733_v2   ;;  %v9476_v4 = vld [vmem:[#allocation0 + $0x390] sm:$0xff]  ;;  %v7078_v19 = vpack.c.bf16 %v4749_v60, %v9413_v42  ;;  %v7093_v30 = vpack.c.bf16 %v9456_v61, %v9450_v56 }
 0x236   :  { %2977 = vst.msk [vmem:[#allocation0 + $0x927] ss:$-24 sm:$0x3] %vm243_vm0, %v8157_v47   ;;  %2979 = vst.msk [vmem:[#allocation0 + $0x987] ss:$-24 sm:$0xc] %vm243_vm0, %v8157_v47   ;;  %v7108_v31 = vpack.c.bf16 %v9458_v8, %v9452_v57 }
 0x237   :  { %2981 = vst.msk [vmem:[#allocation0 + $0x9e7] ss:$-24 sm:$0x30] %vm243_vm0, %v8157_v47   ;;  %2983 = vst.msk [vmem:[#allocation0 + $0xa47] ss:$-24 sm:$0xc0] %vm243_vm0, %v8157_v47   ;;  %v8178_v47 = vunpack.i.h.bf16 %v8176_v41 }
 0x238   :  { %v9478_v5 = vld [vmem:[#allocation0 + $0x3c0] sm:$0xff]  ;;  %v9480_v6 = vld [vmem:[#allocation0 + $0x3f0] sm:$0xff]  ;;  %7476 = vst [vmem:[%s10181_s1 + $0xa8] sm:$0xff] %v6748_v48   ;;  %v9493_v16 = vld [vmem:[#allocation0 + $0x308] sm:$0xff] }
 0x239   :  { %v9482_v10 = vld [vmem:[#allocation0 + $0x330] sm:$0xff]  ;;  %v9486_v12 = vld [vmem:[#allocation0 + $0x420] sm:$0xff]  ;;  %v9495_v17 = vld [vmem:[#allocation0 + $0x338] sm:$0xff]  ;;  %7527 = vst [vmem:[%s10181_s1 + $0x240] sm:$0xff] %v7003_v52   ;;  %v6883_v32 = vpack.c.bf16 %v9493_v16, %v9454_v59  ;;  %v8183_v59 = vunpack.i.h.bf16 %v8181_v46 }
 0x23a   :  { %v9484_v11 = vld [vmem:[#allocation0 + $0x450] sm:$0xff]  ;;  %v9488_v15 = vld [vmem:[#allocation0 + $0x780] sm:$0xff]  ;;  %v4221_v18 = vld [vmem:[#allocation0 + $0x368] sm:$0xff]  ;;  %7530 = vst [vmem:[%s10181_s1 + $0x258] sm:$0xff] %v7018_v53   ;;  %v6898_v58 = vpack.c.bf16 %v9495_v17, %v9482_v10 }
 0x23b   :  { %7464 = vst [vmem:[%s10181_s1 + $0x48] sm:$0xff] %v6688_v13   ;;  %v9507_v23 = vld [vmem:[#allocation0 + $0x810] sm:$0xff]  ;;  %v9509_v24 = vld [vmem:[#allocation0 + $0x7e0] sm:$0xff]  ;;  %v9513_v26 = vld [vmem:[#allocation0 + $0x398] sm:$0xff]  ;;  %v6913_v29 = vpack.c.bf16 %v4221_v18, %v9448_v54  ;;  %v8186_v18 = vpop.permute.xlu0 %8185 }
 0x23c   :  { %v9511_v25 = vld [vmem:[#allocation0 + $0x7b0] sm:$0xff]  ;;  %v9515_v27 = vld [vmem:[#allocation0 + $0x3c8] sm:$0xff]  ;;  %v9517_v28 = vld [vmem:[#allocation0 + $0x3f8] sm:$0xff]  ;;  %7533 = vst [vmem:[%s10181_s1 + $0x270] sm:$0xff] %v7033_v62   ;;  %v6928_v38 = vpack.c.bf16 %v9513_v26, %v9476_v4  ;;  %v8188_v26 = vunpack.i.h.bf16 %v8186_v18 }
 0x23d   :  { %7536 = vst [vmem:[%s10181_s1 + $0x288] sm:$0xff] %v7048_v63   ;;  %7539 = vst [vmem:[%s10181_s1 + $0x2a0] sm:$0xff] %v7063_v1   ;;  %v9539_v33 = vld [vmem:[#allocation0 + $0x8a0] sm:$0xff]  ;;  %v9543_v35 = vld [vmem:[#allocation0 + $0x870] sm:$0xff]  ;;  %v6943_v39 = vpack.c.bf16 %v9515_v27, %v9478_v5  ;;  %v6958_v40 = vpack.c.bf16 %v9517_v28, %v9480_v6  ;;  %v8182_v6 = vunpack.i.l.bf16 %v8181_v46 }
 0x23e   :  { %3037 = vst.msk [vmem:[#allocation0 + $0x280] ss:$-24 sm:$0x7] %vm243_vm0, %v8168_v9   ;;  %3039 = vst.msk [vmem:[#allocation0 + $0x1c0] ss:$72 sm:$0x18] %vm243_vm0, %v8168_v9  }
 0x23f   :  { %3041 = vst.msk [vmem:[#allocation0 + $0x340] ss:$-24 sm:$0x60] %vm243_vm0, %v8168_v9   ;;  %3043 = vst.msk [vmem:[#allocation0 + $0x2f1] sm:$0x80] %vm243_vm0, %v8168_v9   ;;  %v9541_v34 = vld [vmem:[#allocation0 + $0x840] sm:$0xff] }
 0x240   :  { %v4413_v36 = vld [vmem:[#allocation0 + $0x428] sm:$0xff]  ;;  %v4461_v14 = vld [vmem:[#allocation0 + $0x458] sm:$0xff]  ;;  %7542 = vst [vmem:[%s10181_s1 + $0x2b8] sm:$0xff] %v7078_v19   ;;  %3063 = vst.msk [vmem:[#allocation0 + $0x400] ss:$-24 sm:$0x7] %vm243_vm0, %v8173_v20  }
 0x241   :  { %v5277_v37 = vld [vmem:[#allocation0 + $0x788] sm:$0xff]  ;;  %3065 = vst.msk [vmem:[#allocation0 + $0x340] ss:$72 sm:$0x18] %vm243_vm0, %v8173_v20   ;;  %3069 = vst.msk [vmem:[#allocation0 + $0x471] sm:$0x80] %vm243_vm0, %v8173_v20   ;;  %v6973_v42 = vpack.c.bf16 %v4413_v36, %v9486_v12  ;;  %v6988_v43 = vpack.c.bf16 %v4461_v14, %v9484_v11 }
 0x242   :  { %3067 = vst.msk [vmem:[#allocation0 + $0x4c0] ss:$-24 sm:$0x60] %vm243_vm0, %v8173_v20   ;;  %3050 = vst.msk [vmem:[#allocation0 + $0x340] ss:$-24 sm:$0x7] %vm243_vm0, %v8172_v21   ;;  %v7243_v7 = vpack.c.bf16 %v5277_v37, %v9488_v15  ;;  %v8177_v15 = vunpack.i.l.bf16 %v8176_v41 }
 0x243   :  { %3052 = vst.msk [vmem:[#allocation0 + $0x280] ss:$72 sm:$0x18] %vm243_vm0, %v8172_v21   ;;  %3054 = vst.msk [vmem:[#allocation0 + $0x400] ss:$-24 sm:$0x60] %vm243_vm0, %v8172_v21  }
 0x244   :  { %3056 = vst.msk [vmem:[#allocation0 + $0x3b1] sm:$0x80] %vm243_vm0, %v8172_v21   ;;  %3024 = vst.msk [vmem:[#allocation0 + $0x1c0] ss:$-24 sm:$0x7] %vm243_vm0, %v8167_v22   ;;  %v9568_v0 = vld [vmem:[#allocation0 + $0x8d0] sm:$0xff] }
 0x245   :  { %3026 = vst.msk [vmem:[#allocation0 + $0x100] ss:$72 sm:$0x18] %vm243_vm0, %v8167_v22   ;;  %3028 = vst.msk [vmem:[#allocation0 + $0x280] ss:$-24 sm:$0x60] %vm243_vm0, %v8167_v22  }
 0x246   :  { %3030 = vst.msk [vmem:[#allocation0 + $0x231] sm:$0x80] %vm243_vm0, %v8167_v22   ;;  %v5325_v44 = vld [vmem:[#allocation0 + $0x7b8] sm:$0xff]  ;;  %v5373_v45 = vld [vmem:[#allocation0 + $0x7e8] sm:$0xff]  ;;  %7509 = vst [vmem:[%s10181_s1 + $0x1b0] sm:$0xff] %v6913_v29  }
 0x247   :  { %v5421_v2 = vld [vmem:[#allocation0 + $0x818] sm:$0xff]  ;;  %v9576_v48 = vld [vmem:[#allocation0 + $0x600] sm:$0xff]  ;;  %v9578_v49 = vld [vmem:[#allocation0 + $0x630] sm:$0xff]  ;;  %7545 = vst [vmem:[%s10181_s1 + $0x2d0] sm:$0xff] %v7093_v30   ;;  %v7258_v55 = vpack.c.bf16 %v5325_v44, %v9511_v25  ;;  %v7273_v56 = vpack.c.bf16 %v5373_v45, %v9509_v24  ;;  %v8191_v25 = vpop.permute.xlu1 %8190 }
 0x248   :  { %7548 = vst [vmem:[%s10181_s1 + $0x2e8] sm:$0xff] %v7108_v31   ;;  %7503 = vst [vmem:[%s10181_s1 + $0x180] sm:$0xff] %v6883_v32   ;;  %v9589_v50 = vld [vmem:[#allocation0 + $0x690] sm:$0xff]  ;;  %v9591_v51 = vld [vmem:[#allocation0 + $0x660] sm:$0xff]  ;;  %v7288_v57 = vpack.c.bf16 %v5421_v2, %v9507_v23  ;;  %v8192_v37 = vunpack.i.l.bf16 %v8191_v25 }
 0x249   :  { %v9593_v52 = vld [vmem:[#allocation0 + $0x6c0] sm:$0xff]  ;;  %v5469_v53 = vld [vmem:[#allocation0 + $0x848] sm:$0xff]  ;;  %v5517_v13 = vld [vmem:[#allocation0 + $0x878] sm:$0xff]  ;;  %7512 = vst [vmem:[%s10181_s1 + $0x1c8] sm:$0xff] %v6928_v38   ;;  %v8187_v38 = vunpack.i.l.bf16 %v8186_v18 }
 0x24a   :  { %v5565_v54 = vld [vmem:[#allocation0 + $0x8a8] sm:$0xff]  ;;  %7515 = vst [vmem:[%s10181_s1 + $0x1e0] sm:$0xff] %v6943_v39   ;;  %7518 = vst [vmem:[%s10181_s1 + $0x1f8] sm:$0xff] %v6958_v40   ;;  %v9610_v60 = vld [vmem:[#allocation0 + $0x6f0] sm:$0xff]  ;;  %v7303_v3 = vpack.c.bf16 %v5469_v53, %v9541_v34  ;;  %v7318_v4 = vpack.c.bf16 %v5517_v13, %v9543_v35  ;;  %v8193_v34 = vunpack.i.h.bf16 %v8191_v25 }
 0x24b   :  { %7506 = vst [vmem:[%s10181_s1 + $0x198] sm:$0xff] %v6898_v58   ;;  %v9612_v61 = vld [vmem:[#allocation0 + $0x720] sm:$0xff]  ;;  %v9614_v8 = vld [vmem:[#allocation0 + $0x750] sm:$0xff]  ;;  %v5613_v62 = vld [vmem:[#allocation0 + $0x8d8] sm:$0xff]  ;;  %v7333_v5 = vpack.c.bf16 %v5565_v54, %v9539_v33  ;;  %v8201_v46 = vpop.permute.xlu1 %8200 }
 0x24c   :  { %7521 = vst [vmem:[%s10181_s1 + $0x210] sm:$0xff] %v6973_v42   ;;  %7524 = vst [vmem:[%s10181_s1 + $0x228] sm:$0xff] %v6988_v43   ;;  %v4893_v63 = vld [vmem:[#allocation0 + $0x608] sm:$0xff]  ;;  %v4941_v1 = vld [vmem:[#allocation0 + $0x638] sm:$0xff]  ;;  %v7348_v12 = vpack.c.bf16 %v5613_v62, %v9568_v0  ;;  %v8196_v42 = vpop.permute.xlu0 %8195 }
 0x24d   :  { %7575 = vst [vmem:[%s10181_s1 + $0x3c0] sm:$0xff] %v7243_v7   ;;  %3089 = vst.msk [vmem:[#allocation0 + $0x580] ss:$-24 sm:$0x7] %vm243_vm0, %v8178_v47   ;;  %v4989_v9 = vld [vmem:[#allocation0 + $0x668] sm:$0xff]  ;;  %v5037_v10 = vld [vmem:[#allocation0 + $0x698] sm:$0xff]  ;;  %v7123_v16 = vpack.c.bf16 %v4893_v63, %v9576_v48  ;;  %v7138_v17 = vpack.c.bf16 %v4941_v1, %v9578_v49  ;;  %v8203_v49 = vunpack.i.h.bf16 %v8201_v46 }
 0x24e   :  { %3091 = vst.msk [vmem:[#allocation0 + $0x4c0] ss:$72 sm:$0x18] %vm243_vm0, %v8178_v47   ;;  %3093 = vst.msk [vmem:[#allocation0 + $0x640] ss:$-24 sm:$0x60] %vm243_vm0, %v8178_v47   ;;  %v7153_v22 = vpack.c.bf16 %v4989_v9, %v9591_v51  ;;  %v7168_v23 = vpack.c.bf16 %v5037_v10, %v9589_v50  ;;  %v8202_v50 = vunpack.i.l.bf16 %v8201_v46  ;;  %v8197_v51 = vunpack.i.l.bf16 %v8196_v42 }
 0x24f   :  { %3095 = vst.msk [vmem:[#allocation0 + $0x5f1] sm:$0x80] %vm243_vm0, %v8178_v47   ;;  %v5085_v11 = vld [vmem:[#allocation0 + $0x6c8] sm:$0xff]  ;;  %7578 = vst [vmem:[%s10181_s1 + $0x3d8] sm:$0xff] %v7258_v55   ;;  %v5133_v19 = vld [vmem:[#allocation0 + $0x6f8] sm:$0xff]  ;;  %v8198_v47 = vunpack.i.h.bf16 %v8196_v42  ;;  %v8211_v53 = vpop.permute.xlu1 %8210 }
 0x250   :  { %7581 = vst [vmem:[%s10181_s1 + $0x3f0] sm:$0xff] %v7273_v56   ;;  %7584 = vst [vmem:[%s10181_s1 + $0x408] sm:$0xff] %v7288_v57   ;;  %v5181_v20 = vld [vmem:[#allocation0 + $0x728] sm:$0xff]  ;;  %v5229_v21 = vld [vmem:[#allocation0 + $0x758] sm:$0xff]  ;;  %v7183_v24 = vpack.c.bf16 %v5085_v11, %v9593_v52  ;;  %v7198_v31 = vpack.c.bf16 %v5133_v19, %v9610_v60  ;;  %v8206_v52 = vpop.permute.xlu0 %8205  ;;  %v8213_v55 = vunpack.i.h.bf16 %v8211_v53  ;;  %v8212_v56 = vunpack.i.l.bf16 %v8211_v53 }
 0x251   :  { %3115 = vst.msk [vmem:[#allocation0 + $0x700] ss:$-24 sm:$0x7] %vm243_vm0, %v8183_v59   ;;  %3117 = vst.msk [vmem:[#allocation0 + $0x640] ss:$72 sm:$0x18] %vm243_vm0, %v8183_v59   ;;  %v7213_v32 = vpack.c.bf16 %v5181_v20, %v9612_v61  ;;  %v7228_v33 = vpack.c.bf16 %v5229_v21, %v9614_v8  ;;  %v8208_v13 = vunpack.i.h.bf16 %v8206_v52  ;;  %v8207_v54 = vunpack.i.l.bf16 %v8206_v52 }
 0x252   :  { %3119 = vst.msk [vmem:[#allocation0 + $0x7c0] ss:$-24 sm:$0x60] %vm243_vm0, %v8183_v59   ;;  %3121 = vst.msk [vmem:[#allocation0 + $0x771] sm:$0x80] %vm243_vm0, %v8183_v59   ;;  %v5797_v27 = vld [vmem:[#allocation0 + $0x990] sm:$0xff] }
 0x253   :  { %7587 = vst [vmem:[%s10181_s1 + $0x420] sm:$0xff] %v7303_v3   ;;  %7590 = vst [vmem:[%s10181_s1 + $0x438] sm:$0xff] %v7318_v4   ;;  %v5845_v28 = vld [vmem:[#allocation0 + $0x9c0] sm:$0xff]  ;;  %v5701_v35 = vld [vmem:[#allocation0 + $0x930] sm:$0xff]  ;;  %v8221_v1 = vpop.permute.xlu1 %8220 }
 0x254   :  { %7593 = vst [vmem:[%s10181_s1 + $0x450] sm:$0xff] %v7333_v5   ;;  %3102 = vst.msk [vmem:[#allocation0 + $0x640] ss:$-24 sm:$0x7] %vm243_vm0, %v8182_v6   ;;  %v5749_v29 = vld [vmem:[#allocation0 + $0x960] sm:$0xff]  ;;  %v5661_v36 = vld [vmem:[#allocation0 + $0x908] sm:$0xff]  ;;  %v8216_v59 = vpop.permute.xlu0 %8215 }
 0x255   :  { %3104 = vst.msk [vmem:[#allocation0 + $0x580] ss:$72 sm:$0x18] %vm243_vm0, %v8182_v6   ;;  %3106 = vst.msk [vmem:[#allocation0 + $0x700] ss:$-24 sm:$0x60] %vm243_vm0, %v8182_v6   ;;  %v8218_v3 = vunpack.i.h.bf16 %v8216_v59  ;;  %v8217_v4 = vunpack.i.l.bf16 %v8216_v59 }
 0x256   :  { %3108 = vst.msk [vmem:[#allocation0 + $0x6b1] sm:$0x80] %vm243_vm0, %v8182_v6   ;;  %v5653_v30 = vld [vmem:[#allocation0 + $0x900] sm:$0xff]  ;;  %7596 = vst [vmem:[%s10181_s1 + $0x468] sm:$0xff] %v7348_v12   ;;  %v5709_v14 = vld [vmem:[#allocation0 + $0x938] sm:$0xff] }
 0x257   :  { %3076 = vst.msk [vmem:[#allocation0 + $0x4c0] ss:$-24 sm:$0x7] %vm243_vm0, %v8177_v15   ;;  %3078 = vst.msk [vmem:[#allocation0 + $0x400] ss:$72 sm:$0x18] %vm243_vm0, %v8177_v15   ;;  %v7363_v58 = vpack.c.bf16 %v5661_v36, %v5653_v30  ;;  %v7378_v0 = vpack.c.bf16 %v5709_v14, %v5701_v35 }
 0x258   :  { %3080 = vst.msk [vmem:[#allocation0 + $0x580] ss:$-24 sm:$0x60] %vm243_vm0, %v8177_v15   ;;  %3082 = vst.msk [vmem:[#allocation0 + $0x531] sm:$0x80] %vm243_vm0, %v8177_v15   ;;  %v5757_v39 = vld [vmem:[#allocation0 + $0x968] sm:$0xff]  ;;  %v8223_v15 = vunpack.i.h.bf16 %v8221_v1  ;;  %v8226_v35 = vpop.permute.xlu0 %8225 }
 0x259   :  { %7551 = vst [vmem:[%s10181_s1 + $0x300] sm:$0xff] %v7123_v16   ;;  %7554 = vst [vmem:[%s10181_s1 + $0x318] sm:$0xff] %v7138_v17   ;;  %v5805_v40 = vld [vmem:[#allocation0 + $0x998] sm:$0xff]  ;;  %v5853_v41 = vld [vmem:[#allocation0 + $0x9c8] sm:$0xff]  ;;  %v7393_v45 = vpack.c.bf16 %v5757_v39, %v5749_v29  ;;  %v8222_v16 = vunpack.i.l.bf16 %v8221_v1  ;;  %v8228_v42 = vunpack.i.h.bf16 %v8226_v35 }
 0x25a   :  { %7557 = vst [vmem:[%s10181_s1 + $0x330] sm:$0xff] %v7153_v22   ;;  %7560 = vst [vmem:[%s10181_s1 + $0x348] sm:$0xff] %v7168_v23   ;;  %v5893_v43 = vld [vmem:[#allocation0 + $0x9f0] sm:$0xff]  ;;  %v5901_v44 = vld [vmem:[#allocation0 + $0x9f8] sm:$0xff]  ;;  %v7408_v2 = vpack.c.bf16 %v5805_v40, %v5797_v27  ;;  %v7423_v7 = vpack.c.bf16 %v5853_v41, %v5845_v28 }
 0x25b   :  { %7563 = vst [vmem:[%s10181_s1 + $0x360] sm:$0xff] %v7183_v24   ;;  %3141 = vst.msk [vmem:[#allocation0 + $0x880] ss:$-24 sm:$0x7] %vm243_vm0, %v8188_v26   ;;  %v7438_v48 = vpack.c.bf16 %v5901_v44, %v5893_v43  ;;  %v9754_v57 = vld [vmem:[#allocation0 + $0xd8] sm:$0xff]  ;;  %v9766_v61 = vld [vmem:[#allocation0 + $0x1a0] sm:$0xff] }
 0x25c   :  { %3143 = vst.msk [vmem:[#allocation0 + $0x7c0] ss:$72 sm:$0x18] %vm243_vm0, %v8188_v26   ;;  %3145 = vst.msk [vmem:[#allocation0 + $0x940] ss:$-24 sm:$0x60] %vm243_vm0, %v8188_v26  }
 0x25d   :  { %3147 = vst.msk [vmem:[#allocation0 + $0x8f1] sm:$0x80] %vm243_vm0, %v8188_v26   ;;  %7566 = vst [vmem:[%s10181_s1 + $0x378] sm:$0xff] %v7198_v31   ;;  %v9764_v60 = vld [vmem:[#allocation0 + $0x198] sm:$0xff]  ;;  %v9768_v8 = vld [vmem:[#allocation0 + $0x1c8] sm:$0xff] }
 0x25e   :  { %7569 = vst [vmem:[%s10181_s1 + $0x390] sm:$0xff] %v7213_v32   ;;  %7572 = vst [vmem:[%s10181_s1 + $0x3a8] sm:$0xff] %v7228_v33   ;;  %v3573_v62 = vld [vmem:[#allocation0 + $0xe0] sm:$0xff]  ;;  %v3613_v63 = vld [vmem:[#allocation0 + $0x108] sm:$0xff] }
 0x25f   :  { %3167 = vst.msk [vmem:[#allocation0 + $0xa00] ss:$-24 sm:$0x7] %vm243_vm0, %v8193_v34   ;;  %3169 = vst.msk [vmem:[#allocation0 + $0xa15] sm:$0x8] %vm243_vm0, %v8193_v34   ;;  %v9770_v5 = vld [vmem:[#allocation0 + $0x1d0] sm:$0xff] }
 0x260   :  { %3154 = vst.msk [vmem:[#allocation0 + $0x940] ss:$-24 sm:$0x7] %vm243_vm0, %v8192_v37   ;;  %3156 = vst.msk [vmem:[#allocation0 + $0x880] ss:$72 sm:$0x18] %vm243_vm0, %v8192_v37  }
 0x261   :  { %3158 = vst.msk [vmem:[#allocation0 + $0xa00] ss:$-24 sm:$0x60] %vm243_vm0, %v8192_v37   ;;  %3160 = vst.msk [vmem:[#allocation0 + $0x9b1] sm:$0x80] %vm243_vm0, %v8192_v37   ;;  %v9772_v6 = vld [vmem:[#allocation0 + $0x228] sm:$0xff] }
 0x262   :  { %3128 = vst.msk [vmem:[#allocation0 + $0x7c0] ss:$-24 sm:$0x7] %vm243_vm0, %v8187_v38   ;;  %3130 = vst.msk [vmem:[#allocation0 + $0x700] ss:$72 sm:$0x18] %vm243_vm0, %v8187_v38  }
 0x263   :  { %3132 = vst.msk [vmem:[#allocation0 + $0x880] ss:$-24 sm:$0x60] %vm243_vm0, %v8187_v38   ;;  %3134 = vst.msk [vmem:[#allocation0 + $0x831] sm:$0x80] %vm243_vm0, %v8187_v38   ;;  %v9774_v9 = vld [vmem:[#allocation0 + $0x258] sm:$0xff] }
 0x264   :  { %7599 = vst [vmem:[%s10181_s1 + $0x480] sm:$0xff] %v7363_v58   ;;  %7602 = vst [vmem:[%s10181_s1 + $0x498] sm:$0xff] %v7378_v0   ;;  %v9776_v20 = vld [vmem:[#allocation0 + $0x260] sm:$0xff]  ;;  %v9778_v21 = vld [vmem:[#allocation0 + $0x288] sm:$0xff] }
 0x265   :  { %7605 = vst [vmem:[%s10181_s1 + $0x4b0] sm:$0xff] %v7393_v45   ;;  %7608 = vst [vmem:[%s10181_s1 + $0x4c8] sm:$0xff] %v7408_v2   ;;  %v9780_v22 = vld [vmem:[#allocation0 + $0x290] sm:$0xff]  ;;  %v9794_v32 = vld [vmem:[#allocation0 + $0x2b8] sm:$0xff] }
 0x266   :  { %7611 = vst [vmem:[%s10181_s1 + $0x4e0] sm:$0xff] %v7423_v7   ;;  %3188 = vst.msk [vmem:[#allocation0 + $0x101] ss:$-24 sm:$0x7] %vm243_vm0, %v8198_v47   ;;  %v9796_v33 = vld [vmem:[#allocation0 + $0x2c0] sm:$0xff]  ;;  %v9798_v34 = vld [vmem:[#allocation0 + $0x2e8] sm:$0xff] }
 0x267   :  { %3190 = vst.msk [vmem:[#allocation0 + $0x41] ss:$72 sm:$0x18] %vm243_vm0, %v8198_v47   ;;  %3192 = vst.msk [vmem:[#allocation0 + $0x1c1] ss:$-24 sm:$0x60] %vm243_vm0, %v8198_v47  }
 0x268   :  { %3194 = vst.msk [vmem:[#allocation0 + $0x172] sm:$0x80] %vm243_vm0, %v8198_v47   ;;  %7614 = vst [vmem:[%s10181_s1 + $0x4f8] sm:$0xff] %v7438_v48   ;;  %v9808_v36 = vld [vmem:[#allocation0 + $0x1f8] sm:$0xff]  ;;  %v9810_v14 = vld [vmem:[#allocation0 + $0x200] sm:$0xff] }
 0x269   :  { %3214 = vst.msk [vmem:[#allocation0 + $0x281] ss:$-24 sm:$0x7] %vm243_vm0, %v8203_v49   ;;  %3216 = vst.msk [vmem:[#allocation0 + $0x1c1] ss:$72 sm:$0x18] %vm243_vm0, %v8203_v49  }
 0x26a   :  { %3218 = vst.msk [vmem:[#allocation0 + $0x341] ss:$-24 sm:$0x60] %vm243_vm0, %v8203_v49   ;;  %3220 = vst.msk [vmem:[#allocation0 + $0x2f2] sm:$0x80] %vm243_vm0, %v8203_v49   ;;  %v9812_v37 = vld [vmem:[#allocation0 + $0x230] sm:$0xff] }
 0x26b   :  { %3201 = vst.msk [vmem:[#allocation0 + $0x1c1] ss:$-24 sm:$0x7] %vm243_vm0, %v8202_v50   ;;  %3203 = vst.msk [vmem:[#allocation0 + $0x101] ss:$72 sm:$0x18] %vm243_vm0, %v8202_v50  }
 0x26c   :  { %3205 = vst.msk [vmem:[#allocation0 + $0x281] ss:$-24 sm:$0x60] %vm243_vm0, %v8202_v50   ;;  %3207 = vst.msk [vmem:[#allocation0 + $0x232] sm:$0x80] %vm243_vm0, %v8202_v50   ;;  %v9826_v43 = vld [vmem:[#allocation0 + $0x2f0] sm:$0xff]  ;;  %v8227_v50 = vunpack.i.l.bf16 %v8226_v35 }
 0x26d   :  { %3175 = vst.msk [vmem:[#allocation0 + $0x41] ss:$-24 sm:$0x7] %vm243_vm0, %v8197_v51   ;;  %3177 = vst.msk [vmem:[#allocation0 - $0x7f] ss:$72 sm:$0x18] %vm243_vm0, %v8197_v51  }
 0x26e   :  { %3179 = vst.msk [vmem:[#allocation0 + $0x101] ss:$-24 sm:$0x60] %vm243_vm0, %v8197_v51   ;;  %3181 = vst.msk [vmem:[#allocation0 + $0xb2] sm:$0x80] %vm243_vm0, %v8197_v51   ;;  %v3557_v10 = vld [vmem:[#allocation0 + $0xd0] sm:$0xff] }
 0x26f   :  { %3240 = vst.msk [vmem:[#allocation0 + $0x401] ss:$-24 sm:$0x7] %vm243_vm0, %v8208_v13   ;;  %3242 = vst.msk [vmem:[#allocation0 + $0x341] ss:$72 sm:$0x18] %vm243_vm0, %v8208_v13   ;;  %v6708_v23 = vpack.c.bf16 %v9754_v57, %v3557_v10 }
 0x270   :  { %3244 = vst.msk [vmem:[#allocation0 + $0x4c1] ss:$-24 sm:$0x60] %vm243_vm0, %v8208_v13   ;;  %3246 = vst.msk [vmem:[#allocation0 + $0x472] sm:$0x80] %vm243_vm0, %v8208_v13   ;;  %v3581_v11 = vld [vmem:[#allocation0 + $0xe8] sm:$0xff] }
 0x271   :  { %3227 = vst.msk [vmem:[#allocation0 + $0x341] ss:$-24 sm:$0x7] %vm243_vm0, %v8207_v54   ;;  %3229 = vst.msk [vmem:[#allocation0 + $0x281] ss:$72 sm:$0x18] %vm243_vm0, %v8207_v54   ;;  %v6713_v24 = vpack.c.bf16 %v3581_v11, %v3573_v62 }
 0x272   :  { %3231 = vst.msk [vmem:[#allocation0 + $0x401] ss:$-24 sm:$0x60] %vm243_vm0, %v8207_v54   ;;  %3233 = vst.msk [vmem:[#allocation0 + $0x3b2] sm:$0x80] %vm243_vm0, %v8207_v54   ;;  %v3605_v12 = vld [vmem:[#allocation0 + $0x100] sm:$0xff] }
 0x273   :  { %3266 = vst.msk [vmem:[#allocation0 + $0x581] ss:$-24 sm:$0x7] %vm243_vm0, %v8213_v55   ;;  %3268 = vst.msk [vmem:[#allocation0 + $0x4c1] ss:$72 sm:$0x18] %vm243_vm0, %v8213_v55   ;;  %v6723_v25 = vpack.c.bf16 %v3613_v63, %v3605_v12 }
 0x274   :  { %3270 = vst.msk [vmem:[#allocation0 + $0x641] ss:$-24 sm:$0x60] %vm243_vm0, %v8213_v55   ;;  %3272 = vst.msk [vmem:[#allocation0 + $0x5f2] sm:$0x80] %vm243_vm0, %v8213_v55   ;;  %v3749_v17 = vld [vmem:[#allocation0 + $0x190] sm:$0xff] }
 0x275   :  { %3253 = vst.msk [vmem:[#allocation0 + $0x4c1] ss:$-24 sm:$0x7] %vm243_vm0, %v8212_v56   ;;  %3255 = vst.msk [vmem:[#allocation0 + $0x401] ss:$72 sm:$0x18] %vm243_vm0, %v8212_v56   ;;  %v6768_v26 = vpack.c.bf16 %v9764_v60, %v3749_v17 }
 0x276   :  { %3257 = vst.msk [vmem:[#allocation0 + $0x581] ss:$-24 sm:$0x60] %vm243_vm0, %v8212_v56   ;;  %3259 = vst.msk [vmem:[#allocation0 + $0x532] sm:$0x80] %vm243_vm0, %v8212_v56   ;;  %v3773_v18 = vld [vmem:[#allocation0 + $0x1a8] sm:$0xff] }
 0x277   :  { %v3797_v19 = vld [vmem:[#allocation0 + $0x1c0] sm:$0xff]  ;;  %3292 = vst.msk [vmem:[#allocation0 + $0x701] ss:$-24 sm:$0x7] %vm243_vm0, %v8218_v3   ;;  %3298 = vst.msk [vmem:[#allocation0 + $0x772] sm:$0x80] %vm243_vm0, %v8218_v3   ;;  %v6773_v27 = vpack.c.bf16 %v3773_v18, %v9766_v61 }
 0x278   :  { %3294 = vst.msk [vmem:[#allocation0 + $0x641] ss:$72 sm:$0x18] %vm243_vm0, %v8218_v3   ;;  %3296 = vst.msk [vmem:[#allocation0 + $0x7c1] ss:$-24 sm:$0x60] %vm243_vm0, %v8218_v3   ;;  %v6783_v28 = vpack.c.bf16 %v9768_v8, %v3797_v19 }
 0x279   :  { %3279 = vst.msk [vmem:[#allocation0 + $0x641] ss:$-24 sm:$0x7] %vm243_vm0, %v8217_v4   ;;  %3281 = vst.msk [vmem:[#allocation0 + $0x581] ss:$72 sm:$0x18] %vm243_vm0, %v8217_v4  }
 0x27a   :  { %3283 = vst.msk [vmem:[#allocation0 + $0x701] ss:$-24 sm:$0x60] %vm243_vm0, %v8217_v4   ;;  %3285 = vst.msk [vmem:[#allocation0 + $0x6b2] sm:$0x80] %vm243_vm0, %v8217_v4   ;;  %v3821_v29 = vld [vmem:[#allocation0 + $0x1d8] sm:$0xff] }
 0x27b   :  { %v3893_v30 = vld [vmem:[#allocation0 + $0x220] sm:$0xff]  ;;  %v3941_v31 = vld [vmem:[#allocation0 + $0x250] sm:$0xff]  ;;  %3318 = vst.msk [vmem:[#allocation0 + $0x881] ss:$-24 sm:$0x7] %vm243_vm0, %v8223_v15   ;;  %v6788_v38 = vpack.c.bf16 %v3821_v29, %v9770_v5  ;;  %v3965_v41 = vld [vmem:[#allocation0 + $0x268] sm:$0xff] }
 0x27c   :  { %3320 = vst.msk [vmem:[#allocation0 + $0x7c1] ss:$72 sm:$0x18] %vm243_vm0, %v8223_v15   ;;  %3322 = vst.msk [vmem:[#allocation0 + $0x941] ss:$-24 sm:$0x60] %vm243_vm0, %v8223_v15   ;;  %v6813_v39 = vpack.c.bf16 %v9772_v6, %v3893_v30  ;;  %v6828_v40 = vpack.c.bf16 %v9774_v9, %v3941_v31  ;;  %v6833_v44 = vpack.c.bf16 %v3965_v41, %v9776_v20 }
 0x27d   :  { %3324 = vst.msk [vmem:[#allocation0 + $0x8f2] sm:$0x80] %vm243_vm0, %v8223_v15   ;;  %3305 = vst.msk [vmem:[#allocation0 + $0x7c1] ss:$-24 sm:$0x7] %vm243_vm0, %v8222_v16   ;;  %v3989_v58 = vld [vmem:[#allocation0 + $0x280] sm:$0xff] }
 0x27e   :  { %3307 = vst.msk [vmem:[#allocation0 + $0x701] ss:$72 sm:$0x18] %vm243_vm0, %v8222_v16   ;;  %3309 = vst.msk [vmem:[#allocation0 + $0x881] ss:$-24 sm:$0x60] %vm243_vm0, %v8222_v16   ;;  %v6843_v45 = vpack.c.bf16 %v9778_v21, %v3989_v58 }
 0x27f   :  { %3311 = vst.msk [vmem:[#allocation0 + $0x832] sm:$0x80] %vm243_vm0, %v8222_v16   ;;  %v4013_v0 = vld [vmem:[#allocation0 + $0x298] sm:$0xff]  ;;  %7468 = vst [vmem:[%s10181_s1 + $0x68] sm:$0xff] %v6708_v23   ;;  %v4037_v7 = vld [vmem:[#allocation0 + $0x2b0] sm:$0xff] }
 0x280   :  { %7469 = vst [vmem:[%s10181_s1 + $0x70] sm:$0xff] %v6713_v24   ;;  %7471 = vst [vmem:[%s10181_s1 + $0x80] sm:$0xff] %v6723_v25   ;;  %v6848_v2 = vpack.c.bf16 %v4013_v0, %v9780_v22  ;;  %v4061_v46 = vld [vmem:[#allocation0 + $0x2c8] sm:$0xff]  ;;  %v4085_v47 = vld [vmem:[#allocation0 + $0x2e0] sm:$0xff]  ;;  %v6858_v51 = vpack.c.bf16 %v9794_v32, %v4037_v7 }
 0x281   :  { %7480 = vst [vmem:[%s10181_s1 + $0xc8] sm:$0xff] %v6768_v26   ;;  %7481 = vst [vmem:[%s10181_s1 + $0xd0] sm:$0xff] %v6773_v27   ;;  %v3373_v48 = vld [vmem:[#allocation0 + $0x18] sm:$0xff]  ;;  %v3717_v49 = vld [vmem:[#allocation0 + $0x170] sm:$0xff]  ;;  %v6863_v52 = vpack.c.bf16 %v4061_v46, %v9796_v33  ;;  %v6873_v53 = vpack.c.bf16 %v9798_v34, %v4085_v47 }
 0x282   :  { %7483 = vst [vmem:[%s10181_s1 + $0xe0] sm:$0xff] %v6783_v28   ;;  %7484 = vst [vmem:[%s10181_s1 + $0xe8] sm:$0xff] %v6788_v38   ;;  %v3845_v13 = vld [vmem:[#allocation0 + $0x1f0] sm:$0xff]  ;;  %v3869_v54 = vld [vmem:[#allocation0 + $0x208] sm:$0xff] }
 0x283   :  { %7489 = vst [vmem:[%s10181_s1 + $0x110] sm:$0xff] %v6813_v39   ;;  %7492 = vst [vmem:[%s10181_s1 + $0x128] sm:$0xff] %v6828_v40   ;;  %v3917_v55 = vld [vmem:[#allocation0 + $0x238] sm:$0xff]  ;;  %v3381_v56 = vld [vmem:[#allocation0 + $0x20] sm:$0xff]  ;;  %v6798_v3 = vpack.c.bf16 %v9808_v36, %v3845_v13  ;;  %v6803_v4 = vpack.c.bf16 %v3869_v54, %v9810_v14 }
 0x284   :  { %v3421_v57 = vld [vmem:[#allocation0 + $0x48] sm:$0xff]  ;;  %v3429_v59 = vld [vmem:[#allocation0 + $0x50] sm:$0xff]  ;;  %3344 = vst.msk [vmem:[#allocation0 + $0xa01] ss:$-24 sm:$0x7] %vm243_vm0, %v8228_v42   ;;  %v9854_v60 = vld [vmem:[#allocation0 + $0x78] sm:$0xff]  ;;  %v6818_v5 = vpack.c.bf16 %v3917_v55, %v9812_v37 }
 0x285   :  { %3346 = vst.msk [vmem:[#allocation0 + $0xa16] sm:$0x8] %vm243_vm0, %v8228_v42   ;;  %v9856_v61 = vld [vmem:[#allocation0 + $0x80] sm:$0xff]  ;;  %7493 = vst [vmem:[%s10181_s1 + $0x130] sm:$0xff] %v6833_v44   ;;  %v4109_v8 = vld [vmem:[#allocation0 + $0x2f8] sm:$0xff] }
 0x286   :  { %7495 = vst [vmem:[%s10181_s1 + $0x140] sm:$0xff] %v6843_v45   ;;  %7496 = vst [vmem:[%s10181_s1 + $0x148] sm:$0xff] %v6848_v2   ;;  %v3725_v62 = vld [vmem:[#allocation0 + $0x178] sm:$0xff]  ;;  %v3365_v63 = vld [vmem:[#allocation0 + $0x10] sm:$0xff]  ;;  %v6878_v18 = vpack.c.bf16 %v4109_v8, %v9826_v43 }
 0x287   :  { %v3517_v1 = vld [vmem:[#allocation0 + $0xa8] sm:$0xff]  ;;  %3331 = vst.msk [vmem:[#allocation0 + $0x941] ss:$-24 sm:$0x7] %vm243_vm0, %v8227_v50   ;;  %3337 = vst.msk [vmem:[#allocation0 + $0x9b2] sm:$0x80] %vm243_vm0, %v8227_v50   ;;  %v6648_v11 = vpack.c.bf16 %v3373_v48, %v3365_v63  ;;  %v6758_v17 = vpack.c.bf16 %v3725_v62, %v3717_v49 }
 0x288   :  { %3333 = vst.msk [vmem:[#allocation0 + $0x881] ss:$72 sm:$0x18] %vm243_vm0, %v8227_v50   ;;  %3335 = vst.msk [vmem:[#allocation0 + $0xa01] ss:$-24 sm:$0x60] %vm243_vm0, %v8227_v50  }
 0x289   :  { %v9874_v6 = vld [vmem:[#allocation0 + $0xb0] sm:$0xff]  ;;  %v9878_v10 = vld [vmem:[#allocation0 + $0x138] sm:$0xff]  ;;  %7498 = vst [vmem:[%s10181_s1 + $0x158] sm:$0xff] %v6858_v51   ;;  %7499 = vst [vmem:[%s10181_s1 + $0x160] sm:$0xff] %v6863_v52  }
 0x28a   :  { %v9876_v9 = vld [vmem:[#allocation0 + $0x110] sm:$0xff]  ;;  %7501 = vst [vmem:[%s10181_s1 + $0x170] sm:$0xff] %v6873_v53   ;;  %v3389_v12 = vld [vmem:[#allocation0 + $0x28] sm:$0xff]  ;;  %v3413_v15 = vld [vmem:[#allocation0 + $0x40] sm:$0xff] }
 0x28b   :  { %v3437_v16 = vld [vmem:[#allocation0 + $0x58] sm:$0xff]  ;;  %v9890_v19 = vld [vmem:[#allocation0 + $0x140] sm:$0xff]  ;;  %v9892_v20 = vld [vmem:[#allocation0 + $0x168] sm:$0xff]  ;;  %v6653_v21 = vpack.c.bf16 %v3389_v12, %v3381_v56  ;;  %v6663_v22 = vpack.c.bf16 %v3421_v57, %v3413_v15  ;;  %7486 = vst [vmem:[%s10181_s1 + $0xf8] sm:$0xff] %v6798_v3  }
 0x28c   :  { %v6668_v23 = vpack.c.bf16 %v3437_v16, %v3429_v59  ;;  %v3509_v24 = vld [vmem:[#allocation0 + $0xa0] sm:$0xff]  ;;  %v3461_v25 = vld [vmem:[#allocation0 + $0x70] sm:$0xff]  ;;  %v3485_v26 = vld [vmem:[#allocation0 + $0x88] sm:$0xff]  ;;  %7487 = vst [vmem:[%s10181_s1 + $0x100] sm:$0xff] %v6803_v4  }
 0x28d   :  { %v4581_v27 = vld [vmem:[#allocation0 + $0x4d0] sm:$0xff]  ;;  %7490 = vst [vmem:[%s10181_s1 + $0x118] sm:$0xff] %v6818_v5   ;;  %7456 = vst [vmem:[%s10181_s1 + $0x8] sm:$0xff] %v6648_v11   ;;  %v6693_v28 = vpack.c.bf16 %v3517_v1, %v3509_v24  ;;  %v3533_v29 = vld [vmem:[#allocation0 + $0xb8] sm:$0xff]  ;;  %v6678_v35 = vpack.c.bf16 %v9854_v60, %v3461_v25  ;;  %v6683_v36 = vpack.c.bf16 %v3485_v26, %v9856_v61 }
 0x28e   :  { %7478 = vst [vmem:[%s10181_s1 + $0xb8] sm:$0xff] %v6758_v17   ;;  %v3629_v30 = vld [vmem:[#allocation0 + $0x118] sm:$0xff]  ;;  %v3653_v31 = vld [vmem:[#allocation0 + $0x130] sm:$0xff]  ;;  %v4629_v33 = vld [vmem:[#allocation0 + $0x500] sm:$0xff]  ;;  %v6698_v40 = vpack.c.bf16 %v3533_v29, %v9874_v6 }
 0x28f   :  { %v4621_v32 = vld [vmem:[#allocation0 + $0x4f8] sm:$0xff]  ;;  %v4669_v34 = vld [vmem:[#allocation0 + $0x528] sm:$0xff]  ;;  %7502 = vst [vmem:[%s10181_s1 + $0x178] sm:$0xff] %v6878_v18   ;;  %7457 = vst [vmem:[%s10181_s1 + $0x10] sm:$0xff] %v6653_v21   ;;  %v6728_v41 = vpack.c.bf16 %v3629_v30, %v9876_v9  ;;  %v6738_v58 = vpack.c.bf16 %v9878_v10, %v3653_v31 }
 0x290   :  { %7459 = vst [vmem:[%s10181_s1 + $0x20] sm:$0xff] %v6663_v22   ;;  %7460 = vst [vmem:[%s10181_s1 + $0x28] sm:$0xff] %v6668_v23   ;;  %v3677_v14 = vld [vmem:[#allocation0 + $0x148] sm:$0xff]  ;;  %v3701_v37 = vld [vmem:[#allocation0 + $0x160] sm:$0xff] }
 0x291   :  { %v4589_v38 = vld [vmem:[#allocation0 + $0x4d8] sm:$0xff]  ;;  %7465 = vst [vmem:[%s10181_s1 + $0x50] sm:$0xff] %v6693_v28   ;;  %v4613_v42 = vld [vmem:[#allocation0 + $0x4f0] sm:$0xff]  ;;  %v4637_v43 = vld [vmem:[#allocation0 + $0x508] sm:$0xff]  ;;  %v6743_v2 = vpack.c.bf16 %v3677_v14, %v9890_v19  ;;  %v6753_v7 = vpack.c.bf16 %v9892_v20, %v3701_v37 }
 0x292   :  { %v4717_v39 = vld [vmem:[#allocation0 + $0x558] sm:$0xff]  ;;  %v7028_v0 = vpack.c.bf16 %v4589_v38, %v4581_v27  ;;  %v4661_v44 = vld [vmem:[#allocation0 + $0x520] sm:$0xff]  ;;  %v4765_v45 = vld [vmem:[#allocation0 + $0x588] sm:$0xff]  ;;  %7462 = vst [vmem:[%s10181_s1 + $0x38] sm:$0xff] %v6678_v35   ;;  %v7038_v46 = vpack.c.bf16 %v4621_v32, %v4613_v42  ;;  %v7043_v47 = vpack.c.bf16 %v4637_v43, %v4629_v33 }
 0x293   :  { %7463 = vst [vmem:[%s10181_s1 + $0x40] sm:$0xff] %v6683_v36   ;;  %v7053_v48 = vpack.c.bf16 %v4669_v34, %v4661_v44  ;;  %v4677_v49 = vld [vmem:[#allocation0 + $0x530] sm:$0xff]  ;;  %v4685_v50 = vld [vmem:[#allocation0 + $0x538] sm:$0xff]  ;;  %v4861_v52 = vld [vmem:[#allocation0 + $0x5e8] sm:$0xff] }
 0x294   :  { %v4709_v51 = vld [vmem:[#allocation0 + $0x550] sm:$0xff]  ;;  %7466 = vst [vmem:[%s10181_s1 + $0x58] sm:$0xff] %v6698_v40   ;;  %7472 = vst [vmem:[%s10181_s1 + $0x88] sm:$0xff] %v6728_v41   ;;  %v4525_v53 = vld [vmem:[#allocation0 + $0x498] sm:$0xff]  ;;  %v7058_v55 = vpack.c.bf16 %v4685_v50, %v4677_v49 }
 0x295   :  { %7474 = vst [vmem:[%s10181_s1 + $0x98] sm:$0xff] %v6738_v58   ;;  %v4533_v13 = vld [vmem:[#allocation0 + $0x4a0] sm:$0xff]  ;;  %v4573_v54 = vld [vmem:[#allocation0 + $0x4c8] sm:$0xff]  ;;  %7532 = vst [vmem:[%s10181_s1 + $0x268] sm:$0xff] %v7028_v0   ;;  %v7068_v56 = vpack.c.bf16 %v4717_v39, %v4709_v51 }
 0x296   :  { %v4725_v57 = vld [vmem:[#allocation0 + $0x560] sm:$0xff]  ;;  %v4733_v59 = vld [vmem:[#allocation0 + $0x568] sm:$0xff]  ;;  %7475 = vst [vmem:[%s10181_s1 + $0xa0] sm:$0xff] %v6743_v2   ;;  %7477 = vst [vmem:[%s10181_s1 + $0xb0] sm:$0xff] %v6753_v7  }
 0x297   :  { %v4757_v60 = vld [vmem:[#allocation0 + $0x580] sm:$0xff]  ;;  %v4813_v61 = vld [vmem:[#allocation0 + $0x5b8] sm:$0xff]  ;;  %v4869_v62 = vld [vmem:[#allocation0 + $0x5f0] sm:$0xff]  ;;  %7534 = vst [vmem:[%s10181_s1 + $0x278] sm:$0xff] %v7038_v46   ;;  %v7073_v63 = vpack.c.bf16 %v4733_v59, %v4725_v57 }
 0x298   :  { %v4821_v8 = vld [vmem:[#allocation0 + $0x5c0] sm:$0xff]  ;;  %7535 = vst [vmem:[%s10181_s1 + $0x280] sm:$0xff] %v7043_v47   ;;  %7537 = vst [vmem:[%s10181_s1 + $0x290] sm:$0xff] %v7053_v48   ;;  %v7083_v1 = vpack.c.bf16 %v4765_v45, %v4757_v60  ;;  %v4773_v3 = vld [vmem:[#allocation0 + $0x590] sm:$0xff] }
 0x299   :  { %v4781_v4 = vld [vmem:[#allocation0 + $0x598] sm:$0xff]  ;;  %v4853_v5 = vld [vmem:[#allocation0 + $0x5e0] sm:$0xff]  ;;  %7538 = vst [vmem:[%s10181_s1 + $0x298] sm:$0xff] %v7058_v55   ;;  %7540 = vst [vmem:[%s10181_s1 + $0x2a8] sm:$0xff] %v7068_v56  }
 0x29a   :  { %v7088_v6 = vpack.c.bf16 %v4781_v4, %v4773_v3  ;;  %v7113_v9 = vpack.c.bf16 %v4861_v52, %v4853_v5  ;;  %v4517_v10 = vld [vmem:[#allocation0 + $0x490] sm:$0xff]  ;;  %v4541_v11 = vld [vmem:[#allocation0 + $0x4a8] sm:$0xff]  ;;  %v4565_v12 = vld [vmem:[#allocation0 + $0x4c0] sm:$0xff]  ;;  %7541 = vst [vmem:[%s10181_s1 + $0x2b0] sm:$0xff] %v7073_v63  }
 0x29b   :  { %v4141_v15 = vld [vmem:[#allocation0 + $0x318] sm:$0xff]  ;;  %v4477_v16 = vld [vmem:[#allocation0 + $0x468] sm:$0xff]  ;;  %7543 = vst [vmem:[%s10181_s1 + $0x2c0] sm:$0xff] %v7083_v1   ;;  %v4805_v17 = vld [vmem:[#allocation0 + $0x5b0] sm:$0xff]  ;;  %v7008_v21 = vpack.c.bf16 %v4525_v53, %v4517_v10  ;;  %v7013_v22 = vpack.c.bf16 %v4541_v11, %v4533_v13  ;;  %v7023_v23 = vpack.c.bf16 %v4573_v54, %v4565_v12 }
 0x29c   :  { %v4829_v18 = vld [vmem:[#allocation0 + $0x5c8] sm:$0xff]  ;;  %v4877_v19 = vld [vmem:[#allocation0 + $0x5f8] sm:$0xff]  ;;  %7544 = vst [vmem:[%s10181_s1 + $0x2c8] sm:$0xff] %v7088_v6   ;;  %7549 = vst [vmem:[%s10181_s1 + $0x2f0] sm:$0xff] %v7113_v9   ;;  %v7098_v28 = vpack.c.bf16 %v4813_v61, %v4805_v17 }
 0x29d   :  { %v4189_v20 = vld [vmem:[#allocation0 + $0x348] sm:$0xff]  ;;  %v4397_v24 = vld [vmem:[#allocation0 + $0x418] sm:$0xff]  ;;  %v4469_v25 = vld [vmem:[#allocation0 + $0x460] sm:$0xff]  ;;  %v7103_v29 = vpack.c.bf16 %v4829_v18, %v4821_v8  ;;  %v7118_v30 = vpack.c.bf16 %v4877_v19, %v4869_v62  ;;  %7528 = vst [vmem:[%s10181_s1 + $0x248] sm:$0xff] %v7008_v21  }
 0x29e   :  { %v4133_v26 = vld [vmem:[#allocation0 + $0x310] sm:$0xff]  ;;  %v4237_v27 = vld [vmem:[#allocation0 + $0x378] sm:$0xff]  ;;  %v4285_v32 = vld [vmem:[#allocation0 + $0x3a8] sm:$0xff]  ;;  %v6993_v14 = vpack.c.bf16 %v4477_v16, %v4469_v25  ;;  %7529 = vst [vmem:[%s10181_s1 + $0x250] sm:$0xff] %v7013_v22  }
 0x29f   :  { %v4197_v31 = vld [vmem:[#allocation0 + $0x350] sm:$0xff]  ;;  %v6888_v33 = vpack.c.bf16 %v4141_v15, %v4133_v26  ;;  %v4149_v34 = vld [vmem:[#allocation0 + $0x320] sm:$0xff]  ;;  %v4157_v35 = vld [vmem:[#allocation0 + $0x328] sm:$0xff]  ;;  %7531 = vst [vmem:[%s10181_s1 + $0x260] sm:$0xff] %v7023_v23  }
 0x2a0   :  { %v4181_v36 = vld [vmem:[#allocation0 + $0x340] sm:$0xff]  ;;  %v4293_v37 = vld [vmem:[#allocation0 + $0x3b0] sm:$0xff]  ;;  %v4333_v38 = vld [vmem:[#allocation0 + $0x3d8] sm:$0xff]  ;;  %v6893_v40 = vpack.c.bf16 %v4157_v35, %v4149_v34  ;;  %7546 = vst [vmem:[%s10181_s1 + $0x2d8] sm:$0xff] %v7098_v28  }
 0x2a1   :  { %v4341_v39 = vld [vmem:[#allocation0 + $0x3e0] sm:$0xff]  ;;  %v6903_v41 = vpack.c.bf16 %v4189_v20, %v4181_v36  ;;  %v4229_v58 = vld [vmem:[#allocation0 + $0x370] sm:$0xff]  ;;  %v4253_v42 = vld [vmem:[#allocation0 + $0x388] sm:$0xff]  ;;  %7547 = vst [vmem:[%s10181_s1 + $0x2e0] sm:$0xff] %v7103_v29  }
 0x2a2   :  { %v4245_v0 = vld [vmem:[#allocation0 + $0x380] sm:$0xff]  ;;  %7550 = vst [vmem:[%s10181_s1 + $0x2f8] sm:$0xff] %v7118_v30   ;;  %v4381_v43 = vld [vmem:[#allocation0 + $0x408] sm:$0xff]  ;;  %v4429_v44 = vld [vmem:[#allocation0 + $0x438] sm:$0xff]  ;;  %v6918_v2 = vpack.c.bf16 %v4237_v27, %v4229_v58 }
 0x2a3   :  { %v4437_v45 = vld [vmem:[#allocation0 + $0x440] sm:$0xff]  ;;  %7504 = vst [vmem:[%s10181_s1 + $0x188] sm:$0xff] %v6888_v33   ;;  %v6923_v7 = vpack.c.bf16 %v4253_v42, %v4245_v0  ;;  %v4389_v46 = vld [vmem:[#allocation0 + $0x410] sm:$0xff]  ;;  %7525 = vst [vmem:[%s10181_s1 + $0x230] sm:$0xff] %v6993_v14  }
 0x2a4   :  { %v4205_v47 = vld [vmem:[#allocation0 + $0x358] sm:$0xff]  ;;  %v4277_v48 = vld [vmem:[#allocation0 + $0x3a0] sm:$0xff]  ;;  %v4485_v49 = vld [vmem:[#allocation0 + $0x470] sm:$0xff]  ;;  %7505 = vst [vmem:[%s10181_s1 + $0x190] sm:$0xff] %v6893_v40   ;;  %v6968_v50 = vpack.c.bf16 %v4397_v24, %v4389_v46 }
 0x2a5   :  { %7507 = vst [vmem:[%s10181_s1 + $0x1a0] sm:$0xff] %v6903_v41   ;;  %v4301_v51 = vld [vmem:[#allocation0 + $0x3b8] sm:$0xff]  ;;  %v4325_v52 = vld [vmem:[#allocation0 + $0x3d0] sm:$0xff]  ;;  %v4349_v53 = vld [vmem:[#allocation0 + $0x3e8] sm:$0xff]  ;;  %v6908_v54 = vpack.c.bf16 %v4205_v47, %v4197_v31  ;;  %v6933_v55 = vpack.c.bf16 %v4285_v32, %v4277_v48 }
 0x2a6   :  { %v5293_v13 = vld [vmem:[#allocation0 + $0x798] sm:$0xff]  ;;  %7510 = vst [vmem:[%s10181_s1 + $0x1b8] sm:$0xff] %v6918_v2   ;;  %7511 = vst [vmem:[%s10181_s1 + $0x1c0] sm:$0xff] %v6923_v7   ;;  %v4373_v56 = vld [vmem:[#allocation0 + $0x400] sm:$0xff]  ;;  %v6938_v61 = vpack.c.bf16 %v4301_v51, %v4293_v37  ;;  %v6948_v8 = vpack.c.bf16 %v4333_v38, %v4325_v52  ;;  %v6953_v62 = vpack.c.bf16 %v4349_v53, %v4341_v39 }
 0x2a7   :  { %v4421_v57 = vld [vmem:[#allocation0 + $0x430] sm:$0xff]  ;;  %v4445_v59 = vld [vmem:[#allocation0 + $0x448] sm:$0xff]  ;;  %7520 = vst [vmem:[%s10181_s1 + $0x208] sm:$0xff] %v6968_v50   ;;  %v4493_v63 = vld [vmem:[#allocation0 + $0x478] sm:$0xff]  ;;  %v6963_v5 = vpack.c.bf16 %v4381_v43, %v4373_v56 }
 0x2a8   :  { %v5341_v60 = vld [vmem:[#allocation0 + $0x7c8] sm:$0xff]  ;;  %v5285_v1 = vld [vmem:[#allocation0 + $0x790] sm:$0xff]  ;;  %v5301_v3 = vld [vmem:[#allocation0 + $0x7a0] sm:$0xff]  ;;  %v6978_v6 = vpack.c.bf16 %v4429_v44, %v4421_v57  ;;  %v6983_v9 = vpack.c.bf16 %v4445_v59, %v4437_v45  ;;  %7508 = vst [vmem:[%s10181_s1 + $0x1a8] sm:$0xff] %v6908_v54   ;;  %v6998_v17 = vpack.c.bf16 %v4493_v63, %v4485_v49 }
 0x2a9   :  { %v5389_v4 = vld [vmem:[#allocation0 + $0x7f8] sm:$0xff]  ;;  %7513 = vst [vmem:[%s10181_s1 + $0x1d0] sm:$0xff] %v6933_v55   ;;  %v7248_v10 = vpack.c.bf16 %v5293_v13, %v5285_v1  ;;  %v5309_v11 = vld [vmem:[#allocation0 + $0x7a8] sm:$0xff]  ;;  %v5333_v12 = vld [vmem:[#allocation0 + $0x7c0] sm:$0xff] }
 0x2aa   :  { %v5349_v15 = vld [vmem:[#allocation0 + $0x7d0] sm:$0xff]  ;;  %v5437_v16 = vld [vmem:[#allocation0 + $0x828] sm:$0xff]  ;;  %7514 = vst [vmem:[%s10181_s1 + $0x1d8] sm:$0xff] %v6938_v61   ;;  %7516 = vst [vmem:[%s10181_s1 + $0x1e8] sm:$0xff] %v6948_v8   ;;  %v7253_v18 = vpack.c.bf16 %v5309_v11, %v5301_v3  ;;  %v7263_v19 = vpack.c.bf16 %v5341_v60, %v5333_v12 }
 0x2ab   :  { %7517 = vst [vmem:[%s10181_s1 + $0x1f0] sm:$0xff] %v6953_v62   ;;  %v5357_v20 = vld [vmem:[#allocation0 + $0x7d8] sm:$0xff]  ;;  %v5381_v21 = vld [vmem:[#allocation0 + $0x7f0] sm:$0xff]  ;;  %v5397_v22 = vld [vmem:[#allocation0 + $0x800] sm:$0xff] }
 0x2ac   :  { %v5485_v23 = vld [vmem:[#allocation0 + $0x858] sm:$0xff]  ;;  %7519 = vst [vmem:[%s10181_s1 + $0x200] sm:$0xff] %v6963_v5   ;;  %7522 = vst [vmem:[%s10181_s1 + $0x218] sm:$0xff] %v6978_v6   ;;  %v7268_v24 = vpack.c.bf16 %v5357_v20, %v5349_v15  ;;  %v7278_v25 = vpack.c.bf16 %v5389_v4, %v5381_v21  ;;  %v5405_v26 = vld [vmem:[#allocation0 + $0x808] sm:$0xff] }
 0x2ad   :  { %7523 = vst [vmem:[%s10181_s1 + $0x220] sm:$0xff] %v6983_v9   ;;  %7576 = vst [vmem:[%s10181_s1 + $0x3c8] sm:$0xff] %v7248_v10   ;;  %v5429_v27 = vld [vmem:[#allocation0 + $0x820] sm:$0xff]  ;;  %v5445_v28 = vld [vmem:[#allocation0 + $0x830] sm:$0xff]  ;;  %v7283_v30 = vpack.c.bf16 %v5405_v26, %v5397_v22 }
 0x2ae   :  { %v5533_v29 = vld [vmem:[#allocation0 + $0x888] sm:$0xff]  ;;  %7526 = vst [vmem:[%s10181_s1 + $0x238] sm:$0xff] %v6998_v17   ;;  %7577 = vst [vmem:[%s10181_s1 + $0x3d0] sm:$0xff] %v7253_v18   ;;  %v7293_v31 = vpack.c.bf16 %v5437_v16, %v5429_v27  ;;  %v5453_v32 = vld [vmem:[#allocation0 + $0x838] sm:$0xff] }
 0x2af   :  { %7579 = vst [vmem:[%s10181_s1 + $0x3e0] sm:$0xff] %v7263_v19   ;;  %v5477_v33 = vld [vmem:[#allocation0 + $0x850] sm:$0xff]  ;;  %v5493_v34 = vld [vmem:[#allocation0 + $0x860] sm:$0xff]  ;;  %v5581_v35 = vld [vmem:[#allocation0 + $0x8b8] sm:$0xff]  ;;  %v7298_v36 = vpack.c.bf16 %v5453_v32, %v5445_v28 }
 0x2b0   :  { %7580 = vst [vmem:[%s10181_s1 + $0x3e8] sm:$0xff] %v7268_v24   ;;  %7582 = vst [vmem:[%s10181_s1 + $0x3f8] sm:$0xff] %v7278_v25   ;;  %v7308_v14 = vpack.c.bf16 %v5485_v23, %v5477_v33  ;;  %v5501_v37 = vld [vmem:[#allocation0 + $0x868] sm:$0xff]  ;;  %v5525_v38 = vld [vmem:[#allocation0 + $0x880] sm:$0xff] }
 0x2b1   :  { %v5541_v39 = vld [vmem:[#allocation0 + $0x890] sm:$0xff]  ;;  %v5629_v40 = vld [vmem:[#allocation0 + $0x8e8] sm:$0xff]  ;;  %7583 = vst [vmem:[%s10181_s1 + $0x400] sm:$0xff] %v7283_v30   ;;  %7585 = vst [vmem:[%s10181_s1 + $0x410] sm:$0xff] %v7293_v31   ;;  %v7313_v41 = vpack.c.bf16 %v5501_v37, %v5493_v34  ;;  %v7323_v58 = vpack.c.bf16 %v5533_v29, %v5525_v38 }
 0x2b2   :  { %v5549_v0 = vld [vmem:[#allocation0 + $0x898] sm:$0xff]  ;;  %v5573_v42 = vld [vmem:[#allocation0 + $0x8b0] sm:$0xff]  ;;  %v5589_v43 = vld [vmem:[#allocation0 + $0x8c0] sm:$0xff]  ;;  %7586 = vst [vmem:[%s10181_s1 + $0x418] sm:$0xff] %v7298_v36  }
 0x2b3   :  { %v5197_v44 = vld [vmem:[#allocation0 + $0x738] sm:$0xff]  ;;  %7588 = vst [vmem:[%s10181_s1 + $0x428] sm:$0xff] %v7308_v14   ;;  %v7328_v45 = vpack.c.bf16 %v5549_v0, %v5541_v39  ;;  %v7338_v2 = vpack.c.bf16 %v5581_v35, %v5573_v42  ;;  %v5597_v7 = vld [vmem:[#allocation0 + $0x8c8] sm:$0xff]  ;;  %v5621_v46 = vld [vmem:[#allocation0 + $0x8e0] sm:$0xff] }
 0x2b4   :  { %v5637_v47 = vld [vmem:[#allocation0 + $0x8f0] sm:$0xff]  ;;  %v4909_v48 = vld [vmem:[#allocation0 + $0x618] sm:$0xff]  ;;  %v5245_v49 = vld [vmem:[#allocation0 + $0x768] sm:$0xff]  ;;  %7589 = vst [vmem:[%s10181_s1 + $0x430] sm:$0xff] %v7313_v41   ;;  %v7343_v50 = vpack.c.bf16 %v5597_v7, %v5589_v43  ;;  %v7353_v51 = vpack.c.bf16 %v5629_v40, %v5621_v46 }
 0x2b5   :  { %7591 = vst [vmem:[%s10181_s1 + $0x440] sm:$0xff] %v7323_v58   ;;  %v5645_v52 = vld [vmem:[#allocation0 + $0x8f8] sm:$0xff]  ;;  %v5189_v13 = vld [vmem:[#allocation0 + $0x730] sm:$0xff]  ;;  %v4957_v54 = vld [vmem:[#allocation0 + $0x648] sm:$0xff] }
 0x2b6   :  { %v5165_v53 = vld [vmem:[#allocation0 + $0x718] sm:$0xff]  ;;  %7592 = vst [vmem:[%s10181_s1 + $0x448] sm:$0xff] %v7328_v45   ;;  %7594 = vst [vmem:[%s10181_s1 + $0x458] sm:$0xff] %v7338_v2   ;;  %v7358_v55 = vpack.c.bf16 %v5645_v52, %v5637_v47  ;;  %v5213_v56 = vld [vmem:[#allocation0 + $0x748] sm:$0xff]  ;;  %v7218_v61 = vpack.c.bf16 %v5197_v44, %v5189_v13 }
 0x2b7   :  { %v5237_v57 = vld [vmem:[#allocation0 + $0x760] sm:$0xff]  ;;  %v4901_v59 = vld [vmem:[#allocation0 + $0x610] sm:$0xff]  ;;  %v5005_v60 = vld [vmem:[#allocation0 + $0x678] sm:$0xff]  ;;  %7595 = vst [vmem:[%s10181_s1 + $0x460] sm:$0xff] %v7343_v50  }
 0x2b8   :  { %v4965_v8 = vld [vmem:[#allocation0 + $0x650] sm:$0xff]  ;;  %7597 = vst [vmem:[%s10181_s1 + $0x470] sm:$0xff] %v7353_v51   ;;  %v7128_v62 = vpack.c.bf16 %v4909_v48, %v4901_v59  ;;  %v4917_v63 = vld [vmem:[#allocation0 + $0x620] sm:$0xff]  ;;  %v4925_v1 = vld [vmem:[#allocation0 + $0x628] sm:$0xff]  ;;  %v7233_v4 = vpack.c.bf16 %v5245_v49, %v5237_v57 }
 0x2b9   :  { %v4949_v3 = vld [vmem:[#allocation0 + $0x640] sm:$0xff]  ;;  %v5053_v5 = vld [vmem:[#allocation0 + $0x6a8] sm:$0xff]  ;;  %v5061_v6 = vld [vmem:[#allocation0 + $0x6b0] sm:$0xff]  ;;  %7598 = vst [vmem:[%s10181_s1 + $0x478] sm:$0xff] %v7358_v55   ;;  %v7133_v10 = vpack.c.bf16 %v4925_v1, %v4917_v63 }
 0x2ba   :  { %v5101_v9 = vld [vmem:[#allocation0 + $0x6d8] sm:$0xff]  ;;  %v7143_v11 = vpack.c.bf16 %v4957_v54, %v4949_v3  ;;  %v4997_v12 = vld [vmem:[#allocation0 + $0x670] sm:$0xff]  ;;  %v5013_v15 = vld [vmem:[#allocation0 + $0x680] sm:$0xff]  ;;  %7570 = vst [vmem:[%s10181_s1 + $0x398] sm:$0xff] %v7218_v61  }
 0x2bb   :  { %v5021_v16 = vld [vmem:[#allocation0 + $0x688] sm:$0xff]  ;;  %v5109_v17 = vld [vmem:[#allocation0 + $0x6e0] sm:$0xff]  ;;  %v5253_v19 = vld [vmem:[#allocation0 + $0x770] sm:$0xff]  ;;  %7552 = vst [vmem:[%s10181_s1 + $0x308] sm:$0xff] %v7128_v62   ;;  %v7158_v20 = vpack.c.bf16 %v5005_v60, %v4997_v12 }
 0x2bc   :  { %v5149_v18 = vld [vmem:[#allocation0 + $0x708] sm:$0xff]  ;;  %v7163_v21 = vpack.c.bf16 %v5021_v16, %v5013_v15  ;;  %v5157_v22 = vld [vmem:[#allocation0 + $0x710] sm:$0xff]  ;;  %v5205_v23 = vld [vmem:[#allocation0 + $0x740] sm:$0xff]  ;;  %7573 = vst [vmem:[%s10181_s1 + $0x3b0] sm:$0xff] %v7233_v4  }
 0x2bd   :  { %v4973_v24 = vld [vmem:[#allocation0 + $0x658] sm:$0xff]  ;;  %7553 = vst [vmem:[%s10181_s1 + $0x310] sm:$0xff] %v7133_v10   ;;  %7555 = vst [vmem:[%s10181_s1 + $0x320] sm:$0xff] %v7143_v11   ;;  %v7208_v25 = vpack.c.bf16 %v5165_v53, %v5157_v22  ;;  %v7223_v26 = vpack.c.bf16 %v5213_v56, %v5205_v23  ;;  %v5045_v27 = vld [vmem:[#allocation0 + $0x6a0] sm:$0xff] }
 0x2be   :  { %v5069_v28 = vld [vmem:[#allocation0 + $0x6b8] sm:$0xff]  ;;  %v5093_v29 = vld [vmem:[#allocation0 + $0x6d0] sm:$0xff]  ;;  %v7148_v31 = vpack.c.bf16 %v4973_v24, %v4965_v8  ;;  %7558 = vst [vmem:[%s10181_s1 + $0x338] sm:$0xff] %v7158_v20   ;;  %7559 = vst [vmem:[%s10181_s1 + $0x340] sm:$0xff] %v7163_v21   ;;  %v7173_v36 = vpack.c.bf16 %v5053_v5, %v5045_v27 }
 0x2bf   :  { %v5869_v30 = vld [vmem:[#allocation0 + $0x9d8] sm:$0xff]  ;;  %v5117_v32 = vld [vmem:[#allocation0 + $0x6e8] sm:$0xff]  ;;  %v5141_v33 = vld [vmem:[#allocation0 + $0x700] sm:$0xff]  ;;  %v7178_v14 = vpack.c.bf16 %v5069_v28, %v5061_v6  ;;  %v7188_v37 = vpack.c.bf16 %v5101_v9, %v5093_v29  ;;  %7568 = vst [vmem:[%s10181_s1 + $0x388] sm:$0xff] %v7208_v25  }
 0x2c0   :  { %v5261_v34 = vld [vmem:[#allocation0 + $0x778] sm:$0xff]  ;;  %7571 = vst [vmem:[%s10181_s1 + $0x3a0] sm:$0xff] %v7223_v26   ;;  %v5861_v38 = vld [vmem:[#allocation0 + $0x9d0] sm:$0xff]  ;;  %v5909_v39 = vld [vmem:[#allocation0 + $0xa00] sm:$0xff]  ;;  %v7193_v58 = vpack.c.bf16 %v5117_v32, %v5109_v17  ;;  %v7203_v0 = vpack.c.bf16 %v5149_v18, %v5141_v33 }
 0x2c1   :  { %v5677_v35 = vld [vmem:[#allocation0 + $0x918] sm:$0xff]  ;;  %v5725_v40 = vld [vmem:[#allocation0 + $0x948] sm:$0xff]  ;;  %7556 = vst [vmem:[%s10181_s1 + $0x328] sm:$0xff] %v7148_v31   ;;  %v7238_v42 = vpack.c.bf16 %v5261_v34, %v5253_v19  ;;  %v5669_v45 = vld [vmem:[#allocation0 + $0x910] sm:$0xff]  ;;  %v7428_v46 = vpack.c.bf16 %v5869_v30, %v5861_v38 }
 0x2c2   :  { %v5917_v41 = vld [vmem:[#allocation0 + $0xa08] sm:$0xff]  ;;  %v5933_v44 = vld [vmem:[#allocation0 + $0xa18] sm:$0xff]  ;;  %v5685_v2 = vld [vmem:[#allocation0 + $0x920] sm:$0xff]  ;;  %7561 = vst [vmem:[%s10181_s1 + $0x350] sm:$0xff] %v7173_v36   ;;  %v7368_v48 = vpack.c.bf16 %v5677_v35, %v5669_v45 }
 0x2c3   :  { %v5885_v43 = vld [vmem:[#allocation0 + $0x9e8] sm:$0xff]  ;;  %v5773_v7 = vld [vmem:[#allocation0 + $0x978] sm:$0xff]  ;;  %v7443_v47 = vpack.c.bf16 %v5917_v41, %v5909_v39  ;;  %7562 = vst [vmem:[%s10181_s1 + $0x358] sm:$0xff] %v7178_v14   ;;  %7564 = vst [vmem:[%s10181_s1 + $0x368] sm:$0xff] %v7188_v37  }
 0x2c4   :  { %v5693_v49 = vld [vmem:[#allocation0 + $0x928] sm:$0xff]  ;;  %v5717_v50 = vld [vmem:[#allocation0 + $0x940] sm:$0xff]  ;;  %v5733_v51 = vld [vmem:[#allocation0 + $0x950] sm:$0xff]  ;;  %7565 = vst [vmem:[%s10181_s1 + $0x370] sm:$0xff] %v7193_v58  }
 0x2c5   :  { %v5821_v52 = vld [vmem:[#allocation0 + $0x9a8] sm:$0xff]  ;;  %7567 = vst [vmem:[%s10181_s1 + $0x380] sm:$0xff] %v7203_v0   ;;  %7574 = vst [vmem:[%s10181_s1 + $0x3b8] sm:$0xff] %v7238_v42   ;;  %v7373_v53 = vpack.c.bf16 %v5693_v49, %v5685_v2  ;;  %v7383_v13 = vpack.c.bf16 %v5725_v40, %v5717_v50  ;;  %v5741_v54 = vld [vmem:[#allocation0 + $0x958] sm:$0xff] }
 0x2c6   :  { %v5765_v55 = vld [vmem:[#allocation0 + $0x970] sm:$0xff]  ;;  %v5781_v56 = vld [vmem:[#allocation0 + $0x980] sm:$0xff]  ;;  %7612 = vst [vmem:[%s10181_s1 + $0x4e8] sm:$0xff] %v7428_v46   ;;  %7615 = vst [vmem:[%s10181_s1 + $0x500] sm:$0xff] %v7443_v47   ;;  %v7388_v57 = vpack.c.bf16 %v5741_v54, %v5733_v51 }
 0x2c7   :  { %7600 = vst [vmem:[%s10181_s1 + $0x488] sm:$0xff] %v7368_v48   ;;  %v7398_v59 = vpack.c.bf16 %v5773_v7, %v5765_v55  ;;  %v5789_v60 = vld [vmem:[#allocation0 + $0x988] sm:$0xff]  ;;  %v5813_v61 = vld [vmem:[#allocation0 + $0x9a0] sm:$0xff]  ;;  %v5829_v8 = vld [vmem:[#allocation0 + $0x9b0] sm:$0xff] }
 0x2c8   :  { %7601 = vst [vmem:[%s10181_s1 + $0x490] sm:$0xff] %v7373_v53   ;;  %7603 = vst [vmem:[%s10181_s1 + $0x4a0] sm:$0xff] %v7383_v13   ;;  %v7403_v62 = vpack.c.bf16 %v5789_v60, %v5781_v56  ;;  %v7413_v63 = vpack.c.bf16 %v5821_v52, %v5813_v61  ;;  %v5837_v1 = vld [vmem:[#allocation0 + $0x9b8] sm:$0xff]  ;;  %v5877_v3 = vld [vmem:[#allocation0 + $0x9e0] sm:$0xff] }
 0x2c9   :  { %v5925_v4 = vld [vmem:[#allocation0 + $0xa10] sm:$0xff]  ;;  %7604 = vst [vmem:[%s10181_s1 + $0x4a8] sm:$0xff] %v7388_v57   ;;  %7606 = vst [vmem:[%s10181_s1 + $0x4b8] sm:$0xff] %v7398_v59   ;;  %v7418_v5 = vpack.c.bf16 %v5837_v1, %v5829_v8  ;;  %v7433_v6 = vpack.c.bf16 %v5885_v43, %v5877_v3 }
 0x2ca   :  { %v7448_v9 = vpack.c.bf16 %v5933_v44, %v5925_v4  ;;  %7607 = vst [vmem:[%s10181_s1 + $0x4c0] sm:$0xff] %v7403_v62   ;;  %7609 = vst [vmem:[%s10181_s1 + $0x4d0] sm:$0xff] %v7413_v63  }
 0x2cb   :  { %7610 = vst [vmem:[%s10181_s1 + $0x4d8] sm:$0xff] %v7418_v5   ;;  %7613 = vst [vmem:[%s10181_s1 + $0x4f0] sm:$0xff] %v7433_v6  }
 0x2cc   :  { %7616 = vst [vmem:[%s10181_s1 + $0x508] sm:$0xff] %v7448_v9  }

// kernel: conv2d_sigmoid.1
= control target key start
LH: loop header
LB: loop body
LE: loop exit
PB: predicated region body
PF: predicated region fallthrough
CT: control target
= control target key end

     0   :  { %vm260_vm0 = vcmask 1043456   ;;  %vm199_vm1 = vcmask 64512   ;;  %vm959_vm2 = vsmask.f32 7424  ;;  %vm3877_vm3 = vsmask.f32 6400  ;;  %s7884_s1 = inlined_call_operand.vmem [shape: bf16[9,8,128], index: 1, kind: input, shape index: {}]   ;;  %s7885_s0 = inlined_call_operand.vmem [shape: bf16[4,352,8], index: 0, kind: input, shape index: {}]   ;;  %s7886_s2 = inlined_call_operand.vmem [shape: f32[1,128], index: 2, kind: input, shape index: {}]   ;;  %s7887_s3 = inlined_call_operand.vmem [shape: f32[320,128], index: 3, kind: output, shape index: {}]  }
   0x1   :  { %v4733_v0 = vld [vmem:[%s7884_s1 + $0x4] sm:$0xf]  ;;  %v5868_v2 = vld [vmem:[%s7885_s0 + $0xb0] sm:$0xff]   ;;  %v5870_v4 = vld [vmem:[%s7885_s0 + $0xb8] sm:$0xff]   ;;  %vm3050_vm4 = vcmask 1046528  }
   0x2   :  { %5858 = vmatprep.subr.msk.bf16.mxu0 %vm260_vm0, %v4733_v0  ;;  %5859 = vmatprep.subr.msk.bf16.mxu1 %vm260_vm0, %v4733_v0  ;;  %v262_v1 = vsel %vm260_vm0, %v4733_v0, 0  ;;  %v5869_v3 = vld [vmem:[%s7885_s0 + $0x100] sm:$0xff]   ;;  %v5871_v5 = vld [vmem:[%s7885_s0 + $0x108] sm:$0xff]   ;;  %v5873_v11 = vld [vmem:[%s7885_s0 + $0x110] sm:$0xff]  }
   0x3   :  { %5479 = vmatpush3.bf16.msra.mxu0 %v262_v1  ;;  %5857 = vmatpush3.bf16.msra.mxu1 %v262_v1  ;;  %v55_v6 = vld [vmem:[%s7884_s1] sm:$0xf]  ;;  %v4814_v7 = vld [vmem:[%s7884_s1 + $0x8] sm:$0xf]  ;;  %v5875_v13 = vld [vmem:[%s7885_s0 + $0x118] sm:$0xff]  }
   0x4   :  { %5480 = vmatprep.mubr.msk.bf16.mxu0 %vm199_vm1, %v5868_v2  ;;  %5500 = vmatprep.mubr.msk.bf16.mxu1 %vm199_vm1, %v5869_v3  ;;  %v618_v8 = vsel %vm260_vm0, %v55_v6, 0  ;;  %v1185_v9 = vsel %vm260_vm0, %v4814_v7, 0  ;;  %v5872_v10 = vld [vmem:[%s7885_s0 + $0xc0] sm:$0xff]   ;;  %v5874_v12 = vld [vmem:[%s7885_s0 + $0xc8] sm:$0xff]   ;;  %v5876_v14 = vld [vmem:[%s7885_s0 + $0xd0] sm:$0xff]  }
   0x5   :  { %5860 = vmatprep.subr.msk.bf16.mxu1 %vm260_vm0, %v55_v6  ;;  %5861 = vmatprep.subr.msk.bf16.mxu0 %vm260_vm0, %v4814_v7  ;;  %v5877_v15 = vld [vmem:[%s7885_s0 + $0x120] sm:$0xff]   ;;  %v5878_v16 = vld [vmem:[%s7885_s0 + $0xd8] sm:$0xff]   ;;  %v5879_v17 = vld [vmem:[%s7885_s0 + $0x128] sm:$0xff]  }
   0x6   :  { %5481 = vmatmul.mubr.msk.bf16.vlgmr.msra.gmra.mxu0 %vm199_vm1, %v5870_v4  ;;  %5501 = vmatmul.mubr.msk.bf16.vlgmr.msra.gmra.mxu1 %vm199_vm1, %v5871_v5  ;;  %v5880_v18 = vld [vmem:[%s7885_s0 + $0xe0] sm:$0xff]   ;;  %v5881_v19 = vld [vmem:[%s7885_s0 + $0x130] sm:$0xff]   ;;  %v5890_v21 = vld [vmem:[%s7885_s0 + $0x8] sm:$0xff]  }
   0x7   :  { %5521 = vmatpush3.bf16.msra.mxu1 %v618_v8  ;;  %5563 = vmatpush3.bf16.msra.mxu0 %v1185_v9  ;;  %v5889_v20 = vld [vmem:[%s7885_s0] sm:$0xff]   ;;  %v5882_v22 = vld [vmem:[%s7885_s0 + $0xe8] sm:$0xff]   ;;  %v5883_v23 = vld [vmem:[%s7885_s0 + $0x138] sm:$0xff]   ;;  %v968_v30 = vshll.u32 %v5890_v21, 16  ;;  %v972_v38 = vshrl.u32 %v5890_v21, 16 }
   0x8   :  { %5484 = vmatprep.mubr.msk.bf16.mxu0 %vm199_vm1, %v5872_v10  ;;  %5504 = vmatprep.mubr.msk.bf16.mxu1 %vm199_vm1, %v5873_v11  ;;  %v963_v24 = vshll.u32 %v5889_v20, 16  ;;  %v5884_v25 = vld [vmem:[%s7885_s0 + $0xf0] sm:$0xff]   ;;  %v4896_v26 = vld [vmem:[%s7884_s1 + $0xc] sm:$0xf]  ;;  %v5885_v27 = vld [vmem:[%s7885_s0 + $0x140] sm:$0xff]   ;;  %v961_v28 = vshrl.u32 %v5889_v20, 16 }
   0x9   :  { %5862 = vmatprep.subr.msk.bf16.mxu1 %vm260_vm0, %v4896_v26  ;;  %v4977_v31 = vld [vmem:[%s7884_s1 + $0x10] sm:$0xf]  ;;  %v5886_v33 = vld [vmem:[%s7885_s0 + $0xf8] sm:$0xff]   ;;  %v970_v35 = vrot.slane %v968_v30, 1  ;;  %v5887_v37 = vld [vmem:[%s7885_s0 + $0x148] sm:$0xff]   ;;  %v1624_v58 = vsel %vm260_vm0, %v4896_v26, 0 }
   0xa   :  { %v965_v29 = vrot.slane %v963_v24, 1  ;;  %5863 = vmatprep.subr.msk.bf16.mxu0 %vm260_vm0, %v4977_v31  ;;  %v5892_v32 = vld [vmem:[%s7885_s0 + $0x10] sm:$0xff]   ;;  %v5894_v36 = vld [vmem:[%s7885_s0 + $0x18] sm:$0xff]   ;;  %v5888_v40 = vld [vmem:[%s7885_s0] sm:$0xff]   ;;  %v2063_v54 = vsel %vm260_vm0, %v4977_v31, 0 }
   0xb   :  { %v976_v39 = vshll.u32 %v5892_v32, 16  ;;  %v980_v42 = vshrl.u32 %v5892_v32, 16  ;;  %v984_v43 = vshll.u32 %v5894_v36, 16  ;;  %v5896_v44 = vld [vmem:[%s7885_s0 + $0x20] sm:$0xff]   ;;  %v974_v45 = vor.u32 %v972_v38, %v970_v35  ;;  %v5898_v47 = vld [vmem:[%s7885_s0 + $0x28] sm:$0xff]   ;;  %v5893_v49 = vld [vmem:[%s7885_s0 + $0x10] sm:$0xff]  }
   0xc   :  { %v966_v34 = vor.u32 %v965_v29, %v961_v28  ;;  %v5891_v48 = vld [vmem:[%s7885_s0 + $0x8] sm:$0xff]   ;;  %v992_v52 = vshll.u32 %v5896_v44, 16  ;;  %v988_v55 = vshrl.u32 %v5894_v36, 16  ;;  %v996_v56 = vshrl.u32 %v5896_v44, 16  ;;  %v5900_v61 = vld [vmem:[%s7885_s0 + $0x30] sm:$0xff]   ;;  %v5902_v1 = vld [vmem:[%s7885_s0 + $0x38] sm:$0xff]  }
   0xd   :  { %v978_v46 = vrot.slane %v976_v39, 1  ;;  %v986_v51 = vrot.slane %v984_v43, 1  ;;  %v1000_v57 = vshll.u32 %v5898_v47, 16  ;;  %v1008_v2 = vshll.u32 %v5900_v61, 16  ;;  %v5895_v3 = vld [vmem:[%s7885_s0 + $0x18] sm:$0xff]   ;;  %v5897_v6 = vld [vmem:[%s7885_s0 + $0x20] sm:$0xff]  }
   0xe   :  { %5485 = vmatmul.mubr.msk.bf16.gmra.mxu0 %vm199_vm1, %v5874_v12  ;;  %5505 = vmatmul.mubr.msk.bf16.gmra.mxu1 %vm199_vm1, %v5875_v13  ;;  %v971_v41 = vsel %vm959_vm2, %v966_v34, %v970_v35  ;;  %v994_v60 = vrot.slane %v992_v52, 1  ;;  %v1004_v5 = vshrl.u32 %v5898_v47, 16  ;;  %v1012_v8 = vshrl.u32 %v5900_v61, 16  ;;  %v5904_v10 = vld [vmem:[%s7885_s0 + $0x40] sm:$0xff]   ;;  %v5906_v13 = vld [vmem:[%s7885_s0 + $0x48] sm:$0xff]   ;;  %v5910_v29 = vld [vmem:[%s7885_s0 + $0x58] sm:$0xff]  }
   0xf   :  { %5488 = vmatprep.mubr.msk.bf16.mxu0 %vm199_vm1, %v5876_v14  ;;  %5508 = vmatprep.mubr.msk.bf16.mxu1 %vm199_vm1, %v5877_v15  ;;  %v982_v50 = vor.u32 %v980_v42, %v978_v46  ;;  %v979_v53 = vsel %vm959_vm2, %v974_v45, %v978_v46  ;;  %v990_v62 = vor.u32 %v988_v55, %v986_v51  ;;  %v1002_v0 = vrot.slane %v1000_v57, 1  ;;  %v5903_v31 = vld [vmem:[%s7885_s0 + $0x38] sm:$0xff]   ;;  %v5905_v34 = vld [vmem:[%s7885_s0 + $0x40] sm:$0xff]   ;;  %v5914_v43 = vld [vmem:[%s7885_s0 + $0x68] sm:$0xff]  }
  0x10   :  { %v998_v63 = vor.u32 %v996_v56, %v994_v60  ;;  %v1016_v9 = vshll.u32 %v5902_v1, 16  ;;  %v1010_v11 = vrot.slane %v1008_v2, 1  ;;  %v1020_v20 = vshrl.u32 %v5902_v1, 16  ;;  %v5912_v39 = vld [vmem:[%s7885_s0 + $0x60] sm:$0xff]   ;;  %v6418_v44 = vld [vmem:[%s7884_s1 + $0x14] sm:$0xf] }
  0x11   :  { %v987_v59 = vsel %vm959_vm2, %v982_v50, %v986_v51  ;;  %v995_v4 = vsel %vm959_vm2, %v990_v62, %v994_v60  ;;  %v1006_v12 = vor.u32 %v1004_v5, %v1002_v0  ;;  %v1028_v21 = vshrl.u32 %v5904_v10, 16  ;;  %v6423_v45 = vld [vmem:[%s7884_s1 + $0x18] sm:$0xf]  ;;  %v5907_v46 = vld [vmem:[%s7885_s0 + $0x48] sm:$0xff]   ;;  %v5916_v55 = vld [vmem:[%s7885_s0 + $0x70] sm:$0xff]  }
  0x12   :  { %v1003_v7 = vsel %vm959_vm2, %v998_v63, %v1002_v0  ;;  %v1014_v14 = vor.u32 %v1012_v8, %v1010_v11  ;;  %v1018_v15 = vrot.slane %v1016_v9, 1  ;;  %v1056_v47 = vshll.u32 %v5912_v39, 16  ;;  %v5911_v60 = vld [vmem:[%s7885_s0 + $0x58] sm:$0xff]   ;;  %v5913_v63 = vld [vmem:[%s7885_s0 + $0x60] sm:$0xff]   ;;  %v5922_v9 = vld [vmem:[%s7885_s0 + $0x88] sm:$0xff]  }
  0x13   :  { %v1052_v50 = vshrl.u32 %v5910_v29, 16  ;;  %v1060_v52 = vshrl.u32 %v5912_v39, 16  ;;  %v1072_v61 = vshll.u32 %v5916_v55, 16  ;;  %v1068_v0 = vshrl.u32 %v5914_v43, 16  ;;  %v5920_v5 = vld [vmem:[%s7885_s0 + $0x80] sm:$0xff]  }
  0x14   :  { %v1022_v26 = vor.u32 %v1020_v20, %v1018_v15  ;;  %v1076_v2 = vshrl.u32 %v5916_v55, 16  ;;  %v2669_v55 = vsel %vm260_vm0, %v6418_v44, 0 }
  0x16   :  { %5489 = vmatmul.mubr.msk.bf16.gmra.mxu0 %vm199_vm1, %v5878_v16  ;;  %5509 = vmatmul.mubr.msk.bf16.gmra.mxu1 %vm199_vm1, %v5879_v17  ;;  %v5899_v16 = vld [vmem:[%s7885_s0 + $0x28] sm:$0xff]   ;;  %v1024_v17 = vshll.u32 %v5904_v10, 16 }
  0x17   :  { %5492 = vmatprep.mubr.msk.bf16.mxu0 %vm199_vm1, %v5880_v18  ;;  %5512 = vmatprep.mubr.msk.bf16.mxu1 %vm199_vm1, %v5881_v19  ;;  %v1011_v18 = vsel %vm959_vm2, %v1006_v12, %v1010_v11  ;;  %v5901_v19 = vld [vmem:[%s7885_s0 + $0x30] sm:$0xff]   ;;  %v5915_v10 = vld [vmem:[%s7885_s0 + $0x68] sm:$0xff]   ;;  %v1088_v11 = vshll.u32 %v5920_v5, 16 }
  0x18   :  { %v1026_v24 = vrot.slane %v1024_v17, 1  ;;  %v1096_v17 = vshll.u32 %v5922_v9, 16 }
  0x1a   :  { %v1027_v32 = vsel %vm959_vm2, %v1022_v26, %v1026_v24 }
  0x1e   :  { %5493 = vmatmul.mubr.msk.bf16.gmra.mxu0 %vm199_vm1, %v5882_v22  ;;  %5513 = vmatmul.mubr.msk.bf16.gmra.mxu1 %vm199_vm1, %v5883_v23  ;;  %v1032_v22 = vshll.u32 %v5906_v13, 16  ;;  %v1019_v23 = vsel %vm959_vm2, %v1014_v14, %v1018_v15 }
  0x1f   :  { %5496 = vmatprep.mubr.msk.bf16.mxu0 %vm199_vm1, %v5884_v25  ;;  %5516 = vmatprep.mubr.msk.bf16.mxu1 %vm199_vm1, %v5885_v27  ;;  %v5908_v25 = vld [vmem:[%s7885_s0 + $0x50] sm:$0xff]   ;;  %v1030_v27 = vor.u32 %v1028_v21, %v1026_v24  ;;  %v5919_v24 = vld [vmem:[%s7885_s0 + $0x78] sm:$0xff]  }
  0x20   :  { %v1034_v28 = vrot.slane %v1032_v22, 1  ;;  %v1040_v30 = vshll.u32 %v5908_v25, 16  ;;  %v1044_v36 = vshrl.u32 %v5908_v25, 16  ;;  %v1098_v22 = vrot.slane %v1096_v17, 1 }
  0x22   :  { %v1035_v35 = vsel %vm959_vm2, %v1030_v27, %v1034_v28  ;;  %v1042_v38 = vrot.slane %v1040_v30, 1  ;;  %v5921_v27 = vld [vmem:[%s7885_s0 + $0x80] sm:$0xff]  }
  0x26   :  { %5497 = vmatmul.mubr.msk.bf16.gmra.mxu0 %vm199_vm1, %v5886_v33  ;;  %5517 = vmatmul.mubr.msk.bf16.gmra.mxu1 %vm199_vm1, %v5887_v37  ;;  %v1036_v33 = vshrl.u32 %v5906_v13, 16  ;;  %v1048_v37 = vshll.u32 %v5910_v29, 16  ;;  %v5917_v13 = vld [vmem:[%s7885_s0 + $0x70] sm:$0xff]  }
  0x27   :  { %5564 = vmatprep.mubr.msk.bf16.mxu0 %vm199_vm1, %v971_v41  ;;  %5522 = vmatprep.mubr.msk.bf16.mxu1 %vm199_vm1, %v5888_v40  ;;  %v1046_v41 = vor.u32 %v1044_v36, %v1042_v38 }
  0x28   :  { %v1038_v40 = vor.u32 %v1036_v33, %v1034_v28  ;;  %v1050_v42 = vrot.slane %v1048_v37, 1  ;;  %v1100_v28 = vshrl.u32 %v5922_v9, 16  ;;  %v5923_v37 = vld [vmem:[%s7885_s0 + $0x88] sm:$0xff]  }
  0x29   :  { %v6621_v9 = vld [vmem:[%s7885_s0 + $0x8] sm:$0xfe]  }
  0x2a   :  { %v1051_v51 = vsel %vm959_vm2, %v1046_v41, %v1050_v42  ;;  %v1054_v56 = vor.u32 %v1052_v50, %v1050_v42  ;;  %v5925_v41 = vld [vmem:[%s7885_s0 + $0x90] sm:$0xff]   ;;  %v5929_v50 = vld [vmem:[%s7885_s0 + $0x160] sm:$0xff]  }
  0x2e   :  { %5565 = vmatmul.mubr.msk.bf16.vlgmr.msra.gmra.mxu0 %vm199_vm1, %v979_v53  ;;  %5523 = vmatmul.mubr.msk.bf16.vlgmr.msra.gmra.mxu1 %vm199_vm1, %v5891_v48  ;;  %v1043_v48 = vsel %vm959_vm2, %v1038_v40, %v1042_v38  ;;  %v1064_v53 = vshll.u32 %v5914_v43, 16 }
  0x2f   :  { %5647 = vmatpush3.bf16.msra.mxu0 %v2063_v54  ;;  %5605 = vmatpush3.bf16.msra.mxu1 %v1624_v58  ;;  %v1058_v54 = vrot.slane %v1056_v47, 1  ;;  %v5927_v47 = vld [vmem:[%s7885_s0 + $0x98] sm:$0xff]  }
  0x30   :  { %5526 = vmatprep.mubr.msk.bf16.mxu1 %vm199_vm1, %v5893_v49  ;;  %5568 = vmatprep.mubr.msk.bf16.mxu0 %vm199_vm1, %v987_v59  ;;  %v5909_v49 = vld [vmem:[%s7885_s0 + $0x50] sm:$0xff]   ;;  %v1066_v58 = vrot.slane %v1064_v53, 1  ;;  %v5918_v59 = vld [vmem:[%s7885_s0 + $0x78] sm:$0xff]   ;;  %v3153_v53 = vsel %vm260_vm0, %v6423_v45, 0 }
  0x31   :  { %5864 = vmatprep.subr.msk.bf16.mxu1 %vm260_vm0, %v6418_v44  ;;  %5865 = vmatprep.subr.msk.bf16.mxu0 %vm260_vm0, %v6423_v45  ;;  %v1062_v57 = vor.u32 %v1060_v52, %v1058_v54  ;;  %v1059_v62 = vsel %vm959_vm2, %v1054_v56, %v1058_v54  ;;  %v1084_v14 = vshrl.u32 %v5918_v59, 16  ;;  %v5931_v52 = vld [vmem:[%s7885_s0 + $0x168] sm:$0xff]   ;;  %v5933_v54 = vld [vmem:[%s7885_s0 + $0x170] sm:$0xff]   ;;  %v5934_v56 = vld [vmem:[%s7885_s0 + $0x220] sm:$0xff]  }
  0x32   :  { %v6550_v45 = vld [vmem:[%s7884_s1 + $0x20] sm:$0xf]  ;;  %v5935_v44 = vld [vmem:[%s7885_s0 + $0x178] sm:$0xff]  }
  0x33   :  { %v1067_v1 = vsel %vm959_vm2, %v1062_v57, %v1066_v58  ;;  %v6544_v57 = vld [vmem:[%s7884_s1 + $0x1c] sm:$0xf] }
  0x36   :  { %5569 = vmatmul.mubr.msk.bf16.gmra.mxu0 %vm199_vm1, %v995_v4  ;;  %5527 = vmatmul.mubr.msk.bf16.gmra.mxu1 %vm199_vm1, %v5895_v3  ;;  %v1080_v3 = vshll.u32 %v5918_v59, 16  ;;  %v1074_v4 = vrot.slane %v1072_v61, 1  ;;  %v5938_v59 = vld [vmem:[%s7885_s0 + $0x230] sm:$0xff]   ;;  %v5939_v61 = vld [vmem:[%s7885_s0 + $0x188] sm:$0xff]  }
  0x37   :  { %5572 = vmatprep.mubr.msk.bf16.mxu0 %vm199_vm1, %v1003_v7  ;;  %5530 = vmatprep.mubr.msk.bf16.mxu1 %vm199_vm1, %v5897_v6  ;;  %v1070_v6 = vor.u32 %v1068_v0, %v1066_v58  ;;  %v5936_v58 = vld [vmem:[%s7885_s0 + $0x228] sm:$0xff]   ;;  %v5941_v0 = vld [vmem:[%s7885_s0 + $0x190] sm:$0xff]  }
  0x38   :  { %v1078_v7 = vor.u32 %v1076_v2, %v1074_v4  ;;  %v1082_v8 = vrot.slane %v1080_v3, 1  ;;  %v5944_v2 = vld [vmem:[%s7885_s0 + $0x248] sm:$0xff]   ;;  %v5946_v3 = vld [vmem:[%s7885_s0 + $0x250] sm:$0xff]  }
  0x39   :  { %v1075_v12 = vsel %vm959_vm2, %v1070_v6, %v1074_v4  ;;  %v5945_v4 = vld [vmem:[%s7885_s0 + $0x1a0] sm:$0xff]   ;;  %v5948_v6 = vld [vmem:[%s7885_s0 + $0x258] sm:$0xff]  }
  0x3a   :  { %v1083_v15 = vsel %vm959_vm2, %v1078_v7, %v1082_v8  ;;  %v1086_v20 = vor.u32 %v1084_v14, %v1082_v8  ;;  %v5949_v7 = vld [vmem:[%s7885_s0 + $0x1b0] sm:$0xff]   ;;  %v5950_v8 = vld [vmem:[%s7885_s0 + $0x260] sm:$0xff]  }
  0x3b   :  { %v5953_v14 = vld [vmem:[%s7885_s0 + $0x1c0] sm:$0xff]  }
  0x3e   :  { %5573 = vmatmul.mubr.msk.bf16.gmra.mxu0 %vm199_vm1, %v1011_v18  ;;  %5531 = vmatmul.mubr.msk.bf16.gmra.mxu1 %vm199_vm1, %v5899_v16  ;;  %v1092_v16 = vshrl.u32 %v5920_v5, 16  ;;  %v1090_v18 = vrot.slane %v1088_v11, 1  ;;  %v5947_v5 = vld [vmem:[%s7885_s0 + $0x1a8] sm:$0xff]   ;;  %v6631_v11 = vld [vmem:[%s7885_s0 + $0x10] sm:$0xff]  }
  0x3f   :  { %5576 = vmatprep.mubr.msk.bf16.mxu0 %vm199_vm1, %v1019_v23  ;;  %5534 = vmatprep.mubr.msk.bf16.mxu1 %vm199_vm1, %v5901_v19  ;;  %v5924_v19 = vld [vmem:[%s7885_s0 + $0x90] sm:$0xff]   ;;  %v5926_v23 = vld [vmem:[%s7885_s0 + $0x98] sm:$0xff]  }
  0x40   :  { %v1094_v21 = vor.u32 %v1092_v16, %v1090_v18  ;;  %v1104_v25 = vshll.u32 %v5924_v19, 16  ;;  %v1091_v26 = vsel %vm959_vm2, %v1086_v20, %v1090_v18  ;;  %v1108_v30 = vshrl.u32 %v5924_v19, 16  ;;  %v6648_v16 = vld [vmem:[%s7885_s0 + $0x18] sm:$0xff]   ;;  %v6655_v20 = vld [vmem:[%s7885_s0 + $0x20] sm:$0xff]  }
  0x41   :  { %v1116_v39 = vshrl.u32 %v5926_v23, 16  ;;  %v3882_v18 = vshll.u32 %v6621_v9, 16  ;;  %v3887_v19 = vshrl.u32 %v6631_v11, 16 }
  0x42   :  { %v1099_v29 = vsel %vm959_vm2, %v1094_v21, %v1098_v22  ;;  %v1106_v33 = vrot.slane %v1104_v25, 1  ;;  %v3890_v21 = vshll.u32 %v6631_v11, 16  ;;  %v3896_v25 = vshrl.u32 %v6648_v16, 16 }
  0x46   :  { %5577 = vmatmul.mubr.msk.bf16.gmra.mxu0 %vm199_vm1, %v1027_v32  ;;  %5535 = vmatmul.mubr.msk.bf16.gmra.mxu1 %vm199_vm1, %v5903_v31  ;;  %v1112_v31 = vshll.u32 %v5926_v23, 16  ;;  %v5928_v32 = vld [vmem:[%s7885_s0 + $0xa0] ss:$0 sps:$4 sm:$0x11]   ;;  %v3889_v23 = vrot.slane %v3887_v19, 1 }
  0x47   :  { %5580 = vmatprep.mubr.msk.bf16.mxu0 %vm199_vm1, %v1035_v35  ;;  %5538 = vmatprep.mubr.msk.bf16.mxu1 %vm199_vm1, %v5905_v34  ;;  %v1102_v34 = vor.u32 %v1100_v28, %v1098_v22  ;;  %v1110_v35 = vor.u32 %v1108_v30, %v1106_v33  ;;  %v1120_v40 = vshll.u32 %v5928_v32, 16  ;;  %v3884_v22 = vrot.slane %v3882_v18, 2  ;;  %v5969_v19 = vld [vmem:[%s7885_s0 + $0x160] sm:$0xff]  }
  0x48   :  { %v1114_v36 = vrot.slane %v1112_v31, 1  ;;  %v3898_v31 = vrot.slane %v3896_v25, 1 }
  0x49   :  { %v1107_v38 = vsel %vm959_vm2, %v1102_v34, %v1106_v33  ;;  %v3908_v33 = vshll.u32 %v6655_v20, 16  ;;  %v6674_v34 = vld [vmem:[%s7885_s0 + $0x30] sm:$0xff]  }
  0x4a   :  { %v1115_v42 = vsel %vm959_vm2, %v1110_v35, %v1114_v36  ;;  %v1118_v43 = vor.u32 %v1116_v39, %v1114_v36 }
  0x4e   :  { %5581 = vmatmul.mubr.msk.bf16.gmra.mxu0 %vm199_vm1, %v1043_v48  ;;  %5539 = vmatmul.mubr.msk.bf16.gmra.mxu1 %vm199_vm1, %v5907_v46  ;;  %v1122_v46 = vrot.slane %v1120_v40, 1 }
  0x4f   :  { %5584 = vmatprep.mubr.msk.bf16.mxu0 %vm199_vm1, %v1051_v51  ;;  %5542 = vmatprep.mubr.msk.bf16.mxu1 %vm199_vm1, %v5909_v49  ;;  %v5930_v49 = vld [vmem:[%s7885_s0 + $0x210] sm:$0xff]   ;;  %v5932_v51 = vld [vmem:[%s7885_s0 + $0x218] sm:$0xff]  }
  0x50   :  { %v1123_v48 = vsel %vm959_vm2, %v1118_v43, %v1122_v46  ;;  %v6690_v43 = vld [vmem:[%s7885_s0 + $0x38] sm:$0xff]  }
  0x56   :  { %5585 = vmatmul.mubr.msk.bf16.gmra.mxu0 %vm199_vm1, %v1059_v62  ;;  %5543 = vmatmul.mubr.msk.bf16.gmra.mxu1 %vm199_vm1, %v5911_v60  ;;  %v5937_v60 = vld [vmem:[%s7885_s0 + $0x180] sm:$0xff]   ;;  %v5940_v62 = vld [vmem:[%s7885_s0 + $0x238] sm:$0xff]  }
  0x57   :  { %5588 = vmatprep.mubr.msk.bf16.mxu0 %vm199_vm1, %v1067_v1  ;;  %5546 = vmatprep.mubr.msk.bf16.mxu1 %vm199_vm1, %v5913_v63  ;;  %v5942_v63 = vld [vmem:[%s7885_s0 + $0x240] sm:$0xff]   ;;  %v5943_v1 = vld [vmem:[%s7885_s0 + $0x198] sm:$0xff]  }
  0x5e   :  { %5589 = vmatmul.mubr.msk.bf16.gmra.mxu0 %vm199_vm1, %v1075_v12  ;;  %5547 = vmatmul.mubr.msk.bf16.gmra.mxu1 %vm199_vm1, %v5915_v10  ;;  %v3879_v10 = vshrl.u32 %v6621_v9, 16  ;;  %v5951_v12 = vld [vmem:[%s7885_s0 + $0x1b8] sm:$0xff]  }
  0x5f   :  { %5592 = vmatprep.mubr.msk.bf16.mxu0 %vm199_vm1, %v1083_v15  ;;  %5550 = vmatprep.mubr.msk.bf16.mxu1 %vm199_vm1, %v5917_v13  ;;  %v5952_v13 = vld [vmem:[%s7885_s0 + $0x268] sm:$0xff]   ;;  %v5954_v15 = vld [vmem:[%s7885_s0 + $0x270] sm:$0xff]  }
  0x60   :  { %v3881_v17 = vrot.slane %v3879_v10, 1 }
  0x62   :  { %v3885_v28 = vor.u32 %v3884_v22, %v3881_v17 }
  0x66   :  { %5593 = vmatmul.mubr.msk.bf16.gmra.mxu0 %vm199_vm1, %v1091_v26  ;;  %5551 = vmatmul.mubr.msk.bf16.gmra.mxu1 %vm199_vm1, %v5919_v24  ;;  %v3892_v24 = vrot.slane %v3890_v21, 2  ;;  %v3899_v26 = vshll.u32 %v6648_v16, 16  ;;  %v6750_v21 = vld [vmem:[%s7885_s0 + $0x50] sm:$0xff]  }
  0x67   :  { %5596 = vmatprep.mubr.msk.bf16.mxu0 %vm199_vm1, %v1099_v29  ;;  %5554 = vmatprep.mubr.msk.bf16.mxu1 %vm199_vm1, %v5921_v27  ;;  %v6664_v27 = vld [vmem:[%s7885_s0 + $0x28] sm:$0xff]   ;;  %v3905_v29 = vshrl.u32 %v6655_v20, 16 }
  0x68   :  { %v3893_v30 = vor.u32 %v3892_v24, %v3889_v23  ;;  %v3901_v32 = vrot.slane %v3899_v26, 2  ;;  %v3914_v36 = vshrl.u32 %v6664_v27, 16  ;;  %v6758_v24 = vld [vmem:[%s7885_s0 + $0x58] sm:$0xff]  }
  0x69   :  { %v3907_v35 = vrot.slane %v3905_v29, 1  ;;  %v3959_v29 = vshrl.u32 %v6750_v21, 16 }
  0x6a   :  { %v6684_v39 = vsel %vm3877_vm3, %v3885_v28, %v3893_v30  ;;  %v3902_v40 = vor.u32 %v3901_v32, %v3898_v31  ;;  %v3916_v46 = vrot.slane %v3914_v36, 1  ;;  %v3968_v31 = vshrl.u32 %v6758_v24, 16 }
  0x6b   :  { %v3971_v32 = vshll.u32 %v6758_v24, 16  ;;  %v3961_v36 = vrot.slane %v3959_v29, 1 }
  0x6e   :  { %5597 = vmatmul.mubr.msk.bf16.gmra.mxu0 %vm199_vm1, %v1107_v38  ;;  %5555 = vmatmul.mubr.msk.bf16.gmra.mxu1 %vm199_vm1, %v5923_v37  ;;  %v5955_v37 = vld [vmem:[%s7885_s0 + $0x1c8] sm:$0xff]   ;;  %v5956_v38 = vld [vmem:[%s7885_s0 + $0x278] sm:$0xff]  }
  0x6f   :  { %5600 = vmatprep.mubr.msk.bf16.mxu0 %vm199_vm1, %v1115_v42  ;;  %5558 = vmatprep.mubr.msk.bf16.mxu1 %vm199_vm1, %v5925_v41  ;;  %v3910_v41 = vrot.slane %v3908_v33, 2  ;;  %v3917_v42 = vshll.u32 %v6664_v27, 16  ;;  %v6777_v33 = vld [vmem:[%s7885_s0 + $0x168] sm:$0xff]  }
  0x76   :  { %5601 = vmatmul.mubr.msk.bf16.gmra.mxu0 %vm199_vm1, %v1123_v48  ;;  %5559 = vmatmul.mubr.msk.bf16.gmra.mxu1 %vm199_vm1, %v5927_v47  ;;  %v3923_v47 = vshrl.u32 %v6674_v34, 16  ;;  %v3926_v48 = vshll.u32 %v6674_v34, 16 }
  0x77   :  { %5648 = vmatprep.mubr.msk.bf16.mxu0 %vm199_vm1, %v5930_v49  ;;  %5606 = vmatprep.mubr.msk.bf16.mxu1 %vm199_vm1, %v5929_v50  ;;  %v5958_v49 = vld [vmem:[%s7885_s0 + $0x280] sm:$0xff]   ;;  %v6698_v50 = vsel %vm3877_vm3, %v3893_v30, %v3902_v40  ;;  %v3962_v30 = vshll.u32 %v6750_v21, 16 }
  0x7e   :  { %5649 = vmatmul.mubr.msk.bf16.vlgmr.msra.gmra.mxu0 %vm199_vm1, %v5932_v51  ;;  %5607 = vmatmul.mubr.msk.bf16.vlgmr.msra.gmra.mxu1 %vm199_vm1, %v5931_v52  ;;  %v3911_v51 = vor.u32 %v3910_v41, %v3907_v35  ;;  %v3919_v52 = vrot.slane %v3917_v42, 2  ;;  %v2447_v35 = vshll.u32 %v5969_v19, 16  ;;  %v3973_v41 = vrot.slane %v3971_v32, 2  ;;  %v5963_v42 = vld [vmem:[%s7885_s0 + $0x1e8] sm:$0xff]  }
  0x7f   :  { %5731 = vmatpush3.bf16.msra.mxu0 %v3153_v53  ;;  %5689 = vmatpush3.bf16.msra.mxu1 %v2669_v55  ;;  %v5957_v53 = vld [vmem:[%s7885_s0 + $0x1d0] sm:$0xff]   ;;  %v3928_v55 = vrot.slane %v3926_v48, 2 }
  0x80   :  { %5610 = vmatprep.mubr.msk.bf16.mxu1 %vm199_vm1, %v5933_v54  ;;  %5652 = vmatprep.mubr.msk.bf16.mxu0 %vm199_vm1, %v5934_v56  ;;  %v3925_v54 = vrot.slane %v3923_v47, 1  ;;  %v3932_v56 = vshrl.u32 %v6690_v43, 16  ;;  %v5965_v48 = vld [vmem:[%s7885_s0 + $0x1f0] sm:$0xff]  }
  0x81   :  { %5866 = vmatprep.subr.msk.bf16.mxu1 %vm260_vm0, %v6544_v57  ;;  %5867 = vmatprep.subr.msk.bf16.mxu0 %vm260_vm0, %v6550_v45 }
  0x86   :  { %5653 = vmatmul.mubr.msk.bf16.gmra.mxu0 %vm199_vm1, %v5936_v58  ;;  %5611 = vmatmul.mubr.msk.bf16.gmra.mxu1 %vm199_vm1, %v5935_v44  ;;  %v6707_v44 = vld [vmem:[%s7885_s0 + $0x40] sm:$0xff]   ;;  %v6710_v58 = vsel %vm3877_vm3, %v3902_v40, %v3911_v51  ;;  %v3970_v40 = vrot.slane %v3968_v31, 1  ;;  %v6839_v31 = vld [vmem:[%s7885_s0 + $0x70] sm:$0xff]  }
  0x87   :  { %5656 = vmatprep.mubr.msk.bf16.mxu0 %vm199_vm1, %v5938_v59  ;;  %5614 = vmatprep.mubr.msk.bf16.mxu1 %vm199_vm1, %v5937_v60  ;;  %v3920_v59 = vor.u32 %v3919_v52, %v3916_v46  ;;  %v3935_v60 = vshll.u32 %v6690_v43, 16  ;;  %v5966_v46 = vld [vmem:[%s7885_s0 + $0x2a0] sm:$0xff]   ;;  %v2449_v52 = vrot.slane %v2447_v35, 1 }
  0x8e   :  { %5657 = vmatmul.mubr.msk.bf16.gmra.mxu0 %vm199_vm1, %v5940_v62  ;;  %5615 = vmatmul.mubr.msk.bf16.gmra.mxu1 %vm199_vm1, %v5939_v61  ;;  %v6717_v61 = vld [vmem:[%s7885_s0 + $0x48] sm:$0xff]   ;;  %v3929_v62 = vor.u32 %v3928_v55, %v3925_v54  ;;  %v6795_v54 = vld [vmem:[%s7885_s0 + $0x60] sm:$0xff]  }
  0x8f   :  { %5660 = vmatprep.mubr.msk.bf16.mxu0 %vm199_vm1, %v5942_v63  ;;  %5618 = vmatprep.mubr.msk.bf16.mxu1 %vm199_vm1, %v5941_v0  ;;  %v3934_v63 = vrot.slane %v3932_v56, 1  ;;  %v6722_v0 = vsel %vm3877_vm3, %v3911_v51, %v3920_v59  ;;  %v2445_v51 = vshrl.u32 %v5969_v19, 16  ;;  %v6804_v56 = vld [vmem:[%s7885_s0 + $0x68] sm:$0xff]  }
  0x96   :  { %5661 = vmatmul.mubr.msk.bf16.gmra.mxu0 %vm199_vm1, %v5944_v2  ;;  %5619 = vmatmul.mubr.msk.bf16.gmra.mxu1 %vm199_vm1, %v5943_v1  ;;  %v3937_v1 = vrot.slane %v3935_v60, 2  ;;  %v3941_v2 = vshrl.u32 %v6707_v44, 16  ;;  %v5973_v60 = vld [vmem:[%s7885_s0 + $0x170] sm:$0xff]  }
  0x97   :  { %5664 = vmatprep.mubr.msk.bf16.mxu0 %vm199_vm1, %v5946_v3  ;;  %5622 = vmatprep.mubr.msk.bf16.mxu1 %vm199_vm1, %v5945_v4  ;;  %v3944_v3 = vshll.u32 %v6707_v44, 16  ;;  %v6728_v4 = vsel %vm3877_vm3, %v3920_v59, %v3929_v62  ;;  %v2464_v29 = vshrl.u32 %v5973_v60, 16 }
  0x98   :  { %7889 = vst [vmem:[#allocation2_spill] sm:$0xff] %v6728_v4  ;;  %v3938_v10 = vor.u32 %v3937_v1, %v3934_v63  ;;  %v3980_v63 = vshll.u32 %v6795_v54, 16  ;;  %v3051_v1 = vrot.slane %v6621_v9, 1 }
  0x9a   :  { %v6753_v22 = vsel %vm3877_vm3, %v3929_v62, %v3938_v10  ;;  %v3977_v62 = vshrl.u32 %v6795_v54, 16 }
  0x9b   :  { %7890 = vst [vmem:[#allocation3_spill] sm:$0xff] %v6753_v22 }
  0x9e   :  { %5665 = vmatmul.mubr.msk.bf16.gmra.mxu0 %vm199_vm1, %v5948_v6  ;;  %5623 = vmatmul.mubr.msk.bf16.gmra.mxu1 %vm199_vm1, %v5947_v5  ;;  %v3950_v5 = vshrl.u32 %v6717_v61, 16  ;;  %v3953_v6 = vshll.u32 %v6717_v61, 16 }
  0x9f   :  { %5668 = vmatprep.mubr.msk.bf16.mxu0 %vm199_vm1, %v5950_v8  ;;  %5626 = vmatprep.mubr.msk.bf16.mxu1 %vm199_vm1, %v5949_v7  ;;  %v5959_v7 = vld [vmem:[%s7885_s0 + $0x1d8] sm:$0xff]   ;;  %v5960_v8 = vld [vmem:[%s7885_s0 + $0x288] sm:$0xff]  }
  0xa0   :  { %v3952_v17 = vrot.slane %v3950_v5, 1  ;;  %v3955_v18 = vrot.slane %v3953_v6, 2  ;;  %v3989_v5 = vshll.u32 %v6804_v56, 16  ;;  %v2450_v6 = vor.u32 %v2449_v52, %v2445_v51 }
  0xa2   :  { %v3956_v25 = vor.u32 %v3955_v18, %v3952_v17  ;;  %v2456_v18 = vshrl.u32 %v6777_v33, 16 }
  0xa6   :  { %5669 = vmatmul.mubr.msk.bf16.gmra.mxu0 %vm199_vm1, %v5952_v13  ;;  %5627 = vmatmul.mubr.msk.bf16.gmra.mxu1 %vm199_vm1, %v5951_v12  ;;  %v3943_v12 = vrot.slane %v3941_v2, 1  ;;  %v3946_v13 = vrot.slane %v3944_v3, 2  ;;  %v3052_v2 = vrot.slane %v6631_v11, 1  ;;  %v3986_v3 = vshrl.u32 %v6804_v56, 16  ;;  %v5967_v11 = vld [vmem:[%s7885_s0 + $0x1f8] sm:$0xff]  }
  0xa7   :  { %5672 = vmatprep.mubr.msk.bf16.mxu0 %vm199_vm1, %v5954_v15  ;;  %5630 = vmatprep.mubr.msk.bf16.mxu1 %vm199_vm1, %v5953_v14  ;;  %v5961_v14 = vld [vmem:[%s7885_s0 + $0x1e0] sm:$0xff]   ;;  %v5962_v15 = vld [vmem:[%s7885_s0 + $0x290] sm:$0xff]  }
  0xa8   :  { %v3947_v23 = vor.u32 %v3946_v13, %v3943_v12  ;;  %v3982_v12 = vrot.slane %v3980_v63, 2  ;;  %v5968_v13 = vld [vmem:[%s7885_s0 + $0x2a8] sm:$0xff]   ;;  %v3988_v9 = vrot.slane %v3986_v3, 1  ;;  %v3053_v19 = vsel %vm3050_vm4, %v3051_v1, %v3052_v2 }
  0xa9   :  { %v3056_v3 = vrot.slane %v6655_v20, 1 }
  0xaa   :  { %v6761_v26 = vsel %vm3877_vm3, %v3938_v10, %v3947_v23  ;;  %v6765_v28 = vsel %vm3877_vm3, %v3947_v23, %v3956_v25  ;;  %v3979_v10 = vrot.slane %v3977_v62, 1 }
  0xab   :  { %7891 = vst [vmem:[#allocation4_spill] sm:$0xff] %v6761_v26  ;;  %7892 = vst [vmem:[#allocation5_spill] sm:$0xff] %v6765_v28 }
  0xac   :  { %v3983_v17 = vor.u32 %v3982_v12, %v3979_v10  ;;  %v3636_v12 = vsel %vm260_vm0, %v6544_v57, 0  ;;  %v6898_v57 = vld [vmem:[%s7885_s0 + $0x80] sm:$0xff]  }
  0xae   :  { %5673 = vmatmul.mubr.msk.bf16.gmra.mxu0 %vm199_vm1, %v5956_v38  ;;  %5631 = vmatmul.mubr.msk.bf16.gmra.mxu1 %vm199_vm1, %v5955_v37  ;;  %v3964_v37 = vrot.slane %v3962_v30, 2  ;;  %v5964_v38 = vld [vmem:[%s7885_s0 + $0x298] sm:$0xff]  }
  0xaf   :  { %5676 = vmatprep.mubr.msk.bf16.mxu0 %vm199_vm1, %v5958_v49  ;;  %5634 = vmatprep.mubr.msk.bf16.mxu1 %vm199_vm1, %v5957_v53  ;;  %v3974_v49 = vor.u32 %v3973_v41, %v3970_v40  ;;  %v2452_v53 = vshll.u32 %v6777_v33, 16  ;;  %v6850_v33 = vld [vmem:[%s7885_s0 + $0x78] sm:$0xff]   ;;  %v3054_v40 = vrot.slane %v6648_v16, 1  ;;  %v5977_v41 = vld [vmem:[%s7885_s0 + $0x180] sm:$0xff]  }
  0xb0   :  { %v3965_v47 = vor.u32 %v3964_v37, %v3961_v36  ;;  %v4007_v51 = vshll.u32 %v6850_v33, 16 }
  0xb1   :  { %v6842_v32 = vsel %vm3877_vm3, %v3974_v49, %v3983_v17  ;;  %v3055_v10 = vsel %vm3050_vm4, %v3052_v2, %v3054_v40  ;;  %v2480_v2 = vshrl.u32 %v5977_v41, 16 }
  0xb2   :  { %v6798_v55 = vsel %vm3877_vm3, %v3956_v25, %v3965_v47  ;;  %v6807_v59 = vsel %vm3877_vm3, %v3965_v47, %v3974_v49  ;;  %7895 = vst [vmem:[#allocation8_spill] sm:$0xff] %v6842_v32  ;;  %v4004_v49 = vshrl.u32 %v6850_v33, 16 }
  0xb3   :  { %7893 = vst [vmem:[#allocation6_spill] sm:$0xff] %v6798_v55  ;;  %7894 = vst [vmem:[#allocation7_spill] sm:$0xff] %v6807_v59 }
  0xb6   :  { %5677 = vmatmul.mubr.msk.bf16.gmra.mxu0 %vm199_vm1, %v5960_v8  ;;  %5635 = vmatmul.mubr.msk.bf16.gmra.mxu1 %vm199_vm1, %v5959_v7  ;;  %v2454_v7 = vrot.slane %v2452_v53, 1  ;;  %v6824_v8 = vld [vmem:[%s7885_s0 + $0x178] sm:$0xff]  }
  0xb7   :  { %5680 = vmatprep.mubr.msk.bf16.mxu0 %vm199_vm1, %v5962_v15  ;;  %5638 = vmatprep.mubr.msk.bf16.mxu1 %vm199_vm1, %v5961_v14  ;;  %v3991_v14 = vrot.slane %v3989_v5, 2  ;;  %v2460_v15 = vshll.u32 %v5973_v60, 16  ;;  %v2468_v30 = vshll.u32 %v6824_v8, 16  ;;  %v6875_v60 = vld [vmem:[%s7885_s0 + $0x188] sm:$0xff]   ;;  %v4006_v5 = vrot.slane %v4004_v49, 1 }
  0xb8   :  { %v2455_v25 = vsel %vm959_vm2, %v2450_v6, %v2454_v7  ;;  %v4009_v6 = vrot.slane %v4007_v51, 2  ;;  %v2472_v20 = vshrl.u32 %v6824_v8, 16  ;;  %v6910_v8 = vld [vmem:[%s7885_s0 + $0x88] sm:$0xff]  }
  0xb9   :  { %v3992_v23 = vor.u32 %v3991_v14, %v3988_v9  ;;  %v2470_v53 = vrot.slane %v2468_v30, 1 }
  0xbb   :  { %v6853_v36 = vsel %vm3877_vm3, %v3983_v17, %v3992_v23  ;;  %v4010_v17 = vor.u32 %v4009_v6, %v4006_v5  ;;  %v2474_v51 = vor.u32 %v2472_v20, %v2470_v53 }
  0xbc   :  { %7896 = vst [vmem:[#allocation9_spill] sm:$0xff] %v6853_v36 }
  0xbe   :  { %5681 = vmatmul.mubr.msk.bf16.gmra.mxu0 %vm199_vm1, %v5964_v38  ;;  %5639 = vmatmul.mubr.msk.bf16.gmra.mxu1 %vm199_vm1, %v5963_v42  ;;  %v2462_v38 = vrot.slane %v2460_v15, 1  ;;  %v3995_v42 = vshrl.u32 %v6839_v31, 16  ;;  %v4127_v15 = vsel %vm260_vm0, %v6550_v45, 0  ;;  %v3057_v45 = vsel %vm3050_vm4, %v3054_v40, %v3056_v3  ;;  %v5981_v40 = vld [vmem:[%s7885_s0 + $0x190] sm:$0xff]  }
  0xbf   :  { %5684 = vmatprep.mubr.msk.bf16.mxu0 %vm199_vm1, %v5966_v46  ;;  %5642 = vmatprep.mubr.msk.bf16.mxu1 %vm199_vm1, %v5965_v48  ;;  %v3998_v46 = vshll.u32 %v6839_v31, 16  ;;  %v2458_v48 = vor.u32 %v2456_v18, %v2454_v7  ;;  %v2492_v20 = vshll.u32 %v5981_v40, 16 }
  0xc0   :  { %v2466_v16 = vor.u32 %v2464_v29, %v2462_v38  ;;  %v3997_v62 = vrot.slane %v3995_v42, 1  ;;  %v3058_v42 = vrot.slane %v6664_v27, 1  ;;  %v4025_v27 = vshll.u32 %v6910_v8, 16 }
  0xc1   :  { %v4000_v63 = vrot.slane %v3998_v46, 2  ;;  %v4013_v46 = vshrl.u32 %v6898_v57, 16 }
  0xc3   :  { %v4001_v9 = vor.u32 %v4000_v63, %v3997_v62  ;;  %v4022_v62 = vshrl.u32 %v6910_v8, 16 }
  0xc5   :  { %v6901_v29 = vsel %vm3877_vm3, %v3992_v23, %v4001_v9 }
  0xc6   :  { %v6844_v35 = vpop.f32.mrf.mxu0  ;;  %5685 = vmatmul.mubr.msk.bf16.gmra.mxu0 %vm199_vm1, %v5968_v13  ;;  %v6855_v37 = vpop.f32.mrf.mxu1  ;;  %5643 = vmatmul.mubr.msk.bf16.gmra.mxu1 %vm199_vm1, %v5967_v11  ;;  %v2476_v13 = vshll.u32 %v5977_v41, 16  ;;  %v2463_v11 = vsel %vm959_vm2, %v2458_v48, %v2462_v38  ;;  %7897 = vst [vmem:[#allocation10_spill] sm:$0xff] %v6901_v29  ;;  %v6913_v38 = vsel %vm3877_vm3, %v4001_v9, %v4010_v17  ;;  %v4016_v48 = vshll.u32 %v6898_v57, 16 }
  0xc7   :  { %5732 = vmatprep.mubr.msk.bf16.mxu0 %vm199_vm1, %v3053_v19  ;;  %5690 = vmatprep.mubr.msk.bf16.mxu1 %vm199_vm1, %v2455_v25  ;;  %v2471_v19 = vsel %vm959_vm2, %v2466_v16, %v2470_v53  ;;  %v2484_v25 = vshll.u32 %v6875_v60, 16  ;;  %7898 = vst [vmem:[#allocation11_spill] sm:$0xff] %v6913_v38  ;;  %v3060_v16 = vrot.slane %v6674_v34, 1  ;;  %v4024_v34 = vrot.slane %v4022_v62, 1 }
  0xc8   :  { %v6865_v47 = vpop.f32.mrf.mxu0  ;;  %v6870_v52 = vpop.f32.mrf.mxu1  ;;  %v2478_v23 = vrot.slane %v2476_v13, 1  ;;  %v4018_v13 = vrot.slane %v4016_v48, 2  ;;  %v4027_v9 = vrot.slane %v4025_v27, 2  ;;  %v2488_v38 = vshrl.u32 %v6875_v60, 16  ;;  %v6966_v60 = vld [vmem:[%s7885_s0 + $0x98] sm:$0xff]  }
  0xc9   :  { %v2486_v6 = vrot.slane %v2484_v25, 1  ;;  %v3061_v25 = vsel %vm3050_vm4, %v3058_v42, %v3060_v16  ;;  %v2496_v27 = vshrl.u32 %v5981_v40, 16 }
  0xca   :  { %v6877_v1 = vpop.f32.mrf.mxu0  ;;  %v6880_v7 = vpop.f32.mrf.mxu1  ;;  %v2482_v5 = vor.u32 %v2480_v2, %v2478_v23  ;;  %v2479_v2 = vsel %vm959_vm2, %v2474_v51, %v2478_v23  ;;  %v3062_v51 = vrot.slane %v6690_v43, 1 }
  0xcc   :  { %v6885_v14 = vpop.f32.mrf.mxu0  ;;  %v6891_v18 = vpop.f32.mrf.mxu1  ;;  %v2487_v62 = vsel %vm959_vm2, %v2482_v5, %v2486_v6  ;;  %v5985_v5 = vld [vmem:[%s7885_s0 + $0x1a0] sm:$0xff]  }
  0xcd   :  { %v2508_v55 = vshll.u32 %v5985_v5, 16 }
  0xce   :  { %v6903_v30 = vpop.f32.mrf.mxu0  ;;  %5733 = vmatmul.mubr.msk.bf16.vlgmr.msra.gmra.mxu0 %vm199_vm1, %v3055_v10  ;;  %v6915_v41 = vpop.f32.mrf.mxu1  ;;  %5691 = vmatmul.mubr.msk.bf16.vlgmr.msra.gmra.mxu1 %vm199_vm1, %v2463_v11  ;;  %v6936_v10 = vld [vmem:[%s7885_s0 + $0x198] sm:$0xff]  }
  0xcf   :  { %5815 = vmatpush3.bf16.msra.mxu0 %v4127_v15  ;;  %5773 = vmatpush3.bf16.msra.mxu1 %v3636_v12  ;;  %v4015_v12 = vrot.slane %v4013_v46, 1  ;;  %v3059_v15 = vsel %vm3050_vm4, %v3056_v3, %v3058_v42  ;;  %v4028_v46 = vor.u32 %v4027_v9, %v4024_v34  ;;  %v2500_v29 = vshll.u32 %v6936_v10, 16  ;;  %v6955_v3 = vld [vmem:[%s7885_s0 + $0x90] sm:$0xff]  }
  0xd0   :  { %v6924_v49 = vpop.f32.mrf.mxu0  ;;  %5694 = vmatprep.mubr.msk.bf16.mxu1 %vm199_vm1, %v2471_v19  ;;  %v6930_v63 = vpop.f32.mrf.mxu1  ;;  %5736 = vmatprep.mubr.msk.bf16.mxu0 %vm199_vm1, %v3057_v45  ;;  %v4034_v34 = vshll.u32 %v6955_v3, 16 }
  0xd1   :  { %v4019_v19 = vor.u32 %v4018_v13, %v4015_v12  ;;  %v4031_v13 = vshrl.u32 %v6955_v3, 16 }
  0xd2   :  { %v6938_v53 = vpop.f32.mrf.mxu0  ;;  %v6940_v11 = vpop.f32.mrf.mxu1  ;;  %v4036_v32 = vrot.slane %v4034_v34, 2 }
  0xd3   :  { %v6958_v12 = vsel %vm3877_vm3, %v4010_v17, %v4019_v19  ;;  %v6969_v42 = vsel %vm3877_vm3, %v4019_v19, %v4028_v46  ;;  %v2494_v17 = vrot.slane %v2492_v20, 1  ;;  %v3064_v19 = vrot.slane %v6707_v44, 1 }
  0xd4   :  { %v6943_v45 = vpop.f32.mrf.mxu0  ;;  %v6948_v48 = vpop.f32.mrf.mxu1  ;;  %7899 = vst [vmem:[#allocation12_spill] sm:$0xff] %v6958_v12  ;;  %7900 = vst [vmem:[#allocation13_spill] sm:$0xff] %v6969_v42  ;;  %v4043_v20 = vshll.u32 %v6966_v60, 16  ;;  %v2502_v42 = vrot.slane %v2500_v29, 1  ;;  %v6992_v12 = vld [vmem:[%s7885_s0 + $0x1a8] sm:$0xff]   ;;  %v4033_v36 = vrot.slane %v4031_v13, 1 }
  0xd5   :  { %v3065_v22 = vsel %vm3050_vm4, %v3062_v51, %v3064_v19 }
  0xd6   :  { %v6960_v23 = vpop.f32.mrf.mxu0  ;;  %5737 = vmatmul.mubr.msk.bf16.gmra.mxu0 %vm199_vm1, %v3059_v15  ;;  %v6971_v40 = vpop.f32.mrf.mxu1  ;;  %5695 = vmatmul.mubr.msk.bf16.gmra.mxu1 %vm199_vm1, %v2479_v2  ;;  %v2490_v15 = vor.u32 %v2488_v38, %v2486_v6  ;;  %v4040_v2 = vshrl.u32 %v6966_v60, 16  ;;  %v4045_v6 = vrot.slane %v4043_v20, 2  ;;  %v4037_v28 = vor.u32 %v4036_v32, %v4033_v36  ;;  %v7011_v32 = vld [vmem:[%s7885_s0 + $0xa0] sm:$0xff]  }
  0xd7   :  { %7901 = vst [vmem:[#allocation14_spill] sm:$0xff] %v6971_v40  ;;  %5740 = vmatprep.mubr.msk.bf16.mxu0 %vm199_vm1, %v3061_v25  ;;  %5698 = vmatprep.mubr.msk.bf16.mxu1 %vm199_vm1, %v2487_v62  ;;  %v2498_v25 = vor.u32 %v2496_v27, %v2494_v17  ;;  %v3063_v62 = vsel %vm3050_vm4, %v3060_v16, %v3062_v51  ;;  %v2504_v27 = vshrl.u32 %v6936_v10, 16  ;;  %v2512_v20 = vshrl.u32 %v5985_v5, 16 }
  0xd8   :  { %v6981_v9 = vpop.f32.mrf.mxu0  ;;  %v6987_v43 = vpop.f32.mrf.mxu1  ;;  %v4042_v38 = vrot.slane %v4040_v2, 1  ;;  %v2495_v29 = vsel %vm959_vm2, %v2490_v15, %v2494_v17  ;;  %v7014_v36 = vsel %vm3877_vm3, %v4028_v46, %v4037_v28  ;;  %v2510_v51 = vrot.slane %v2508_v55, 1  ;;  %v5989_v46 = vld [vmem:[%s7885_s0 + $0x1b0] sm:$0xff]  }
  0xd9   :  { %7902 = vst [vmem:[#allocation15_spill] sm:$0xff] %v6987_v43  ;;  %v2503_v2 = vsel %vm959_vm2, %v2498_v25, %v2502_v42  ;;  %7905 = vst [vmem:[#allocation18_spill] sm:$0xff] %v7014_v36  ;;  %v3066_v5 = vrot.slane %v6717_v61, 1  ;;  %v4049_v15 = vshrl.u32 %v7011_v32, 16  ;;  %v4052_v25 = vshll.u32 %v7011_v32, 16  ;;  %v5991_v61 = vld [vmem:[%s7885_s0 + $0x1b8] sm:$0xff]  }
  0xda   :  { %v6994_v59 = vpop.f32.mrf.mxu0  ;;  %v6996_v44 = vpop.f32.mrf.mxu1  ;;  %v4046_v13 = vor.u32 %v4045_v6, %v4042_v38  ;;  %v3068_v6 = vrot.slane %v6750_v21, 1  ;;  %v2532_v43 = vshll.u32 %v5991_v61, 16 }
  0xdb   :  { %7903 = vst [vmem:[#allocation16_spill] sm:$0xff] %v6996_v44  ;;  %v2516_v44 = vshll.u32 %v6992_v12, 16 }
  0xdc   :  { %v6999_v26 = vpop.f32.mrf.mxu0  ;;  %v7004_v34 = vpop.f32.mrf.mxu1  ;;  %v7020_v10 = vsel %vm3877_vm3, %v4037_v28, %v4046_v13  ;;  %v2506_v28 = vor.u32 %v2504_v27, %v2502_v42  ;;  %v3067_v42 = vsel %vm3050_vm4, %v3064_v19, %v3066_v5  ;;  %v2524_v27 = vshll.u32 %v5989_v46, 16 }
  0xdd   :  { %7904 = vst [vmem:[#allocation17_spill] sm:$0xff] %v7004_v34  ;;  %7906 = vst [vmem:[#allocation19_spill] sm:$0xff] %v7020_v10  ;;  %v2518_v55 = vrot.slane %v2516_v44, 1  ;;  %v4054_v10 = vrot.slane %v4052_v25, 2  ;;  %v2520_v44 = vshrl.u32 %v6992_v12, 16  ;;  %v2528_v25 = vshrl.u32 %v5989_v46, 16 }
  0xde   :  { %v7016_v16 = vpop.f32.mrf.mxu0  ;;  %5741 = vmatmul.mubr.msk.bf16.gmra.mxu0 %vm199_vm1, %v3063_v62  ;;  %v7022_v17 = vpop.f32.mrf.mxu1  ;;  %5699 = vmatmul.mubr.msk.bf16.gmra.mxu1 %vm199_vm1, %v2495_v29  ;;  %v4051_v29 = vrot.slane %v4049_v15, 1  ;;  %v2526_v12 = vrot.slane %v2524_v27, 1 }
  0xdf   :  { %7907 = vst [vmem:[#allocation20_spill] sm:$0xff] %v7022_v17  ;;  %5744 = vmatprep.mubr.msk.bf16.mxu0 %vm199_vm1, %v3065_v22  ;;  %5702 = vmatprep.mubr.msk.bf16.mxu1 %vm199_vm1, %v2503_v2  ;;  %v2514_v22 = vor.u32 %v2512_v20, %v2510_v51  ;;  %v2511_v20 = vsel %vm959_vm2, %v2506_v28, %v2510_v51  ;;  %v3070_v51 = vrot.slane %v6758_v24, 1  ;;  %v3072_v28 = vrot.slane %v6795_v54, 1 }
  0xe0   :  { %v7032_v38 = vpop.f32.mrf.mxu0  ;;  %v7036_v62 = vpop.f32.mrf.mxu1  ;;  %v7046_v2 = vor.u32 %v4054_v10, %v4051_v29  ;;  %v2536_v54 = vshrl.u32 %v5991_v61, 16  ;;  %v5997_v61 = vld [vmem:[%s7885_s0 + $0x1d0] sm:$0xff]  }
  0xe1   :  { %7908 = vst [vmem:[#allocation21_spill] sm:$0xff] %v7036_v62  ;;  %v3069_v62 = vsel %vm3050_vm4, %v3066_v5, %v3068_v6  ;;  %v2519_v15 = vsel %vm959_vm2, %v2514_v22, %v2518_v55  ;;  %v5993_v5 = vld [vmem:[%s7885_s0 + $0x1c0] sm:$0xff]  }
  0xe2   :  { %v7041_v36 = vpop.f32.mrf.mxu0  ;;  %v7043_v17 = vpop.f32.mrf.mxu1  ;;  %7910 = vst [vmem:[#allocation23_spill] sm:$0xff] %v7046_v2  ;;  %v7058_v19 = vsel %vm3877_vm3, %v4046_v13, %v7046_v2  ;;  %v2522_v13 = vor.u32 %v2520_v44, %v2518_v55  ;;  %v3071_v2 = vsel %vm3050_vm4, %v3068_v6, %v3070_v51 }
  0xe3   :  { %7909 = vst [vmem:[#allocation22_spill] sm:$0xff] %v7043_v17  ;;  %7912 = vst [vmem:[#allocation25_spill] sm:$0xff] %v7058_v19  ;;  %v2540_v19 = vshll.u32 %v5993_v5, 16 }
  0xe4   :  { %v7048_v21 = vpop.f32.mrf.mxu0  ;;  %v7053_v34 = vpop.f32.mrf.mxu1  ;;  %v2527_v44 = vsel %vm959_vm2, %v2522_v13, %v2526_v12 }
  0xe5   :  { %7911 = vst [vmem:[#allocation24_spill] sm:$0xff] %v7053_v34  ;;  %v2542_v6 = vrot.slane %v2540_v19, 1  ;;  %v7105_v19 = vld [vmem:[%s7885_s0 + $0x1d8] sm:$0xff]  }
  0xe6   :  { %v7060_v10 = vpop.f32.mrf.mxu0  ;;  %5745 = vmatmul.mubr.msk.bf16.gmra.mxu0 %vm199_vm1, %v3067_v42  ;;  %v7063_v29 = vpop.f32.mrf.mxu1  ;;  %5703 = vmatmul.mubr.msk.bf16.gmra.mxu1 %vm199_vm1, %v2511_v20  ;;  %v2530_v42 = vor.u32 %v2528_v25, %v2526_v12  ;;  %v2534_v20 = vrot.slane %v2532_v43, 1  ;;  %v3074_v12 = vrot.slane %v6804_v56, 1 }
  0xe7   :  { %7913 = vst [vmem:[#allocation26_spill] sm:$0xff] %v7063_v29  ;;  %5748 = vmatprep.mubr.msk.bf16.mxu0 %vm199_vm1, %v3069_v62  ;;  %5706 = vmatprep.mubr.msk.bf16.mxu1 %vm199_vm1, %v2519_v15  ;;  %v5995_v62 = vld [vmem:[%s7885_s0 + $0x1c8] sm:$0xff]   ;;  %v3073_v15 = vsel %vm3050_vm4, %v3070_v51, %v3072_v28 }
  0xe8   :  { %v7071_v46 = vpop.f32.mrf.mxu0  ;;  %v7075_v22 = vpop.f32.mrf.mxu1  ;;  %v2535_v43 = vsel %vm959_vm2, %v2530_v42, %v2534_v20  ;;  %v2548_v29 = vshll.u32 %v5995_v62, 16 }
  0xe9   :  { %7914 = vst [vmem:[#allocation27_spill] sm:$0xff] %v7075_v22  ;;  %v2544_v22 = vshrl.u32 %v5993_v5, 16  ;;  %v2538_v5 = vor.u32 %v2536_v54, %v2534_v20  ;;  %v3075_v20 = vsel %vm3050_vm4, %v3072_v28, %v3074_v12  ;;  %v2556_v54 = vshll.u32 %v5997_v61, 16 }
  0xea   :  { %v7080_v24 = vpop.f32.mrf.mxu0  ;;  %v7082_v27 = vpop.f32.mrf.mxu1 }
  0xeb   :  { %7915 = vst [vmem:[#allocation28_spill] sm:$0xff] %v7082_v27 }
  0xec   :  { %v7085_v55 = vpop.f32.mrf.mxu0  ;;  %v7089_v25 = vpop.f32.mrf.mxu1 }
  0xed   :  { %7916 = vst [vmem:[#allocation29_spill] sm:$0xff] %v7089_v25  ;;  %v2546_v25 = vor.u32 %v2544_v22, %v2542_v6  ;;  %v2543_v22 = vsel %vm959_vm2, %v2538_v5, %v2542_v6  ;;  %v3078_v6 = vrot.slane %v6850_v33, 1  ;;  %v6003_v33 = vld [vmem:[%s7885_s0 + $0x1e8] sm:$0xff]  }
  0xee   :  { %v5566_v34 = vpop.f32.mrf.mxu0  ;;  %5749 = vmatmul.mubr.msk.bf16.gmra.mxu0 %vm199_vm1, %v3071_v2  ;;  %v5524_v27 = vpop.f32.mrf.mxu1  ;;  %5707 = vmatmul.mubr.msk.bf16.gmra.mxu1 %vm199_vm1, %v2527_v44  ;;  %v3076_v2 = vrot.slane %v6839_v31, 1  ;;  %v2550_v44 = vrot.slane %v2548_v29, 1 }
  0xef   :  { %5752 = vmatprep.mubr.msk.bf16.mxu0 %vm199_vm1, %v3073_v15  ;;  %v663_v51 = vadd.f32 %v5524_v27, %v6844_v35  ;;  %5710 = vmatprep.mubr.msk.bf16.mxu1 %vm199_vm1, %v2535_v43  ;;  %v2552_v27 = vshrl.u32 %v5995_v62, 16 }
  0xf0   :  { %v1221_v13 = vpop.f32.mrf.mxu0  ;;  %v654_v42 = vpop.f32.mrf.mxu1  ;;  %v3077_v40 = vsel %vm3050_vm4, %v3074_v12, %v3076_v2 }
  0xf1   :  { %v7107_v56 = vadd.f32 %v5566_v34, %v663_v51  ;;  %v655_v15 = vadd.f32 %v654_v42, %v6865_v47  ;;  %v2551_v34 = vsel %vm959_vm2, %v2546_v25, %v2550_v44  ;;  %v2560_v51 = vshrl.u32 %v5997_v61, 16  ;;  %v6001_v25 = vld [vmem:[%s7885_s0 + $0x1e0] sm:$0xff]  }
  0xf2   :  { %v5567_v17 = vpop.f32.mrf.mxu0  ;;  %v5525_v35 = vpop.f32.mrf.mxu1  ;;  %v2564_v47 = vshll.u32 %v7105_v19, 16  ;;  %v3080_v61 = vrot.slane %v6898_v57, 1 }
  0xf3   :  { %v7111_v43 = vadd.f32 %v1221_v13, %v655_v15  ;;  %v666_v31 = vadd.f32 %v5525_v35, %v6877_v1  ;;  %v2558_v1 = vrot.slane %v2556_v54, 1 }
  0xf4   :  { %v1224_v29 = vpop.f32.mrf.mxu0  ;;  %v657_v4 = vpop.f32.mrf.mxu1 }
  0xf5   :  { %v7118_v42 = vadd.f32 %v5567_v17, %v666_v31  ;;  %v658_v28 = vadd.f32 %v657_v4, %v6885_v14  ;;  %v2554_v14 = vor.u32 %v2552_v27, %v2550_v44  ;;  %v2562_v15 = vor.u32 %v2560_v51, %v2558_v1 }
  0xf6   :  { %v5570_v62 = vpop.f32.mrf.mxu0  ;;  %5753 = vmatmul.mubr.msk.bf16.gmra.mxu0 %vm199_vm1, %v3075_v20  ;;  %v5528_v13 = vpop.f32.mrf.mxu1  ;;  %5711 = vmatmul.mubr.msk.bf16.gmra.mxu1 %vm199_vm1, %v2543_v22  ;;  %v2568_v44 = vshrl.u32 %v7105_v19, 16  ;;  %v2572_v27 = vshll.u32 %v6001_v25, 16  ;;  %v3081_v51 = vsel %vm3050_vm4, %v3078_v6, %v3080_v61 }
  0xf7   :  { %5756 = vmatprep.mubr.msk.bf16.mxu0 %vm199_vm1, %v3077_v40  ;;  %v7128_v12 = vadd.f32 %v1224_v29, %v658_v28  ;;  %v679_v17 = vadd.f32 %v5528_v13, %v6903_v30  ;;  %5714 = vmatprep.mubr.msk.bf16.mxu1 %vm199_vm1, %v2551_v34  ;;  %v2566_v40 = vrot.slane %v2564_v47, 1  ;;  %v3079_v30 = vsel %vm3050_vm4, %v3076_v2, %v3078_v6  ;;  %v6005_v6 = vld [vmem:[%s7885_s0 + $0x1f0] sm:$0xff]  }
  0xf8   :  { %v1237_v4 = vpop.f32.mrf.mxu0  ;;  %v670_v5 = vpop.f32.mrf.mxu1  ;;  %v2559_v34 = vsel %vm959_vm2, %v2554_v14, %v2558_v1  ;;  %v3082_v1 = vrot.slane %v6910_v8, 1  ;;  %v7165_v8 = vld [vmem:[%s7885_s0 + $0x1f8] sm:$0xff]  }
  0xf9   :  { %v7136_v35 = vadd.f32 %v5570_v62, %v679_v17  ;;  %v671_v20 = vadd.f32 %v670_v5, %v6924_v49  ;;  %v2567_v28 = vsel %vm959_vm2, %v2562_v15, %v2566_v40  ;;  %v2576_v49 = vshrl.u32 %v6001_v25, 16 }
  0xfa   :  { %v5571_v54 = vpop.f32.mrf.mxu0  ;;  %v5529_v31 = vpop.f32.mrf.mxu1  ;;  %v2580_v62 = vshll.u32 %v6003_v33, 16  ;;  %v2570_v14 = vor.u32 %v2568_v44, %v2566_v40  ;;  %v3084_v5 = vrot.slane %v6955_v3, 1  ;;  %v3083_v40 = vsel %vm3050_vm4, %v3080_v61, %v3082_v1 }
  0xfb   :  { %v7141_v29 = vadd.f32 %v1237_v4, %v671_v20  ;;  %v682_v57 = vadd.f32 %v5529_v31, %v6938_v53  ;;  %v2574_v53 = vrot.slane %v2572_v27, 1  ;;  %v2584_v44 = vshrl.u32 %v6003_v33, 16 }
  0xfc   :  { %v1240_v22 = vpop.f32.mrf.mxu0  ;;  %v673_v47 = vpop.f32.mrf.mxu1 }
  0xfd   :  { %v7147_v13 = vadd.f32 %v5571_v54, %v682_v57  ;;  %v674_v2 = vadd.f32 %v673_v47, %v6943_v45  ;;  %v2578_v20 = vor.u32 %v2576_v49, %v2574_v53  ;;  %v2582_v54 = vrot.slane %v2580_v62, 1 }
  0xfe   :  { %v5574_v19 = vpop.f32.mrf.mxu0  ;;  %5757 = vmatmul.mubr.msk.bf16.gmra.mxu0 %vm199_vm1, %v3079_v30  ;;  %v5532_v17 = vpop.f32.mrf.mxu1  ;;  %5715 = vmatmul.mubr.msk.bf16.gmra.mxu1 %vm199_vm1, %v2559_v34  ;;  %v2588_v57 = vshll.u32 %v6005_v6, 16  ;;  %v3085_v47 = vsel %vm3050_vm4, %v3082_v1, %v3084_v5  ;;  %v2592_v62 = vshrl.u32 %v6005_v6, 16 }
  0xff   :  { %5760 = vmatprep.mubr.msk.bf16.mxu0 %vm199_vm1, %v3081_v51  ;;  %v7157_v25 = vadd.f32 %v1240_v22, %v674_v2  ;;  %v695_v4 = vadd.f32 %v5532_v17, %v6960_v23  ;;  %5718 = vmatprep.mubr.msk.bf16.mxu1 %vm199_vm1, %v2567_v28  ;;  %v2575_v51 = vsel %vm959_vm2, %v2570_v14, %v2574_v53  ;;  %v3086_v53 = vrot.slane %v6966_v60, 1 }
 0x100   :  { %v1253_v45 = vpop.f32.mrf.mxu0  ;;  %v686_v15 = vpop.f32.mrf.mxu1  ;;  %v2583_v49 = vsel %vm959_vm2, %v2578_v20, %v2582_v54  ;;  %v2590_v17 = vrot.slane %v2588_v57, 1 }
 0x101   :  { %v7167_v31 = vadd.f32 %v5574_v19, %v695_v4  ;;  %v687_v30 = vadd.f32 %v686_v15, %v6981_v9  ;;  %v2596_v9 = vshll.u32 %v7165_v8, 16 }
 0x102   :  { %v5575_v27 = vpop.f32.mrf.mxu0  ;;  %v5533_v23 = vpop.f32.mrf.mxu1  ;;  %v2594_v15 = vor.u32 %v2592_v62, %v2590_v17 }
 0x103   :  { %v7171_v22 = vadd.f32 %v1253_v45, %v687_v30  ;;  %v698_v3 = vadd.f32 %v5533_v23, %v6994_v59  ;;  %v2586_v59 = vor.u32 %v2584_v44, %v2582_v54  ;;  %v6009_v45 = vld [vmem:[%s7885_s0 + $0x200] ss:$0 sps:$4 sm:$0x11]   ;;  %v2598_v20 = vrot.slane %v2596_v9, 1 }
 0x104   :  { %v1256_v34 = vpop.f32.mrf.mxu0  ;;  %v689_v28 = vpop.f32.mrf.mxu1  ;;  %v3087_v23 = vsel %vm3050_vm4, %v3084_v5, %v3086_v53  ;;  %v6011_v5 = vld [vmem:[%s7885_s0 + $0xb8] sm:$0xfe]  }
 0x105   :  { %v7178_v2 = vadd.f32 %v5575_v27, %v698_v3  ;;  %v690_v61 = vadd.f32 %v689_v28, %v6999_v26  ;;  %v3088_v26 = vrot.slane %v7011_v32, 1  ;;  %v6010_v32 = vld [vmem:[%s7885_s0 + $0xa8] ss:$0 sps:$4 sm:$0x11]  }
 0x106   :  { %v5578_v33 = vpop.f32.mrf.mxu0  ;;  %5761 = vmatmul.mubr.msk.bf16.gmra.mxu0 %vm199_vm1, %v3083_v40  ;;  %v5536_v19 = vpop.f32.mrf.mxu1  ;;  %5719 = vmatmul.mubr.msk.bf16.gmra.mxu1 %vm199_vm1, %v2575_v51  ;;  %v2600_v40 = vshrl.u32 %v7165_v8, 16  ;;  %v6012_v8 = vld [vmem:[%s7885_s0 + $0xc0] sm:$0xff]   ;;  %v3090_v9 = vrot.slane %v6010_v32, 1 }
 0x107   :  { %5764 = vmatprep.mubr.msk.bf16.mxu0 %vm199_vm1, %v3085_v47  ;;  %v7185_v1 = vadd.f32 %v1256_v34, %v690_v61  ;;  %v711_v6 = vadd.f32 %v5536_v19, %v7016_v16  ;;  %5722 = vmatprep.mubr.msk.bf16.mxu1 %vm199_vm1, %v2583_v49  ;;  %v2591_v16 = vsel %vm959_vm2, %v2586_v59, %v2590_v17 }
 0x108   :  { %v1269_v4 = vpop.f32.mrf.mxu0  ;;  %v702_v14 = vpop.f32.mrf.mxu1  ;;  %v3089_v34 = vsel %vm3050_vm4, %v3086_v53, %v3088_v26  ;;  %v2599_v47 = vsel %vm959_vm2, %v2594_v15, %v2598_v20  ;;  %v2602_v59 = vor.u32 %v2600_v40, %v2598_v20 }
 0x109   :  { %v7193_v54 = vadd.f32 %v5578_v33, %v711_v6  ;;  %v703_v60 = vadd.f32 %v702_v14, %v7032_v38  ;;  %v2604_v38 = vshll.u32 %v6009_v45, 16  ;;  %v3535_v6 = vrot.slane %v6012_v8, 1 }
 0x10a   :  { %v5579_v30 = vpop.f32.mrf.mxu0  ;;  %v5537_v27 = vpop.f32.mrf.mxu1 }
 0x10b   :  { %v7202_v44 = vadd.f32 %v1269_v4, %v703_v60  ;;  %v714_v57 = vadd.f32 %v5537_v27, %v7041_v36  ;;  %v2606_v17 = vrot.slane %v2604_v38, 1  ;;  %v3091_v60 = vsel %vm3050_vm4, %v3088_v26, %v3090_v9 }
 0x10c   :  { %v1272_v3 = vpop.f32.mrf.mxu0  ;;  %v705_v51 = vpop.f32.mrf.mxu1 }
 0x10d   :  { %v7213_v28 = vadd.f32 %v5579_v30, %v714_v57  ;;  %v706_v49 = vadd.f32 %v705_v51, %v7048_v21  ;;  %v3534_v21 = vrot.slane %v6011_v5, 1  ;;  %v2607_v20 = vsel %vm959_vm2, %v2602_v59, %v2606_v17 }
 0x10e   :  { %v5582_v36 = vpop.f32.mrf.mxu0  ;;  %5765 = vmatmul.mubr.msk.bf16.gmra.mxu0 %vm199_vm1, %v3087_v23  ;;  %v5540_v62 = vpop.f32.mrf.mxu1  ;;  %5723 = vmatmul.mubr.msk.bf16.gmra.mxu1 %vm199_vm1, %v2591_v16  ;;  %v6013_v16 = vld [vmem:[%s7885_s0 + $0xc8] sm:$0xff]  }
 0x10f   :  { %5768 = vmatprep.mubr.msk.bf16.mxu0 %vm199_vm1, %v3089_v34  ;;  %v7219_v61 = vadd.f32 %v1272_v3, %v706_v49  ;;  %v727_v33 = vadd.f32 %v5540_v62, %v7060_v10  ;;  %5726 = vmatprep.mubr.msk.bf16.mxu1 %vm199_vm1, %v2599_v47  ;;  %v3536_v40 = vsel %vm3050_vm4, %v3534_v21, %v3535_v6  ;;  %v3537_v51 = vrot.slane %v6013_v16, 1 }
 0x110   :  { %v1285_v19 = vpop.f32.mrf.mxu0  ;;  %v718_v53 = vpop.f32.mrf.mxu1 }
 0x111   :  { %v7223_v4 = vadd.f32 %v5582_v36, %v727_v33  ;;  %v719_v45 = vadd.f32 %v718_v53, %v7071_v46  ;;  %v6014_v46 = vld [vmem:[%s7885_s0 + $0xd0] sm:$0xff]   ;;  %v3538_v33 = vsel %vm3050_vm4, %v3535_v6, %v3537_v51 }
 0x112   :  { %v5583_v14 = vpop.f32.mrf.mxu0  ;;  %v5541_v15 = vpop.f32.mrf.mxu1  ;;  %v3539_v5 = vrot.slane %v6014_v46, 1 }
 0x113   :  { %v7227_v30 = vadd.f32 %v1285_v19, %v719_v45  ;;  %v730_v10 = vadd.f32 %v5541_v15, %v7080_v24 }
 0x114   :  { %v1288_v27 = vpop.f32.mrf.mxu0  ;;  %v721_v23 = vpop.f32.mrf.mxu1  ;;  %v3540_v59 = vsel %vm3050_vm4, %v3537_v51, %v3539_v5 }
 0x115   :  { %v7238_v32 = vadd.f32 %v5583_v14, %v730_v10  ;;  %v722_v26 = vadd.f32 %v721_v23, %v7085_v55 }
 0x116   :  { %v5586_v57 = vpop.f32.mrf.mxu0  ;;  %5769 = vmatmul.mubr.msk.bf16.gmra.mxu0 %vm199_vm1, %v3091_v60  ;;  %v5544_v24 = vpop.f32.mrf.mxu1  ;;  %5727 = vmatmul.mubr.msk.bf16.gmra.mxu1 %vm199_vm1, %v2607_v20 }
 0x117   :  { %5816 = vmatprep.mubr.msk.bf16.mxu0 %vm199_vm1, %v6684_v39  ;;  %v7245_v3 = vadd.f32 %v1288_v27, %v722_v26  ;;  %v743_v34 = vadd.f32 %v5544_v24, %v6855_v37  ;;  %5774 = vmatprep.mubr.msk.bf16.mxu1 %vm199_vm1, %v3536_v40  ;;  %v6015_v37 = vld [vmem:[%s7885_s0 + $0xd8] sm:$0xff]  }
 0x118   :  { %v1301_v38 = vpop.f32.mrf.mxu0  ;;  %v734_v47 = vpop.f32.mrf.mxu1  ;;  %v3541_v15 = vrot.slane %v6015_v37, 1 }
 0x119   :  { %v7249_v55 = vadd.f32 %v5586_v57, %v743_v34  ;;  %v735_v8 = vadd.f32 %v734_v47, %v6870_v52  ;;  %v6016_v52 = vld [vmem:[%s7885_s0 + $0xe0] sm:$0xff]  }
 0x11a   :  { %v5587_v49 = vpop.f32.mrf.mxu0  ;;  %v5545_v36 = vpop.f32.mrf.mxu1  ;;  %v3542_v40 = vsel %vm3050_vm4, %v3539_v5, %v3541_v15  ;;  %v7918_v47 = vld [vmem:[#allocation14_spill] sm:$0xff] }
 0x11b   :  { %v7252_v62 = vadd.f32 %v1301_v38, %v735_v8  ;;  %v746_v39 = vadd.f32 %v5545_v36, %v6880_v7  ;;  %v7917_v38 = vld [vmem:[#allocation2_spill] sm:$0xff] }
 0x11c   :  { %v1304_v9 = vpop.f32.mrf.mxu0  ;;  %v737_v19 = vpop.f32.mrf.mxu1 }
 0x11d   :  { %v7263_v17 = vadd.f32 %v5587_v49, %v746_v39  ;;  %v738_v53 = vadd.f32 %v737_v19, %v6891_v18  ;;  %v3543_v18 = vrot.slane %v6016_v52, 1 }
 0x11e   :  { %v5590_v21 = vpop.f32.mrf.mxu0  ;;  %5817 = vmatmul.mubr.msk.bf16.vlgmr.msra.gmra.mxu0 %vm199_vm1, %v6698_v50  ;;  %v5548_v7 = vpop.f32.mrf.mxu1  ;;  %5775 = vmatmul.mubr.msk.bf16.vlgmr.msra.gmra.mxu1 %vm199_vm1, %v3538_v33 }
 0x11f   :  { %5820 = vmatprep.mubr.msk.bf16.mxu0 %vm199_vm1, %v6710_v58  ;;  %v7271_v6 = vadd.f32 %v1304_v9, %v738_v53  ;;  %v759_v45 = vadd.f32 %v5548_v7, %v6915_v41  ;;  %5778 = vmatprep.mubr.msk.bf16.mxu1 %vm199_vm1, %v3540_v59  ;;  %v6017_v41 = vld [vmem:[%s7885_s0 + $0xe8] sm:$0xff]   ;;  %v3544_v26 = vsel %vm3050_vm4, %v3541_v15, %v3543_v18  ;;  %v7920_v59 = vld [vmem:[#allocation16_spill] sm:$0xff]  ;;  %v6019_v7 = vld [vmem:[%s7885_s0 + $0xf8] sm:$0xff]  }
 0x120   :  { %v1317_v14 = vpop.f32.mrf.mxu0  ;;  %v750_v60 = vpop.f32.mrf.mxu1  ;;  %v3545_v49 = vrot.slane %v6017_v41, 1  ;;  %v7919_v9 = vld [vmem:[#allocation15_spill] sm:$0xff]  ;;  %v6020_v15 = vld [vmem:[%s7885_s0 + $0x100] sm:$0xff]   ;;  %v7924_v41 = vld [vmem:[#allocation20_spill] sm:$0xff] }
 0x121   :  { %v7275_v10 = vadd.f32 %v5590_v21, %v759_v45  ;;  %v751_v50 = vadd.f32 %v750_v60, %v6930_v63  ;;  %v6018_v63 = vld [vmem:[%s7885_s0 + $0xf0] sm:$0xff]  }
 0x122   :  { %v5591_v27 = vpop.f32.mrf.mxu0  ;;  %v5549_v20 = vpop.f32.mrf.mxu1  ;;  %v3546_v21 = vsel %vm3050_vm4, %v3543_v18, %v3545_v49 }
 0x123   :  { %v7278_v16 = vadd.f32 %v1317_v14, %v751_v50  ;;  %v762_v58 = vadd.f32 %v5549_v20, %v6940_v11  ;;  %v7921_v50 = vld [vmem:[#allocation17_spill] sm:$0xff] }
 0x124   :  { %v1320_v23 = vpop.f32.mrf.mxu0  ;;  %v753_v46 = vpop.f32.mrf.mxu1 }
 0x125   :  { %v7289_v57 = vadd.f32 %v5591_v27, %v762_v58  ;;  %v754_v24 = vadd.f32 %v753_v46, %v6948_v48  ;;  %v3547_v48 = vrot.slane %v6018_v63, 1  ;;  %v7922_v58 = vld [vmem:[#allocation3_spill] sm:$0xff]  ;;  %v3549_v63 = vrot.slane %v6019_v7, 1  ;;  %v7927_v7 = vld [vmem:[#allocation24_spill] sm:$0xff] }
 0x126   :  { %v5594_v34 = vpop.f32.mrf.mxu0  ;;  %5821 = vmatmul.mubr.msk.bf16.gmra.mxu0 %vm199_vm1, %v6722_v0  ;;  %v5552_v11 = vpop.f32.mrf.mxu1  ;;  %5779 = vmatmul.mubr.msk.bf16.gmra.mxu1 %vm199_vm1, %v3542_v40 }
 0x127   :  { %5824 = vmatprep.mubr.msk.bf16.mxu0 %vm199_vm1, %v7917_v38  ;;  %v7297_v51 = vadd.f32 %v1320_v23, %v754_v24  ;;  %v775_v5 = vadd.f32 %v5552_v11, %v7918_v47  ;;  %5782 = vmatprep.mubr.msk.bf16.mxu1 %vm199_vm1, %v3544_v26  ;;  %v3548_v14 = vsel %vm3050_vm4, %v3545_v49, %v3547_v48  ;;  %v7923_v23 = vld [vmem:[#allocation4_spill] sm:$0xff]  ;;  %v7925_v38 = vld [vmem:[#allocation21_spill] sm:$0xff] }
 0x128   :  { %v1333_v8 = vpop.f32.mrf.mxu0  ;;  %v766_v36 = vpop.f32.mrf.mxu1 }
 0x129   :  { %v7301_v39 = vadd.f32 %v5594_v34, %v775_v5  ;;  %v767_v0 = vadd.f32 %v766_v36, %v7919_v9  ;;  %v3551_v34 = vrot.slane %v6020_v15, 1  ;;  %v7926_v36 = vld [vmem:[#allocation22_spill] sm:$0xff]  ;;  %v7928_v15 = vld [vmem:[#allocation5_spill] sm:$0xff] }
 0x12a   :  { %v5595_v33 = vpop.f32.mrf.mxu0  ;;  %v5553_v37 = vpop.f32.mrf.mxu1 }
 0x12b   :  { %v7304_v19 = vadd.f32 %v1333_v8, %v767_v0  ;;  %v778_v52 = vadd.f32 %v5553_v37, %v7920_v59  ;;  %v6021_v37 = vld [vmem:[%s7885_s0 + $0x108] sm:$0xff]  }
 0x12c   :  { %v1336_v53 = vpop.f32.mrf.mxu0  ;;  %v769_v45 = vpop.f32.mrf.mxu1 }
 0x12d   :  { %v7315_v60 = vadd.f32 %v5595_v33, %v778_v52  ;;  %v770_v27 = vadd.f32 %v769_v45, %v7921_v50  ;;  %v3550_v33 = vsel %vm3050_vm4, %v3547_v48, %v3549_v63  ;;  %v3552_v52 = vsel %vm3050_vm4, %v3549_v63, %v3551_v34  ;;  %v7929_v50 = vld [vmem:[#allocation6_spill] sm:$0xff]  ;;  %v7931_v63 = vld [vmem:[#allocation27_spill] sm:$0xff] }
 0x12e   :  { %v5598_v20 = vpop.f32.mrf.mxu0  ;;  %5825 = vmatmul.mubr.msk.bf16.gmra.mxu0 %vm199_vm1, %v7922_v58  ;;  %v5556_v18 = vpop.f32.mrf.mxu1  ;;  %5783 = vmatmul.mubr.msk.bf16.gmra.mxu1 %vm199_vm1, %v3546_v21 }
 0x12f   :  { %5828 = vmatprep.mubr.msk.bf16.mxu0 %vm199_vm1, %v7923_v23  ;;  %v7323_v40 = vadd.f32 %v1336_v53, %v770_v27  ;;  %v791_v46 = vadd.f32 %v5556_v18, %v7924_v41  ;;  %5786 = vmatprep.mubr.msk.bf16.mxu1 %vm199_vm1, %v3548_v14  ;;  %v6022_v53 = vld [vmem:[%s7885_s0 + $0x110] sm:$0xff]   ;;  %v3553_v23 = vrot.slane %v6021_v37, 1 }
 0x130   :  { %v1349_v26 = vpop.f32.mrf.mxu0  ;;  %v782_v24 = vpop.f32.mrf.mxu1 }
 0x131   :  { %v7327_v11 = vadd.f32 %v5598_v20, %v791_v46  ;;  %v783_v47 = vadd.f32 %v782_v24, %v7925_v38  ;;  %v7930_v20 = vld [vmem:[#allocation26_spill] sm:$0xff]  ;;  %v3555_v46 = vrot.slane %v6022_v53, 1 }
 0x132   :  { %v5599_v5 = vpop.f32.mrf.mxu0  ;;  %v5557_v8 = vpop.f32.mrf.mxu1 }
 0x133   :  { %v7330_v49 = vadd.f32 %v1349_v26, %v783_v47  ;;  %v794_v9 = vadd.f32 %v5557_v8, %v7926_v36  ;;  %v7932_v8 = vld [vmem:[#allocation28_spill] sm:$0xff] }
 0x134   :  { %v1352_v0 = vpop.f32.mrf.mxu0  ;;  %v785_v59 = vpop.f32.mrf.mxu1 }
 0x135   :  { %v7341_v21 = vadd.f32 %v5599_v5, %v794_v9  ;;  %v786_v45 = vadd.f32 %v785_v59, %v7927_v7  ;;  %v3556_v59 = vsel %vm3050_vm4, %v3553_v23, %v3555_v46  ;;  %v7933_v7 = vld [vmem:[#allocation29_spill] sm:$0xff] }
 0x136   :  { %v5602_v14 = vpop.f32.mrf.mxu0  ;;  %5829 = vmatmul.mubr.msk.bf16.gmra.mxu0 %vm199_vm1, %v7928_v15  ;;  %v5560_v48 = vpop.f32.mrf.mxu1  ;;  %5787 = vmatmul.mubr.msk.bf16.gmra.mxu1 %vm199_vm1, %v3550_v33  ;;  %v6023_v33 = vld [vmem:[%s7885_s0 + $0x118] sm:$0xff]   ;;  %v7934_v15 = vld [vmem:[#allocation7_spill] sm:$0xff] }
 0x137   :  { %5832 = vmatprep.mubr.msk.bf16.mxu0 %vm199_vm1, %v7929_v50  ;;  %v7349_v27 = vadd.f32 %v1352_v0, %v786_v45  ;;  %v807_v58 = vadd.f32 %v5560_v48, %v7930_v20  ;;  %5790 = vmatprep.mubr.msk.bf16.mxu1 %vm199_vm1, %v3552_v52  ;;  %v3554_v0 = vsel %vm3050_vm4, %v3551_v34, %v3553_v23  ;;  %v6024_v52 = vld [vmem:[%s7885_s0 + $0x120] sm:$0xff]   ;;  %v7935_v48 = vld [vmem:[#allocation8_spill] sm:$0xff] }
 0x138   :  { %v1365_v18 = vpop.f32.mrf.mxu0  ;;  %v798_v41 = vpop.f32.mrf.mxu1 }
 0x139   :  { %v7353_v26 = vadd.f32 %v5602_v14, %v807_v58  ;;  %v799_v24 = vadd.f32 %v798_v41, %v7931_v63  ;;  %v3559_v41 = vrot.slane %v6024_v52, 1 }
 0x13a   :  { %v5603_v38 = vpop.f32.mrf.mxu0  ;;  %v5561_v47 = vpop.f32.mrf.mxu1 }
 0x13b   :  { %v7356_v5 = vadd.f32 %v1365_v18, %v799_v24  ;;  %v810_v36 = vadd.f32 %v5561_v47, %v7932_v8  ;;  %v3557_v18 = vrot.slane %v6023_v33, 1 }
 0x13c   :  { %v1368_v9 = vpop.f32.mrf.mxu0  ;;  %v801_v37 = vpop.f32.mrf.mxu1 }
 0x13d   :  { %v7367_v53 = vadd.f32 %v5603_v38, %v810_v36  ;;  %v802_v45 = vadd.f32 %v801_v37, %v7933_v7  ;;  %v3560_v37 = vsel %vm3050_vm4, %v3557_v18, %v3559_v41 }
 0x13e   :  { %v5650_v14 = vpop.f32.mrf.mxu0  ;;  %5833 = vmatmul.mubr.msk.bf16.gmra.mxu0 %vm199_vm1, %v7934_v15  ;;  %v5608_v34 = vpop.f32.mrf.mxu1  ;;  %5791 = vmatmul.mubr.msk.bf16.gmra.mxu1 %vm199_vm1, %v3554_v0  ;;  %v3558_v0 = vsel %vm3050_vm4, %v3555_v46, %v3557_v18 }
 0x13f   :  { %5836 = vmatprep.mubr.msk.bf16.mxu0 %vm199_vm1, %v7935_v48  ;;  %v7375_v50 = vadd.f32 %v1368_v9, %v802_v45  ;;  %v1821_v20 = vadd.f32 %v5608_v34, %v7107_v56  ;;  %5794 = vmatprep.mubr.msk.bf16.mxu1 %vm199_vm1, %v3556_v59  ;;  %v6025_v56 = vld [vmem:[%s7885_s0 + $0x128] sm:$0xff]   ;;  %v7937_v45 = vld [vmem:[#allocation10_spill] sm:$0xff] }
 0x140   :  { %v2099_v58 = vpop.f32.mrf.mxu0  ;;  %v1660_v23 = vpop.f32.mrf.mxu1  ;;  %v3561_v48 = vrot.slane %v6025_v56, 1 }
 0x141   :  { %v7379_v63 = vadd.f32 %v5650_v14, %v1821_v20  ;;  %v1819_v24 = vadd.f32 %v1660_v23, %v7111_v43  ;;  %v6026_v43 = vld [vmem:[%s7885_s0 + $0x130] sm:$0xff]  }
 0x142   :  { %v5651_v38 = vpop.f32.mrf.mxu0  ;;  %v5609_v47 = vpop.f32.mrf.mxu1 }
 0x143   :  { %v7382_v8 = vadd.f32 %v2099_v58, %v1819_v24  ;;  %v1822_v36 = vadd.f32 %v5609_v47, %v7118_v42  ;;  %v7936_v42 = vld [vmem:[#allocation9_spill] sm:$0xff] }
 0x144   :  { %v2102_v9 = vpop.f32.mrf.mxu0  ;;  %v1663_v33 = vpop.f32.mrf.mxu1 }
 0x145   :  { %v7393_v59 = vadd.f32 %v5651_v38, %v1822_v36  ;;  %v1820_v52 = vadd.f32 %v1663_v33, %v7128_v12  ;;  %v3563_v12 = vrot.slane %v6026_v43, 1 }
 0x146   :  { %v5654_v7 = vpop.f32.mrf.mxu0  ;;  %5837 = vmatmul.mubr.msk.bf16.gmra.mxu0 %vm199_vm1, %v7936_v42  ;;  %v5612_v46 = vpop.f32.mrf.mxu1  ;;  %5795 = vmatmul.mubr.msk.bf16.gmra.mxu1 %vm199_vm1, %v3558_v0 }
 0x147   :  { %5840 = vmatprep.mubr.msk.bf16.mxu0 %vm199_vm1, %v7937_v45  ;;  %v7401_v14 = vadd.f32 %v2102_v9, %v1820_v52  ;;  %v1825_v15 = vadd.f32 %v5612_v46, %v7136_v35  ;;  %5798 = vmatprep.mubr.msk.bf16.mxu1 %vm199_vm1, %v3560_v37  ;;  %v3562_v9 = vsel %vm3050_vm4, %v3559_v41, %v3561_v48  ;;  %v6027_v35 = vld [vmem:[%s7885_s0 + $0x138] sm:$0xff]   ;;  %v7939_v52 = vld [vmem:[#allocation12_spill] sm:$0xff] }
 0x148   :  { %v2115_v34 = vpop.f32.mrf.mxu0  ;;  %v1676_v20 = vpop.f32.mrf.mxu1  ;;  %v3564_v56 = vsel %vm3050_vm4, %v3561_v48, %v3563_v12  ;;  %v3565_v45 = vrot.slane %v6027_v35, 1 }
 0x149   :  { %v7405_v58 = vadd.f32 %v5654_v7, %v1825_v15  ;;  %v1823_v18 = vadd.f32 %v1676_v20, %v7141_v29  ;;  %v6028_v29 = vld [vmem:[%s7885_s0 + $0x140] sm:$0xff]  }
 0x14a   :  { %v5655_v23 = vpop.f32.mrf.mxu0  ;;  %v5613_v24 = vpop.f32.mrf.mxu1 }
 0x14b   :  { %v7408_v38 = vadd.f32 %v2115_v34, %v1823_v18  ;;  %v1826_v47 = vadd.f32 %v5613_v24, %v7147_v13  ;;  %v7938_v13 = vld [vmem:[#allocation11_spill] sm:$0xff] }
 0x14c   :  { %v2118_v36 = vpop.f32.mrf.mxu0  ;;  %v1679_v0 = vpop.f32.mrf.mxu1 }
 0x14d   :  { %v7419_v33 = vadd.f32 %v5655_v23, %v1826_v47  ;;  %v1824_v37 = vadd.f32 %v1679_v0, %v7157_v25  ;;  %v3567_v25 = vrot.slane %v6028_v29, 1  ;;  %v6032_v23 = vld [vmem:[%s7885_s0 + $0xa8] ss:$0 sps:$4 sm:$0x33]   ;;  %v6030_v0 = vld [vmem:[%s7885_s0 + $0x150] sm:$0xff]  }
 0x14e   :  { %v5658_v43 = vpop.f32.mrf.mxu0  ;;  %5841 = vmatmul.mubr.msk.bf16.gmra.mxu0 %vm199_vm1, %v7938_v13  ;;  %v5616_v41 = vpop.f32.mrf.mxu1  ;;  %5799 = vmatmul.mubr.msk.bf16.gmra.mxu1 %vm199_vm1, %v3562_v9  ;;  %v6029_v9 = vld [vmem:[%s7885_s0 + $0x148] sm:$0xff]   ;;  %v4058_v13 = vshrl.u32 %v6032_v23, 16 }
 0x14f   :  { %5844 = vmatprep.mubr.msk.bf16.mxu0 %vm199_vm1, %v7939_v52  ;;  %v7427_v7 = vadd.f32 %v2118_v36, %v1824_v37  ;;  %v1829_v42 = vadd.f32 %v5616_v41, %v7167_v31  ;;  %5802 = vmatprep.mubr.msk.bf16.mxu1 %vm199_vm1, %v3564_v56  ;;  %v3566_v36 = vsel %vm3050_vm4, %v3563_v12, %v3565_v45  ;;  %v4061_v41 = vshll.u32 %v6032_v23, 16 }
 0x150   :  { %v2131_v46 = vpop.f32.mrf.mxu0  ;;  %v1692_v15 = vpop.f32.mrf.mxu1 }
 0x151   :  { %v7431_v34 = vadd.f32 %v5658_v43, %v1829_v42  ;;  %v1827_v48 = vadd.f32 %v1692_v15, %v7171_v22  ;;  %v3568_v22 = vsel %vm3050_vm4, %v3565_v45, %v3567_v25  ;;  %v7941_v43 = vld [vmem:[#allocation18_spill] sm:$0xff]  ;;  %v3571_v15 = vrot.slane %v6030_v0, 1 }
 0x152   :  { %v5659_v20 = vpop.f32.mrf.mxu0  ;;  %v5617_v18 = vpop.f32.mrf.mxu1 }
 0x153   :  { %v7437_v24 = vadd.f32 %v2131_v46, %v1827_v48  ;;  %v1830_v31 = vadd.f32 %v5617_v18, %v7178_v2  ;;  %v7940_v2 = vld [vmem:[#allocation13_spill] sm:$0xff] }
 0x154   :  { %v2134_v47 = vpop.f32.mrf.mxu0  ;;  %v1695_v35 = vpop.f32.mrf.mxu1 }
 0x155   :  { %v7448_v56 = vadd.f32 %v5659_v20, %v1830_v31  ;;  %v1828_v29 = vadd.f32 %v1695_v35, %v7185_v1  ;;  %v3569_v1 = vrot.slane %v6029_v9, 1  ;;  %v4063_v35 = vrot.slane %v4061_v41, 2  ;;  %v6031_v9 = vld [vmem:[%s7885_s0 + $0x158] ss:$0 sps:$4 sm:$0x11]  }
 0x156   :  { %v5662_v37 = vpop.f32.mrf.mxu0  ;;  %5845 = vmatmul.mubr.msk.bf16.gmra.mxu0 %vm199_vm1, %v7940_v2  ;;  %v5620_v12 = vpop.f32.mrf.mxu1  ;;  %5803 = vmatmul.mubr.msk.bf16.gmra.mxu1 %vm199_vm1, %v3566_v36  ;;  %v4060_v36 = vrot.slane %v4058_v13, 1 }
 0x157   :  { %5848 = vmatprep.mubr.msk.bf16.mxu0 %vm199_vm1, %v7941_v43  ;;  %v7456_v52 = vadd.f32 %v2134_v47, %v1828_v29  ;;  %v1833_v42 = vadd.f32 %v5620_v12, %v7193_v54  ;;  %5806 = vmatprep.mubr.msk.bf16.mxu1 %vm199_vm1, %v3568_v22  ;;  %v3570_v54 = vsel %vm3050_vm4, %v3567_v25, %v3569_v1  ;;  %v7942_v12 = vld [vmem:[#allocation19_spill] sm:$0xff] }
 0x158   :  { %v2147_v46 = vpop.f32.mrf.mxu0  ;;  %v1708_v45 = vpop.f32.mrf.mxu1  ;;  %v3572_v0 = vsel %vm3050_vm4, %v3569_v1, %v3571_v15  ;;  %v4064_v25 = vor.u32 %v4063_v35, %v4060_v36 }
 0x159   :  { %v7460_v48 = vadd.f32 %v5662_v37, %v1833_v42  ;;  %v1831_v20 = vadd.f32 %v1708_v45, %v7202_v44 }
 0x15a   :  { %v5663_v18 = vpop.f32.mrf.mxu0  ;;  %v5621_v31 = vpop.f32.mrf.mxu1 }
 0x15b   :  { %v7463_v2 = vadd.f32 %v2147_v46, %v1831_v20  ;;  %v1834_v23 = vadd.f32 %v5621_v31, %v7213_v28  ;;  %v7943_v28 = vld [vmem:[#allocation25_spill] sm:$0xff]  ;;  %v3573_v46 = vrot.slane %v6031_v9, 1  ;;  %v7944_v31 = vld [vmem:[#allocation23_spill] sm:$0xff] }
 0x15c   :  { %v2150_v47 = vpop.f32.mrf.mxu0  ;;  %v1711_v22 = vpop.f32.mrf.mxu1 }
 0x15d   :  { %v7471_v29 = vadd.f32 %v5663_v18, %v1834_v23  ;;  %v1832_v44 = vadd.f32 %v1711_v22, %v7219_v61  ;;  %v4065_v23 = vsel %vm3877_vm3, %v7944_v31, %v4064_v25 }
 0x15e   :  { %v5666_v37 = vpop.f32.mrf.mxu0  ;;  %5849 = vmatmul.mubr.msk.bf16.gmra.mxu0 %vm199_vm1, %v7942_v12  ;;  %v5624_v43 = vpop.f32.mrf.mxu1  ;;  %5807 = vmatmul.mubr.msk.bf16.gmra.mxu1 %vm199_vm1, %v3570_v54 }
 0x15f   :  { %5852 = vmatprep.mubr.msk.bf16.mxu0 %vm199_vm1, %v7943_v28  ;;  %v7479_v13 = vadd.f32 %v2150_v47, %v1832_v44  ;;  %v1837_v41 = vadd.f32 %v5624_v43, %v7223_v4  ;;  %5810 = vmatprep.mubr.msk.bf16.mxu1 %vm199_vm1, %v3572_v0  ;;  %v3574_v4 = vsel %vm3050_vm4, %v3571_v15, %v3573_v46 }
 0x160   :  { %v2163_v42 = vpop.f32.mrf.mxu0  ;;  %v1724_v61 = vpop.f32.mrf.mxu1 }
 0x161   :  { %v7483_v1 = vadd.f32 %v5666_v37, %v1837_v41  ;;  %v1835_v45 = vadd.f32 %v1724_v61, %v7227_v30 }
 0x162   :  { %v5667_v20 = vpop.f32.mrf.mxu0  ;;  %v5625_v18 = vpop.f32.mrf.mxu1 }
 0x163   :  { %v7488_v54 = vadd.f32 %v2163_v42, %v1835_v45  ;;  %v1838_v36 = vadd.f32 %v5625_v18, %v7238_v32 }
 0x164   :  { %v2166_v35 = vpop.f32.mrf.mxu0  ;;  %v1727_v47 = vpop.f32.mrf.mxu1 }
 0x165   :  { %v7492_v22 = vadd.f32 %v5667_v20, %v1838_v36  ;;  %v1836_v9 = vadd.f32 %v1727_v47, %v7245_v3 }
 0x166   :  { %v5670_v0 = vpop.f32.mrf.mxu0  ;;  %5853 = vmatmul.mubr.msk.bf16.gmra.mxu0 %vm199_vm1, %v4065_v23  ;;  %v5628_v30 = vpop.f32.mrf.mxu1  ;;  %5811 = vmatmul.mubr.msk.bf16.gmra.mxu1 %vm199_vm1, %v3574_v4 }
 0x167   :  { %v7497_v44 = vadd.f32 %v2166_v35, %v1836_v9  ;;  %v1841_v37 = vadd.f32 %v5628_v30, %v7249_v55 }
 0x168   :  { %v2179_v12 = vpop.f32.mrf.mxu0  ;;  %v1740_v32 = vpop.f32.mrf.mxu1 }
 0x169   :  { %v7500_v43 = vadd.f32 %v5670_v0, %v1841_v37  ;;  %v1839_v15 = vadd.f32 %v1740_v32, %v7252_v62 }
 0x16a   :  { %v5671_v28 = vpop.f32.mrf.mxu0  ;;  %v5629_v25 = vpop.f32.mrf.mxu1 }
 0x16b   :  { %v7503_v41 = vadd.f32 %v2179_v12, %v1839_v15  ;;  %v1842_v3 = vadd.f32 %v5629_v25, %v7263_v17 }
 0x16c   :  { %v2182_v42 = vpop.f32.mrf.mxu0  ;;  %v1743_v46 = vpop.f32.mrf.mxu1 }
 0x16d   :  { %v7506_v61 = vadd.f32 %v5671_v28, %v1842_v3  ;;  %v1840_v45 = vadd.f32 %v1743_v46, %v7271_v6 }
 0x16e   :  { %v5674_v20 = vpop.f32.mrf.mxu0  ;;  %v5632_v55 = vpop.f32.mrf.mxu1 }
 0x16f   :  { %v7509_v18 = vadd.f32 %v2182_v42, %v1840_v45  ;;  %v1845_v31 = vadd.f32 %v5632_v55, %v7275_v10 }
 0x170   :  { %v2195_v23 = vpop.f32.mrf.mxu0  ;;  %v1756_v62 = vpop.f32.mrf.mxu1 }
 0x171   :  { %v7512_v36 = vadd.f32 %v5674_v20, %v1845_v31  ;;  %v1843_v35 = vadd.f32 %v1756_v62, %v7278_v16 }
 0x172   :  { %v5675_v4 = vpop.f32.mrf.mxu0  ;;  %v5633_v17 = vpop.f32.mrf.mxu1 }
 0x173   :  { %v7515_v47 = vadd.f32 %v2195_v23, %v1843_v35  ;;  %v1846_v9 = vadd.f32 %v5633_v17, %v7289_v57 }
 0x174   :  { %v2198_v0 = vpop.f32.mrf.mxu0  ;;  %v1759_v6 = vpop.f32.mrf.mxu1 }
 0x175   :  { %v7518_v30 = vadd.f32 %v5675_v4, %v1846_v9  ;;  %v1844_v37 = vadd.f32 %v1759_v6, %v7297_v51 }
 0x176   :  { %v5678_v12 = vpop.f32.mrf.mxu0  ;;  %v5636_v10 = vpop.f32.mrf.mxu1 }
 0x177   :  { %v7521_v32 = vadd.f32 %v2198_v0, %v1844_v37  ;;  %v1849_v15 = vadd.f32 %v5636_v10, %v7301_v39 }
 0x178   :  { %v2211_v28 = vpop.f32.mrf.mxu0  ;;  %v1772_v16 = vpop.f32.mrf.mxu1 }
 0x179   :  { %v7524_v25 = vadd.f32 %v5678_v12, %v1849_v15  ;;  %v1847_v3 = vadd.f32 %v1772_v16, %v7304_v19 }
 0x17a   :  { %v5679_v42 = vpop.f32.mrf.mxu0  ;;  %v5637_v57 = vpop.f32.mrf.mxu1 }
 0x17b   :  { %v7527_v46 = vadd.f32 %v2211_v28, %v1847_v3  ;;  %v1850_v45 = vadd.f32 %v5637_v57, %v7315_v60 }
 0x17c   :  { %v2214_v20 = vpop.f32.mrf.mxu0  ;;  %v1775_v51 = vpop.f32.mrf.mxu1 }
 0x17d   :  { %v7530_v55 = vadd.f32 %v5679_v42, %v1850_v45  ;;  %v1848_v31 = vadd.f32 %v1775_v51, %v7323_v40 }
 0x17e   :  { %v5682_v23 = vpop.f32.mrf.mxu0  ;;  %v5640_v39 = vpop.f32.mrf.mxu1 }
 0x17f   :  { %v7533_v62 = vadd.f32 %v2214_v20, %v1848_v31  ;;  %v1853_v35 = vadd.f32 %v5640_v39, %v7327_v11 }
 0x180   :  { %v2227_v4 = vpop.f32.mrf.mxu0  ;;  %v1788_v19 = vpop.f32.mrf.mxu1 }
 0x181   :  { %v7536_v17 = vadd.f32 %v5682_v23, %v1853_v35  ;;  %v1851_v9 = vadd.f32 %v1788_v19, %v7330_v49 }
 0x182   :  { %v5683_v0 = vpop.f32.mrf.mxu0  ;;  %v5641_v60 = vpop.f32.mrf.mxu1 }
 0x183   :  { %v7539_v6 = vadd.f32 %v2227_v4, %v1851_v9  ;;  %v1854_v37 = vadd.f32 %v5641_v60, %v7341_v21 }
 0x184   :  { %v2230_v12 = vpop.f32.mrf.mxu0  ;;  %v1791_v40 = vpop.f32.mrf.mxu1 }
 0x185   :  { %v7542_v10 = vadd.f32 %v5683_v0, %v1854_v37  ;;  %v1852_v15 = vadd.f32 %v1791_v40, %v7349_v27 }
 0x186   :  { %v5686_v28 = vpop.f32.mrf.mxu0  ;;  %v5644_v11 = vpop.f32.mrf.mxu1 }
 0x187   :  { %v7545_v16 = vadd.f32 %v2230_v12, %v1852_v15  ;;  %v1857_v3 = vadd.f32 %v5644_v11, %v7353_v26 }
 0x188   :  { %v2243_v42 = vpop.f32.mrf.mxu0  ;;  %v1804_v49 = vpop.f32.mrf.mxu1 }
 0x189   :  { %v7548_v57 = vadd.f32 %v5686_v28, %v1857_v3  ;;  %v1855_v45 = vadd.f32 %v1804_v49, %v7356_v5 }
 0x18a   :  { %v5687_v20 = vpop.f32.mrf.mxu0  ;;  %v5645_v21 = vpop.f32.mrf.mxu1 }
 0x18b   :  { %v7551_v51 = vadd.f32 %v2243_v42, %v1855_v45  ;;  %v1858_v31 = vadd.f32 %v5645_v21, %v7367_v53 }
 0x18c   :  { %v2246_v23 = vpop.f32.mrf.mxu0  ;;  %v1807_v27 = vpop.f32.mrf.mxu1 }
 0x18d   :  { %v7554_v39 = vadd.f32 %v5687_v20, %v1858_v31  ;;  %v1856_v35 = vadd.f32 %v1807_v27, %v7375_v50 }
 0x18e   :  { %v5734_v4 = vpop.f32.mrf.mxu0  ;;  %v5692_v26 = vpop.f32.mrf.mxu1 }
 0x18f   :  { %v7557_v19 = vadd.f32 %v2246_v23, %v1856_v35  ;;  %v2866_v9 = vadd.f32 %v5692_v26, %v7379_v63 }
 0x190   :  { %v3189_v0 = vpop.f32.mrf.mxu0  ;;  %v2705_v5 = vpop.f32.mrf.mxu1 }
 0x191   :  { %v7560_v60 = vadd.f32 %v5734_v4, %v2866_v9  ;;  %v2864_v37 = vadd.f32 %v2705_v5, %v7382_v8 }
 0x192   :  { %v5735_v12 = vpop.f32.mrf.mxu0  ;;  %v5693_v53 = vpop.f32.mrf.mxu1 }
 0x193   :  { %v7563_v40 = vadd.f32 %v3189_v0, %v2864_v37  ;;  %v2867_v15 = vadd.f32 %v5693_v53, %v7393_v59 }
 0x194   :  { %v3192_v28 = vpop.f32.mrf.mxu0  ;;  %v2708_v50 = vpop.f32.mrf.mxu1 }
 0x195   :  { %v7566_v11 = vadd.f32 %v5735_v12, %v2867_v15  ;;  %v2865_v3 = vadd.f32 %v2708_v50, %v7401_v14 }
 0x196   :  { %v5738_v42 = vpop.f32.mrf.mxu0  ;;  %v5696_v63 = vpop.f32.mrf.mxu1 }
 0x197   :  { %v7569_v49 = vadd.f32 %v3192_v28, %v2865_v3  ;;  %v2870_v45 = vadd.f32 %v5696_v63, %v7405_v58 }
 0x198   :  { %v3205_v20 = vpop.f32.mrf.mxu0  ;;  %v2721_v8 = vpop.f32.mrf.mxu1 }
 0x199   :  { %v7572_v21 = vadd.f32 %v5738_v42, %v2870_v45  ;;  %v2868_v31 = vadd.f32 %v2721_v8, %v7408_v38 }
 0x19a   :  { %v5739_v23 = vpop.f32.mrf.mxu0  ;;  %v5697_v59 = vpop.f32.mrf.mxu1 }
 0x19b   :  { %v7575_v27 = vadd.f32 %v3205_v20, %v2868_v31  ;;  %v2871_v35 = vadd.f32 %v5697_v59, %v7419_v33 }
 0x19c   :  { %v3208_v4 = vpop.f32.mrf.mxu0  ;;  %v2724_v14 = vpop.f32.mrf.mxu1 }
 0x19d   :  { %v7578_v26 = vadd.f32 %v5739_v23, %v2871_v35  ;;  %v2869_v9 = vadd.f32 %v2724_v14, %v7427_v7 }
 0x19e   :  { %v5742_v0 = vpop.f32.mrf.mxu0  ;;  %v5700_v58 = vpop.f32.mrf.mxu1 }
 0x19f   :  { %v7581_v5 = vadd.f32 %v3208_v4, %v2869_v9  ;;  %v2874_v37 = vadd.f32 %v5700_v58, %v7431_v34 }
 0x1a0   :  { %v3221_v12 = vpop.f32.mrf.mxu0  ;;  %v2737_v38 = vpop.f32.mrf.mxu1 }
 0x1a1   :  { %v7584_v53 = vadd.f32 %v5742_v0, %v2874_v37  ;;  %v2872_v15 = vadd.f32 %v2737_v38, %v7437_v24 }
 0x1a2   :  { %v5743_v28 = vpop.f32.mrf.mxu0  ;;  %v5701_v33 = vpop.f32.mrf.mxu1 }
 0x1a3   :  { %v7587_v50 = vadd.f32 %v3221_v12, %v2872_v15  ;;  %v2875_v3 = vadd.f32 %v5701_v33, %v7448_v56 }
 0x1a4   :  { %v3224_v42 = vpop.f32.mrf.mxu0  ;;  %v2740_v7 = vpop.f32.mrf.mxu1 }
 0x1a5   :  { %v7590_v63 = vadd.f32 %v5743_v28, %v2875_v3  ;;  %v2873_v45 = vadd.f32 %v2740_v7, %v7456_v52 }
 0x1a6   :  { %v5746_v20 = vpop.f32.mrf.mxu0  ;;  %v5704_v34 = vpop.f32.mrf.mxu1 }
 0x1a7   :  { %v7593_v8 = vadd.f32 %v3224_v42, %v2873_v45  ;;  %v2878_v31 = vadd.f32 %v5704_v34, %v7460_v48 }
 0x1a8   :  { %v3237_v23 = vpop.f32.mrf.mxu0  ;;  %v2753_v24 = vpop.f32.mrf.mxu1 }
 0x1a9   :  { %v7596_v59 = vadd.f32 %v5746_v20, %v2878_v31  ;;  %v2876_v35 = vadd.f32 %v2753_v24, %v7463_v2 }
 0x1aa   :  { %v5747_v4 = vpop.f32.mrf.mxu0  ;;  %v5705_v56 = vpop.f32.mrf.mxu1 }
 0x1ab   :  { %v7599_v14 = vadd.f32 %v3237_v23, %v2876_v35  ;;  %v2879_v9 = vadd.f32 %v5705_v56, %v7471_v29 }
 0x1ac   :  { %v3240_v0 = vpop.f32.mrf.mxu0  ;;  %v2756_v52 = vpop.f32.mrf.mxu1 }
 0x1ad   :  { %v7602_v58 = vadd.f32 %v5747_v4, %v2879_v9  ;;  %v2877_v37 = vadd.f32 %v2756_v52, %v7479_v13 }
 0x1ae   :  { %v5750_v12 = vpop.f32.mrf.mxu0  ;;  %v5708_v48 = vpop.f32.mrf.mxu1 }
 0x1af   :  { %v7605_v38 = vadd.f32 %v3240_v0, %v2877_v37  ;;  %v2882_v15 = vadd.f32 %v5708_v48, %v7483_v1 }
 0x1b0   :  { %v3253_v28 = vpop.f32.mrf.mxu0  ;;  %v2769_v2 = vpop.f32.mrf.mxu1 }
 0x1b1   :  { %v7608_v33 = vadd.f32 %v5750_v12, %v2882_v15  ;;  %v2880_v3 = vadd.f32 %v2769_v2, %v7488_v54 }
 0x1b2   :  { %v5751_v42 = vpop.f32.mrf.mxu0  ;;  %v5709_v29 = vpop.f32.mrf.mxu1 }
 0x1b3   :  { %v7611_v7 = vadd.f32 %v3253_v28, %v2880_v3  ;;  %v2883_v45 = vadd.f32 %v5709_v29, %v7492_v22 }
 0x1b4   :  { %v3256_v20 = vpop.f32.mrf.mxu0  ;;  %v2772_v13 = vpop.f32.mrf.mxu1 }
 0x1b5   :  { %v7614_v34 = vadd.f32 %v5751_v42, %v2883_v45  ;;  %v2881_v31 = vadd.f32 %v2772_v13, %v7497_v44 }
 0x1b6   :  { %v5754_v23 = vpop.f32.mrf.mxu0  ;;  %v5712_v1 = vpop.f32.mrf.mxu1 }
 0x1b7   :  { %v7617_v24 = vadd.f32 %v3256_v20, %v2881_v31  ;;  %v2886_v35 = vadd.f32 %v5712_v1, %v7500_v43 }
 0x1b8   :  { %v3269_v4 = vpop.f32.mrf.mxu0  ;;  %v2785_v54 = vpop.f32.mrf.mxu1 }
 0x1b9   :  { %v7620_v56 = vadd.f32 %v5754_v23, %v2886_v35  ;;  %v2884_v9 = vadd.f32 %v2785_v54, %v7503_v41 }
 0x1ba   :  { %v5755_v0 = vpop.f32.mrf.mxu0  ;;  %v5713_v22 = vpop.f32.mrf.mxu1 }
 0x1bb   :  { %v7623_v52 = vadd.f32 %v3269_v4, %v2884_v9  ;;  %v2887_v37 = vadd.f32 %v5713_v22, %v7506_v61 }
 0x1bc   :  { %v3272_v12 = vpop.f32.mrf.mxu0  ;;  %v2788_v44 = vpop.f32.mrf.mxu1 }
 0x1bd   :  { %v7626_v48 = vadd.f32 %v5755_v0, %v2887_v37  ;;  %v2885_v15 = vadd.f32 %v2788_v44, %v7509_v18 }
 0x1be   :  { %v5758_v28 = vpop.f32.mrf.mxu0  ;;  %v5716_v43 = vpop.f32.mrf.mxu1 }
 0x1bf   :  { %v7629_v2 = vadd.f32 %v3272_v12, %v2885_v15  ;;  %v2890_v3 = vadd.f32 %v5716_v43, %v7512_v36 }
 0x1c0   :  { %v3285_v42 = vpop.f32.mrf.mxu0  ;;  %v2801_v41 = vpop.f32.mrf.mxu1 }
 0x1c1   :  { %v7632_v29 = vadd.f32 %v5758_v28, %v2890_v3  ;;  %v2888_v45 = vadd.f32 %v2801_v41, %v7515_v47 }
 0x1c2   :  { %v5759_v20 = vpop.f32.mrf.mxu0  ;;  %v5717_v61 = vpop.f32.mrf.mxu1 }
 0x1c3   :  { %v7635_v13 = vadd.f32 %v3285_v42, %v2888_v45  ;;  %v2891_v31 = vadd.f32 %v5717_v61, %v7518_v30 }
 0x1c4   :  { %v3288_v23 = vpop.f32.mrf.mxu0  ;;  %v2804_v18 = vpop.f32.mrf.mxu1 }
 0x1c5   :  { %v7638_v1 = vadd.f32 %v5759_v20, %v2891_v31  ;;  %v2889_v35 = vadd.f32 %v2804_v18, %v7521_v32 }
 0x1c6   :  { %v5762_v4 = vpop.f32.mrf.mxu0  ;;  %v5720_v36 = vpop.f32.mrf.mxu1 }
 0x1c7   :  { %v7641_v54 = vadd.f32 %v3288_v23, %v2889_v35  ;;  %v2894_v9 = vadd.f32 %v5720_v36, %v7524_v25 }
 0x1c8   :  { %v3301_v0 = vpop.f32.mrf.mxu0  ;;  %v2817_v47 = vpop.f32.mrf.mxu1 }
 0x1c9   :  { %v7644_v22 = vadd.f32 %v5762_v4, %v2894_v9  ;;  %v2892_v37 = vadd.f32 %v2817_v47, %v7527_v46 }
 0x1ca   :  { %v5763_v12 = vpop.f32.mrf.mxu0  ;;  %v5721_v30 = vpop.f32.mrf.mxu1 }
 0x1cb   :  { %v7647_v44 = vadd.f32 %v3301_v0, %v2892_v37  ;;  %v2895_v15 = vadd.f32 %v5721_v30, %v7530_v55 }
 0x1cc   :  { %v3304_v28 = vpop.f32.mrf.mxu0  ;;  %v2820_v32 = vpop.f32.mrf.mxu1 }
 0x1cd   :  { %v7650_v43 = vadd.f32 %v5763_v12, %v2895_v15  ;;  %v2893_v3 = vadd.f32 %v2820_v32, %v7533_v62 }
 0x1ce   :  { %v5766_v42 = vpop.f32.mrf.mxu0  ;;  %v5724_v25 = vpop.f32.mrf.mxu1 }
 0x1cf   :  { %v7653_v41 = vadd.f32 %v3304_v28, %v2893_v3  ;;  %v2898_v45 = vadd.f32 %v5724_v25, %v7536_v17 }
 0x1d0   :  { %v3317_v20 = vpop.f32.mrf.mxu0  ;;  %v2833_v46 = vpop.f32.mrf.mxu1 }
 0x1d1   :  { %v7656_v61 = vadd.f32 %v5766_v42, %v2898_v45  ;;  %v2896_v31 = vadd.f32 %v2833_v46, %v7539_v6 }
 0x1d2   :  { %v5767_v23 = vpop.f32.mrf.mxu0  ;;  %v5725_v55 = vpop.f32.mrf.mxu1 }
 0x1d3   :  { %v7659_v18 = vadd.f32 %v3317_v20, %v2896_v31  ;;  %v2899_v35 = vadd.f32 %v5725_v55, %v7542_v10 }
 0x1d4   :  { %v3320_v4 = vpop.f32.mrf.mxu0  ;;  %v2836_v62 = vpop.f32.mrf.mxu1 }
 0x1d5   :  { %v7662_v36 = vadd.f32 %v5767_v23, %v2899_v35  ;;  %v2897_v9 = vadd.f32 %v2836_v62, %v7545_v16 }
 0x1d6   :  { %v5770_v0 = vpop.f32.mrf.mxu0  ;;  %v5728_v17 = vpop.f32.mrf.mxu1 }
 0x1d7   :  { %v7665_v47 = vadd.f32 %v3320_v4, %v2897_v9  ;;  %v2902_v37 = vadd.f32 %v5728_v17, %v7548_v57 }
 0x1d8   :  { %v3333_v12 = vpop.f32.mrf.mxu0  ;;  %v2849_v6 = vpop.f32.mrf.mxu1 }
 0x1d9   :  { %v7668_v30 = vadd.f32 %v5770_v0, %v2902_v37  ;;  %v2900_v15 = vadd.f32 %v2849_v6, %v7551_v51  ;;  %v7683_v51 = vld [vmem:[%s7886_s2] ss:$0 sm:$0xff] }
 0x1da   :  { %v5771_v28 = vpop.f32.mrf.mxu0  ;;  %v5729_v10 = vpop.f32.mrf.mxu1 }
 0x1db   :  { %v7671_v32 = vadd.f32 %v3333_v12, %v2900_v15  ;;  %v2903_v3 = vadd.f32 %v5729_v10, %v7554_v39 }
 0x1dc   :  { %v3336_v42 = vpop.f32.mrf.mxu0  ;;  %v2852_v16 = vpop.f32.mrf.mxu1 }
 0x1dd   :  { %v7674_v25 = vadd.f32 %v5771_v28, %v2903_v3  ;;  %v2901_v45 = vadd.f32 %v2852_v16, %v7557_v19 }
 0x1de   :  { %v5818_v20 = vpop.f32.mrf.mxu0  ;;  %v5776_v57 = vpop.f32.mrf.mxu1 }
 0x1df   :  { %v7677_v46 = vadd.f32 %v3336_v42, %v2901_v45  ;;  %v3833_v31 = vadd.f32 %v5776_v57, %v7560_v60 }
 0x1e0   :  { %v4163_v23 = vpop.f32.mrf.mxu0  ;;  %v3672_v55 = vpop.f32.mrf.mxu1 }
 0x1e1   :  { %v4324_v39 = vadd.f32 %v5818_v20, %v3833_v31  ;;  %v3831_v35 = vadd.f32 %v3672_v55, %v7563_v40 }
 0x1e2   :  { %v5819_v4 = vpop.f32.mrf.mxu0  ;;  %v5777_v62 = vpop.f32.mrf.mxu1 }
 0x1e3   :  { %v4371_v19 = vadd.f32 %v7683_v51, %v4324_v39  ;;  %v4322_v9 = vadd.f32 %v4163_v23, %v3831_v35  ;;  %v3834_v0 = vadd.f32 %v5777_v62, %v7566_v11 }
 0x1e4   :  { %v4166_v17 = vpop.f32.mrf.mxu0  ;;  %v3675_v37 = vpop.f32.mrf.mxu1 }
 0x1e5   :  { %v5251_v60 = vmul.f32 -1.442695, %v4371_v19  ;;  %v4369_v12 = vadd.f32 %v7683_v51, %v4322_v9  ;;  %v4325_v6 = vadd.f32 %v5819_v4, %v3834_v0  ;;  %v3832_v15 = vadd.f32 %v3675_v37, %v7569_v49 }
 0x1e6   :  { %v5822_v28 = vpop.f32.mrf.mxu0  ;;  %v5780_v10 = vpop.f32.mrf.mxu1 }
 0x1e7   :  { %6033 = vpow2.f32 %v5251_v60  ;;  %v5249_v3 = vmul.f32 -1.442695, %v4369_v12  ;;  %v4372_v40 = vadd.f32 %v7683_v51, %v4325_v6  ;;  %v4323_v42 = vadd.f32 %v4166_v17, %v3832_v15 }
 0x1e8   :  { %v4179_v16 = vpop.f32.mrf.mxu0  ;;  %v3837_v45 = vadd.f32 %v5780_v10, %v7572_v21  ;;  %v3688_v20 = vpop.f32.mrf.mxu1 }
 0x1e9   :  { %6035 = vpow2.f32 %v5249_v3  ;;  %v5252_v11 = vmul.f32 -1.442695, %v4372_v40  ;;  %v4370_v57 = vadd.f32 %v7683_v51, %v4323_v42  ;;  %v3835_v31 = vadd.f32 %v3688_v20, %v7575_v27 }
 0x1ea   :  { %v5823_v23 = vpop.f32.mrf.mxu0  ;;  %v4328_v55 = vadd.f32 %v5822_v28, %v3837_v45  ;;  %v5781_v49 = vpop.f32.mrf.mxu1 }
 0x1eb   :  { %6037 = vpow2.f32 %v5252_v11  ;;  %v5250_v39 = vmul.f32 -1.442695, %v4370_v57  ;;  %v4326_v35 = vadd.f32 %v4179_v16, %v3835_v31  ;;  %v3838_v4 = vadd.f32 %v5781_v49, %v7578_v26 }
 0x1ec   :  { %v4182_v62 = vpop.f32.mrf.mxu0  ;;  %v4375_v19 = vadd.f32 %v7683_v51, %v4328_v55  ;;  %v3691_v9 = vpop.f32.mrf.mxu1 }
 0x1ed   :  { %6039 = vpow2.f32 %v5250_v39  ;;  %v4373_v21 = vadd.f32 %v7683_v51, %v4326_v35  ;;  %v4329_v0 = vadd.f32 %v5823_v23, %v3838_v4  ;;  %v3836_v17 = vadd.f32 %v3691_v9, %v7581_v5 }
 0x1ee   :  { %v5826_v37 = vpop.f32.mrf.mxu0  ;;  %v5255_v27 = vmul.f32 -1.442695, %v4375_v19  ;;  %v5784_v60 = vpop.f32.mrf.mxu1 }
 0x1ef   :  { %v5253_v12 = vmul.f32 -1.442695, %v4373_v21  ;;  %v4376_v6 = vadd.f32 %v7683_v51, %v4329_v0  ;;  %v4327_v15 = vadd.f32 %v4182_v62, %v3836_v17  ;;  %v3841_v28 = vadd.f32 %v5784_v60, %v7584_v53 }
 0x1f0   :  { %v4195_v26 = vpop.f32.mrf.mxu0  ;;  %6041 = vpow2.f32 %v5255_v27  ;;  %v3704_v10 = vpop.f32.mrf.mxu1 }
 0x1f1   :  { %6043 = vpow2.f32 %v5253_v12  ;;  %v5256_v3 = vmul.f32 -1.442695, %v4376_v6  ;;  %v4374_v40 = vadd.f32 %v7683_v51, %v4327_v15  ;;  %v4332_v42 = vadd.f32 %v5826_v37, %v3841_v28 }
 0x1f2   :  { %v5827_v16 = vpop.f32.mrf.mxu0  ;;  %v3839_v5 = vadd.f32 %v3704_v10, %v7587_v50  ;;  %v5785_v45 = vpop.f32.mrf.mxu1 }
 0x1f3   :  { %6045 = vpow2.f32 %v5256_v3  ;;  %v5254_v20 = vmul.f32 -1.442695, %v4374_v40  ;;  %v4379_v11 = vadd.f32 %v7683_v51, %v4332_v42  ;;  %v3842_v57 = vadd.f32 %v5785_v45, %v7590_v63 }
 0x1f4   :  { %v4198_v31 = vpop.f32.mrf.mxu0  ;;  %v6034_v53 = vpop.eup %6033  ;;  %v4330_v23 = vadd.f32 %v4195_v26, %v3839_v5 }
 0x1f5   :  { %v3707_v55 = vpop.f32.mrf.mxu1  ;;  %v4531_v49 = vadd.f32 1.0, %v6034_v53  ;;  %6047 = vpow2.f32 %v5254_v20  ;;  %v5259_v39 = vmul.f32 -1.442695, %v4379_v11  ;;  %v4333_v35 = vadd.f32 %v5827_v16, %v3842_v57 }
 0x1f6   :  { %v5830_v4 = vpop.f32.mrf.mxu0  ;;  %v6036_v62 = vpop.eup %6035  ;;  %v4377_v19 = vadd.f32 %v7683_v51, %v4330_v23  ;;  %v3840_v50 = vadd.f32 %v3707_v55, %v7593_v8 }
 0x1f7   :  { %v5788_v9 = vpop.f32.mrf.mxu1  ;;  %6049 = vrcp.f32 %v4531_v49  ;;  %v4529_v21 = vadd.f32 1.0, %v6036_v62  ;;  %v4380_v0 = vadd.f32 %v7683_v51, %v4333_v35 }
 0x1f8   :  { %v3845_v63 = vadd.f32 %v5788_v9, %v7596_v59  ;;  %v4211_v17 = vpop.f32.mrf.mxu0  ;;  %v6038_v37 = vpop.eup %6037  ;;  %6051 = vpow2.f32 %v5259_v39  ;;  %v5257_v27 = vmul.f32 -1.442695, %v4377_v19  ;;  %v4331_v60 = vadd.f32 %v4198_v31, %v3840_v50 }
 0x1f9   :  { %v3720_v12 = vpop.f32.mrf.mxu1  ;;  %6053 = vrcp.f32 %v4529_v21  ;;  %v4532_v6 = vadd.f32 1.0, %v6038_v37  ;;  %v5260_v15 = vmul.f32 -1.442695, %v4380_v0 }
 0x1fa   :  { %v4336_v28 = vadd.f32 %v5830_v4, %v3845_v63  ;;  %v5831_v26 = vpop.f32.mrf.mxu0  ;;  %v6040_v10 = vpop.eup %6039  ;;  %6055 = vpow2.f32 %v5257_v27  ;;  %v4378_v8 = vadd.f32 %v7683_v51, %v4331_v60  ;;  %v3843_v3 = vadd.f32 %v3720_v12, %v7599_v14 }
 0x1fb   :  { %v5789_v40 = vpop.f32.mrf.mxu1  ;;  %6057 = vrcp.f32 %v4532_v6  ;;  %v4530_v59 = vadd.f32 1.0, %v6040_v10 }
 0x1fc   :  { %v4383_v42 = vadd.f32 %v7683_v51, %v4336_v28  ;;  %v3846_v16 = vadd.f32 %v5789_v40, %v7602_v58  ;;  %v4214_v5 = vpop.f32.mrf.mxu0  ;;  %6059 = vpow2.f32 %v5260_v15  ;;  %v5258_v45 = vmul.f32 -1.442695, %v4378_v8 }
 0x1fd   :  { %v4334_v20 = vadd.f32 %v4211_v17, %v3843_v3  ;;  %v3723_v11 = vpop.f32.mrf.mxu1  ;;  %v6042_v57 = vpop.eup %6041  ;;  %6061 = vrcp.f32 %v4530_v59 }
 0x1fe   :  { %v5263_v31 = vmul.f32 -1.442695, %v4383_v42  ;;  %v4337_v53 = vadd.f32 %v5831_v26, %v3846_v16  ;;  %v3844_v23 = vadd.f32 %v3723_v11, %v7605_v38  ;;  %v5834_v55 = vpop.f32.mrf.mxu0  ;;  %v6044_v14 = vpop.eup %6043  ;;  %v4535_v49 = vadd.f32 1.0, %v6042_v57 }
 0x1ff   :  { %6063 = vpow2.f32 %v5258_v45  ;;  %v4381_v39 = vadd.f32 %v7683_v51, %v4334_v20  ;;  %v5792_v35 = vpop.f32.mrf.mxu1  ;;  %v4533_v4 = vadd.f32 1.0, %v6044_v14 }
 0x200   :  { %6065 = vpow2.f32 %v5263_v31  ;;  %v4384_v58 = vadd.f32 %v7683_v51, %v4337_v53  ;;  %v4335_v62 = vadd.f32 %v4214_v5, %v3844_v23  ;;  %v4227_v19 = vpop.f32.mrf.mxu0  ;;  %v6046_v50 = vpop.eup %6045  ;;  %v3849_v21 = vadd.f32 %v5792_v35, %v7608_v33 }
 0x201   :  { %6067 = vrcp.f32 %v4535_v49  ;;  %v5261_v9 = vmul.f32 -1.442695, %v4381_v39  ;;  %v3736_v0 = vpop.f32.mrf.mxu1  ;;  %v4536_v38 = vadd.f32 1.0, %v6046_v50 }
 0x202   :  { %6069 = vrcp.f32 %v4533_v4  ;;  %v5264_v63 = vmul.f32 -1.442695, %v4384_v58  ;;  %v4382_v17 = vadd.f32 %v7683_v51, %v4335_v62  ;;  %v5835_v37 = vpop.f32.mrf.mxu0  ;;  %v6048_v27 = vpop.eup %6047  ;;  %v4340_v60 = vadd.f32 %v5834_v55, %v3849_v21 }
 0x203   :  { %6071 = vpow2.f32 %v5261_v9  ;;  %v3847_v12 = vadd.f32 %v3736_v0, %v7611_v7  ;;  %v5793_v6 = vpop.f32.mrf.mxu1  ;;  %v4534_v15 = vadd.f32 1.0, %v6048_v27 }
 0x204   :  { %6073 = vrcp.f32 %v4536_v38  ;;  %v5262_v28 = vmul.f32 -1.442695, %v4382_v17  ;;  %v3850_v26 = vadd.f32 %v5793_v6, %v7614_v34  ;;  %v4230_v10 = vpop.f32.mrf.mxu0  ;;  %v6050_v33 = vpop.eup %6049  ;;  %v4387_v8 = vadd.f32 %v7683_v51, %v4340_v60 }
 0x205   :  { %6075 = vpow2.f32 %v5264_v63  ;;  %v4338_v3 = vadd.f32 %v4227_v19, %v3847_v12  ;;  %v3739_v40 = vpop.f32.mrf.mxu1  ;;  %v6052_v59 = vpop.eup %6051  ;;  %4651 = vst [vmem:[%s7887_s3 + $0x10] sm:$0xff] %v6050_v33 }
 0x206   :  { %6077 = vrcp.f32 %v4534_v15  ;;  %v4341_v7 = vadd.f32 %v5835_v37, %v3850_v26  ;;  %v3848_v42 = vadd.f32 %v3739_v40, %v7617_v24  ;;  %v5838_v16 = vpop.f32.mrf.mxu0  ;;  %v6054_v5 = vpop.eup %6053  ;;  %v4539_v45 = vadd.f32 1.0, %v6052_v59 }
 0x207   :  { %6079 = vpow2.f32 %v5262_v28  ;;  %v5267_v34 = vmul.f32 -1.442695, %v4387_v8  ;;  %v4385_v20 = vadd.f32 %v7683_v51, %v4338_v3  ;;  %v5796_v11 = vpop.f32.mrf.mxu1  ;;  %v6056_v57 = vpop.eup %6055  ;;  %4649 = vst [vmem:[%s7887_s3] sm:$0xff] %v6054_v5 }
 0x208   :  { %v4388_v31 = vadd.f32 %v7683_v51, %v4341_v7  ;;  %v4339_v53 = vadd.f32 %v4230_v10, %v3848_v42  ;;  %v3853_v23 = vadd.f32 %v5796_v11, %v7620_v56  ;;  %v4243_v55 = vpop.f32.mrf.mxu0  ;;  %v6058_v24 = vpop.eup %6057  ;;  %6081 = vrcp.f32 %v4539_v45 }
 0x209   :  { %v4537_v14 = vadd.f32 1.0, %v6056_v57  ;;  %v5265_v49 = vmul.f32 -1.442695, %v4385_v20  ;;  %v3752_v39 = vpop.f32.mrf.mxu1  ;;  %v6060_v35 = vpop.eup %6059  ;;  %4652 = vst [vmem:[%s7887_s3 + $0x18] sm:$0xff] %v6058_v24  ;;  %6083 = vpow2.f32 %v5267_v34 }
 0x20a   :  { %v5268_v4 = vmul.f32 -1.442695, %v4388_v31  ;;  %v4386_v58 = vadd.f32 %v7683_v51, %v4339_v53  ;;  %v4344_v62 = vadd.f32 %v5838_v16, %v3853_v23  ;;  %v5839_v19 = vpop.f32.mrf.mxu0  ;;  %v6062_v50 = vpop.eup %6061  ;;  %v4540_v56 = vadd.f32 1.0, %v6060_v35 }
 0x20b   :  { %6085 = vrcp.f32 %v4537_v14  ;;  %v3851_v9 = vadd.f32 %v3752_v39, %v7623_v52  ;;  %v5797_v21 = vpop.f32.mrf.mxu1  ;;  %4650 = vst [vmem:[%s7887_s3 + $0x8] sm:$0xff] %v6062_v50 }
 0x20c   :  { %v6064_v0 = vpop.eup %6063  ;;  %6087 = vpow2.f32 %v5265_v49  ;;  %v4391_v38 = vadd.f32 %v7683_v51, %v4344_v62  ;;  %v3854_v63 = vadd.f32 %v5797_v21, %v7626_v48  ;;  %v4246_v17 = vpop.f32.mrf.mxu0  ;;  %v5266_v60 = vmul.f32 -1.442695, %v4386_v58 }
 0x20d   :  { %v6066_v37 = vpop.eup %6065  ;;  %6089 = vrcp.f32 %v4540_v56  ;;  %v4538_v27 = vadd.f32 1.0, %v6064_v0  ;;  %v4342_v12 = vadd.f32 %v4243_v55, %v3851_v9  ;;  %v3755_v6 = vpop.f32.mrf.mxu1 }
 0x20e   :  { %v6068_v15 = vpop.eup %6067  ;;  %v4543_v52 = vadd.f32 1.0, %v6066_v37  ;;  %6091 = vpow2.f32 %v5268_v4  ;;  %v5271_v28 = vmul.f32 -1.442695, %v4391_v38  ;;  %v4345_v26 = vadd.f32 %v5839_v19, %v3854_v63  ;;  %v5842_v10 = vpop.f32.mrf.mxu0 }
 0x20f   :  { %v6070_v33 = vpop.eup %6069  ;;  %4655 = vst [vmem:[%s7887_s3 + $0x30] sm:$0xff] %v6068_v15  ;;  %6093 = vrcp.f32 %v4538_v27  ;;  %v4389_v48 = vadd.f32 %v7683_v51, %v4342_v12  ;;  %v3852_v8 = vadd.f32 %v3755_v6, %v7629_v2  ;;  %v5800_v3 = vpop.f32.mrf.mxu1 }
 0x210   :  { %v6072_v40 = vpop.eup %6071  ;;  %4653 = vst [vmem:[%s7887_s3 + $0x20] sm:$0xff] %v6070_v33  ;;  %6095 = vrcp.f32 %v4543_v52  ;;  %v4392_v59 = vadd.f32 %v7683_v51, %v4345_v26  ;;  %v3857_v7 = vadd.f32 %v5800_v3, %v7632_v29  ;;  %v4259_v42 = vpop.f32.mrf.mxu0 }
 0x211   :  { %v6074_v16 = vpop.eup %6073  ;;  %v4541_v5 = vadd.f32 1.0, %v6072_v40  ;;  %6097 = vpow2.f32 %v5266_v60  ;;  %v5269_v45 = vmul.f32 -1.442695, %v4389_v48  ;;  %v4343_v34 = vadd.f32 %v4246_v17, %v3852_v8  ;;  %v3768_v20 = vpop.f32.mrf.mxu1 }
 0x212   :  { %v6076_v11 = vpop.eup %6075  ;;  %4656 = vst [vmem:[%s7887_s3 + $0x38] sm:$0xff] %v6074_v16  ;;  %6099 = vpow2.f32 %v5271_v28  ;;  %v5272_v2 = vmul.f32 -1.442695, %v4392_v59  ;;  %v4348_v57 = vadd.f32 %v5842_v10, %v3857_v7  ;;  %v3855_v31 = vadd.f32 %v3768_v20, %v7635_v13  ;;  %v5843_v53 = vpop.f32.mrf.mxu0 }
 0x213   :  { %v6078_v23 = vpop.eup %6077  ;;  %6101 = vrcp.f32 %v4541_v5  ;;  %v4544_v29 = vadd.f32 1.0, %v6076_v11  ;;  %v4390_v55 = vadd.f32 %v7683_v51, %v4343_v34  ;;  %v5801_v24 = vpop.f32.mrf.mxu1 }
 0x214   :  { %v6080_v14 = vpop.eup %6079  ;;  %4654 = vst [vmem:[%s7887_s3 + $0x28] sm:$0xff] %v6078_v23  ;;  %6103 = vpow2.f32 %v5269_v45  ;;  %v4395_v49 = vadd.f32 %v7683_v51, %v4348_v57  ;;  %v4346_v39 = vadd.f32 %v4259_v42, %v3855_v31  ;;  %v3858_v35 = vadd.f32 %v5801_v24, %v7638_v1  ;;  %v4262_v4 = vpop.f32.mrf.mxu0 }
 0x215   :  { %6105 = vrcp.f32 %v4544_v29  ;;  %v4542_v13 = vadd.f32 1.0, %v6080_v14  ;;  %v5270_v58 = vmul.f32 -1.442695, %v4390_v55  ;;  %v3771_v62 = vpop.f32.mrf.mxu1  ;;  %v6082_v19 = vpop.eup %6081 }
 0x216   :  { %6107 = vpow2.f32 %v5272_v2  ;;  %v5275_v50 = vmul.f32 -1.442695, %v4395_v49  ;;  %v4393_v56 = vadd.f32 %v7683_v51, %v4346_v39  ;;  %v4349_v9 = vadd.f32 %v5843_v53, %v3858_v35  ;;  %v5846_v21 = vpop.f32.mrf.mxu0  ;;  %v6084_v0 = vpop.eup %6083  ;;  %4659 = vst [vmem:[%s7887_s3 + $0x50] sm:$0xff] %v6082_v19 }
 0x217   :  { %6109 = vrcp.f32 %v4542_v13  ;;  %v3856_v1 = vadd.f32 %v3771_v62, %v7641_v54  ;;  %v5804_v38 = vpop.f32.mrf.mxu1  ;;  %v4547_v17 = vadd.f32 1.0, %v6084_v0 }
 0x218   :  { %v6086_v63 = vpop.eup %6085  ;;  %6111 = vpow2.f32 %v5270_v58  ;;  %v5273_v37 = vmul.f32 -1.442695, %v4393_v56  ;;  %v4396_v27 = vadd.f32 %v7683_v51, %v4349_v9  ;;  %v4275_v60 = vpop.f32.mrf.mxu0  ;;  %v3861_v15 = vadd.f32 %v5804_v38, %v7644_v22 }
 0x219   :  { %v6088_v12 = vpop.eup %6087  ;;  %4657 = vst [vmem:[%s7887_s3 + $0x40] sm:$0xff] %v6086_v63  ;;  %6113 = vpow2.f32 %v5275_v50  ;;  %v4347_v6 = vadd.f32 %v4262_v4, %v3856_v1  ;;  %v3784_v52 = vpop.f32.mrf.mxu1 }
 0x21a   :  { %v6090_v28 = vpop.eup %6089  ;;  %6115 = vrcp.f32 %v4547_v17  ;;  %v4545_v54 = vadd.f32 1.0, %v6088_v12  ;;  %v5276_v26 = vmul.f32 -1.442695, %v4396_v27  ;;  %v3859_v10 = vadd.f32 %v3784_v52, %v7647_v44  ;;  %v5847_v33 = vpop.f32.mrf.mxu0 }
 0x21b   :  { %v6092_v48 = vpop.eup %6091  ;;  %4660 = vst [vmem:[%s7887_s3 + $0x58] sm:$0xff] %v6090_v28  ;;  %6117 = vpow2.f32 %v5273_v37  ;;  %v4394_v8 = vadd.f32 %v7683_v51, %v4347_v6  ;;  %v4352_v3 = vadd.f32 %v5846_v21, %v3861_v15  ;;  %v5805_v40 = vpop.f32.mrf.mxu1 }
 0x21c   :  { %v6094_v59 = vpop.eup %6093  ;;  %6119 = vrcp.f32 %v4545_v54  ;;  %v4548_v22 = vadd.f32 1.0, %v6092_v48  ;;  %v4350_v7 = vadd.f32 %v4275_v60, %v3859_v10  ;;  %v3862_v42 = vadd.f32 %v5805_v40, %v7650_v43  ;;  %v4278_v16 = vpop.f32.mrf.mxu0 }
 0x21d   :  { %v6096_v5 = vpop.eup %6095  ;;  %4658 = vst [vmem:[%s7887_s3 + $0x48] sm:$0xff] %v6094_v59  ;;  %6121 = vpow2.f32 %v5276_v26  ;;  %v5274_v44 = vmul.f32 -1.442695, %v4394_v8  ;;  %v4399_v45 = vadd.f32 %v7683_v51, %v4352_v3  ;;  %v3787_v34 = vpop.f32.mrf.mxu1 }
 0x21e   :  { %v6098_v20 = vpop.eup %6097  ;;  %4663 = vst [vmem:[%s7887_s3 + $0x70] sm:$0xff] %v6096_v5  ;;  %6123 = vrcp.f32 %v4548_v22  ;;  %v4397_v11 = vadd.f32 %v7683_v51, %v4350_v7  ;;  %v4353_v43 = vadd.f32 %v5847_v33, %v3862_v42  ;;  %v3860_v2 = vadd.f32 %v3787_v34, %v7653_v41  ;;  %v5850_v57 = vpop.f32.mrf.mxu0 }
 0x21f   :  { %v6100_v31 = vpop.eup %6099  ;;  %v4546_v53 = vadd.f32 1.0, %v6098_v20  ;;  %6125 = vpow2.f32 %v5274_v44  ;;  %v5279_v23 = vmul.f32 -1.442695, %v4399_v45  ;;  %v5808_v29 = vpop.f32.mrf.mxu1 }
 0x220   :  { %v6102_v55 = vpop.eup %6101  ;;  %v4551_v24 = vadd.f32 1.0, %v6100_v31  ;;  %v4400_v14 = vadd.f32 %v7683_v51, %v4353_v43  ;;  %v4351_v49 = vadd.f32 %v4278_v16, %v3860_v2  ;;  %v4291_v39 = vpop.f32.mrf.mxu0  ;;  %v5277_v4 = vmul.f32 -1.442695, %v4397_v11 }
 0x221   :  { %v6104_v35 = vpop.eup %6103  ;;  %4661 = vst [vmem:[%s7887_s3 + $0x60] sm:$0xff] %v6102_v55  ;;  %6127 = vrcp.f32 %v4546_v53  ;;  %v3865_v41 = vadd.f32 %v5808_v29, %v7656_v61  ;;  %v3800_v13 = vpop.f32.mrf.mxu1 }
 0x222   :  { %v6106_v58 = vpop.eup %6105  ;;  %6129 = vrcp.f32 %v4551_v24  ;;  %v4549_v62 = vadd.f32 1.0, %v6104_v35  ;;  %v4398_v19 = vadd.f32 %v7683_v51, %v4351_v49  ;;  %v5851_v50 = vpop.f32.mrf.mxu0  ;;  %v5280_v9 = vmul.f32 -1.442695, %v4400_v14 }
 0x223   :  { %v6108_v56 = vpop.eup %6107  ;;  %4664 = vst [vmem:[%s7887_s3 + $0x78] sm:$0xff] %v6106_v58  ;;  %6131 = vpow2.f32 %v5279_v23  ;;  %v4356_v21 = vadd.f32 %v5850_v57, %v3865_v41  ;;  %v3863_v0 = vadd.f32 %v3800_v13, %v7659_v18  ;;  %v5809_v1 = vpop.f32.mrf.mxu1 }
 0x224   :  { %v6110_v38 = vpop.eup %6109  ;;  %6133 = vrcp.f32 %v4549_v62  ;;  %v4552_v61 = vadd.f32 1.0, %v6108_v56  ;;  %v3866_v63 = vadd.f32 %v5809_v1, %v7662_v36  ;;  %v4294_v17 = vpop.f32.mrf.mxu0  ;;  %v5278_v27 = vmul.f32 -1.442695, %v4398_v19 }
 0x225   :  { %v6112_v37 = vpop.eup %6111  ;;  %4662 = vst [vmem:[%s7887_s3 + $0x68] sm:$0xff] %v6110_v38  ;;  %6135 = vpow2.f32 %v5277_v4  ;;  %v4403_v60 = vadd.f32 %v7683_v51, %v4356_v21  ;;  %v4354_v12 = vadd.f32 %v4291_v39, %v3863_v0  ;;  %v3803_v6 = vpop.f32.mrf.mxu1 }
 0x226   :  { %v6114_v15 = vpop.eup %6113  ;;  %6137 = vrcp.f32 %v4552_v61  ;;  %v4550_v18 = vadd.f32 1.0, %v6112_v37  ;;  %v4357_v52 = vadd.f32 %v5851_v50, %v3866_v63  ;;  %v3864_v28 = vadd.f32 %v3803_v6, %v7665_v47  ;;  %v5854_v54 = vpop.f32.mrf.mxu0 }
 0x227   :  { %v6116_v36 = vpop.eup %6115  ;;  %v4555_v26 = vadd.f32 1.0, %v6114_v15  ;;  %6139 = vpow2.f32 %v5280_v9  ;;  %v5283_v10 = vmul.f32 -1.442695, %v4403_v60  ;;  %v4401_v33 = vadd.f32 %v7683_v51, %v4354_v12  ;;  %v5812_v48 = vpop.f32.mrf.mxu1 }
 0x228   :  { %v6118_v8 = vpop.eup %6117  ;;  %4667 = vst [vmem:[%s7887_s3 + $0x90] sm:$0xff] %v6116_v36  ;;  %6141 = vrcp.f32 %v4550_v18  ;;  %v4404_v3 = vadd.f32 %v7683_v51, %v4357_v52  ;;  %v4355_v40 = vadd.f32 %v4294_v17, %v3864_v28  ;;  %v3869_v59 = vadd.f32 %v5812_v48, %v7668_v30  ;;  %v4307_v47 = vpop.f32.mrf.mxu0 }
 0x229   :  { %v6120_v22 = vpop.eup %6119  ;;  %6143 = vrcp.f32 %v4555_v26  ;;  %v4553_v7 = vadd.f32 1.0, %v6118_v8  ;;  %v3816_v42 = vpop.f32.mrf.mxu1  ;;  %v5281_v5 = vmul.f32 -1.442695, %v4401_v33 }
 0x22a   :  { %v6122_v16 = vpop.eup %6121  ;;  %4665 = vst [vmem:[%s7887_s3 + $0x80] sm:$0xff] %v6120_v22  ;;  %6145 = vpow2.f32 %v5278_v27  ;;  %v4402_v44 = vadd.f32 %v7683_v51, %v4355_v40  ;;  %v4360_v45 = vadd.f32 %v5854_v54, %v3869_v59  ;;  %v3867_v30 = vadd.f32 %v3816_v42, %v7671_v32  ;;  %v5855_v43 = vpop.f32.mrf.mxu0 }
 0x22b   :  { %v6124_v34 = vpop.eup %6123  ;;  %6147 = vrcp.f32 %v4553_v7  ;;  %v4556_v20 = vadd.f32 1.0, %v6122_v16  ;;  %v5813_v11 = vpop.f32.mrf.mxu1  ;;  %v5284_v57 = vmul.f32 -1.442695, %v4404_v3 }
 0x22c   :  { %v6126_v2 = vpop.eup %6125  ;;  %4668 = vst [vmem:[%s7887_s3 + $0x98] sm:$0xff] %v6124_v34  ;;  %6149 = vpow2.f32 %v5283_v10  ;;  %v4407_v31 = vadd.f32 %v7683_v51, %v4360_v45  ;;  %v3870_v53 = vadd.f32 %v5813_v11, %v7674_v25  ;;  %v5282_v29 = vmul.f32 -1.442695, %v4402_v44  ;;  %v4310_v25 = vpop.f32.mrf.mxu0 }
 0x22d   :  { %6151 = vrcp.f32 %v4556_v20  ;;  %v4554_v23 = vadd.f32 1.0, %v6126_v2  ;;  %v4358_v55 = vadd.f32 %v4307_v47, %v3867_v30  ;;  %v3819_v24 = vpop.f32.mrf.mxu1 }
 0x22e   :  { %v6128_v14 = vpop.eup %6127  ;;  %6153 = vpow2.f32 %v5281_v5  ;;  %v5287_v32 = vmul.f32 -1.442695, %v4407_v31  ;;  %v4361_v49 = vadd.f32 %v5855_v43, %v3870_v53  ;;  %v3868_v39 = vadd.f32 %v3819_v24, %v7677_v46 }
 0x22f   :  { %v6130_v35 = vpop.eup %6129  ;;  %4666 = vst [vmem:[%s7887_s3 + $0x88] sm:$0xff] %v6128_v14  ;;  %6155 = vrcp.f32 %v4554_v23  ;;  %v4405_v4 = vadd.f32 %v7683_v51, %v4358_v55 }
 0x230   :  { %v6132_v41 = vpop.eup %6131  ;;  %4671 = vst [vmem:[%s7887_s3 + $0xb0] sm:$0xff] %v6130_v35  ;;  %6157 = vpow2.f32 %v5284_v57  ;;  %v4408_v13 = vadd.f32 %v7683_v51, %v4361_v49  ;;  %v4359_v58 = vadd.f32 %v4310_v25, %v3868_v39 }
 0x231   :  { %v6134_v62 = vpop.eup %6133  ;;  %v4559_v46 = vadd.f32 1.0, %v6132_v41  ;;  %6159 = vpow2.f32 %v5282_v29  ;;  %v5285_v19 = vmul.f32 -1.442695, %v4405_v4 }
 0x232   :  { %v6136_v50 = vpop.eup %6135  ;;  %4669 = vst [vmem:[%s7887_s3 + $0xa0] sm:$0xff] %v6134_v62  ;;  %6161 = vpow2.f32 %v5287_v32  ;;  %v5288_v56 = vmul.f32 -1.442695, %v4408_v13  ;;  %v4406_v9 = vadd.f32 %v7683_v51, %v4359_v58 }
 0x233   :  { %v6138_v21 = vpop.eup %6137  ;;  %6163 = vrcp.f32 %v4559_v46  ;;  %v4557_v0 = vadd.f32 1.0, %v6136_v50 }
 0x234   :  { %v6140_v1 = vpop.eup %6139  ;;  %4672 = vst [vmem:[%s7887_s3 + $0xb8] sm:$0xff] %v6138_v21  ;;  %6165 = vpow2.f32 %v5285_v19  ;;  %v5286_v38 = vmul.f32 -1.442695, %v4406_v9 }
 0x235   :  { %v6142_v61 = vpop.eup %6141  ;;  %6167 = vrcp.f32 %v4557_v0  ;;  %v4560_v63 = vadd.f32 1.0, %v6140_v1 }
 0x236   :  { %v6144_v17 = vpop.eup %6143  ;;  %4670 = vst [vmem:[%s7887_s3 + $0xa8] sm:$0xff] %v6142_v61  ;;  %6169 = vpow2.f32 %v5288_v56 }
 0x237   :  { %v6146_v51 = vpop.eup %6145  ;;  %4675 = vst [vmem:[%s7887_s3 + $0xd0] sm:$0xff] %v6144_v17  ;;  %6171 = vrcp.f32 %v4560_v63 }
 0x238   :  { %v6148_v37 = vpop.eup %6147  ;;  %v4558_v27 = vadd.f32 1.0, %v6146_v51  ;;  %6173 = vpow2.f32 %v5286_v38 }
 0x239   :  { %v6150_v60 = vpop.eup %6149  ;;  %4673 = vst [vmem:[%s7887_s3 + $0xc0] sm:$0xff] %v6148_v37 }
 0x23a   :  { %v6152_v12 = vpop.eup %6151  ;;  %6175 = vrcp.f32 %v4558_v27  ;;  %v4563_v6 = vadd.f32 1.0, %v6150_v60 }
 0x23b   :  { %v6154_v15 = vpop.eup %6153  ;;  %4676 = vst [vmem:[%s7887_s3 + $0xd8] sm:$0xff] %v6152_v12 }
 0x23c   :  { %v6156_v18 = vpop.eup %6155  ;;  %6177 = vrcp.f32 %v4563_v6  ;;  %v4561_v52 = vadd.f32 1.0, %v6154_v15 }
 0x23d   :  { %v6158_v28 = vpop.eup %6157  ;;  %4674 = vst [vmem:[%s7887_s3 + $0xc8] sm:$0xff] %v6156_v18 }
 0x23e   :  { %v6160_v54 = vpop.eup %6159  ;;  %6179 = vrcp.f32 %v4561_v52  ;;  %v4564_v36 = vadd.f32 1.0, %v6158_v28 }
 0x23f   :  { %v6162_v26 = vpop.eup %6161  ;;  %v4562_v10 = vadd.f32 1.0, %v6160_v54 }
 0x240   :  { %v6164_v33 = vpop.eup %6163  ;;  %6181 = vrcp.f32 %v4564_v36  ;;  %v4567_v48 = vadd.f32 1.0, %v6162_v26 }
 0x241   :  { %v6166_v8 = vpop.eup %6165  ;;  %4679 = vst [vmem:[%s7887_s3 + $0xf0] sm:$0xff] %v6164_v33  ;;  %6183 = vrcp.f32 %v4562_v10 }
 0x242   :  { %v6168_v3 = vpop.eup %6167  ;;  %6185 = vrcp.f32 %v4567_v48  ;;  %v4565_v40 = vadd.f32 1.0, %v6166_v8 }
 0x243   :  { %v6170_v59 = vpop.eup %6169  ;;  %4677 = vst [vmem:[%s7887_s3 + $0xe0] sm:$0xff] %v6168_v3 }
 0x244   :  { %v6172_v47 = vpop.eup %6171  ;;  %6187 = vrcp.f32 %v4565_v40  ;;  %v4568_v22 = vadd.f32 1.0, %v6170_v59 }
 0x245   :  { %v6174_v7 = vpop.eup %6173  ;;  %4680 = vst [vmem:[%s7887_s3 + $0xf8] sm:$0xff] %v6172_v47 }
 0x246   :  { %6189 = vrcp.f32 %v4568_v22  ;;  %v4566_v42 = vadd.f32 1.0, %v6174_v7 }
 0x247   :  { %v6176_v16 = vpop.eup %6175 }
 0x248   :  { %4678 = vst [vmem:[%s7887_s3 + $0xe8] sm:$0xff] %v6176_v16  ;;  %6191 = vrcp.f32 %v4566_v42 }
 0x249   :  { %v6178_v5 = vpop.eup %6177 }
 0x24a   :  { %4683 = vst [vmem:[%s7887_s3 + $0x110] sm:$0xff] %v6178_v5 }
 0x24b   :  { %v6180_v44 = vpop.eup %6179 }
 0x24c   :  { %4681 = vst [vmem:[%s7887_s3 + $0x100] sm:$0xff] %v6180_v44 }
 0x24d   :  { %v6182_v45 = vpop.eup %6181 }
 0x24e   :  { %v6184_v34 = vpop.eup %6183  ;;  %4684 = vst [vmem:[%s7887_s3 + $0x118] sm:$0xff] %v6182_v45 }
 0x24f   :  { %v6186_v20 = vpop.eup %6185  ;;  %4682 = vst [vmem:[%s7887_s3 + $0x108] sm:$0xff] %v6184_v34 }
 0x250   :  { %4687 = vst [vmem:[%s7887_s3 + $0x130] sm:$0xff] %v6186_v20 }
 0x251   :  { %v6188_v30 = vpop.eup %6187 }
 0x252   :  { %4685 = vst [vmem:[%s7887_s3 + $0x120] sm:$0xff] %v6188_v30 }
 0x253   :  { %v6190_v11 = vpop.eup %6189 }
 0x254   :  { %4688 = vst [vmem:[%s7887_s3 + $0x138] sm:$0xff] %v6190_v11 }
 0x255   :  { %v6192_v43 = vpop.eup %6191 }
 0x256   :  { %4686 = vst [vmem:[%s7887_s3 + $0x128] sm:$0xff] %v6192_v43 }

</bundles_post_ra>
